<compile_context>
chip_gen: v7x
topology: tpu7x:2x2x1
jax: 0.10.0
libtpu: 0.0.40
codegen_flags: <defaults>
</compile_context>

<pallas_src>
import functools

import jax
import jax.numpy as jnp
import numpy as np
from jax.experimental import pallas as pl
from jax.experimental.pallas import tpu as pltpu

BN_EPS = 1e-5


# ----------------------------------------------------------------------------
# Fused Pallas kernel (B images per grid step)
# ----------------------------------------------------------------------------
def _adjustment_fused_kernel(x_ref, w1_ref, brow_ref, wcat_ref, uwt_ref, o_ref,
                             *, B, Cin, Cout, H, W, Ho, Wo):
    # x_ref:    [B, Cin, H, W]        image block (NCHW slice, no host reshapes)
    # w1_ref:   [Cout, Cin]           1x1 conv weight with BN scale folded in
    # brow_ref: [Cout*H, 1]           folded BN bias, repeated per plane row
    # wcat_ref: [3*Cout*Ho, Cout*H]   bf16: height-interp x vertical-taps x pointwise,
    #                                 stacked over dx in {-1, 0, +1}
    # uwt_ref:  [3, W, Wo]            width interp, shifted / zero-padded per dx
    # o_ref:    [B, Cout*Ho, Wo]      output block, rows = (out_channel, ho)
    w1 = w1_ref[...]
    brow = brow_ref[...]
    wcat = wcat_ref[...]
    chho = Cout * Ho

    for b in range(B):  # B is a small static int -> unrolled
        # --- 1x1 conv + BN(folded) + ReLU on the VPU (channels too small for MXU)
        planes = []
        for c in range(Cout):
            p = w1[c:c + 1, 0:1] * x_ref[b, 0]
            for ci in range(1, Cin):
                p = p + w1[c:c + 1, ci:ci + 1] * x_ref[b, ci]
            planes.append(p)                                 # [H, W] each
        ycat = jnp.concatenate(planes, axis=0)               # [Cout*H, W]
        ycat = jnp.maximum(ycat + brow, 0.0)

        # --- fused height-interp + vertical taps + pointwise: one bf16 MXU matmul
        p_all = jnp.dot(wcat, ycat.astype(jnp.bfloat16),
                        preferred_element_type=jnp.float32)  # [3*Cout*Ho, W]

        # --- width-interp + horizontal taps (borders are zero columns in uwT_dx)
        acc = jnp.dot(p_all[0:chho, :], uwt_ref[0],
                      preferred_element_type=jnp.float32)    # [Cout*Ho, Wo]
        for j in range(1, 3):
            acc = acc + jnp.dot(p_all[j * chho:(j + 1) * chho, :], uwt_ref[j],
                                preferred_element_type=jnp.float32)

        o_ref[b] = acc


# ----------------------------------------------------------------------------
# Host-side helpers
# ----------------------------------------------------------------------------
def _interp_matrix(out_size, in_size):
    """Bilinear interpolation weights, align_corners=True (UpsamplingBilinear2d)."""
    src = jnp.arange(out_size, dtype=jnp.float32) * (in_size - 1) / (out_size - 1)
    i0 = jnp.clip(jnp.floor(src), 0, in_size - 1).astype(jnp.int32)
    i1 = jnp.clip(i0 + 1, 0, in_size - 1)
    frac = src - i0.astype(jnp.float32)
    cols = jnp.arange(in_size, dtype=jnp.int32)
    w0 = (cols[None, :] == i0[:, None]).astype(jnp.float32) * (1.0 - frac)[:, None]
    w1 = (cols[None, :] == i1[:, None]).astype(jnp.float32) * frac[:, None]
    return w0 + w1                                            # [out, in]


def _shift_rows(m, d):
    """Row-shifted copy with zero padding: result[r] = m[r + d] if valid else 0."""
    if d == 0:
        return m
    z = jnp.zeros((abs(d),) + m.shape[1:], m.dtype)
    if d > 0:
        return jnp.concatenate([m[d:], z], axis=0)
    return jnp.concatenate([z, m[:d]], axis=0)


def _pick_batch_block(n):
    """Images per grid step.

    Folding several images into one step amortizes the ~0.35us fixed per-step
    cost (the dominant cost at small problem sizes).  For larger batches keep
    >= ~8 grid steps (>= 4 per v7x TensorCore) so the "parallel" grid axis still
    has work to software-pipeline / split across cores.
    """
    if n <= 4:
        return n
    for b in range(max(1, n // 8), 0, -1):
        if n % b == 0:
            return b
    return 1


def init_params(key, in_channel, out_channel):
    ks = jax.random.split(key, 7)
    return dict(
        w1=0.1 * jax.random.normal(ks[0], (out_channel, in_channel), jnp.float32),
        bn_gamma=1.0 + 0.1 * jax.random.normal(ks[1], (out_channel,), jnp.float32),
        bn_beta=0.1 * jax.random.normal(ks[2], (out_channel,), jnp.float32),
        bn_mean=0.05 * jax.random.normal(ks[3], (out_channel,), jnp.float32),
        bn_var=1.0 + 0.1 * jnp.abs(jax.random.normal(ks[4], (out_channel,), jnp.float32)),
        dw=0.1 * jax.random.normal(ks[5], (3, 3, out_channel), jnp.float32),
        pw=0.1 * jax.random.normal(ks[6], (out_channel, out_channel), jnp.float32),
    )


# ----------------------------------------------------------------------------
# Forward pass
# ----------------------------------------------------------------------------
@functools.partial(jax.jit, static_argnames=("single_buffer_consts",))
def adjustment_block_forward(x, params, *, single_buffer_consts=True):
    # x: [N, Cin, H, W]  (NCHW)
    N, Cin, H, W = x.shape
    Cout = params["w1"].shape[0]
    Ho, Wo = 2 * H, 2 * W

    # --- fold inference BatchNorm into the 1x1 conv weight / per-channel bias --
    scale = params["bn_gamma"] / jnp.sqrt(params["bn_var"] + BN_EPS)
    bias = params["bn_beta"] - params["bn_mean"] * scale
    w1s = params["w1"] * scale[:, None]                       # [Cout, Cin]
    brow = jnp.repeat(bias, H)[:, None]                       # [Cout*H, 1]

    # --- build the fused linear operators (upsample + depthwise + pointwise) ---
    uh = _interp_matrix(Ho, H)                                # [Ho, H]
    uw = _interp_matrix(Wo, W)                                # [Wo, W]
    dw = params["dw"]                                         # [3, 3, Cout]
    pwT = params["pw"].T                                      # [out, in]

    w_blocks, uwt_blocks = [], []
    for dx in (-1, 0, 1):
        w_dx = jnp.zeros((Cout, Ho, Cout, H), jnp.float32)
        for dy in (-1, 0, 1):
            # m[d, c] = pw[c, d] * dw[dy+1, dx+1, c]
            m = pwT * dw[dy + 1, dx + 1, :][None, :]
            w_dx = w_dx + jnp.einsum("dc,oh->doch", m, _shift_rows(uh, dy))
        w_blocks.append(w_dx.reshape(Cout * Ho, Cout * H))
        uwt_blocks.append(_shift_rows(uw, dx).T)              # [W, Wo]
    wcat = jnp.concatenate(w_blocks, axis=0).astype(jnp.bfloat16)  # [3*Cout*Ho, Cout*H]
    uwt = jnp.stack(uwt_blocks, axis=0)                       # [3, W, Wo] f32

    # --- grid / batch blocking --------------------------------------------------
    B = _pick_batch_block(N)
    grid = (N // B,)

    def const_spec(shape, index_map):
        # Grid-constant operands: single-buffer them (double-buffering only
        # doubles VMEM for no pipelining benefit).  Falls back gracefully if
        # pipeline_mode / Buffered(1) is unsupported (see __main__).
        if single_buffer_consts:
            return pl.BlockSpec(shape, index_map, pipeline_mode=pl.Buffered(1))
        return pl.BlockSpec(shape, index_map)

    in_specs = [
        pl.BlockSpec((B, Cin, H, W), lambda n: (n, 0, 0, 0)),
        const_spec((Cout, Cin), lambda n: (0, 0)),
        const_spec((Cout * H, 1), lambda n: (0, 0)),
        const_spec((3 * Cout * Ho, Cout * H), lambda n: (0, 0)),
        const_spec((3, W, Wo), lambda n: (0, 0, 0)),
    ]
    out_specs = pl.BlockSpec((B, Cout * Ho, Wo), lambda n: (n, 0, 0))

    # --- VMEM limit / cost estimate from actual shapes ---------------------------
    bpe = 4
    x_block_bytes = B * Cin * H * W * bpe
    o_block_bytes = B * Cout * Ho * Wo * bpe
    const_bytes = (w1s.size + brow.size + uwt.size) * bpe + wcat.size * 2
    const_bufs = 1 if single_buffer_consts else 2
    vmem_needed = 2 * (x_block_bytes + o_block_bytes) + const_bufs * const_bytes
    vmem_limit = int(min(max(vmem_needed + (8 << 20), 16 << 20), 48 << 20))

    flops = 2 * N * (Cout * Cin * H * W                       # 1x1 conv (VPU)
                     + (3 * Cout * Ho) * (Cout * H) * W       # fused operator matmul
                     + 3 * (Cout * Ho) * W * Wo)              # width-interp matmuls
    bytes_accessed = int(bpe * N * (Cin * H * W + Cout * Ho * Wo) + const_bytes)

    kernel = functools.partial(
        _adjustment_fused_kernel,
        B=B, Cin=Cin, Cout=Cout, H=H, W=W, Ho=Ho, Wo=Wo)

    out_rows = pl.pallas_call(
        kernel,
        grid=grid,
        in_specs=in_specs,
        out_specs=out_specs,
        out_shape=jax.ShapeDtypeStruct((N, Cout * Ho, Wo), jnp.float32),
        compiler_params=pltpu.CompilerParams(
            dimension_semantics=("parallel",),
            vmem_limit_bytes=vmem_limit,
        ),
        cost_estimate=pl.CostEstimate(
            flops=flops, transcendentals=0, bytes_accessed=bytes_accessed),
    )(x, w1s, brow, wcat, uwt)

    # rows are (out_channel, ho): free view back to NCHW.
    return out_rows.reshape(N, Cout, Ho, Wo)


# ----------------------------------------------------------------------------
# Pure-JAX reference (for correctness check)
# ----------------------------------------------------------------------------
def reference_forward(x, params):
    N, Cin, H, W = x.shape
    Cout = params["w1"].shape[0]
    y = jnp.einsum("nchw,oc->nohw", x, params["w1"])
    scale = params["bn_gamma"] / jnp.sqrt(params["bn_var"] + BN_EPS)
    bias = params["bn_beta"] - params["bn_mean"] * scale
    y = jnp.maximum(y * scale[None, :, None, None] + bias[None, :, None, None], 0.0)
    uh = _interp_matrix(2 * H, H)
    uw = _interp_matrix(2 * W, W)
    up = jnp.einsum("nchw,Hh,Ww->ncHW", y, uh, uw)
    dw_oihw = jnp.transpose(params["dw"], (2, 0, 1))[:, None, :, :]   # [C,1,3,3]
    d = jax.lax.conv_general_dilated(
        up, dw_oihw, (1, 1), "SAME", feature_group_count=Cout,
        dimension_numbers=("NCHW", "OIHW", "NCHW"))
    return jnp.einsum("nchw,cd->ndhw", d, params["pw"])


if __name__ == "__main__":
    N, Cin, Cout, H, W = 2, 4, 8, 16, 16
    key = jax.random.PRNGKey(0)
    kx, kp = jax.random.split(key)
    x = jax.random.normal(kx, (N, Cin, H, W), jnp.float32)
    params = init_params(kp, Cin, Cout)

    try:
        out = jax.block_until_ready(adjustment_block_forward(x, params))
    except Exception:
        # pl.Buffered(1) (single-buffered grid-constant operands) unsupported on
        # this jax version -> fall back to default (double) buffering.
        out = jax.block_until_ready(
            adjustment_block_forward(x, params, single_buffer_consts=False))

    ref = jax.block_until_ready(reference_forward(x, params))
    assert out.shape == (N, Cout, 2 * H, 2 * W), out.shape
    # bf16 MXU operands in the fused operator matmul -> slightly looser than
    # pure-f32 tolerance (still ~1e-3-level agreement with the f32 reference).
    np.testing.assert_allclose(np.asarray(out), np.asarray(ref), rtol=2e-3, atol=2e-3)

    print("KERNEL_OK")
</pallas_src>

<mosaic_0001>
module attributes {stable_mosaic.version = 11 : i64} {
  func.func @_adjustment_fused_kernel(%arg0: i32, %arg1: memref<2x4x16x16xf32, #tpu.memory_space<vmem>>, %arg2: memref<8x4xf32, #tpu.memory_space<vmem>>, %arg3: memref<128x1xf32, #tpu.memory_space<vmem>>, %arg4: memref<768x128xbf16, #tpu.memory_space<vmem>>, %arg5: memref<3x16x32xf32, #tpu.memory_space<vmem>>, %arg6: memref<2x256x32xf32, #tpu.memory_space<vmem>>) attributes {dimension_semantics = [#tpu.dimension_semantics<parallel>], iteration_bounds = array<i64: 1>, scalar_prefetch = 0 : i64, scratch_operands = 0 : i64, tpu.core_type = #tpu.core_type<tc>, window_params = [{transform_indices = @transform_0, window_bounds = array<i64: 2, 4, 16, 16>}, {pipeline_mode = #tpu.pipeline_mode<synchronous>, transform_indices = @transform_1, window_bounds = array<i64: 8, 4>}, {pipeline_mode = #tpu.pipeline_mode<synchronous>, transform_indices = @transform_2, window_bounds = array<i64: 128, 1>}, {pipeline_mode = #tpu.pipeline_mode<synchronous>, transform_indices = @transform_3, window_bounds = array<i64: 768, 128>}, {pipeline_mode = #tpu.pipeline_mode<synchronous>, transform_indices = @transform_4, window_bounds = array<i64: 3, 16, 32>}, {transform_indices = @transform_5, window_bounds = array<i64: 2, 256, 32>}]} {
    %c0 = arith.constant 0 : index
    %c0_0 = arith.constant 0 : index
    %0 = vector.load %arg2[%c0, %c0_0] : memref<8x4xf32, #tpu.memory_space<vmem>>, vector<8x4xf32>
    %c0_1 = arith.constant 0 : index
    %c0_2 = arith.constant 0 : index
    %1 = vector.load %arg3[%c0_1, %c0_2] : memref<128x1xf32, #tpu.memory_space<vmem>>, vector<128x1xf32>
    %c0_3 = arith.constant 0 : index
    %c0_4 = arith.constant 0 : index
    %2 = vector.load %arg4[%c0_3, %c0_4] : memref<768x128xbf16, #tpu.memory_space<vmem>>, vector<768x128xbf16>
    %3 = vector.extract_strided_slice %0 {offsets = [0, 0], sizes = [1, 1], strides = [1, 1]} : vector<8x4xf32> to vector<1x1xf32>
    %c0_5 = arith.constant 0 : index
    %c0_6 = arith.constant 0 : index
    %c0_7 = arith.constant 0 : index
    %c0_8 = arith.constant 0 : index
    %4 = vector.load %arg1[%c0_5, %c0_6, %c0_7, %c0_8] : memref<2x4x16x16xf32, #tpu.memory_space<vmem>>, vector<1x1x16x16xf32>
    %5 = vector.shape_cast %4 : vector<1x1x16x16xf32> to vector<16x16xf32>
    %6 = vector.broadcast %3 : vector<1x1xf32> to vector<16x16xf32>
    %7 = arith.mulf %6, %5 : vector<16x16xf32>
    %8 = vector.extract_strided_slice %0 {offsets = [0, 1], sizes = [1, 1], strides = [1, 1]} : vector<8x4xf32> to vector<1x1xf32>
    %c0_9 = arith.constant 0 : index
    %c1 = arith.constant 1 : index
    %c0_10 = arith.constant 0 : index
    %c0_11 = arith.constant 0 : index
    %9 = vector.load %arg1[%c0_9, %c1, %c0_10, %c0_11] : memref<2x4x16x16xf32, #tpu.memory_space<vmem>>, vector<1x1x16x16xf32>
    %10 = vector.shape_cast %9 : vector<1x1x16x16xf32> to vector<16x16xf32>
    %11 = vector.broadcast %8 : vector<1x1xf32> to vector<16x16xf32>
    %12 = arith.mulf %11, %10 : vector<16x16xf32>
    %13 = arith.addf %7, %12 : vector<16x16xf32>
    %14 = vector.extract_strided_slice %0 {offsets = [0, 2], sizes = [1, 1], strides = [1, 1]} : vector<8x4xf32> to vector<1x1xf32>
    %c0_12 = arith.constant 0 : index
    %c2 = arith.constant 2 : index
    %c0_13 = arith.constant 0 : index
    %c0_14 = arith.constant 0 : index
    %15 = vector.load %arg1[%c0_12, %c2, %c0_13, %c0_14] : memref<2x4x16x16xf32, #tpu.memory_space<vmem>>, vector<1x1x16x16xf32>
    %16 = vector.shape_cast %15 : vector<1x1x16x16xf32> to vector<16x16xf32>
    %17 = vector.broadcast %14 : vector<1x1xf32> to vector<16x16xf32>
    %18 = arith.mulf %17, %16 : vector<16x16xf32>
    %19 = arith.addf %13, %18 : vector<16x16xf32>
    %20 = vector.extract_strided_slice %0 {offsets = [0, 3], sizes = [1, 1], strides = [1, 1]} : vector<8x4xf32> to vector<1x1xf32>
    %c0_15 = arith.constant 0 : index
    %c3 = arith.constant 3 : index
    %c0_16 = arith.constant 0 : index
    %c0_17 = arith.constant 0 : index
    %21 = vector.load %arg1[%c0_15, %c3, %c0_16, %c0_17] : memref<2x4x16x16xf32, #tpu.memory_space<vmem>>, vector<1x1x16x16xf32>
    %22 = vector.shape_cast %21 : vector<1x1x16x16xf32> to vector<16x16xf32>
    %23 = vector.broadcast %20 : vector<1x1xf32> to vector<16x16xf32>
    %24 = arith.mulf %23, %22 : vector<16x16xf32>
    %25 = arith.addf %19, %24 : vector<16x16xf32>
    %26 = vector.extract_strided_slice %0 {offsets = [1, 0], sizes = [1, 1], strides = [1, 1]} : vector<8x4xf32> to vector<1x1xf32>
    %c0_18 = arith.constant 0 : index
    %c0_19 = arith.constant 0 : index
    %c0_20 = arith.constant 0 : index
    %c0_21 = arith.constant 0 : index
    %27 = vector.load %arg1[%c0_18, %c0_19, %c0_20, %c0_21] : memref<2x4x16x16xf32, #tpu.memory_space<vmem>>, vector<1x1x16x16xf32>
    %28 = vector.shape_cast %27 : vector<1x1x16x16xf32> to vector<16x16xf32>
    %29 = vector.broadcast %26 : vector<1x1xf32> to vector<16x16xf32>
    %30 = arith.mulf %29, %28 : vector<16x16xf32>
    %31 = vector.extract_strided_slice %0 {offsets = [1, 1], sizes = [1, 1], strides = [1, 1]} : vector<8x4xf32> to vector<1x1xf32>
    %c0_22 = arith.constant 0 : index
    %c1_23 = arith.constant 1 : index
    %c0_24 = arith.constant 0 : index
    %c0_25 = arith.constant 0 : index
    %32 = vector.load %arg1[%c0_22, %c1_23, %c0_24, %c0_25] : memref<2x4x16x16xf32, #tpu.memory_space<vmem>>, vector<1x1x16x16xf32>
    %33 = vector.shape_cast %32 : vector<1x1x16x16xf32> to vector<16x16xf32>
    %34 = vector.broadcast %31 : vector<1x1xf32> to vector<16x16xf32>
    %35 = arith.mulf %34, %33 : vector<16x16xf32>
    %36 = arith.addf %30, %35 : vector<16x16xf32>
    %37 = vector.extract_strided_slice %0 {offsets = [1, 2], sizes = [1, 1], strides = [1, 1]} : vector<8x4xf32> to vector<1x1xf32>
    %c0_26 = arith.constant 0 : index
    %c2_27 = arith.constant 2 : index
    %c0_28 = arith.constant 0 : index
    %c0_29 = arith.constant 0 : index
    %38 = vector.load %arg1[%c0_26, %c2_27, %c0_28, %c0_29] : memref<2x4x16x16xf32, #tpu.memory_space<vmem>>, vector<1x1x16x16xf32>
    %39 = vector.shape_cast %38 : vector<1x1x16x16xf32> to vector<16x16xf32>
    %40 = vector.broadcast %37 : vector<1x1xf32> to vector<16x16xf32>
    %41 = arith.mulf %40, %39 : vector<16x16xf32>
    %42 = arith.addf %36, %41 : vector<16x16xf32>
    %43 = vector.extract_strided_slice %0 {offsets = [1, 3], sizes = [1, 1], strides = [1, 1]} : vector<8x4xf32> to vector<1x1xf32>
    %c0_30 = arith.constant 0 : index
    %c3_31 = arith.constant 3 : index
    %c0_32 = arith.constant 0 : index
    %c0_33 = arith.constant 0 : index
    %44 = vector.load %arg1[%c0_30, %c3_31, %c0_32, %c0_33] : memref<2x4x16x16xf32, #tpu.memory_space<vmem>>, vector<1x1x16x16xf32>
    %45 = vector.shape_cast %44 : vector<1x1x16x16xf32> to vector<16x16xf32>
    %46 = vector.broadcast %43 : vector<1x1xf32> to vector<16x16xf32>
    %47 = arith.mulf %46, %45 : vector<16x16xf32>
    %48 = arith.addf %42, %47 : vector<16x16xf32>
    %49 = vector.extract_strided_slice %0 {offsets = [2, 0], sizes = [1, 1], strides = [1, 1]} : vector<8x4xf32> to vector<1x1xf32>
    %c0_34 = arith.constant 0 : index
    %c0_35 = arith.constant 0 : index
    %c0_36 = arith.constant 0 : index
    %c0_37 = arith.constant 0 : index
    %50 = vector.load %arg1[%c0_34, %c0_35, %c0_36, %c0_37] : memref<2x4x16x16xf32, #tpu.memory_space<vmem>>, vector<1x1x16x16xf32>
    %51 = vector.shape_cast %50 : vector<1x1x16x16xf32> to vector<16x16xf32>
    %52 = vector.broadcast %49 : vector<1x1xf32> to vector<16x16xf32>
    %53 = arith.mulf %52, %51 : vector<16x16xf32>
    %54 = vector.extract_strided_slice %0 {offsets = [2, 1], sizes = [1, 1], strides = [1, 1]} : vector<8x4xf32> to vector<1x1xf32>
    %c0_38 = arith.constant 0 : index
    %c1_39 = arith.constant 1 : index
    %c0_40 = arith.constant 0 : index
    %c0_41 = arith.constant 0 : index
    %55 = vector.load %arg1[%c0_38, %c1_39, %c0_40, %c0_41] : memref<2x4x16x16xf32, #tpu.memory_space<vmem>>, vector<1x1x16x16xf32>
    %56 = vector.shape_cast %55 : vector<1x1x16x16xf32> to vector<16x16xf32>
    %57 = vector.broadcast %54 : vector<1x1xf32> to vector<16x16xf32>
    %58 = arith.mulf %57, %56 : vector<16x16xf32>
    %59 = arith.addf %53, %58 : vector<16x16xf32>
    %60 = vector.extract_strided_slice %0 {offsets = [2, 2], sizes = [1, 1], strides = [1, 1]} : vector<8x4xf32> to vector<1x1xf32>
    %c0_42 = arith.constant 0 : index
    %c2_43 = arith.constant 2 : index
    %c0_44 = arith.constant 0 : index
    %c0_45 = arith.constant 0 : index
    %61 = vector.load %arg1[%c0_42, %c2_43, %c0_44, %c0_45] : memref<2x4x16x16xf32, #tpu.memory_space<vmem>>, vector<1x1x16x16xf32>
    %62 = vector.shape_cast %61 : vector<1x1x16x16xf32> to vector<16x16xf32>
    %63 = vector.broadcast %60 : vector<1x1xf32> to vector<16x16xf32>
    %64 = arith.mulf %63, %62 : vector<16x16xf32>
    %65 = arith.addf %59, %64 : vector<16x16xf32>
    %66 = vector.extract_strided_slice %0 {offsets = [2, 3], sizes = [1, 1], strides = [1, 1]} : vector<8x4xf32> to vector<1x1xf32>
    %c0_46 = arith.constant 0 : index
    %c3_47 = arith.constant 3 : index
    %c0_48 = arith.constant 0 : index
    %c0_49 = arith.constant 0 : index
    %67 = vector.load %arg1[%c0_46, %c3_47, %c0_48, %c0_49] : memref<2x4x16x16xf32, #tpu.memory_space<vmem>>, vector<1x1x16x16xf32>
    %68 = vector.shape_cast %67 : vector<1x1x16x16xf32> to vector<16x16xf32>
    %69 = vector.broadcast %66 : vector<1x1xf32> to vector<16x16xf32>
    %70 = arith.mulf %69, %68 : vector<16x16xf32>
    %71 = arith.addf %65, %70 : vector<16x16xf32>
    %72 = vector.extract_strided_slice %0 {offsets = [3, 0], sizes = [1, 1], strides = [1, 1]} : vector<8x4xf32> to vector<1x1xf32>
    %c0_50 = arith.constant 0 : index
    %c0_51 = arith.constant 0 : index
    %c0_52 = arith.constant 0 : index
    %c0_53 = arith.constant 0 : index
    %73 = vector.load %arg1[%c0_50, %c0_51, %c0_52, %c0_53] : memref<2x4x16x16xf32, #tpu.memory_space<vmem>>, vector<1x1x16x16xf32>
    %74 = vector.shape_cast %73 : vector<1x1x16x16xf32> to vector<16x16xf32>
    %75 = vector.broadcast %72 : vector<1x1xf32> to vector<16x16xf32>
    %76 = arith.mulf %75, %74 : vector<16x16xf32>
    %77 = vector.extract_strided_slice %0 {offsets = [3, 1], sizes = [1, 1], strides = [1, 1]} : vector<8x4xf32> to vector<1x1xf32>
    %c0_54 = arith.constant 0 : index
    %c1_55 = arith.constant 1 : index
    %c0_56 = arith.constant 0 : index
    %c0_57 = arith.constant 0 : index
    %78 = vector.load %arg1[%c0_54, %c1_55, %c0_56, %c0_57] : memref<2x4x16x16xf32, #tpu.memory_space<vmem>>, vector<1x1x16x16xf32>
    %79 = vector.shape_cast %78 : vector<1x1x16x16xf32> to vector<16x16xf32>
    %80 = vector.broadcast %77 : vector<1x1xf32> to vector<16x16xf32>
    %81 = arith.mulf %80, %79 : vector<16x16xf32>
    %82 = arith.addf %76, %81 : vector<16x16xf32>
    %83 = vector.extract_strided_slice %0 {offsets = [3, 2], sizes = [1, 1], strides = [1, 1]} : vector<8x4xf32> to vector<1x1xf32>
    %c0_58 = arith.constant 0 : index
    %c2_59 = arith.constant 2 : index
    %c0_60 = arith.constant 0 : index
    %c0_61 = arith.constant 0 : index
    %84 = vector.load %arg1[%c0_58, %c2_59, %c0_60, %c0_61] : memref<2x4x16x16xf32, #tpu.memory_space<vmem>>, vector<1x1x16x16xf32>
    %85 = vector.shape_cast %84 : vector<1x1x16x16xf32> to vector<16x16xf32>
    %86 = vector.broadcast %83 : vector<1x1xf32> to vector<16x16xf32>
    %87 = arith.mulf %86, %85 : vector<16x16xf32>
    %88 = arith.addf %82, %87 : vector<16x16xf32>
    %89 = vector.extract_strided_slice %0 {offsets = [3, 3], sizes = [1, 1], strides = [1, 1]} : vector<8x4xf32> to vector<1x1xf32>
    %c0_62 = arith.constant 0 : index
    %c3_63 = arith.constant 3 : index
    %c0_64 = arith.constant 0 : index
    %c0_65 = arith.constant 0 : index
    %90 = vector.load %arg1[%c0_62, %c3_63, %c0_64, %c0_65] : memref<2x4x16x16xf32, #tpu.memory_space<vmem>>, vector<1x1x16x16xf32>
    %91 = vector.shape_cast %90 : vector<1x1x16x16xf32> to vector<16x16xf32>
    %92 = vector.broadcast %89 : vector<1x1xf32> to vector<16x16xf32>
    %93 = arith.mulf %92, %91 : vector<16x16xf32>
    %94 = arith.addf %88, %93 : vector<16x16xf32>
    %95 = vector.extract_strided_slice %0 {offsets = [4, 0], sizes = [1, 1], strides = [1, 1]} : vector<8x4xf32> to vector<1x1xf32>
    %c0_66 = arith.constant 0 : index
    %c0_67 = arith.constant 0 : index
    %c0_68 = arith.constant 0 : index
    %c0_69 = arith.constant 0 : index
    %96 = vector.load %arg1[%c0_66, %c0_67, %c0_68, %c0_69] : memref<2x4x16x16xf32, #tpu.memory_space<vmem>>, vector<1x1x16x16xf32>
    %97 = vector.shape_cast %96 : vector<1x1x16x16xf32> to vector<16x16xf32>
    %98 = vector.broadcast %95 : vector<1x1xf32> to vector<16x16xf32>
    %99 = arith.mulf %98, %97 : vector<16x16xf32>
    %100 = vector.extract_strided_slice %0 {offsets = [4, 1], sizes = [1, 1], strides = [1, 1]} : vector<8x4xf32> to vector<1x1xf32>
    %c0_70 = arith.constant 0 : index
    %c1_71 = arith.constant 1 : index
    %c0_72 = arith.constant 0 : index
    %c0_73 = arith.constant 0 : index
    %101 = vector.load %arg1[%c0_70, %c1_71, %c0_72, %c0_73] : memref<2x4x16x16xf32, #tpu.memory_space<vmem>>, vector<1x1x16x16xf32>
    %102 = vector.shape_cast %101 : vector<1x1x16x16xf32> to vector<16x16xf32>
    %103 = vector.broadcast %100 : vector<1x1xf32> to vector<16x16xf32>
    %104 = arith.mulf %103, %102 : vector<16x16xf32>
    %105 = arith.addf %99, %104 : vector<16x16xf32>
    %106 = vector.extract_strided_slice %0 {offsets = [4, 2], sizes = [1, 1], strides = [1, 1]} : vector<8x4xf32> to vector<1x1xf32>
    %c0_74 = arith.constant 0 : index
    %c2_75 = arith.constant 2 : index
    %c0_76 = arith.constant 0 : index
    %c0_77 = arith.constant 0 : index
    %107 = vector.load %arg1[%c0_74, %c2_75, %c0_76, %c0_77] : memref<2x4x16x16xf32, #tpu.memory_space<vmem>>, vector<1x1x16x16xf32>
    %108 = vector.shape_cast %107 : vector<1x1x16x16xf32> to vector<16x16xf32>
    %109 = vector.broadcast %106 : vector<1x1xf32> to vector<16x16xf32>
    %110 = arith.mulf %109, %108 : vector<16x16xf32>
    %111 = arith.addf %105, %110 : vector<16x16xf32>
    %112 = vector.extract_strided_slice %0 {offsets = [4, 3], sizes = [1, 1], strides = [1, 1]} : vector<8x4xf32> to vector<1x1xf32>
    %c0_78 = arith.constant 0 : index
    %c3_79 = arith.constant 3 : index
    %c0_80 = arith.constant 0 : index
    %c0_81 = arith.constant 0 : index
    %113 = vector.load %arg1[%c0_78, %c3_79, %c0_80, %c0_81] : memref<2x4x16x16xf32, #tpu.memory_space<vmem>>, vector<1x1x16x16xf32>
    %114 = vector.shape_cast %113 : vector<1x1x16x16xf32> to vector<16x16xf32>
    %115 = vector.broadcast %112 : vector<1x1xf32> to vector<16x16xf32>
    %116 = arith.mulf %115, %114 : vector<16x16xf32>
    %117 = arith.addf %111, %116 : vector<16x16xf32>
    %118 = vector.extract_strided_slice %0 {offsets = [5, 0], sizes = [1, 1], strides = [1, 1]} : vector<8x4xf32> to vector<1x1xf32>
    %c0_82 = arith.constant 0 : index
    %c0_83 = arith.constant 0 : index
    %c0_84 = arith.constant 0 : index
    %c0_85 = arith.constant 0 : index
    %119 = vector.load %arg1[%c0_82, %c0_83, %c0_84, %c0_85] : memref<2x4x16x16xf32, #tpu.memory_space<vmem>>, vector<1x1x16x16xf32>
    %120 = vector.shape_cast %119 : vector<1x1x16x16xf32> to vector<16x16xf32>
    %121 = vector.broadcast %118 : vector<1x1xf32> to vector<16x16xf32>
    %122 = arith.mulf %121, %120 : vector<16x16xf32>
    %123 = vector.extract_strided_slice %0 {offsets = [5, 1], sizes = [1, 1], strides = [1, 1]} : vector<8x4xf32> to vector<1x1xf32>
    %c0_86 = arith.constant 0 : index
    %c1_87 = arith.constant 1 : index
    %c0_88 = arith.constant 0 : index
    %c0_89 = arith.constant 0 : index
    %124 = vector.load %arg1[%c0_86, %c1_87, %c0_88, %c0_89] : memref<2x4x16x16xf32, #tpu.memory_space<vmem>>, vector<1x1x16x16xf32>
    %125 = vector.shape_cast %124 : vector<1x1x16x16xf32> to vector<16x16xf32>
    %126 = vector.broadcast %123 : vector<1x1xf32> to vector<16x16xf32>
    %127 = arith.mulf %126, %125 : vector<16x16xf32>
    %128 = arith.addf %122, %127 : vector<16x16xf32>
    %129 = vector.extract_strided_slice %0 {offsets = [5, 2], sizes = [1, 1], strides = [1, 1]} : vector<8x4xf32> to vector<1x1xf32>
    %c0_90 = arith.constant 0 : index
    %c2_91 = arith.constant 2 : index
    %c0_92 = arith.constant 0 : index
    %c0_93 = arith.constant 0 : index
    %130 = vector.load %arg1[%c0_90, %c2_91, %c0_92, %c0_93] : memref<2x4x16x16xf32, #tpu.memory_space<vmem>>, vector<1x1x16x16xf32>
    %131 = vector.shape_cast %130 : vector<1x1x16x16xf32> to vector<16x16xf32>
    %132 = vector.broadcast %129 : vector<1x1xf32> to vector<16x16xf32>
    %133 = arith.mulf %132, %131 : vector<16x16xf32>
    %134 = arith.addf %128, %133 : vector<16x16xf32>
    %135 = vector.extract_strided_slice %0 {offsets = [5, 3], sizes = [1, 1], strides = [1, 1]} : vector<8x4xf32> to vector<1x1xf32>
    %c0_94 = arith.constant 0 : index
    %c3_95 = arith.constant 3 : index
    %c0_96 = arith.constant 0 : index
    %c0_97 = arith.constant 0 : index
    %136 = vector.load %arg1[%c0_94, %c3_95, %c0_96, %c0_97] : memref<2x4x16x16xf32, #tpu.memory_space<vmem>>, vector<1x1x16x16xf32>
    %137 = vector.shape_cast %136 : vector<1x1x16x16xf32> to vector<16x16xf32>
    %138 = vector.broadcast %135 : vector<1x1xf32> to vector<16x16xf32>
    %139 = arith.mulf %138, %137 : vector<16x16xf32>
    %140 = arith.addf %134, %139 : vector<16x16xf32>
    %141 = vector.extract_strided_slice %0 {offsets = [6, 0], sizes = [1, 1], strides = [1, 1]} : vector<8x4xf32> to vector<1x1xf32>
    %c0_98 = arith.constant 0 : index
    %c0_99 = arith.constant 0 : index
    %c0_100 = arith.constant 0 : index
    %c0_101 = arith.constant 0 : index
    %142 = vector.load %arg1[%c0_98, %c0_99, %c0_100, %c0_101] : memref<2x4x16x16xf32, #tpu.memory_space<vmem>>, vector<1x1x16x16xf32>
    %143 = vector.shape_cast %142 : vector<1x1x16x16xf32> to vector<16x16xf32>
    %144 = vector.broadcast %141 : vector<1x1xf32> to vector<16x16xf32>
    %145 = arith.mulf %144, %143 : vector<16x16xf32>
    %146 = vector.extract_strided_slice %0 {offsets = [6, 1], sizes = [1, 1], strides = [1, 1]} : vector<8x4xf32> to vector<1x1xf32>
    %c0_102 = arith.constant 0 : index
    %c1_103 = arith.constant 1 : index
    %c0_104 = arith.constant 0 : index
    %c0_105 = arith.constant 0 : index
    %147 = vector.load %arg1[%c0_102, %c1_103, %c0_104, %c0_105] : memref<2x4x16x16xf32, #tpu.memory_space<vmem>>, vector<1x1x16x16xf32>
    %148 = vector.shape_cast %147 : vector<1x1x16x16xf32> to vector<16x16xf32>
    %149 = vector.broadcast %146 : vector<1x1xf32> to vector<16x16xf32>
    %150 = arith.mulf %149, %148 : vector<16x16xf32>
    %151 = arith.addf %145, %150 : vector<16x16xf32>
    %152 = vector.extract_strided_slice %0 {offsets = [6, 2], sizes = [1, 1], strides = [1, 1]} : vector<8x4xf32> to vector<1x1xf32>
    %c0_106 = arith.constant 0 : index
    %c2_107 = arith.constant 2 : index
    %c0_108 = arith.constant 0 : index
    %c0_109 = arith.constant 0 : index
    %153 = vector.load %arg1[%c0_106, %c2_107, %c0_108, %c0_109] : memref<2x4x16x16xf32, #tpu.memory_space<vmem>>, vector<1x1x16x16xf32>
    %154 = vector.shape_cast %153 : vector<1x1x16x16xf32> to vector<16x16xf32>
    %155 = vector.broadcast %152 : vector<1x1xf32> to vector<16x16xf32>
    %156 = arith.mulf %155, %154 : vector<16x16xf32>
    %157 = arith.addf %151, %156 : vector<16x16xf32>
    %158 = vector.extract_strided_slice %0 {offsets = [6, 3], sizes = [1, 1], strides = [1, 1]} : vector<8x4xf32> to vector<1x1xf32>
    %c0_110 = arith.constant 0 : index
    %c3_111 = arith.constant 3 : index
    %c0_112 = arith.constant 0 : index
    %c0_113 = arith.constant 0 : index
    %159 = vector.load %arg1[%c0_110, %c3_111, %c0_112, %c0_113] : memref<2x4x16x16xf32, #tpu.memory_space<vmem>>, vector<1x1x16x16xf32>
    %160 = vector.shape_cast %159 : vector<1x1x16x16xf32> to vector<16x16xf32>
    %161 = vector.broadcast %158 : vector<1x1xf32> to vector<16x16xf32>
    %162 = arith.mulf %161, %160 : vector<16x16xf32>
    %163 = arith.addf %157, %162 : vector<16x16xf32>
    %164 = vector.extract_strided_slice %0 {offsets = [7, 0], sizes = [1, 1], strides = [1, 1]} : vector<8x4xf32> to vector<1x1xf32>
    %c0_114 = arith.constant 0 : index
    %c0_115 = arith.constant 0 : index
    %c0_116 = arith.constant 0 : index
    %c0_117 = arith.constant 0 : index
    %165 = vector.load %arg1[%c0_114, %c0_115, %c0_116, %c0_117] : memref<2x4x16x16xf32, #tpu.memory_space<vmem>>, vector<1x1x16x16xf32>
    %166 = vector.shape_cast %165 : vector<1x1x16x16xf32> to vector<16x16xf32>
    %167 = vector.broadcast %164 : vector<1x1xf32> to vector<16x16xf32>
    %168 = arith.mulf %167, %166 : vector<16x16xf32>
    %169 = vector.extract_strided_slice %0 {offsets = [7, 1], sizes = [1, 1], strides = [1, 1]} : vector<8x4xf32> to vector<1x1xf32>
    %c0_118 = arith.constant 0 : index
    %c1_119 = arith.constant 1 : index
    %c0_120 = arith.constant 0 : index
    %c0_121 = arith.constant 0 : index
    %170 = vector.load %arg1[%c0_118, %c1_119, %c0_120, %c0_121] : memref<2x4x16x16xf32, #tpu.memory_space<vmem>>, vector<1x1x16x16xf32>
    %171 = vector.shape_cast %170 : vector<1x1x16x16xf32> to vector<16x16xf32>
    %172 = vector.broadcast %169 : vector<1x1xf32> to vector<16x16xf32>
    %173 = arith.mulf %172, %171 : vector<16x16xf32>
    %174 = arith.addf %168, %173 : vector<16x16xf32>
    %175 = vector.extract_strided_slice %0 {offsets = [7, 2], sizes = [1, 1], strides = [1, 1]} : vector<8x4xf32> to vector<1x1xf32>
    %c0_122 = arith.constant 0 : index
    %c2_123 = arith.constant 2 : index
    %c0_124 = arith.constant 0 : index
    %c0_125 = arith.constant 0 : index
    %176 = vector.load %arg1[%c0_122, %c2_123, %c0_124, %c0_125] : memref<2x4x16x16xf32, #tpu.memory_space<vmem>>, vector<1x1x16x16xf32>
    %177 = vector.shape_cast %176 : vector<1x1x16x16xf32> to vector<16x16xf32>
    %178 = vector.broadcast %175 : vector<1x1xf32> to vector<16x16xf32>
    %179 = arith.mulf %178, %177 : vector<16x16xf32>
    %180 = arith.addf %174, %179 : vector<16x16xf32>
    %181 = vector.extract_strided_slice %0 {offsets = [7, 3], sizes = [1, 1], strides = [1, 1]} : vector<8x4xf32> to vector<1x1xf32>
    %c0_126 = arith.constant 0 : index
    %c3_127 = arith.constant 3 : index
    %c0_128 = arith.constant 0 : index
    %c0_129 = arith.constant 0 : index
    %182 = vector.load %arg1[%c0_126, %c3_127, %c0_128, %c0_129] : memref<2x4x16x16xf32, #tpu.memory_space<vmem>>, vector<1x1x16x16xf32>
    %183 = vector.shape_cast %182 : vector<1x1x16x16xf32> to vector<16x16xf32>
    %184 = vector.broadcast %181 : vector<1x1xf32> to vector<16x16xf32>
    %185 = arith.mulf %184, %183 : vector<16x16xf32>
    %186 = arith.addf %180, %185 : vector<16x16xf32>
    %187 = tpu.concatenate %25, %48, %71, %94, %117, %140, %163, %186 in 0 : vector<16x16xf32>, vector<16x16xf32>, vector<16x16xf32>, vector<16x16xf32>, vector<16x16xf32>, vector<16x16xf32>, vector<16x16xf32>, vector<16x16xf32> -> vector<128x16xf32>
    %188 = vector.broadcast %1 : vector<128x1xf32> to vector<128x16xf32>
    %189 = arith.addf %187, %188 : vector<128x16xf32>
    %cst = arith.constant 0.000000e+00 : f32
    %190 = vector.broadcast %cst : f32 to vector<128x16xf32>
    %191 = arith.maximumf %189, %190 : vector<128x16xf32>
    %192 = arith.truncf %191 : vector<128x16xf32> to vector<128x16xbf16>
    %cst_130 = arith.constant dense<0.000000e+00> : vector<768x16xf32>
    %193 = tpu.matmul %2, %192, %cst_130 {dimension_numbers = #tpu.dot_dimension_numbers<[1], [0], [0], [1], [0, 0, 1, 1], [], []>} : vector<768x128xbf16>, vector<128x16xbf16>, vector<768x16xf32> -> vector<768x16xf32>
    %194 = vector.extract_strided_slice %193 {offsets = [0, 0], sizes = [256, 16], strides = [1, 1]} : vector<768x16xf32> to vector<256x16xf32>
    %c0_131 = arith.constant 0 : index
    %c0_132 = arith.constant 0 : index
    %c0_133 = arith.constant 0 : index
    %195 = vector.load %arg5[%c0_131, %c0_132, %c0_133] : memref<3x16x32xf32, #tpu.memory_space<vmem>>, vector<1x16x32xf32>
    %196 = vector.shape_cast %195 : vector<1x16x32xf32> to vector<16x32xf32>
    %cst_134 = arith.constant dense<0.000000e+00> : vector<256x32xf32>
    %197 = tpu.matmul %194, %196, %cst_134 {dimension_numbers = #tpu.dot_dimension_numbers<[1], [0], [0], [1], [0, 0, 1, 1], [], []>} : vector<256x16xf32>, vector<16x32xf32>, vector<256x32xf32> -> vector<256x32xf32>
    %198 = vector.extract_strided_slice %193 {offsets = [256, 0], sizes = [256, 16], strides = [1, 1]} : vector<768x16xf32> to vector<256x16xf32>
    %c1_135 = arith.constant 1 : index
    %c0_136 = arith.constant 0 : index
    %c0_137 = arith.constant 0 : index
    %199 = vector.load %arg5[%c1_135, %c0_136, %c0_137] : memref<3x16x32xf32, #tpu.memory_space<vmem>>, vector<1x16x32xf32>
    %200 = vector.shape_cast %199 : vector<1x16x32xf32> to vector<16x32xf32>
    %cst_138 = arith.constant dense<0.000000e+00> : vector<256x32xf32>
    %201 = tpu.matmul %198, %200, %cst_138 {dimension_numbers = #tpu.dot_dimension_numbers<[1], [0], [0], [1], [0, 0, 1, 1], [], []>} : vector<256x16xf32>, vector<16x32xf32>, vector<256x32xf32> -> vector<256x32xf32>
    %202 = arith.addf %197, %201 : vector<256x32xf32>
    %203 = vector.extract_strided_slice %193 {offsets = [512, 0], sizes = [256, 16], strides = [1, 1]} : vector<768x16xf32> to vector<256x16xf32>
    %c2_139 = arith.constant 2 : index
    %c0_140 = arith.constant 0 : index
    %c0_141 = arith.constant 0 : index
    %204 = vector.load %arg5[%c2_139, %c0_140, %c0_141] : memref<3x16x32xf32, #tpu.memory_space<vmem>>, vector<1x16x32xf32>
    %205 = vector.shape_cast %204 : vector<1x16x32xf32> to vector<16x32xf32>
    %cst_142 = arith.constant dense<0.000000e+00> : vector<256x32xf32>
    %206 = tpu.matmul %203, %205, %cst_142 {dimension_numbers = #tpu.dot_dimension_numbers<[1], [0], [0], [1], [0, 0, 1, 1], [], []>} : vector<256x16xf32>, vector<16x32xf32>, vector<256x32xf32> -> vector<256x32xf32>
    %207 = arith.addf %202, %206 : vector<256x32xf32>
    %c0_143 = arith.constant 0 : index
    %c0_144 = arith.constant 0 : index
    %c0_145 = arith.constant 0 : index
    %208 = vector.load %arg6[%c0_143, %c0_144, %c0_145] : memref<2x256x32xf32, #tpu.memory_space<vmem>>, vector<1x256x32xf32>
    %209 = vector.shape_cast %208 : vector<1x256x32xf32> to vector<256x32xf32>
    %210 = vector.shape_cast %207 : vector<256x32xf32> to vector<1x256x32xf32>
    tpu.vector_store %arg6[%c0_143, %c0_144, %c0_145], %210 {strides = array<i32>} : memref<2x256x32xf32, #tpu.memory_space<vmem>>, vector<1x256x32xf32>,
    %211 = vector.extract_strided_slice %0 {offsets = [0, 0], sizes = [1, 1], strides = [1, 1]} : vector<8x4xf32> to vector<1x1xf32>
    %c1_146 = arith.constant 1 : index
    %c0_147 = arith.constant 0 : index
    %c0_148 = arith.constant 0 : index
    %c0_149 = arith.constant 0 : index
    %212 = vector.load %arg1[%c1_146, %c0_147, %c0_148, %c0_149] : memref<2x4x16x16xf32, #tpu.memory_space<vmem>>, vector<1x1x16x16xf32>
    %213 = vector.shape_cast %212 : vector<1x1x16x16xf32> to vector<16x16xf32>
    %214 = vector.broadcast %211 : vector<1x1xf32> to vector<16x16xf32>
    %215 = arith.mulf %214, %213 : vector<16x16xf32>
    %216 = vector.extract_strided_slice %0 {offsets = [0, 1], sizes = [1, 1], strides = [1, 1]} : vector<8x4xf32> to vector<1x1xf32>
    %c1_150 = arith.constant 1 : index
    %c1_151 = arith.constant 1 : index
    %c0_152 = arith.constant 0 : index
    %c0_153 = arith.constant 0 : index
    %217 = vector.load %arg1[%c1_150, %c1_151, %c0_152, %c0_153] : memref<2x4x16x16xf32, #tpu.memory_space<vmem>>, vector<1x1x16x16xf32>
    %218 = vector.shape_cast %217 : vector<1x1x16x16xf32> to vector<16x16xf32>
    %219 = vector.broadcast %216 : vector<1x1xf32> to vector<16x16xf32>
    %220 = arith.mulf %219, %218 : vector<16x16xf32>
    %221 = arith.addf %215, %220 : vector<16x16xf32>
    %222 = vector.extract_strided_slice %0 {offsets = [0, 2], sizes = [1, 1], strides = [1, 1]} : vector<8x4xf32> to vector<1x1xf32>
    %c1_154 = arith.constant 1 : index
    %c2_155 = arith.constant 2 : index
    %c0_156 = arith.constant 0 : index
    %c0_157 = arith.constant 0 : index
    %223 = vector.load %arg1[%c1_154, %c2_155, %c0_156, %c0_157] : memref<2x4x16x16xf32, #tpu.memory_space<vmem>>, vector<1x1x16x16xf32>
    %224 = vector.shape_cast %223 : vector<1x1x16x16xf32> to vector<16x16xf32>
    %225 = vector.broadcast %222 : vector<1x1xf32> to vector<16x16xf32>
    %226 = arith.mulf %225, %224 : vector<16x16xf32>
    %227 = arith.addf %221, %226 : vector<16x16xf32>
    %228 = vector.extract_strided_slice %0 {offsets = [0, 3], sizes = [1, 1], strides = [1, 1]} : vector<8x4xf32> to vector<1x1xf32>
    %c1_158 = arith.constant 1 : index
    %c3_159 = arith.constant 3 : index
    %c0_160 = arith.constant 0 : index
    %c0_161 = arith.constant 0 : index
    %229 = vector.load %arg1[%c1_158, %c3_159, %c0_160, %c0_161] : memref<2x4x16x16xf32, #tpu.memory_space<vmem>>, vector<1x1x16x16xf32>
    %230 = vector.shape_cast %229 : vector<1x1x16x16xf32> to vector<16x16xf32>
    %231 = vector.broadcast %228 : vector<1x1xf32> to vector<16x16xf32>
    %232 = arith.mulf %231, %230 : vector<16x16xf32>
    %233 = arith.addf %227, %232 : vector<16x16xf32>
    %234 = vector.extract_strided_slice %0 {offsets = [1, 0], sizes = [1, 1], strides = [1, 1]} : vector<8x4xf32> to vector<1x1xf32>
    %c1_162 = arith.constant 1 : index
    %c0_163 = arith.constant 0 : index
    %c0_164 = arith.constant 0 : index
    %c0_165 = arith.constant 0 : index
    %235 = vector.load %arg1[%c1_162, %c0_163, %c0_164, %c0_165] : memref<2x4x16x16xf32, #tpu.memory_space<vmem>>, vector<1x1x16x16xf32>
    %236 = vector.shape_cast %235 : vector<1x1x16x16xf32> to vector<16x16xf32>
    %237 = vector.broadcast %234 : vector<1x1xf32> to vector<16x16xf32>
    %238 = arith.mulf %237, %236 : vector<16x16xf32>
    %239 = vector.extract_strided_slice %0 {offsets = [1, 1], sizes = [1, 1], strides = [1, 1]} : vector<8x4xf32> to vector<1x1xf32>
    %c1_166 = arith.constant 1 : index
    %c1_167 = arith.constant 1 : index
    %c0_168 = arith.constant 0 : index
    %c0_169 = arith.constant 0 : index
    %240 = vector.load %arg1[%c1_166, %c1_167, %c0_168, %c0_169] : memref<2x4x16x16xf32, #tpu.memory_space<vmem>>, vector<1x1x16x16xf32>
    %241 = vector.shape_cast %240 : vector<1x1x16x16xf32> to vector<16x16xf32>
    %242 = vector.broadcast %239 : vector<1x1xf32> to vector<16x16xf32>
    %243 = arith.mulf %242, %241 : vector<16x16xf32>
    %244 = arith.addf %238, %243 : vector<16x16xf32>
    %245 = vector.extract_strided_slice %0 {offsets = [1, 2], sizes = [1, 1], strides = [1, 1]} : vector<8x4xf32> to vector<1x1xf32>
    %c1_170 = arith.constant 1 : index
    %c2_171 = arith.constant 2 : index
    %c0_172 = arith.constant 0 : index
    %c0_173 = arith.constant 0 : index
    %246 = vector.load %arg1[%c1_170, %c2_171, %c0_172, %c0_173] : memref<2x4x16x16xf32, #tpu.memory_space<vmem>>, vector<1x1x16x16xf32>
    %247 = vector.shape_cast %246 : vector<1x1x16x16xf32> to vector<16x16xf32>
    %248 = vector.broadcast %245 : vector<1x1xf32> to vector<16x16xf32>
    %249 = arith.mulf %248, %247 : vector<16x16xf32>
    %250 = arith.addf %244, %249 : vector<16x16xf32>
    %251 = vector.extract_strided_slice %0 {offsets = [1, 3], sizes = [1, 1], strides = [1, 1]} : vector<8x4xf32> to vector<1x1xf32>
    %c1_174 = arith.constant 1 : index
    %c3_175 = arith.constant 3 : index
    %c0_176 = arith.constant 0 : index
    %c0_177 = arith.constant 0 : index
    %252 = vector.load %arg1[%c1_174, %c3_175, %c0_176, %c0_177] : memref<2x4x16x16xf32, #tpu.memory_space<vmem>>, vector<1x1x16x16xf32>
    %253 = vector.shape_cast %252 : vector<1x1x16x16xf32> to vector<16x16xf32>
    %254 = vector.broadcast %251 : vector<1x1xf32> to vector<16x16xf32>
    %255 = arith.mulf %254, %253 : vector<16x16xf32>
    %256 = arith.addf %250, %255 : vector<16x16xf32>
    %257 = vector.extract_strided_slice %0 {offsets = [2, 0], sizes = [1, 1], strides = [1, 1]} : vector<8x4xf32> to vector<1x1xf32>
    %c1_178 = arith.constant 1 : index
    %c0_179 = arith.constant 0 : index
    %c0_180 = arith.constant 0 : index
    %c0_181 = arith.constant 0 : index
    %258 = vector.load %arg1[%c1_178, %c0_179, %c0_180, %c0_181] : memref<2x4x16x16xf32, #tpu.memory_space<vmem>>, vector<1x1x16x16xf32>
    %259 = vector.shape_cast %258 : vector<1x1x16x16xf32> to vector<16x16xf32>
    %260 = vector.broadcast %257 : vector<1x1xf32> to vector<16x16xf32>
    %261 = arith.mulf %260, %259 : vector<16x16xf32>
    %262 = vector.extract_strided_slice %0 {offsets = [2, 1], sizes = [1, 1], strides = [1, 1]} : vector<8x4xf32> to vector<1x1xf32>
    %c1_182 = arith.constant 1 : index
    %c1_183 = arith.constant 1 : index
    %c0_184 = arith.constant 0 : index
    %c0_185 = arith.constant 0 : index
    %263 = vector.load %arg1[%c1_182, %c1_183, %c0_184, %c0_185] : memref<2x4x16x16xf32, #tpu.memory_space<vmem>>, vector<1x1x16x16xf32>
    %264 = vector.shape_cast %263 : vector<1x1x16x16xf32> to vector<16x16xf32>
    %265 = vector.broadcast %262 : vector<1x1xf32> to vector<16x16xf32>
    %266 = arith.mulf %265, %264 : vector<16x16xf32>
    %267 = arith.addf %261, %266 : vector<16x16xf32>
    %268 = vector.extract_strided_slice %0 {offsets = [2, 2], sizes = [1, 1], strides = [1, 1]} : vector<8x4xf32> to vector<1x1xf32>
    %c1_186 = arith.constant 1 : index
    %c2_187 = arith.constant 2 : index
    %c0_188 = arith.constant 0 : index
    %c0_189 = arith.constant 0 : index
    %269 = vector.load %arg1[%c1_186, %c2_187, %c0_188, %c0_189] : memref<2x4x16x16xf32, #tpu.memory_space<vmem>>, vector<1x1x16x16xf32>
    %270 = vector.shape_cast %269 : vector<1x1x16x16xf32> to vector<16x16xf32>
    %271 = vector.broadcast %268 : vector<1x1xf32> to vector<16x16xf32>
    %272 = arith.mulf %271, %270 : vector<16x16xf32>
    %273 = arith.addf %267, %272 : vector<16x16xf32>
    %274 = vector.extract_strided_slice %0 {offsets = [2, 3], sizes = [1, 1], strides = [1, 1]} : vector<8x4xf32> to vector<1x1xf32>
    %c1_190 = arith.constant 1 : index
    %c3_191 = arith.constant 3 : index
    %c0_192 = arith.constant 0 : index
    %c0_193 = arith.constant 0 : index
    %275 = vector.load %arg1[%c1_190, %c3_191, %c0_192, %c0_193] : memref<2x4x16x16xf32, #tpu.memory_space<vmem>>, vector<1x1x16x16xf32>
    %276 = vector.shape_cast %275 : vector<1x1x16x16xf32> to vector<16x16xf32>
    %277 = vector.broadcast %274 : vector<1x1xf32> to vector<16x16xf32>
    %278 = arith.mulf %277, %276 : vector<16x16xf32>
    %279 = arith.addf %273, %278 : vector<16x16xf32>
    %280 = vector.extract_strided_slice %0 {offsets = [3, 0], sizes = [1, 1], strides = [1, 1]} : vector<8x4xf32> to vector<1x1xf32>
    %c1_194 = arith.constant 1 : index
    %c0_195 = arith.constant 0 : index
    %c0_196 = arith.constant 0 : index
    %c0_197 = arith.constant 0 : index
    %281 = vector.load %arg1[%c1_194, %c0_195, %c0_196, %c0_197] : memref<2x4x16x16xf32, #tpu.memory_space<vmem>>, vector<1x1x16x16xf32>
    %282 = vector.shape_cast %281 : vector<1x1x16x16xf32> to vector<16x16xf32>
    %283 = vector.broadcast %280 : vector<1x1xf32> to vector<16x16xf32>
    %284 = arith.mulf %283, %282 : vector<16x16xf32>
    %285 = vector.extract_strided_slice %0 {offsets = [3, 1], sizes = [1, 1], strides = [1, 1]} : vector<8x4xf32> to vector<1x1xf32>
    %c1_198 = arith.constant 1 : index
    %c1_199 = arith.constant 1 : index
    %c0_200 = arith.constant 0 : index
    %c0_201 = arith.constant 0 : index
    %286 = vector.load %arg1[%c1_198, %c1_199, %c0_200, %c0_201] : memref<2x4x16x16xf32, #tpu.memory_space<vmem>>, vector<1x1x16x16xf32>
    %287 = vector.shape_cast %286 : vector<1x1x16x16xf32> to vector<16x16xf32>
    %288 = vector.broadcast %285 : vector<1x1xf32> to vector<16x16xf32>
    %289 = arith.mulf %288, %287 : vector<16x16xf32>
    %290 = arith.addf %284, %289 : vector<16x16xf32>
    %291 = vector.extract_strided_slice %0 {offsets = [3, 2], sizes = [1, 1], strides = [1, 1]} : vector<8x4xf32> to vector<1x1xf32>
    %c1_202 = arith.constant 1 : index
    %c2_203 = arith.constant 2 : index
    %c0_204 = arith.constant 0 : index
    %c0_205 = arith.constant 0 : index
    %292 = vector.load %arg1[%c1_202, %c2_203, %c0_204, %c0_205] : memref<2x4x16x16xf32, #tpu.memory_space<vmem>>, vector<1x1x16x16xf32>
    %293 = vector.shape_cast %292 : vector<1x1x16x16xf32> to vector<16x16xf32>
    %294 = vector.broadcast %291 : vector<1x1xf32> to vector<16x16xf32>
    %295 = arith.mulf %294, %293 : vector<16x16xf32>
    %296 = arith.addf %290, %295 : vector<16x16xf32>
    %297 = vector.extract_strided_slice %0 {offsets = [3, 3], sizes = [1, 1], strides = [1, 1]} : vector<8x4xf32> to vector<1x1xf32>
    %c1_206 = arith.constant 1 : index
    %c3_207 = arith.constant 3 : index
    %c0_208 = arith.constant 0 : index
    %c0_209 = arith.constant 0 : index
    %298 = vector.load %arg1[%c1_206, %c3_207, %c0_208, %c0_209] : memref<2x4x16x16xf32, #tpu.memory_space<vmem>>, vector<1x1x16x16xf32>
    %299 = vector.shape_cast %298 : vector<1x1x16x16xf32> to vector<16x16xf32>
    %300 = vector.broadcast %297 : vector<1x1xf32> to vector<16x16xf32>
    %301 = arith.mulf %300, %299 : vector<16x16xf32>
    %302 = arith.addf %296, %301 : vector<16x16xf32>
    %303 = vector.extract_strided_slice %0 {offsets = [4, 0], sizes = [1, 1], strides = [1, 1]} : vector<8x4xf32> to vector<1x1xf32>
    %c1_210 = arith.constant 1 : index
    %c0_211 = arith.constant 0 : index
    %c0_212 = arith.constant 0 : index
    %c0_213 = arith.constant 0 : index
    %304 = vector.load %arg1[%c1_210, %c0_211, %c0_212, %c0_213] : memref<2x4x16x16xf32, #tpu.memory_space<vmem>>, vector<1x1x16x16xf32>
    %305 = vector.shape_cast %304 : vector<1x1x16x16xf32> to vector<16x16xf32>
    %306 = vector.broadcast %303 : vector<1x1xf32> to vector<16x16xf32>
    %307 = arith.mulf %306, %305 : vector<16x16xf32>
    %308 = vector.extract_strided_slice %0 {offsets = [4, 1], sizes = [1, 1], strides = [1, 1]} : vector<8x4xf32> to vector<1x1xf32>
    %c1_214 = arith.constant 1 : index
    %c1_215 = arith.constant 1 : index
    %c0_216 = arith.constant 0 : index
    %c0_217 = arith.constant 0 : index
    %309 = vector.load %arg1[%c1_214, %c1_215, %c0_216, %c0_217] : memref<2x4x16x16xf32, #tpu.memory_space<vmem>>, vector<1x1x16x16xf32>
    %310 = vector.shape_cast %309 : vector<1x1x16x16xf32> to vector<16x16xf32>
    %311 = vector.broadcast %308 : vector<1x1xf32> to vector<16x16xf32>
    %312 = arith.mulf %311, %310 : vector<16x16xf32>
    %313 = arith.addf %307, %312 : vector<16x16xf32>
    %314 = vector.extract_strided_slice %0 {offsets = [4, 2], sizes = [1, 1], strides = [1, 1]} : vector<8x4xf32> to vector<1x1xf32>
    %c1_218 = arith.constant 1 : index
    %c2_219 = arith.constant 2 : index
    %c0_220 = arith.constant 0 : index
    %c0_221 = arith.constant 0 : index
    %315 = vector.load %arg1[%c1_218, %c2_219, %c0_220, %c0_221] : memref<2x4x16x16xf32, #tpu.memory_space<vmem>>, vector<1x1x16x16xf32>
    %316 = vector.shape_cast %315 : vector<1x1x16x16xf32> to vector<16x16xf32>
    %317 = vector.broadcast %314 : vector<1x1xf32> to vector<16x16xf32>
    %318 = arith.mulf %317, %316 : vector<16x16xf32>
    %319 = arith.addf %313, %318 : vector<16x16xf32>
    %320 = vector.extract_strided_slice %0 {offsets = [4, 3], sizes = [1, 1], strides = [1, 1]} : vector<8x4xf32> to vector<1x1xf32>
    %c1_222 = arith.constant 1 : index
    %c3_223 = arith.constant 3 : index
    %c0_224 = arith.constant 0 : index
    %c0_225 = arith.constant 0 : index
    %321 = vector.load %arg1[%c1_222, %c3_223, %c0_224, %c0_225] : memref<2x4x16x16xf32, #tpu.memory_space<vmem>>, vector<1x1x16x16xf32>
    %322 = vector.shape_cast %321 : vector<1x1x16x16xf32> to vector<16x16xf32>
    %323 = vector.broadcast %320 : vector<1x1xf32> to vector<16x16xf32>
    %324 = arith.mulf %323, %322 : vector<16x16xf32>
    %325 = arith.addf %319, %324 : vector<16x16xf32>
    %326 = vector.extract_strided_slice %0 {offsets = [5, 0], sizes = [1, 1], strides = [1, 1]} : vector<8x4xf32> to vector<1x1xf32>
    %c1_226 = arith.constant 1 : index
    %c0_227 = arith.constant 0 : index
    %c0_228 = arith.constant 0 : index
    %c0_229 = arith.constant 0 : index
    %327 = vector.load %arg1[%c1_226, %c0_227, %c0_228, %c0_229] : memref<2x4x16x16xf32, #tpu.memory_space<vmem>>, vector<1x1x16x16xf32>
    %328 = vector.shape_cast %327 : vector<1x1x16x16xf32> to vector<16x16xf32>
    %329 = vector.broadcast %326 : vector<1x1xf32> to vector<16x16xf32>
    %330 = arith.mulf %329, %328 : vector<16x16xf32>
    %331 = vector.extract_strided_slice %0 {offsets = [5, 1], sizes = [1, 1], strides = [1, 1]} : vector<8x4xf32> to vector<1x1xf32>
    %c1_230 = arith.constant 1 : index
    %c1_231 = arith.constant 1 : index
    %c0_232 = arith.constant 0 : index
    %c0_233 = arith.constant 0 : index
    %332 = vector.load %arg1[%c1_230, %c1_231, %c0_232, %c0_233] : memref<2x4x16x16xf32, #tpu.memory_space<vmem>>, vector<1x1x16x16xf32>
    %333 = vector.shape_cast %332 : vector<1x1x16x16xf32> to vector<16x16xf32>
    %334 = vector.broadcast %331 : vector<1x1xf32> to vector<16x16xf32>
    %335 = arith.mulf %334, %333 : vector<16x16xf32>
    %336 = arith.addf %330, %335 : vector<16x16xf32>
    %337 = vector.extract_strided_slice %0 {offsets = [5, 2], sizes = [1, 1], strides = [1, 1]} : vector<8x4xf32> to vector<1x1xf32>
    %c1_234 = arith.constant 1 : index
    %c2_235 = arith.constant 2 : index
    %c0_236 = arith.constant 0 : index
    %c0_237 = arith.constant 0 : index
    %338 = vector.load %arg1[%c1_234, %c2_235, %c0_236, %c0_237] : memref<2x4x16x16xf32, #tpu.memory_space<vmem>>, vector<1x1x16x16xf32>
    %339 = vector.shape_cast %338 : vector<1x1x16x16xf32> to vector<16x16xf32>
    %340 = vector.broadcast %337 : vector<1x1xf32> to vector<16x16xf32>
    %341 = arith.mulf %340, %339 : vector<16x16xf32>
    %342 = arith.addf %336, %341 : vector<16x16xf32>
    %343 = vector.extract_strided_slice %0 {offsets = [5, 3], sizes = [1, 1], strides = [1, 1]} : vector<8x4xf32> to vector<1x1xf32>
    %c1_238 = arith.constant 1 : index
    %c3_239 = arith.constant 3 : index
    %c0_240 = arith.constant 0 : index
    %c0_241 = arith.constant 0 : index
    %344 = vector.load %arg1[%c1_238, %c3_239, %c0_240, %c0_241] : memref<2x4x16x16xf32, #tpu.memory_space<vmem>>, vector<1x1x16x16xf32>
    %345 = vector.shape_cast %344 : vector<1x1x16x16xf32> to vector<16x16xf32>
    %346 = vector.broadcast %343 : vector<1x1xf32> to vector<16x16xf32>
    %347 = arith.mulf %346, %345 : vector<16x16xf32>
    %348 = arith.addf %342, %347 : vector<16x16xf32>
    %349 = vector.extract_strided_slice %0 {offsets = [6, 0], sizes = [1, 1], strides = [1, 1]} : vector<8x4xf32> to vector<1x1xf32>
    %c1_242 = arith.constant 1 : index
    %c0_243 = arith.constant 0 : index
    %c0_244 = arith.constant 0 : index
    %c0_245 = arith.constant 0 : index
    %350 = vector.load %arg1[%c1_242, %c0_243, %c0_244, %c0_245] : memref<2x4x16x16xf32, #tpu.memory_space<vmem>>, vector<1x1x16x16xf32>
    %351 = vector.shape_cast %350 : vector<1x1x16x16xf32> to vector<16x16xf32>
    %352 = vector.broadcast %349 : vector<1x1xf32> to vector<16x16xf32>
    %353 = arith.mulf %352, %351 : vector<16x16xf32>
    %354 = vector.extract_strided_slice %0 {offsets = [6, 1], sizes = [1, 1], strides = [1, 1]} : vector<8x4xf32> to vector<1x1xf32>
    %c1_246 = arith.constant 1 : index
    %c1_247 = arith.constant 1 : index
    %c0_248 = arith.constant 0 : index
    %c0_249 = arith.constant 0 : index
    %355 = vector.load %arg1[%c1_246, %c1_247, %c0_248, %c0_249] : memref<2x4x16x16xf32, #tpu.memory_space<vmem>>, vector<1x1x16x16xf32>
    %356 = vector.shape_cast %355 : vector<1x1x16x16xf32> to vector<16x16xf32>
    %357 = vector.broadcast %354 : vector<1x1xf32> to vector<16x16xf32>
    %358 = arith.mulf %357, %356 : vector<16x16xf32>
    %359 = arith.addf %353, %358 : vector<16x16xf32>
    %360 = vector.extract_strided_slice %0 {offsets = [6, 2], sizes = [1, 1], strides = [1, 1]} : vector<8x4xf32> to vector<1x1xf32>
    %c1_250 = arith.constant 1 : index
    %c2_251 = arith.constant 2 : index
    %c0_252 = arith.constant 0 : index
    %c0_253 = arith.constant 0 : index
    %361 = vector.load %arg1[%c1_250, %c2_251, %c0_252, %c0_253] : memref<2x4x16x16xf32, #tpu.memory_space<vmem>>, vector<1x1x16x16xf32>
    %362 = vector.shape_cast %361 : vector<1x1x16x16xf32> to vector<16x16xf32>
    %363 = vector.broadcast %360 : vector<1x1xf32> to vector<16x16xf32>
    %364 = arith.mulf %363, %362 : vector<16x16xf32>
    %365 = arith.addf %359, %364 : vector<16x16xf32>
    %366 = vector.extract_strided_slice %0 {offsets = [6, 3], sizes = [1, 1], strides = [1, 1]} : vector<8x4xf32> to vector<1x1xf32>
    %c1_254 = arith.constant 1 : index
    %c3_255 = arith.constant 3 : index
    %c0_256 = arith.constant 0 : index
    %c0_257 = arith.constant 0 : index
    %367 = vector.load %arg1[%c1_254, %c3_255, %c0_256, %c0_257] : memref<2x4x16x16xf32, #tpu.memory_space<vmem>>, vector<1x1x16x16xf32>
    %368 = vector.shape_cast %367 : vector<1x1x16x16xf32> to vector<16x16xf32>
    %369 = vector.broadcast %366 : vector<1x1xf32> to vector<16x16xf32>
    %370 = arith.mulf %369, %368 : vector<16x16xf32>
    %371 = arith.addf %365, %370 : vector<16x16xf32>
    %372 = vector.extract_strided_slice %0 {offsets = [7, 0], sizes = [1, 1], strides = [1, 1]} : vector<8x4xf32> to vector<1x1xf32>
    %c1_258 = arith.constant 1 : index
    %c0_259 = arith.constant 0 : index
    %c0_260 = arith.constant 0 : index
    %c0_261 = arith.constant 0 : index
    %373 = vector.load %arg1[%c1_258, %c0_259, %c0_260, %c0_261] : memref<2x4x16x16xf32, #tpu.memory_space<vmem>>, vector<1x1x16x16xf32>
    %374 = vector.shape_cast %373 : vector<1x1x16x16xf32> to vector<16x16xf32>
    %375 = vector.broadcast %372 : vector<1x1xf32> to vector<16x16xf32>
    %376 = arith.mulf %375, %374 : vector<16x16xf32>
    %377 = vector.extract_strided_slice %0 {offsets = [7, 1], sizes = [1, 1], strides = [1, 1]} : vector<8x4xf32> to vector<1x1xf32>
    %c1_262 = arith.constant 1 : index
    %c1_263 = arith.constant 1 : index
    %c0_264 = arith.constant 0 : index
    %c0_265 = arith.constant 0 : index
    %378 = vector.load %arg1[%c1_262, %c1_263, %c0_264, %c0_265] : memref<2x4x16x16xf32, #tpu.memory_space<vmem>>, vector<1x1x16x16xf32>
    %379 = vector.shape_cast %378 : vector<1x1x16x16xf32> to vector<16x16xf32>
    %380 = vector.broadcast %377 : vector<1x1xf32> to vector<16x16xf32>
    %381 = arith.mulf %380, %379 : vector<16x16xf32>
    %382 = arith.addf %376, %381 : vector<16x16xf32>
    %383 = vector.extract_strided_slice %0 {offsets = [7, 2], sizes = [1, 1], strides = [1, 1]} : vector<8x4xf32> to vector<1x1xf32>
    %c1_266 = arith.constant 1 : index
    %c2_267 = arith.constant 2 : index
    %c0_268 = arith.constant 0 : index
    %c0_269 = arith.constant 0 : index
    %384 = vector.load %arg1[%c1_266, %c2_267, %c0_268, %c0_269] : memref<2x4x16x16xf32, #tpu.memory_space<vmem>>, vector<1x1x16x16xf32>
    %385 = vector.shape_cast %384 : vector<1x1x16x16xf32> to vector<16x16xf32>
    %386 = vector.broadcast %383 : vector<1x1xf32> to vector<16x16xf32>
    %387 = arith.mulf %386, %385 : vector<16x16xf32>
    %388 = arith.addf %382, %387 : vector<16x16xf32>
    %389 = vector.extract_strided_slice %0 {offsets = [7, 3], sizes = [1, 1], strides = [1, 1]} : vector<8x4xf32> to vector<1x1xf32>
    %c1_270 = arith.constant 1 : index
    %c3_271 = arith.constant 3 : index
    %c0_272 = arith.constant 0 : index
    %c0_273 = arith.constant 0 : index
    %390 = vector.load %arg1[%c1_270, %c3_271, %c0_272, %c0_273] : memref<2x4x16x16xf32, #tpu.memory_space<vmem>>, vector<1x1x16x16xf32>
    %391 = vector.shape_cast %390 : vector<1x1x16x16xf32> to vector<16x16xf32>
    %392 = vector.broadcast %389 : vector<1x1xf32> to vector<16x16xf32>
    %393 = arith.mulf %392, %391 : vector<16x16xf32>
    %394 = arith.addf %388, %393 : vector<16x16xf32>
    %395 = tpu.concatenate %233, %256, %279, %302, %325, %348, %371, %394 in 0 : vector<16x16xf32>, vector<16x16xf32>, vector<16x16xf32>, vector<16x16xf32>, vector<16x16xf32>, vector<16x16xf32>, vector<16x16xf32>, vector<16x16xf32> -> vector<128x16xf32>
    %396 = vector.broadcast %1 : vector<128x1xf32> to vector<128x16xf32>
    %397 = arith.addf %395, %396 : vector<128x16xf32>
    %cst_274 = arith.constant 0.000000e+00 : f32
    %398 = vector.broadcast %cst_274 : f32 to vector<128x16xf32>
    %399 = arith.maximumf %397, %398 : vector<128x16xf32>
    %400 = arith.truncf %399 : vector<128x16xf32> to vector<128x16xbf16>
    %cst_275 = arith.constant dense<0.000000e+00> : vector<768x16xf32>
    %401 = tpu.matmul %2, %400, %cst_275 {dimension_numbers = #tpu.dot_dimension_numbers<[1], [0], [0], [1], [0, 0, 1, 1], [], []>} : vector<768x128xbf16>, vector<128x16xbf16>, vector<768x16xf32> -> vector<768x16xf32>
    %402 = vector.extract_strided_slice %401 {offsets = [0, 0], sizes = [256, 16], strides = [1, 1]} : vector<768x16xf32> to vector<256x16xf32>
    %c0_276 = arith.constant 0 : index
    %c0_277 = arith.constant 0 : index
    %c0_278 = arith.constant 0 : index
    %403 = vector.load %arg5[%c0_276, %c0_277, %c0_278] : memref<3x16x32xf32, #tpu.memory_space<vmem>>, vector<1x16x32xf32>
    %404 = vector.shape_cast %403 : vector<1x16x32xf32> to vector<16x32xf32>
    %cst_279 = arith.constant dense<0.000000e+00> : vector<256x32xf32>
    %405 = tpu.matmul %402, %404, %cst_279 {dimension_numbers = #tpu.dot_dimension_numbers<[1], [0], [0], [1], [0, 0, 1, 1], [], []>} : vector<256x16xf32>, vector<16x32xf32>, vector<256x32xf32> -> vector<256x32xf32>
    %406 = vector.extract_strided_slice %401 {offsets = [256, 0], sizes = [256, 16], strides = [1, 1]} : vector<768x16xf32> to vector<256x16xf32>
    %c1_280 = arith.constant 1 : index
    %c0_281 = arith.constant 0 : index
    %c0_282 = arith.constant 0 : index
    %407 = vector.load %arg5[%c1_280, %c0_281, %c0_282] : memref<3x16x32xf32, #tpu.memory_space<vmem>>, vector<1x16x32xf32>
    %408 = vector.shape_cast %407 : vector<1x16x32xf32> to vector<16x32xf32>
    %cst_283 = arith.constant dense<0.000000e+00> : vector<256x32xf32>
    %409 = tpu.matmul %406, %408, %cst_283 {dimension_numbers = #tpu.dot_dimension_numbers<[1], [0], [0], [1], [0, 0, 1, 1], [], []>} : vector<256x16xf32>, vector<16x32xf32>, vector<256x32xf32> -> vector<256x32xf32>
    %410 = arith.addf %405, %409 : vector<256x32xf32>
    %411 = vector.extract_strided_slice %401 {offsets = [512, 0], sizes = [256, 16], strides = [1, 1]} : vector<768x16xf32> to vector<256x16xf32>
    %c2_284 = arith.constant 2 : index
    %c0_285 = arith.constant 0 : index
    %c0_286 = arith.constant 0 : index
    %412 = vector.load %arg5[%c2_284, %c0_285, %c0_286] : memref<3x16x32xf32, #tpu.memory_space<vmem>>, vector<1x16x32xf32>
    %413 = vector.shape_cast %412 : vector<1x16x32xf32> to vector<16x32xf32>
    %cst_287 = arith.constant dense<0.000000e+00> : vector<256x32xf32>
    %414 = tpu.matmul %411, %413, %cst_287 {dimension_numbers = #tpu.dot_dimension_numbers<[1], [0], [0], [1], [0, 0, 1, 1], [], []>} : vector<256x16xf32>, vector<16x32xf32>, vector<256x32xf32> -> vector<256x32xf32>
    %415 = arith.addf %410, %414 : vector<256x32xf32>
    %c1_288 = arith.constant 1 : index
    %c0_289 = arith.constant 0 : index
    %c0_290 = arith.constant 0 : index
    %416 = vector.load %arg6[%c1_288, %c0_289, %c0_290] : memref<2x256x32xf32, #tpu.memory_space<vmem>>, vector<1x256x32xf32>
    %417 = vector.shape_cast %416 : vector<1x256x32xf32> to vector<256x32xf32>
    %418 = vector.shape_cast %415 : vector<256x32xf32> to vector<1x256x32xf32>
    tpu.vector_store %arg6[%c1_288, %c0_289, %c0_290], %418 {strides = array<i32>} : memref<2x256x32xf32, #tpu.memory_space<vmem>>, vector<1x256x32xf32>,
    return
  }
  func.func @transform_0(%arg0: i32) -> (i32, i32, i32, i32) {
    %c0_i32 = arith.constant 0 : i32
    %c0_i32_0 = arith.constant 0 : i32
    %c0_i32_1 = arith.constant 0 : i32
    %c0_i32_2 = arith.constant 0 : i32
    return %arg0, %c0_i32, %c0_i32_0, %c0_i32_1 : i32, i32, i32, i32
  }
  func.func @transform_1(%arg0: i32) -> (i32, i32) {
    %c0_i32 = arith.constant 0 : i32
    %c0_i32_0 = arith.constant 0 : i32
    %c0_i32_1 = arith.constant 0 : i32
    return %c0_i32, %c0_i32_0 : i32, i32
  }
  func.func @transform_2(%arg0: i32) -> (i32, i32) {
    %c0_i32 = arith.constant 0 : i32
    %c0_i32_0 = arith.constant 0 : i32
    %c0_i32_1 = arith.constant 0 : i32
    return %c0_i32, %c0_i32_0 : i32, i32
  }
  func.func @transform_3(%arg0: i32) -> (i32, i32) {
    %c0_i32 = arith.constant 0 : i32
    %c0_i32_0 = arith.constant 0 : i32
    %c0_i32_1 = arith.constant 0 : i32
    return %c0_i32, %c0_i32_0 : i32, i32
  }
  func.func @transform_4(%arg0: i32) -> (i32, i32, i32) {
    %c0_i32 = arith.constant 0 : i32
    %c0_i32_0 = arith.constant 0 : i32
    %c0_i32_1 = arith.constant 0 : i32
    %c0_i32_2 = arith.constant 0 : i32
    return %c0_i32, %c0_i32_0, %c0_i32_1 : i32, i32, i32
  }
  func.func @transform_5(%arg0: i32) -> (i32, i32, i32) {
    %c0_i32 = arith.constant 0 : i32
    %c0_i32_0 = arith.constant 0 : i32
    %c0_i32_1 = arith.constant 0 : i32
    return %arg0, %c0_i32, %c0_i32_0 : i32, i32, i32
  }
}

module attributes {stable_mosaic.version = 11 : i64} {
  func.func @_adjustment_fused_kernel(%arg0: i32, %arg1: memref<2x4x16x16xf32, #tpu.memory_space<vmem>>, %arg2: memref<8x4xf32, #tpu.memory_space<vmem>>, %arg3: memref<128x1xf32, #tpu.memory_space<vmem>>, %arg4: memref<768x128xbf16, #tpu.memory_space<vmem>>, %arg5: memref<3x16x32xf32, #tpu.memory_space<vmem>>, %arg6: memref<2x256x32xf32, #tpu.memory_space<vmem>>) attributes {dimension_semantics = [#tpu.dimension_semantics<parallel>], iteration_bounds = array<i64: 1>, scalar_prefetch = 0 : i64, scratch_operands = 0 : i64, tpu.core_type = #tpu.core_type<tc>, window_params = [{transform_indices = @transform_0, window_bounds = array<i64: 2, 4, 16, 16>}, {pipeline_mode = #tpu.pipeline_mode<synchronous>, transform_indices = @transform_1, window_bounds = array<i64: 8, 4>}, {pipeline_mode = #tpu.pipeline_mode<synchronous>, transform_indices = @transform_2, window_bounds = array<i64: 128, 1>}, {pipeline_mode = #tpu.pipeline_mode<synchronous>, transform_indices = @transform_3, window_bounds = array<i64: 768, 128>}, {pipeline_mode = #tpu.pipeline_mode<synchronous>, transform_indices = @transform_4, window_bounds = array<i64: 3, 16, 32>}, {transform_indices = @transform_5, window_bounds = array<i64: 2, 256, 32>}]} {
    %c0 = arith.constant 0 : index
    %c0_0 = arith.constant 0 : index
    %0 = vector.load %arg2[%c0, %c0_0] : memref<8x4xf32, #tpu.memory_space<vmem>>, vector<8x4xf32>
    %c0_1 = arith.constant 0 : index
    %c0_2 = arith.constant 0 : index
    %1 = vector.load %arg3[%c0_1, %c0_2] : memref<128x1xf32, #tpu.memory_space<vmem>>, vector<128x1xf32>
    %c0_3 = arith.constant 0 : index
    %c0_4 = arith.constant 0 : index
    %2 = vector.load %arg4[%c0_3, %c0_4] : memref<768x128xbf16, #tpu.memory_space<vmem>>, vector<768x128xbf16>
    %3 = vector.extract_strided_slice %0 {offsets = [0, 0], sizes = [1, 1], strides = [1, 1]} : vector<8x4xf32> to vector<1x1xf32>
    %c0_5 = arith.constant 0 : index
    %c0_6 = arith.constant 0 : index
    %c0_7 = arith.constant 0 : index
    %c0_8 = arith.constant 0 : index
    %4 = vector.load %arg1[%c0_5, %c0_6, %c0_7, %c0_8] : memref<2x4x16x16xf32, #tpu.memory_space<vmem>>, vector<1x1x16x16xf32>
    %5 = vector.shape_cast %4 : vector<1x1x16x16xf32> to vector<16x16xf32>
    %6 = vector.broadcast %3 : vector<1x1xf32> to vector<16x16xf32>
    %7 = arith.mulf %6, %5 : vector<16x16xf32>
    %8 = vector.extract_strided_slice %0 {offsets = [0, 1], sizes = [1, 1], strides = [1, 1]} : vector<8x4xf32> to vector<1x1xf32>
    %c0_9 = arith.constant 0 : index
    %c1 = arith.constant 1 : index
    %c0_10 = arith.constant 0 : index
    %c0_11 = arith.constant 0 : index
    %9 = vector.load %arg1[%c0_9, %c1, %c0_10, %c0_11] : memref<2x4x16x16xf32, #tpu.memory_space<vmem>>, vector<1x1x16x16xf32>
    %10 = vector.shape_cast %9 : vector<1x1x16x16xf32> to vector<16x16xf32>
    %11 = vector.broadcast %8 : vector<1x1xf32> to vector<16x16xf32>
    %12 = arith.mulf %11, %10 : vector<16x16xf32>
    %13 = arith.addf %7, %12 : vector<16x16xf32>
    %14 = vector.extract_strided_slice %0 {offsets = [0, 2], sizes = [1, 1], strides = [1, 1]} : vector<8x4xf32> to vector<1x1xf32>
    %c0_12 = arith.constant 0 : index
    %c2 = arith.constant 2 : index
    %c0_13 = arith.constant 0 : index
    %c0_14 = arith.constant 0 : index
    %15 = vector.load %arg1[%c0_12, %c2, %c0_13, %c0_14] : memref<2x4x16x16xf32, #tpu.memory_space<vmem>>, vector<1x1x16x16xf32>
    %16 = vector.shape_cast %15 : vector<1x1x16x16xf32> to vector<16x16xf32>
    %17 = vector.broadcast %14 : vector<1x1xf32> to vector<16x16xf32>
    %18 = arith.mulf %17, %16 : vector<16x16xf32>
    %19 = arith.addf %13, %18 : vector<16x16xf32>
    %20 = vector.extract_strided_slice %0 {offsets = [0, 3], sizes = [1, 1], strides = [1, 1]} : vector<8x4xf32> to vector<1x1xf32>
    %c0_15 = arith.constant 0 : index
    %c3 = arith.constant 3 : index
    %c0_16 = arith.constant 0 : index
    %c0_17 = arith.constant 0 : index
    %21 = vector.load %arg1[%c0_15, %c3, %c0_16, %c0_17] : memref<2x4x16x16xf32, #tpu.memory_space<vmem>>, vector<1x1x16x16xf32>
    %22 = vector.shape_cast %21 : vector<1x1x16x16xf32> to vector<16x16xf32>
    %23 = vector.broadcast %20 : vector<1x1xf32> to vector<16x16xf32>
    %24 = arith.mulf %23, %22 : vector<16x16xf32>
    %25 = arith.addf %19, %24 : vector<16x16xf32>
    %26 = vector.extract_strided_slice %0 {offsets = [1, 0], sizes = [1, 1], strides = [1, 1]} : vector<8x4xf32> to vector<1x1xf32>
    %c0_18 = arith.constant 0 : index
    %c0_19 = arith.constant 0 : index
    %c0_20 = arith.constant 0 : index
    %c0_21 = arith.constant 0 : index
    %27 = vector.load %arg1[%c0_18, %c0_19, %c0_20, %c0_21] : memref<2x4x16x16xf32, #tpu.memory_space<vmem>>, vector<1x1x16x16xf32>
    %28 = vector.shape_cast %27 : vector<1x1x16x16xf32> to vector<16x16xf32>
    %29 = vector.broadcast %26 : vector<1x1xf32> to vector<16x16xf32>
    %30 = arith.mulf %29, %28 : vector<16x16xf32>
    %31 = vector.extract_strided_slice %0 {offsets = [1, 1], sizes = [1, 1], strides = [1, 1]} : vector<8x4xf32> to vector<1x1xf32>
    %c0_22 = arith.constant 0 : index
    %c1_23 = arith.constant 1 : index
    %c0_24 = arith.constant 0 : index
    %c0_25 = arith.constant 0 : index
    %32 = vector.load %arg1[%c0_22, %c1_23, %c0_24, %c0_25] : memref<2x4x16x16xf32, #tpu.memory_space<vmem>>, vector<1x1x16x16xf32>
    %33 = vector.shape_cast %32 : vector<1x1x16x16xf32> to vector<16x16xf32>
    %34 = vector.broadcast %31 : vector<1x1xf32> to vector<16x16xf32>
    %35 = arith.mulf %34, %33 : vector<16x16xf32>
    %36 = arith.addf %30, %35 : vector<16x16xf32>
    %37 = vector.extract_strided_slice %0 {offsets = [1, 2], sizes = [1, 1], strides = [1, 1]} : vector<8x4xf32> to vector<1x1xf32>
    %c0_26 = arith.constant 0 : index
    %c2_27 = arith.constant 2 : index
    %c0_28 = arith.constant 0 : index
    %c0_29 = arith.constant 0 : index
    %38 = vector.load %arg1[%c0_26, %c2_27, %c0_28, %c0_29] : memref<2x4x16x16xf32, #tpu.memory_space<vmem>>, vector<1x1x16x16xf32>
    %39 = vector.shape_cast %38 : vector<1x1x16x16xf32> to vector<16x16xf32>
    %40 = vector.broadcast %37 : vector<1x1xf32> to vector<16x16xf32>
    %41 = arith.mulf %40, %39 : vector<16x16xf32>
    %42 = arith.addf %36, %41 : vector<16x16xf32>
    %43 = vector.extract_strided_slice %0 {offsets = [1, 3], sizes = [1, 1], strides = [1, 1]} : vector<8x4xf32> to vector<1x1xf32>
    %c0_30 = arith.constant 0 : index
    %c3_31 = arith.constant 3 : index
    %c0_32 = arith.constant 0 : index
    %c0_33 = arith.constant 0 : index
    %44 = vector.load %arg1[%c0_30, %c3_31, %c0_32, %c0_33] : memref<2x4x16x16xf32, #tpu.memory_space<vmem>>, vector<1x1x16x16xf32>
    %45 = vector.shape_cast %44 : vector<1x1x16x16xf32> to vector<16x16xf32>
    %46 = vector.broadcast %43 : vector<1x1xf32> to vector<16x16xf32>
    %47 = arith.mulf %46, %45 : vector<16x16xf32>
    %48 = arith.addf %42, %47 : vector<16x16xf32>
    %49 = vector.extract_strided_slice %0 {offsets = [2, 0], sizes = [1, 1], strides = [1, 1]} : vector<8x4xf32> to vector<1x1xf32>
    %c0_34 = arith.constant 0 : index
    %c0_35 = arith.constant 0 : index
    %c0_36 = arith.constant 0 : index
    %c0_37 = arith.constant 0 : index
    %50 = vector.load %arg1[%c0_34, %c0_35, %c0_36, %c0_37] : memref<2x4x16x16xf32, #tpu.memory_space<vmem>>, vector<1x1x16x16xf32>
    %51 = vector.shape_cast %50 : vector<1x1x16x16xf32> to vector<16x16xf32>
    %52 = vector.broadcast %49 : vector<1x1xf32> to vector<16x16xf32>
    %53 = arith.mulf %52, %51 : vector<16x16xf32>
    %54 = vector.extract_strided_slice %0 {offsets = [2, 1], sizes = [1, 1], strides = [1, 1]} : vector<8x4xf32> to vector<1x1xf32>
    %c0_38 = arith.constant 0 : index
    %c1_39 = arith.constant 1 : index
    %c0_40 = arith.constant 0 : index
    %c0_41 = arith.constant 0 : index
    %55 = vector.load %arg1[%c0_38, %c1_39, %c0_40, %c0_41] : memref<2x4x16x16xf32, #tpu.memory_space<vmem>>, vector<1x1x16x16xf32>
    %56 = vector.shape_cast %55 : vector<1x1x16x16xf32> to vector<16x16xf32>
    %57 = vector.broadcast %54 : vector<1x1xf32> to vector<16x16xf32>
    %58 = arith.mulf %57, %56 : vector<16x16xf32>
    %59 = arith.addf %53, %58 : vector<16x16xf32>
    %60 = vector.extract_strided_slice %0 {offsets = [2, 2], sizes = [1, 1], strides = [1, 1]} : vector<8x4xf32> to vector<1x1xf32>
    %c0_42 = arith.constant 0 : index
    %c2_43 = arith.constant 2 : index
    %c0_44 = arith.constant 0 : index
    %c0_45 = arith.constant 0 : index
    %61 = vector.load %arg1[%c0_42, %c2_43, %c0_44, %c0_45] : memref<2x4x16x16xf32, #tpu.memory_space<vmem>>, vector<1x1x16x16xf32>
    %62 = vector.shape_cast %61 : vector<1x1x16x16xf32> to vector<16x16xf32>
    %63 = vector.broadcast %60 : vector<1x1xf32> to vector<16x16xf32>
    %64 = arith.mulf %63, %62 : vector<16x16xf32>
    %65 = arith.addf %59, %64 : vector<16x16xf32>
    %66 = vector.extract_strided_slice %0 {offsets = [2, 3], sizes = [1, 1], strides = [1, 1]} : vector<8x4xf32> to vector<1x1xf32>
    %c0_46 = arith.constant 0 : index
    %c3_47 = arith.constant 3 : index
    %c0_48 = arith.constant 0 : index
    %c0_49 = arith.constant 0 : index
    %67 = vector.load %arg1[%c0_46, %c3_47, %c0_48, %c0_49] : memref<2x4x16x16xf32, #tpu.memory_space<vmem>>, vector<1x1x16x16xf32>
    %68 = vector.shape_cast %67 : vector<1x1x16x16xf32> to vector<16x16xf32>
    %69 = vector.broadcast %66 : vector<1x1xf32> to vector<16x16xf32>
    %70 = arith.mulf %69, %68 : vector<16x16xf32>
    %71 = arith.addf %65, %70 : vector<16x16xf32>
    %72 = vector.extract_strided_slice %0 {offsets = [3, 0], sizes = [1, 1], strides = [1, 1]} : vector<8x4xf32> to vector<1x1xf32>
    %c0_50 = arith.constant 0 : index
    %c0_51 = arith.constant 0 : index
    %c0_52 = arith.constant 0 : index
    %c0_53 = arith.constant 0 : index
    %73 = vector.load %arg1[%c0_50, %c0_51, %c0_52, %c0_53] : memref<2x4x16x16xf32, #tpu.memory_space<vmem>>, vector<1x1x16x16xf32>
    %74 = vector.shape_cast %73 : vector<1x1x16x16xf32> to vector<16x16xf32>
    %75 = vector.broadcast %72 : vector<1x1xf32> to vector<16x16xf32>
    %76 = arith.mulf %75, %74 : vector<16x16xf32>
    %77 = vector.extract_strided_slice %0 {offsets = [3, 1], sizes = [1, 1], strides = [1, 1]} : vector<8x4xf32> to vector<1x1xf32>
    %c0_54 = arith.constant 0 : index
    %c1_55 = arith.constant 1 : index
    %c0_56 = arith.constant 0 : index
    %c0_57 = arith.constant 0 : index
    %78 = vector.load %arg1[%c0_54, %c1_55, %c0_56, %c0_57] : memref<2x4x16x16xf32, #tpu.memory_space<vmem>>, vector<1x1x16x16xf32>
    %79 = vector.shape_cast %78 : vector<1x1x16x16xf32> to vector<16x16xf32>
    %80 = vector.broadcast %77 : vector<1x1xf32> to vector<16x16xf32>
    %81 = arith.mulf %80, %79 : vector<16x16xf32>
    %82 = arith.addf %76, %81 : vector<16x16xf32>
    %83 = vector.extract_strided_slice %0 {offsets = [3, 2], sizes = [1, 1], strides = [1, 1]} : vector<8x4xf32> to vector<1x1xf32>
    %c0_58 = arith.constant 0 : index
    %c2_59 = arith.constant 2 : index
    %c0_60 = arith.constant 0 : index
    %c0_61 = arith.constant 0 : index
    %84 = vector.load %arg1[%c0_58, %c2_59, %c0_60, %c0_61] : memref<2x4x16x16xf32, #tpu.memory_space<vmem>>, vector<1x1x16x16xf32>
    %85 = vector.shape_cast %84 : vector<1x1x16x16xf32> to vector<16x16xf32>
    %86 = vector.broadcast %83 : vector<1x1xf32> to vector<16x16xf32>
    %87 = arith.mulf %86, %85 : vector<16x16xf32>
    %88 = arith.addf %82, %87 : vector<16x16xf32>
    %89 = vector.extract_strided_slice %0 {offsets = [3, 3], sizes = [1, 1], strides = [1, 1]} : vector<8x4xf32> to vector<1x1xf32>
    %c0_62 = arith.constant 0 : index
    %c3_63 = arith.constant 3 : index
    %c0_64 = arith.constant 0 : index
    %c0_65 = arith.constant 0 : index
    %90 = vector.load %arg1[%c0_62, %c3_63, %c0_64, %c0_65] : memref<2x4x16x16xf32, #tpu.memory_space<vmem>>, vector<1x1x16x16xf32>
    %91 = vector.shape_cast %90 : vector<1x1x16x16xf32> to vector<16x16xf32>
    %92 = vector.broadcast %89 : vector<1x1xf32> to vector<16x16xf32>
    %93 = arith.mulf %92, %91 : vector<16x16xf32>
    %94 = arith.addf %88, %93 : vector<16x16xf32>
    %95 = vector.extract_strided_slice %0 {offsets = [4, 0], sizes = [1, 1], strides = [1, 1]} : vector<8x4xf32> to vector<1x1xf32>
    %c0_66 = arith.constant 0 : index
    %c0_67 = arith.constant 0 : index
    %c0_68 = arith.constant 0 : index
    %c0_69 = arith.constant 0 : index
    %96 = vector.load %arg1[%c0_66, %c0_67, %c0_68, %c0_69] : memref<2x4x16x16xf32, #tpu.memory_space<vmem>>, vector<1x1x16x16xf32>
    %97 = vector.shape_cast %96 : vector<1x1x16x16xf32> to vector<16x16xf32>
    %98 = vector.broadcast %95 : vector<1x1xf32> to vector<16x16xf32>
    %99 = arith.mulf %98, %97 : vector<16x16xf32>
    %100 = vector.extract_strided_slice %0 {offsets = [4, 1], sizes = [1, 1], strides = [1, 1]} : vector<8x4xf32> to vector<1x1xf32>
    %c0_70 = arith.constant 0 : index
    %c1_71 = arith.constant 1 : index
    %c0_72 = arith.constant 0 : index
    %c0_73 = arith.constant 0 : index
    %101 = vector.load %arg1[%c0_70, %c1_71, %c0_72, %c0_73] : memref<2x4x16x16xf32, #tpu.memory_space<vmem>>, vector<1x1x16x16xf32>
    %102 = vector.shape_cast %101 : vector<1x1x16x16xf32> to vector<16x16xf32>
    %103 = vector.broadcast %100 : vector<1x1xf32> to vector<16x16xf32>
    %104 = arith.mulf %103, %102 : vector<16x16xf32>
    %105 = arith.addf %99, %104 : vector<16x16xf32>
    %106 = vector.extract_strided_slice %0 {offsets = [4, 2], sizes = [1, 1], strides = [1, 1]} : vector<8x4xf32> to vector<1x1xf32>
    %c0_74 = arith.constant 0 : index
    %c2_75 = arith.constant 2 : index
    %c0_76 = arith.constant 0 : index
    %c0_77 = arith.constant 0 : index
    %107 = vector.load %arg1[%c0_74, %c2_75, %c0_76, %c0_77] : memref<2x4x16x16xf32, #tpu.memory_space<vmem>>, vector<1x1x16x16xf32>
    %108 = vector.shape_cast %107 : vector<1x1x16x16xf32> to vector<16x16xf32>
    %109 = vector.broadcast %106 : vector<1x1xf32> to vector<16x16xf32>
    %110 = arith.mulf %109, %108 : vector<16x16xf32>
    %111 = arith.addf %105, %110 : vector<16x16xf32>
    %112 = vector.extract_strided_slice %0 {offsets = [4, 3], sizes = [1, 1], strides = [1, 1]} : vector<8x4xf32> to vector<1x1xf32>
    %c0_78 = arith.constant 0 : index
    %c3_79 = arith.constant 3 : index
    %c0_80 = arith.constant 0 : index
    %c0_81 = arith.constant 0 : index
    %113 = vector.load %arg1[%c0_78, %c3_79, %c0_80, %c0_81] : memref<2x4x16x16xf32, #tpu.memory_space<vmem>>, vector<1x1x16x16xf32>
    %114 = vector.shape_cast %113 : vector<1x1x16x16xf32> to vector<16x16xf32>
    %115 = vector.broadcast %112 : vector<1x1xf32> to vector<16x16xf32>
    %116 = arith.mulf %115, %114 : vector<16x16xf32>
    %117 = arith.addf %111, %116 : vector<16x16xf32>
    %118 = vector.extract_strided_slice %0 {offsets = [5, 0], sizes = [1, 1], strides = [1, 1]} : vector<8x4xf32> to vector<1x1xf32>
    %c0_82 = arith.constant 0 : index
    %c0_83 = arith.constant 0 : index
    %c0_84 = arith.constant 0 : index
    %c0_85 = arith.constant 0 : index
    %119 = vector.load %arg1[%c0_82, %c0_83, %c0_84, %c0_85] : memref<2x4x16x16xf32, #tpu.memory_space<vmem>>, vector<1x1x16x16xf32>
    %120 = vector.shape_cast %119 : vector<1x1x16x16xf32> to vector<16x16xf32>
    %121 = vector.broadcast %118 : vector<1x1xf32> to vector<16x16xf32>
    %122 = arith.mulf %121, %120 : vector<16x16xf32>
    %123 = vector.extract_strided_slice %0 {offsets = [5, 1], sizes = [1, 1], strides = [1, 1]} : vector<8x4xf32> to vector<1x1xf32>
    %c0_86 = arith.constant 0 : index
    %c1_87 = arith.constant 1 : index
    %c0_88 = arith.constant 0 : index
    %c0_89 = arith.constant 0 : index
    %124 = vector.load %arg1[%c0_86, %c1_87, %c0_88, %c0_89] : memref<2x4x16x16xf32, #tpu.memory_space<vmem>>, vector<1x1x16x16xf32>
    %125 = vector.shape_cast %124 : vector<1x1x16x16xf32> to vector<16x16xf32>
    %126 = vector.broadcast %123 : vector<1x1xf32> to vector<16x16xf32>
    %127 = arith.mulf %126, %125 : vector<16x16xf32>
    %128 = arith.addf %122, %127 : vector<16x16xf32>
    %129 = vector.extract_strided_slice %0 {offsets = [5, 2], sizes = [1, 1], strides = [1, 1]} : vector<8x4xf32> to vector<1x1xf32>
    %c0_90 = arith.constant 0 : index
    %c2_91 = arith.constant 2 : index
    %c0_92 = arith.constant 0 : index
    %c0_93 = arith.constant 0 : index
    %130 = vector.load %arg1[%c0_90, %c2_91, %c0_92, %c0_93] : memref<2x4x16x16xf32, #tpu.memory_space<vmem>>, vector<1x1x16x16xf32>
    %131 = vector.shape_cast %130 : vector<1x1x16x16xf32> to vector<16x16xf32>
    %132 = vector.broadcast %129 : vector<1x1xf32> to vector<16x16xf32>
    %133 = arith.mulf %132, %131 : vector<16x16xf32>
    %134 = arith.addf %128, %133 : vector<16x16xf32>
    %135 = vector.extract_strided_slice %0 {offsets = [5, 3], sizes = [1, 1], strides = [1, 1]} : vector<8x4xf32> to vector<1x1xf32>
    %c0_94 = arith.constant 0 : index
    %c3_95 = arith.constant 3 : index
    %c0_96 = arith.constant 0 : index
    %c0_97 = arith.constant 0 : index
    %136 = vector.load %arg1[%c0_94, %c3_95, %c0_96, %c0_97] : memref<2x4x16x16xf32, #tpu.memory_space<vmem>>, vector<1x1x16x16xf32>
    %137 = vector.shape_cast %136 : vector<1x1x16x16xf32> to vector<16x16xf32>
    %138 = vector.broadcast %135 : vector<1x1xf32> to vector<16x16xf32>
    %139 = arith.mulf %138, %137 : vector<16x16xf32>
    %140 = arith.addf %134, %139 : vector<16x16xf32>
    %141 = vector.extract_strided_slice %0 {offsets = [6, 0], sizes = [1, 1], strides = [1, 1]} : vector<8x4xf32> to vector<1x1xf32>
    %c0_98 = arith.constant 0 : index
    %c0_99 = arith.constant 0 : index
    %c0_100 = arith.constant 0 : index
    %c0_101 = arith.constant 0 : index
    %142 = vector.load %arg1[%c0_98, %c0_99, %c0_100, %c0_101] : memref<2x4x16x16xf32, #tpu.memory_space<vmem>>, vector<1x1x16x16xf32>
    %143 = vector.shape_cast %142 : vector<1x1x16x16xf32> to vector<16x16xf32>
    %144 = vector.broadcast %141 : vector<1x1xf32> to vector<16x16xf32>
    %145 = arith.mulf %144, %143 : vector<16x16xf32>
    %146 = vector.extract_strided_slice %0 {offsets = [6, 1], sizes = [1, 1], strides = [1, 1]} : vector<8x4xf32> to vector<1x1xf32>
    %c0_102 = arith.constant 0 : index
    %c1_103 = arith.constant 1 : index
    %c0_104 = arith.constant 0 : index
    %c0_105 = arith.constant 0 : index
    %147 = vector.load %arg1[%c0_102, %c1_103, %c0_104, %c0_105] : memref<2x4x16x16xf32, #tpu.memory_space<vmem>>, vector<1x1x16x16xf32>
    %148 = vector.shape_cast %147 : vector<1x1x16x16xf32> to vector<16x16xf32>
    %149 = vector.broadcast %146 : vector<1x1xf32> to vector<16x16xf32>
    %150 = arith.mulf %149, %148 : vector<16x16xf32>
    %151 = arith.addf %145, %150 : vector<16x16xf32>
    %152 = vector.extract_strided_slice %0 {offsets = [6, 2], sizes = [1, 1], strides = [1, 1]} : vector<8x4xf32> to vector<1x1xf32>
    %c0_106 = arith.constant 0 : index
    %c2_107 = arith.constant 2 : index
    %c0_108 = arith.constant 0 : index
    %c0_109 = arith.constant 0 : index
    %153 = vector.load %arg1[%c0_106, %c2_107, %c0_108, %c0_109] : memref<2x4x16x16xf32, #tpu.memory_space<vmem>>, vector<1x1x16x16xf32>
    %154 = vector.shape_cast %153 : vector<1x1x16x16xf32> to vector<16x16xf32>
    %155 = vector.broadcast %152 : vector<1x1xf32> to vector<16x16xf32>
    %156 = arith.mulf %155, %154 : vector<16x16xf32>
    %157 = arith.addf %151, %156 : vector<16x16xf32>
    %158 = vector.extract_strided_slice %0 {offsets = [6, 3], sizes = [1, 1], strides = [1, 1]} : vector<8x4xf32> to vector<1x1xf32>
    %c0_110 = arith.constant 0 : index
    %c3_111 = arith.constant 3 : index
    %c0_112 = arith.constant 0 : index
    %c0_113 = arith.constant 0 : index
    %159 = vector.load %arg1[%c0_110, %c3_111, %c0_112, %c0_113] : memref<2x4x16x16xf32, #tpu.memory_space<vmem>>, vector<1x1x16x16xf32>
    %160 = vector.shape_cast %159 : vector<1x1x16x16xf32> to vector<16x16xf32>
    %161 = vector.broadcast %158 : vector<1x1xf32> to vector<16x16xf32>
    %162 = arith.mulf %161, %160 : vector<16x16xf32>
    %163 = arith.addf %157, %162 : vector<16x16xf32>
    %164 = vector.extract_strided_slice %0 {offsets = [7, 0], sizes = [1, 1], strides = [1, 1]} : vector<8x4xf32> to vector<1x1xf32>
    %c0_114 = arith.constant 0 : index
    %c0_115 = arith.constant 0 : index
    %c0_116 = arith.constant 0 : index
    %c0_117 = arith.constant 0 : index
    %165 = vector.load %arg1[%c0_114, %c0_115, %c0_116, %c0_117] : memref<2x4x16x16xf32, #tpu.memory_space<vmem>>, vector<1x1x16x16xf32>
    %166 = vector.shape_cast %165 : vector<1x1x16x16xf32> to vector<16x16xf32>
    %167 = vector.broadcast %164 : vector<1x1xf32> to vector<16x16xf32>
    %168 = arith.mulf %167, %166 : vector<16x16xf32>
    %169 = vector.extract_strided_slice %0 {offsets = [7, 1], sizes = [1, 1], strides = [1, 1]} : vector<8x4xf32> to vector<1x1xf32>
    %c0_118 = arith.constant 0 : index
    %c1_119 = arith.constant 1 : index
    %c0_120 = arith.constant 0 : index
    %c0_121 = arith.constant 0 : index
    %170 = vector.load %arg1[%c0_118, %c1_119, %c0_120, %c0_121] : memref<2x4x16x16xf32, #tpu.memory_space<vmem>>, vector<1x1x16x16xf32>
    %171 = vector.shape_cast %170 : vector<1x1x16x16xf32> to vector<16x16xf32>
    %172 = vector.broadcast %169 : vector<1x1xf32> to vector<16x16xf32>
    %173 = arith.mulf %172, %171 : vector<16x16xf32>
    %174 = arith.addf %168, %173 : vector<16x16xf32>
    %175 = vector.extract_strided_slice %0 {offsets = [7, 2], sizes = [1, 1], strides = [1, 1]} : vector<8x4xf32> to vector<1x1xf32>
    %c0_122 = arith.constant 0 : index
    %c2_123 = arith.constant 2 : index
    %c0_124 = arith.constant 0 : index
    %c0_125 = arith.constant 0 : index
    %176 = vector.load %arg1[%c0_122, %c2_123, %c0_124, %c0_125] : memref<2x4x16x16xf32, #tpu.memory_space<vmem>>, vector<1x1x16x16xf32>
    %177 = vector.shape_cast %176 : vector<1x1x16x16xf32> to vector<16x16xf32>
    %178 = vector.broadcast %175 : vector<1x1xf32> to vector<16x16xf32>
    %179 = arith.mulf %178, %177 : vector<16x16xf32>
    %180 = arith.addf %174, %179 : vector<16x16xf32>
    %181 = vector.extract_strided_slice %0 {offsets = [7, 3], sizes = [1, 1], strides = [1, 1]} : vector<8x4xf32> to vector<1x1xf32>
    %c0_126 = arith.constant 0 : index
    %c3_127 = arith.constant 3 : index
    %c0_128 = arith.constant 0 : index
    %c0_129 = arith.constant 0 : index
    %182 = vector.load %arg1[%c0_126, %c3_127, %c0_128, %c0_129] : memref<2x4x16x16xf32, #tpu.memory_space<vmem>>, vector<1x1x16x16xf32>
    %183 = vector.shape_cast %182 : vector<1x1x16x16xf32> to vector<16x16xf32>
    %184 = vector.broadcast %181 : vector<1x1xf32> to vector<16x16xf32>
    %185 = arith.mulf %184, %183 : vector<16x16xf32>
    %186 = arith.addf %180, %185 : vector<16x16xf32>
    %187 = tpu.concatenate %25, %48, %71, %94, %117, %140, %163, %186 in 0 : vector<16x16xf32>, vector<16x16xf32>, vector<16x16xf32>, vector<16x16xf32>, vector<16x16xf32>, vector<16x16xf32>, vector<16x16xf32>, vector<16x16xf32> -> vector<128x16xf32>
    %188 = vector.broadcast %1 : vector<128x1xf32> to vector<128x16xf32>
    %189 = arith.addf %187, %188 : vector<128x16xf32>
    %cst = arith.constant 0.000000e+00 : f32
    %190 = vector.broadcast %cst : f32 to vector<128x16xf32>
    %191 = arith.maximumf %189, %190 : vector<128x16xf32>
    %192 = arith.truncf %191 : vector<128x16xf32> to vector<128x16xbf16>
    %cst_130 = arith.constant dense<0.000000e+00> : vector<768x16xf32>
    %193 = tpu.matmul %2, %192, %cst_130 {dimension_numbers = #tpu.dot_dimension_numbers<[1], [0], [0], [1], [0, 0, 1, 1], [], []>} : vector<768x128xbf16>, vector<128x16xbf16>, vector<768x16xf32> -> vector<768x16xf32>
    %194 = vector.extract_strided_slice %193 {offsets = [0, 0], sizes = [256, 16], strides = [1, 1]} : vector<768x16xf32> to vector<256x16xf32>
    %c0_131 = arith.constant 0 : index
    %c0_132 = arith.constant 0 : index
    %c0_133 = arith.constant 0 : index
    %195 = vector.load %arg5[%c0_131, %c0_132, %c0_133] : memref<3x16x32xf32, #tpu.memory_space<vmem>>, vector<1x16x32xf32>
    %196 = vector.shape_cast %195 : vector<1x16x32xf32> to vector<16x32xf32>
    %cst_134 = arith.constant dense<0.000000e+00> : vector<256x32xf32>
    %197 = tpu.matmul %194, %196, %cst_134 {dimension_numbers = #tpu.dot_dimension_numbers<[1], [0], [0], [1], [0, 0, 1, 1], [], []>} : vector<256x16xf32>, vector<16x32xf32>, vector<256x32xf32> -> vector<256x32xf32>
    %198 = vector.extract_strided_slice %193 {offsets = [256, 0], sizes = [256, 16], strides = [1, 1]} : vector<768x16xf32> to vector<256x16xf32>
    %c1_135 = arith.constant 1 : index
    %c0_136 = arith.constant 0 : index
    %c0_137 = arith.constant 0 : index
    %199 = vector.load %arg5[%c1_135, %c0_136, %c0_137] : memref<3x16x32xf32, #tpu.memory_space<vmem>>, vector<1x16x32xf32>
    %200 = vector.shape_cast %199 : vector<1x16x32xf32> to vector<16x32xf32>
    %cst_138 = arith.constant dense<0.000000e+00> : vector<256x32xf32>
    %201 = tpu.matmul %198, %200, %cst_138 {dimension_numbers = #tpu.dot_dimension_numbers<[1], [0], [0], [1], [0, 0, 1, 1], [], []>} : vector<256x16xf32>, vector<16x32xf32>, vector<256x32xf32> -> vector<256x32xf32>
    %202 = arith.addf %197, %201 : vector<256x32xf32>
    %203 = vector.extract_strided_slice %193 {offsets = [512, 0], sizes = [256, 16], strides = [1, 1]} : vector<768x16xf32> to vector<256x16xf32>
    %c2_139 = arith.constant 2 : index
    %c0_140 = arith.constant 0 : index
    %c0_141 = arith.constant 0 : index
    %204 = vector.load %arg5[%c2_139, %c0_140, %c0_141] : memref<3x16x32xf32, #tpu.memory_space<vmem>>, vector<1x16x32xf32>
    %205 = vector.shape_cast %204 : vector<1x16x32xf32> to vector<16x32xf32>
    %cst_142 = arith.constant dense<0.000000e+00> : vector<256x32xf32>
    %206 = tpu.matmul %203, %205, %cst_142 {dimension_numbers = #tpu.dot_dimension_numbers<[1], [0], [0], [1], [0, 0, 1, 1], [], []>} : vector<256x16xf32>, vector<16x32xf32>, vector<256x32xf32> -> vector<256x32xf32>
    %207 = arith.addf %202, %206 : vector<256x32xf32>
    %c0_143 = arith.constant 0 : index
    %c0_144 = arith.constant 0 : index
    %c0_145 = arith.constant 0 : index
    %208 = vector.load %arg6[%c0_143, %c0_144, %c0_145] : memref<2x256x32xf32, #tpu.memory_space<vmem>>, vector<1x256x32xf32>
    %209 = vector.shape_cast %208 : vector<1x256x32xf32> to vector<256x32xf32>
    %210 = vector.shape_cast %207 : vector<256x32xf32> to vector<1x256x32xf32>
    tpu.vector_store %arg6[%c0_143, %c0_144, %c0_145], %210 {strides = array<i32>} : memref<2x256x32xf32, #tpu.memory_space<vmem>>, vector<1x256x32xf32>,
    %211 = vector.extract_strided_slice %0 {offsets = [0, 0], sizes = [1, 1], strides = [1, 1]} : vector<8x4xf32> to vector<1x1xf32>
    %c1_146 = arith.constant 1 : index
    %c0_147 = arith.constant 0 : index
    %c0_148 = arith.constant 0 : index
    %c0_149 = arith.constant 0 : index
    %212 = vector.load %arg1[%c1_146, %c0_147, %c0_148, %c0_149] : memref<2x4x16x16xf32, #tpu.memory_space<vmem>>, vector<1x1x16x16xf32>
    %213 = vector.shape_cast %212 : vector<1x1x16x16xf32> to vector<16x16xf32>
    %214 = vector.broadcast %211 : vector<1x1xf32> to vector<16x16xf32>
    %215 = arith.mulf %214, %213 : vector<16x16xf32>
    %216 = vector.extract_strided_slice %0 {offsets = [0, 1], sizes = [1, 1], strides = [1, 1]} : vector<8x4xf32> to vector<1x1xf32>
    %c1_150 = arith.constant 1 : index
    %c1_151 = arith.constant 1 : index
    %c0_152 = arith.constant 0 : index
    %c0_153 = arith.constant 0 : index
    %217 = vector.load %arg1[%c1_150, %c1_151, %c0_152, %c0_153] : memref<2x4x16x16xf32, #tpu.memory_space<vmem>>, vector<1x1x16x16xf32>
    %218 = vector.shape_cast %217 : vector<1x1x16x16xf32> to vector<16x16xf32>
    %219 = vector.broadcast %216 : vector<1x1xf32> to vector<16x16xf32>
    %220 = arith.mulf %219, %218 : vector<16x16xf32>
    %221 = arith.addf %215, %220 : vector<16x16xf32>
    %222 = vector.extract_strided_slice %0 {offsets = [0, 2], sizes = [1, 1], strides = [1, 1]} : vector<8x4xf32> to vector<1x1xf32>
    %c1_154 = arith.constant 1 : index
    %c2_155 = arith.constant 2 : index
    %c0_156 = arith.constant 0 : index
    %c0_157 = arith.constant 0 : index
    %223 = vector.load %arg1[%c1_154, %c2_155, %c0_156, %c0_157] : memref<2x4x16x16xf32, #tpu.memory_space<vmem>>, vector<1x1x16x16xf32>
    %224 = vector.shape_cast %223 : vector<1x1x16x16xf32> to vector<16x16xf32>
    %225 = vector.broadcast %222 : vector<1x1xf32> to vector<16x16xf32>
    %226 = arith.mulf %225, %224 : vector<16x16xf32>
    %227 = arith.addf %221, %226 : vector<16x16xf32>
    %228 = vector.extract_strided_slice %0 {offsets = [0, 3], sizes = [1, 1], strides = [1, 1]} : vector<8x4xf32> to vector<1x1xf32>
    %c1_158 = arith.constant 1 : index
    %c3_159 = arith.constant 3 : index
    %c0_160 = arith.constant 0 : index
    %c0_161 = arith.constant 0 : index
    %229 = vector.load %arg1[%c1_158, %c3_159, %c0_160, %c0_161] : memref<2x4x16x16xf32, #tpu.memory_space<vmem>>, vector<1x1x16x16xf32>
    %230 = vector.shape_cast %229 : vector<1x1x16x16xf32> to vector<16x16xf32>
    %231 = vector.broadcast %228 : vector<1x1xf32> to vector<16x16xf32>
    %232 = arith.mulf %231, %230 : vector<16x16xf32>
    %233 = arith.addf %227, %232 : vector<16x16xf32>
    %234 = vector.extract_strided_slice %0 {offsets = [1, 0], sizes = [1, 1], strides = [1, 1]} : vector<8x4xf32> to vector<1x1xf32>
    %c1_162 = arith.constant 1 : index
    %c0_163 = arith.constant 0 : index
    %c0_164 = arith.constant 0 : index
    %c0_165 = arith.constant 0 : index
    %235 = vector.load %arg1[%c1_162, %c0_163, %c0_164, %c0_165] : memref<2x4x16x16xf32, #tpu.memory_space<vmem>>, vector<1x1x16x16xf32>
    %236 = vector.shape_cast %235 : vector<1x1x16x16xf32> to vector<16x16xf32>
    %237 = vector.broadcast %234 : vector<1x1xf32> to vector<16x16xf32>
    %238 = arith.mulf %237, %236 : vector<16x16xf32>
    %239 = vector.extract_strided_slice %0 {offsets = [1, 1], sizes = [1, 1], strides = [1, 1]} : vector<8x4xf32> to vector<1x1xf32>
    %c1_166 = arith.constant 1 : index
    %c1_167 = arith.constant 1 : index
    %c0_168 = arith.constant 0 : index
    %c0_169 = arith.constant 0 : index
    %240 = vector.load %arg1[%c1_166, %c1_167, %c0_168, %c0_169] : memref<2x4x16x16xf32, #tpu.memory_space<vmem>>, vector<1x1x16x16xf32>
    %241 = vector.shape_cast %240 : vector<1x1x16x16xf32> to vector<16x16xf32>
    %242 = vector.broadcast %239 : vector<1x1xf32> to vector<16x16xf32>
    %243 = arith.mulf %242, %241 : vector<16x16xf32>
    %244 = arith.addf %238, %243 : vector<16x16xf32>
    %245 = vector.extract_strided_slice %0 {offsets = [1, 2], sizes = [1, 1], strides = [1, 1]} : vector<8x4xf32> to vector<1x1xf32>
    %c1_170 = arith.constant 1 : index
    %c2_171 = arith.constant 2 : index
    %c0_172 = arith.constant 0 : index
    %c0_173 = arith.constant 0 : index
    %246 = vector.load %arg1[%c1_170, %c2_171, %c0_172, %c0_173] : memref<2x4x16x16xf32, #tpu.memory_space<vmem>>, vector<1x1x16x16xf32>
    %247 = vector.shape_cast %246 : vector<1x1x16x16xf32> to vector<16x16xf32>
    %248 = vector.broadcast %245 : vector<1x1xf32> to vector<16x16xf32>
    %249 = arith.mulf %248, %247 : vector<16x16xf32>
    %250 = arith.addf %244, %249 : vector<16x16xf32>
    %251 = vector.extract_strided_slice %0 {offsets = [1, 3], sizes = [1, 1], strides = [1, 1]} : vector<8x4xf32> to vector<1x1xf32>
    %c1_174 = arith.constant 1 : index
    %c3_175 = arith.constant 3 : index
    %c0_176 = arith.constant 0 : index
    %c0_177 = arith.constant 0 : index
    %252 = vector.load %arg1[%c1_174, %c3_175, %c0_176, %c0_177] : memref<2x4x16x16xf32, #tpu.memory_space<vmem>>, vector<1x1x16x16xf32>
    %253 = vector.shape_cast %252 : vector<1x1x16x16xf32> to vector<16x16xf32>
    %254 = vector.broadcast %251 : vector<1x1xf32> to vector<16x16xf32>
    %255 = arith.mulf %254, %253 : vector<16x16xf32>
    %256 = arith.addf %250, %255 : vector<16x16xf32>
    %257 = vector.extract_strided_slice %0 {offsets = [2, 0], sizes = [1, 1], strides = [1, 1]} : vector<8x4xf32> to vector<1x1xf32>
    %c1_178 = arith.constant 1 : index
    %c0_179 = arith.constant 0 : index
    %c0_180 = arith.constant 0 : index
    %c0_181 = arith.constant 0 : index
    %258 = vector.load %arg1[%c1_178, %c0_179, %c0_180, %c0_181] : memref<2x4x16x16xf32, #tpu.memory_space<vmem>>, vector<1x1x16x16xf32>
    %259 = vector.shape_cast %258 : vector<1x1x16x16xf32> to vector<16x16xf32>
    %260 = vector.broadcast %257 : vector<1x1xf32> to vector<16x16xf32>
    %261 = arith.mulf %260, %259 : vector<16x16xf32>
    %262 = vector.extract_strided_slice %0 {offsets = [2, 1], sizes = [1, 1], strides = [1, 1]} : vector<8x4xf32> to vector<1x1xf32>
    %c1_182 = arith.constant 1 : index
    %c1_183 = arith.constant 1 : index
    %c0_184 = arith.constant 0 : index
    %c0_185 = arith.constant 0 : index
    %263 = vector.load %arg1[%c1_182, %c1_183, %c0_184, %c0_185] : memref<2x4x16x16xf32, #tpu.memory_space<vmem>>, vector<1x1x16x16xf32>
    %264 = vector.shape_cast %263 : vector<1x1x16x16xf32> to vector<16x16xf32>
    %265 = vector.broadcast %262 : vector<1x1xf32> to vector<16x16xf32>
    %266 = arith.mulf %265, %264 : vector<16x16xf32>
    %267 = arith.addf %261, %266 : vector<16x16xf32>
    %268 = vector.extract_strided_slice %0 {offsets = [2, 2], sizes = [1, 1], strides = [1, 1]} : vector<8x4xf32> to vector<1x1xf32>
    %c1_186 = arith.constant 1 : index
    %c2_187 = arith.constant 2 : index
    %c0_188 = arith.constant 0 : index
    %c0_189 = arith.constant 0 : index
    %269 = vector.load %arg1[%c1_186, %c2_187, %c0_188, %c0_189] : memref<2x4x16x16xf32, #tpu.memory_space<vmem>>, vector<1x1x16x16xf32>
    %270 = vector.shape_cast %269 : vector<1x1x16x16xf32> to vector<16x16xf32>
    %271 = vector.broadcast %268 : vector<1x1xf32> to vector<16x16xf32>
    %272 = arith.mulf %271, %270 : vector<16x16xf32>
    %273 = arith.addf %267, %272 : vector<16x16xf32>
    %274 = vector.extract_strided_slice %0 {offsets = [2, 3], sizes = [1, 1], strides = [1, 1]} : vector<8x4xf32> to vector<1x1xf32>
    %c1_190 = arith.constant 1 : index
    %c3_191 = arith.constant 3 : index
    %c0_192 = arith.constant 0 : index
    %c0_193 = arith.constant 0 : index
    %275 = vector.load %arg1[%c1_190, %c3_191, %c0_192, %c0_193] : memref<2x4x16x16xf32, #tpu.memory_space<vmem>>, vector<1x1x16x16xf32>
    %276 = vector.shape_cast %275 : vector<1x1x16x16xf32> to vector<16x16xf32>
    %277 = vector.broadcast %274 : vector<1x1xf32> to vector<16x16xf32>
    %278 = arith.mulf %277, %276 : vector<16x16xf32>
    %279 = arith.addf %273, %278 : vector<16x16xf32>
    %280 = vector.extract_strided_slice %0 {offsets = [3, 0], sizes = [1, 1], strides = [1, 1]} : vector<8x4xf32> to vector<1x1xf32>
    %c1_194 = arith.constant 1 : index
    %c0_195 = arith.constant 0 : index
    %c0_196 = arith.constant 0 : index
    %c0_197 = arith.constant 0 : index
    %281 = vector.load %arg1[%c1_194, %c0_195, %c0_196, %c0_197] : memref<2x4x16x16xf32, #tpu.memory_space<vmem>>, vector<1x1x16x16xf32>
    %282 = vector.shape_cast %281 : vector<1x1x16x16xf32> to vector<16x16xf32>
    %283 = vector.broadcast %280 : vector<1x1xf32> to vector<16x16xf32>
    %284 = arith.mulf %283, %282 : vector<16x16xf32>
    %285 = vector.extract_strided_slice %0 {offsets = [3, 1], sizes = [1, 1], strides = [1, 1]} : vector<8x4xf32> to vector<1x1xf32>
    %c1_198 = arith.constant 1 : index
    %c1_199 = arith.constant 1 : index
    %c0_200 = arith.constant 0 : index
    %c0_201 = arith.constant 0 : index
    %286 = vector.load %arg1[%c1_198, %c1_199, %c0_200, %c0_201] : memref<2x4x16x16xf32, #tpu.memory_space<vmem>>, vector<1x1x16x16xf32>
    %287 = vector.shape_cast %286 : vector<1x1x16x16xf32> to vector<16x16xf32>
    %288 = vector.broadcast %285 : vector<1x1xf32> to vector<16x16xf32>
    %289 = arith.mulf %288, %287 : vector<16x16xf32>
    %290 = arith.addf %284, %289 : vector<16x16xf32>
    %291 = vector.extract_strided_slice %0 {offsets = [3, 2], sizes = [1, 1], strides = [1, 1]} : vector<8x4xf32> to vector<1x1xf32>
    %c1_202 = arith.constant 1 : index
    %c2_203 = arith.constant 2 : index
    %c0_204 = arith.constant 0 : index
    %c0_205 = arith.constant 0 : index
    %292 = vector.load %arg1[%c1_202, %c2_203, %c0_204, %c0_205] : memref<2x4x16x16xf32, #tpu.memory_space<vmem>>, vector<1x1x16x16xf32>
    %293 = vector.shape_cast %292 : vector<1x1x16x16xf32> to vector<16x16xf32>
    %294 = vector.broadcast %291 : vector<1x1xf32> to vector<16x16xf32>
    %295 = arith.mulf %294, %293 : vector<16x16xf32>
    %296 = arith.addf %290, %295 : vector<16x16xf32>
    %297 = vector.extract_strided_slice %0 {offsets = [3, 3], sizes = [1, 1], strides = [1, 1]} : vector<8x4xf32> to vector<1x1xf32>
    %c1_206 = arith.constant 1 : index
    %c3_207 = arith.constant 3 : index
    %c0_208 = arith.constant 0 : index
    %c0_209 = arith.constant 0 : index
    %298 = vector.load %arg1[%c1_206, %c3_207, %c0_208, %c0_209] : memref<2x4x16x16xf32, #tpu.memory_space<vmem>>, vector<1x1x16x16xf32>
    %299 = vector.shape_cast %298 : vector<1x1x16x16xf32> to vector<16x16xf32>
    %300 = vector.broadcast %297 : vector<1x1xf32> to vector<16x16xf32>
    %301 = arith.mulf %300, %299 : vector<16x16xf32>
    %302 = arith.addf %296, %301 : vector<16x16xf32>
    %303 = vector.extract_strided_slice %0 {offsets = [4, 0], sizes = [1, 1], strides = [1, 1]} : vector<8x4xf32> to vector<1x1xf32>
    %c1_210 = arith.constant 1 : index
    %c0_211 = arith.constant 0 : index
    %c0_212 = arith.constant 0 : index
    %c0_213 = arith.constant 0 : index
    %304 = vector.load %arg1[%c1_210, %c0_211, %c0_212, %c0_213] : memref<2x4x16x16xf32, #tpu.memory_space<vmem>>, vector<1x1x16x16xf32>
    %305 = vector.shape_cast %304 : vector<1x1x16x16xf32> to vector<16x16xf32>
    %306 = vector.broadcast %303 : vector<1x1xf32> to vector<16x16xf32>
    %307 = arith.mulf %306, %305 : vector<16x16xf32>
    %308 = vector.extract_strided_slice %0 {offsets = [4, 1], sizes = [1, 1], strides = [1, 1]} : vector<8x4xf32> to vector<1x1xf32>
    %c1_214 = arith.constant 1 : index
    %c1_215 = arith.constant 1 : index
    %c0_216 = arith.constant 0 : index
    %c0_217 = arith.constant 0 : index
    %309 = vector.load %arg1[%c1_214, %c1_215, %c0_216, %c0_217] : memref<2x4x16x16xf32, #tpu.memory_space<vmem>>, vector<1x1x16x16xf32>
    %310 = vector.shape_cast %309 : vector<1x1x16x16xf32> to vector<16x16xf32>
    %311 = vector.broadcast %308 : vector<1x1xf32> to vector<16x16xf32>
    %312 = arith.mulf %311, %310 : vector<16x16xf32>
    %313 = arith.addf %307, %312 : vector<16x16xf32>
    %314 = vector.extract_strided_slice %0 {offsets = [4, 2], sizes = [1, 1], strides = [1, 1]} : vector<8x4xf32> to vector<1x1xf32>
    %c1_218 = arith.constant 1 : index
    %c2_219 = arith.constant 2 : index
    %c0_220 = arith.constant 0 : index
    %c0_221 = arith.constant 0 : index
    %315 = vector.load %arg1[%c1_218, %c2_219, %c0_220, %c0_221] : memref<2x4x16x16xf32, #tpu.memory_space<vmem>>, vector<1x1x16x16xf32>
    %316 = vector.shape_cast %315 : vector<1x1x16x16xf32> to vector<16x16xf32>
    %317 = vector.broadcast %314 : vector<1x1xf32> to vector<16x16xf32>
    %318 = arith.mulf %317, %316 : vector<16x16xf32>
    %319 = arith.addf %313, %318 : vector<16x16xf32>
    %320 = vector.extract_strided_slice %0 {offsets = [4, 3], sizes = [1, 1], strides = [1, 1]} : vector<8x4xf32> to vector<1x1xf32>
    %c1_222 = arith.constant 1 : index
    %c3_223 = arith.constant 3 : index
    %c0_224 = arith.constant 0 : index
    %c0_225 = arith.constant 0 : index
    %321 = vector.load %arg1[%c1_222, %c3_223, %c0_224, %c0_225] : memref<2x4x16x16xf32, #tpu.memory_space<vmem>>, vector<1x1x16x16xf32>
    %322 = vector.shape_cast %321 : vector<1x1x16x16xf32> to vector<16x16xf32>
    %323 = vector.broadcast %320 : vector<1x1xf32> to vector<16x16xf32>
    %324 = arith.mulf %323, %322 : vector<16x16xf32>
    %325 = arith.addf %319, %324 : vector<16x16xf32>
    %326 = vector.extract_strided_slice %0 {offsets = [5, 0], sizes = [1, 1], strides = [1, 1]} : vector<8x4xf32> to vector<1x1xf32>
    %c1_226 = arith.constant 1 : index
    %c0_227 = arith.constant 0 : index
    %c0_228 = arith.constant 0 : index
    %c0_229 = arith.constant 0 : index
    %327 = vector.load %arg1[%c1_226, %c0_227, %c0_228, %c0_229] : memref<2x4x16x16xf32, #tpu.memory_space<vmem>>, vector<1x1x16x16xf32>
    %328 = vector.shape_cast %327 : vector<1x1x16x16xf32> to vector<16x16xf32>
    %329 = vector.broadcast %326 : vector<1x1xf32> to vector<16x16xf32>
    %330 = arith.mulf %329, %328 : vector<16x16xf32>
    %331 = vector.extract_strided_slice %0 {offsets = [5, 1], sizes = [1, 1], strides = [1, 1]} : vector<8x4xf32> to vector<1x1xf32>
    %c1_230 = arith.constant 1 : index
    %c1_231 = arith.constant 1 : index
    %c0_232 = arith.constant 0 : index
    %c0_233 = arith.constant 0 : index
    %332 = vector.load %arg1[%c1_230, %c1_231, %c0_232, %c0_233] : memref<2x4x16x16xf32, #tpu.memory_space<vmem>>, vector<1x1x16x16xf32>
    %333 = vector.shape_cast %332 : vector<1x1x16x16xf32> to vector<16x16xf32>
    %334 = vector.broadcast %331 : vector<1x1xf32> to vector<16x16xf32>
    %335 = arith.mulf %334, %333 : vector<16x16xf32>
    %336 = arith.addf %330, %335 : vector<16x16xf32>
    %337 = vector.extract_strided_slice %0 {offsets = [5, 2], sizes = [1, 1], strides = [1, 1]} : vector<8x4xf32> to vector<1x1xf32>
    %c1_234 = arith.constant 1 : index
    %c2_235 = arith.constant 2 : index
    %c0_236 = arith.constant 0 : index
    %c0_237 = arith.constant 0 : index
    %338 = vector.load %arg1[%c1_234, %c2_235, %c0_236, %c0_237] : memref<2x4x16x16xf32, #tpu.memory_space<vmem>>, vector<1x1x16x16xf32>
    %339 = vector.shape_cast %338 : vector<1x1x16x16xf32> to vector<16x16xf32>
    %340 = vector.broadcast %337 : vector<1x1xf32> to vector<16x16xf32>
    %341 = arith.mulf %340, %339 : vector<16x16xf32>
    %342 = arith.addf %336, %341 : vector<16x16xf32>
    %343 = vector.extract_strided_slice %0 {offsets = [5, 3], sizes = [1, 1], strides = [1, 1]} : vector<8x4xf32> to vector<1x1xf32>
    %c1_238 = arith.constant 1 : index
    %c3_239 = arith.constant 3 : index
    %c0_240 = arith.constant 0 : index
    %c0_241 = arith.constant 0 : index
    %344 = vector.load %arg1[%c1_238, %c3_239, %c0_240, %c0_241] : memref<2x4x16x16xf32, #tpu.memory_space<vmem>>, vector<1x1x16x16xf32>
    %345 = vector.shape_cast %344 : vector<1x1x16x16xf32> to vector<16x16xf32>
    %346 = vector.broadcast %343 : vector<1x1xf32> to vector<16x16xf32>
    %347 = arith.mulf %346, %345 : vector<16x16xf32>
    %348 = arith.addf %342, %347 : vector<16x16xf32>
    %349 = vector.extract_strided_slice %0 {offsets = [6, 0], sizes = [1, 1], strides = [1, 1]} : vector<8x4xf32> to vector<1x1xf32>
    %c1_242 = arith.constant 1 : index
    %c0_243 = arith.constant 0 : index
    %c0_244 = arith.constant 0 : index
    %c0_245 = arith.constant 0 : index
    %350 = vector.load %arg1[%c1_242, %c0_243, %c0_244, %c0_245] : memref<2x4x16x16xf32, #tpu.memory_space<vmem>>, vector<1x1x16x16xf32>
    %351 = vector.shape_cast %350 : vector<1x1x16x16xf32> to vector<16x16xf32>
    %352 = vector.broadcast %349 : vector<1x1xf32> to vector<16x16xf32>
    %353 = arith.mulf %352, %351 : vector<16x16xf32>
    %354 = vector.extract_strided_slice %0 {offsets = [6, 1], sizes = [1, 1], strides = [1, 1]} : vector<8x4xf32> to vector<1x1xf32>
    %c1_246 = arith.constant 1 : index
    %c1_247 = arith.constant 1 : index
    %c0_248 = arith.constant 0 : index
    %c0_249 = arith.constant 0 : index
    %355 = vector.load %arg1[%c1_246, %c1_247, %c0_248, %c0_249] : memref<2x4x16x16xf32, #tpu.memory_space<vmem>>, vector<1x1x16x16xf32>
    %356 = vector.shape_cast %355 : vector<1x1x16x16xf32> to vector<16x16xf32>
    %357 = vector.broadcast %354 : vector<1x1xf32> to vector<16x16xf32>
    %358 = arith.mulf %357, %356 : vector<16x16xf32>
    %359 = arith.addf %353, %358 : vector<16x16xf32>
    %360 = vector.extract_strided_slice %0 {offsets = [6, 2], sizes = [1, 1], strides = [1, 1]} : vector<8x4xf32> to vector<1x1xf32>
    %c1_250 = arith.constant 1 : index
    %c2_251 = arith.constant 2 : index
    %c0_252 = arith.constant 0 : index
    %c0_253 = arith.constant 0 : index
    %361 = vector.load %arg1[%c1_250, %c2_251, %c0_252, %c0_253] : memref<2x4x16x16xf32, #tpu.memory_space<vmem>>, vector<1x1x16x16xf32>
    %362 = vector.shape_cast %361 : vector<1x1x16x16xf32> to vector<16x16xf32>
    %363 = vector.broadcast %360 : vector<1x1xf32> to vector<16x16xf32>
    %364 = arith.mulf %363, %362 : vector<16x16xf32>
    %365 = arith.addf %359, %364 : vector<16x16xf32>
    %366 = vector.extract_strided_slice %0 {offsets = [6, 3], sizes = [1, 1], strides = [1, 1]} : vector<8x4xf32> to vector<1x1xf32>
    %c1_254 = arith.constant 1 : index
    %c3_255 = arith.constant 3 : index
    %c0_256 = arith.constant 0 : index
    %c0_257 = arith.constant 0 : index
    %367 = vector.load %arg1[%c1_254, %c3_255, %c0_256, %c0_257] : memref<2x4x16x16xf32, #tpu.memory_space<vmem>>, vector<1x1x16x16xf32>
    %368 = vector.shape_cast %367 : vector<1x1x16x16xf32> to vector<16x16xf32>
    %369 = vector.broadcast %366 : vector<1x1xf32> to vector<16x16xf32>
    %370 = arith.mulf %369, %368 : vector<16x16xf32>
    %371 = arith.addf %365, %370 : vector<16x16xf32>
    %372 = vector.extract_strided_slice %0 {offsets = [7, 0], sizes = [1, 1], strides = [1, 1]} : vector<8x4xf32> to vector<1x1xf32>
    %c1_258 = arith.constant 1 : index
    %c0_259 = arith.constant 0 : index
    %c0_260 = arith.constant 0 : index
    %c0_261 = arith.constant 0 : index
    %373 = vector.load %arg1[%c1_258, %c0_259, %c0_260, %c0_261] : memref<2x4x16x16xf32, #tpu.memory_space<vmem>>, vector<1x1x16x16xf32>
    %374 = vector.shape_cast %373 : vector<1x1x16x16xf32> to vector<16x16xf32>
    %375 = vector.broadcast %372 : vector<1x1xf32> to vector<16x16xf32>
    %376 = arith.mulf %375, %374 : vector<16x16xf32>
    %377 = vector.extract_strided_slice %0 {offsets = [7, 1], sizes = [1, 1], strides = [1, 1]} : vector<8x4xf32> to vector<1x1xf32>
    %c1_262 = arith.constant 1 : index
    %c1_263 = arith.constant 1 : index
    %c0_264 = arith.constant 0 : index
    %c0_265 = arith.constant 0 : index
    %378 = vector.load %arg1[%c1_262, %c1_263, %c0_264, %c0_265] : memref<2x4x16x16xf32, #tpu.memory_space<vmem>>, vector<1x1x16x16xf32>
    %379 = vector.shape_cast %378 : vector<1x1x16x16xf32> to vector<16x16xf32>
    %380 = vector.broadcast %377 : vector<1x1xf32> to vector<16x16xf32>
    %381 = arith.mulf %380, %379 : vector<16x16xf32>
    %382 = arith.addf %376, %381 : vector<16x16xf32>
    %383 = vector.extract_strided_slice %0 {offsets = [7, 2], sizes = [1, 1], strides = [1, 1]} : vector<8x4xf32> to vector<1x1xf32>
    %c1_266 = arith.constant 1 : index
    %c2_267 = arith.constant 2 : index
    %c0_268 = arith.constant 0 : index
    %c0_269 = arith.constant 0 : index
    %384 = vector.load %arg1[%c1_266, %c2_267, %c0_268, %c0_269] : memref<2x4x16x16xf32, #tpu.memory_space<vmem>>, vector<1x1x16x16xf32>
    %385 = vector.shape_cast %384 : vector<1x1x16x16xf32> to vector<16x16xf32>
    %386 = vector.broadcast %383 : vector<1x1xf32> to vector<16x16xf32>
    %387 = arith.mulf %386, %385 : vector<16x16xf32>
    %388 = arith.addf %382, %387 : vector<16x16xf32>
    %389 = vector.extract_strided_slice %0 {offsets = [7, 3], sizes = [1, 1], strides = [1, 1]} : vector<8x4xf32> to vector<1x1xf32>
    %c1_270 = arith.constant 1 : index
    %c3_271 = arith.constant 3 : index
    %c0_272 = arith.constant 0 : index
    %c0_273 = arith.constant 0 : index
    %390 = vector.load %arg1[%c1_270, %c3_271, %c0_272, %c0_273] : memref<2x4x16x16xf32, #tpu.memory_space<vmem>>, vector<1x1x16x16xf32>
    %391 = vector.shape_cast %390 : vector<1x1x16x16xf32> to vector<16x16xf32>
    %392 = vector.broadcast %389 : vector<1x1xf32> to vector<16x16xf32>
    %393 = arith.mulf %392, %391 : vector<16x16xf32>
    %394 = arith.addf %388, %393 : vector<16x16xf32>
    %395 = tpu.concatenate %233, %256, %279, %302, %325, %348, %371, %394 in 0 : vector<16x16xf32>, vector<16x16xf32>, vector<16x16xf32>, vector<16x16xf32>, vector<16x16xf32>, vector<16x16xf32>, vector<16x16xf32>, vector<16x16xf32> -> vector<128x16xf32>
    %396 = vector.broadcast %1 : vector<128x1xf32> to vector<128x16xf32>
    %397 = arith.addf %395, %396 : vector<128x16xf32>
    %cst_274 = arith.constant 0.000000e+00 : f32
    %398 = vector.broadcast %cst_274 : f32 to vector<128x16xf32>
    %399 = arith.maximumf %397, %398 : vector<128x16xf32>
    %400 = arith.truncf %399 : vector<128x16xf32> to vector<128x16xbf16>
    %cst_275 = arith.constant dense<0.000000e+00> : vector<768x16xf32>
    %401 = tpu.matmul %2, %400, %cst_275 {dimension_numbers = #tpu.dot_dimension_numbers<[1], [0], [0], [1], [0, 0, 1, 1], [], []>} : vector<768x128xbf16>, vector<128x16xbf16>, vector<768x16xf32> -> vector<768x16xf32>
    %402 = vector.extract_strided_slice %401 {offsets = [0, 0], sizes = [256, 16], strides = [1, 1]} : vector<768x16xf32> to vector<256x16xf32>
    %c0_276 = arith.constant 0 : index
    %c0_277 = arith.constant 0 : index
    %c0_278 = arith.constant 0 : index
    %403 = vector.load %arg5[%c0_276, %c0_277, %c0_278] : memref<3x16x32xf32, #tpu.memory_space<vmem>>, vector<1x16x32xf32>
    %404 = vector.shape_cast %403 : vector<1x16x32xf32> to vector<16x32xf32>
    %cst_279 = arith.constant dense<0.000000e+00> : vector<256x32xf32>
    %405 = tpu.matmul %402, %404, %cst_279 {dimension_numbers = #tpu.dot_dimension_numbers<[1], [0], [0], [1], [0, 0, 1, 1], [], []>} : vector<256x16xf32>, vector<16x32xf32>, vector<256x32xf32> -> vector<256x32xf32>
    %406 = vector.extract_strided_slice %401 {offsets = [256, 0], sizes = [256, 16], strides = [1, 1]} : vector<768x16xf32> to vector<256x16xf32>
    %c1_280 = arith.constant 1 : index
    %c0_281 = arith.constant 0 : index
    %c0_282 = arith.constant 0 : index
    %407 = vector.load %arg5[%c1_280, %c0_281, %c0_282] : memref<3x16x32xf32, #tpu.memory_space<vmem>>, vector<1x16x32xf32>
    %408 = vector.shape_cast %407 : vector<1x16x32xf32> to vector<16x32xf32>
    %cst_283 = arith.constant dense<0.000000e+00> : vector<256x32xf32>
    %409 = tpu.matmul %406, %408, %cst_283 {dimension_numbers = #tpu.dot_dimension_numbers<[1], [0], [0], [1], [0, 0, 1, 1], [], []>} : vector<256x16xf32>, vector<16x32xf32>, vector<256x32xf32> -> vector<256x32xf32>
    %410 = arith.addf %405, %409 : vector<256x32xf32>
    %411 = vector.extract_strided_slice %401 {offsets = [512, 0], sizes = [256, 16], strides = [1, 1]} : vector<768x16xf32> to vector<256x16xf32>
    %c2_284 = arith.constant 2 : index
    %c0_285 = arith.constant 0 : index
    %c0_286 = arith.constant 0 : index
    %412 = vector.load %arg5[%c2_284, %c0_285, %c0_286] : memref<3x16x32xf32, #tpu.memory_space<vmem>>, vector<1x16x32xf32>
    %413 = vector.shape_cast %412 : vector<1x16x32xf32> to vector<16x32xf32>
    %cst_287 = arith.constant dense<0.000000e+00> : vector<256x32xf32>
    %414 = tpu.matmul %411, %413, %cst_287 {dimension_numbers = #tpu.dot_dimension_numbers<[1], [0], [0], [1], [0, 0, 1, 1], [], []>} : vector<256x16xf32>, vector<16x32xf32>, vector<256x32xf32> -> vector<256x32xf32>
    %415 = arith.addf %410, %414 : vector<256x32xf32>
    %c1_288 = arith.constant 1 : index
    %c0_289 = arith.constant 0 : index
    %c0_290 = arith.constant 0 : index
    %416 = vector.load %arg6[%c1_288, %c0_289, %c0_290] : memref<2x256x32xf32, #tpu.memory_space<vmem>>, vector<1x256x32xf32>
    %417 = vector.shape_cast %416 : vector<1x256x32xf32> to vector<256x32xf32>
    %418 = vector.shape_cast %415 : vector<256x32xf32> to vector<1x256x32xf32>
    tpu.vector_store %arg6[%c1_288, %c0_289, %c0_290], %418 {strides = array<i32>} : memref<2x256x32xf32, #tpu.memory_space<vmem>>, vector<1x256x32xf32>,
    return
  }
  func.func @transform_0(%arg0: i32) -> (i32, i32, i32, i32) {
    %c0_i32 = arith.constant 0 : i32
    %c0_i32_0 = arith.constant 0 : i32
    %c0_i32_1 = arith.constant 0 : i32
    %c0_i32_2 = arith.constant 0 : i32
    return %arg0, %c0_i32, %c0_i32_0, %c0_i32_1 : i32, i32, i32, i32
  }
  func.func @transform_1(%arg0: i32) -> (i32, i32) {
    %c0_i32 = arith.constant 0 : i32
    %c0_i32_0 = arith.constant 0 : i32
    %c0_i32_1 = arith.constant 0 : i32
    return %c0_i32, %c0_i32_0 : i32, i32
  }
  func.func @transform_2(%arg0: i32) -> (i32, i32) {
    %c0_i32 = arith.constant 0 : i32
    %c0_i32_0 = arith.constant 0 : i32
    %c0_i32_1 = arith.constant 0 : i32
    return %c0_i32, %c0_i32_0 : i32, i32
  }
  func.func @transform_3(%arg0: i32) -> (i32, i32) {
    %c0_i32 = arith.constant 0 : i32
    %c0_i32_0 = arith.constant 0 : i32
    %c0_i32_1 = arith.constant 0 : i32
    return %c0_i32, %c0_i32_0 : i32, i32
  }
  func.func @transform_4(%arg0: i32) -> (i32, i32, i32) {
    %c0_i32 = arith.constant 0 : i32
    %c0_i32_0 = arith.constant 0 : i32
    %c0_i32_1 = arith.constant 0 : i32
    %c0_i32_2 = arith.constant 0 : i32
    return %c0_i32, %c0_i32_0, %c0_i32_1 : i32, i32, i32
  }
  func.func @transform_5(%arg0: i32) -> (i32, i32, i32) {
    %c0_i32 = arith.constant 0 : i32
    %c0_i32_0 = arith.constant 0 : i32
    %c0_i32_1 = arith.constant 0 : i32
    return %arg0, %c0_i32, %c0_i32_0 : i32, i32, i32
  }
}

</mosaic_0001>

<bundles_post_ra>
// kernel: adjustment_block_forward.1
= control target key start
LH: loop header
LB: loop body
LE: loop exit
PB: predicated region body
PF: predicated region fallthrough
CT: control target
= control target key end

     0   :  { %s5317_s20 = smov 125   ;;  %s5318_s21 = smov 127   ;;  %v5319_v2 = vmov 0   ;;  %s6673_s0 = inlined_call_operand.vmem [shape: f32[2,4,16,16], index: 0, kind: input, shape index: {}]   ;;  %s6674_s1 = inlined_call_operand.vmem [shape: f32[8,4], index: 1, kind: input, shape index: {}]   ;;  %s6675_s2 = inlined_call_operand.vmem [shape: f32[128,1], index: 2, kind: input, shape index: {}]   ;;  %s6676_s3 = inlined_call_operand.vmem [shape: bf16[768,128], index: 3, kind: input, shape index: {}]   ;;  %s6677_s4 = inlined_call_operand.vmem [shape: f32[3,16,32], index: 4, kind: input, shape index: {}]   ;;  %s6678_s5 = inlined_call_operand.hbm [shape: f32[2,256,32], index: 5, kind: output, shape index: {}]  }
   0x1   :  { %v22_v0 = vld [vmem:[%s6674_s1] sm:$0xff]  ;;  %5243 = vset.pattern.permute.xlu1 %v5319_v2  ;;  %5242 = vset.pattern.permute.xlu0 %v5319_v2  ;;  %s5320_s22 = smov 126   ;;  %v24_v10 = vld [vmem:[%s6675_s2 + $0x8] sm:$0xff] }
   0x2   :  { %170 = vrot.lane.b32.xlu1 %v22_v0, %s5317_s20  ;;  %146 = vrot.lane.b32.xlu0 %v22_v0, %s5318_s21  ;;  %v5359_v1 = vrot.slane %v22_v0, 1  ;;  %5171 = vpush %v22_v0  ;;  %v5366_v3 = vrot.slane %v22_v0, 2  ;;  %v5371_v4 = vrot.slane %v22_v0, 3  ;;  %v5380_v5 = vrot.slane %v22_v0, 4  ;;  %v23_v9 = vld [vmem:[%s6675_s2] sm:$0xff] }
   0x3   :  { %v5385_v6 = vrot.slane %v22_v0, 5  ;;  %v5394_v7 = vrot.slane %v22_v0, 6  ;;  %v5399_v8 = vrot.slane %v22_v0, 7 }
   0x6   :  { %158 = vrot.lane.b32.xlu0 %v22_v0, %s5320_s22  ;;  %185 = vrot.lane.b32.xlu1 %v5359_v1, %s5318_s21 }
   0xa   :  { %194 = vrot.lane.b32.xlu0 %v5359_v1, %s5320_s22  ;;  %203 = vrot.lane.b32.xlu1 %v5359_v1, %s5317_s20 }
   0xe   :  { %218 = vrot.lane.b32.xlu0 %v5366_v3, %s5318_s21  ;;  %227 = vrot.lane.b32.xlu1 %v5366_v3, %s5320_s22 }
  0x12   :  { %236 = vrot.lane.b32.xlu0 %v5366_v3, %s5317_s20  ;;  %251 = vrot.lane.b32.xlu1 %v5371_v4, %s5318_s21 }
  0x16   :  { %260 = vrot.lane.b32.xlu0 %v5371_v4, %s5320_s22  ;;  %269 = vrot.lane.b32.xlu1 %v5371_v4, %s5317_s20 }
  0x1a   :  { %284 = vrot.lane.b32.xlu0 %v5380_v5, %s5318_s21  ;;  %293 = vrot.lane.b32.xlu1 %v5380_v5, %s5320_s22 }
  0x1e   :  { %302 = vrot.lane.b32.xlu0 %v5380_v5, %s5317_s20  ;;  %317 = vrot.lane.b32.xlu1 %v5385_v6, %s5318_s21 }
  0x22   :  { %326 = vrot.lane.b32.xlu0 %v5385_v6, %s5320_s22  ;;  %335 = vrot.lane.b32.xlu1 %v5385_v6, %s5317_s20 }
  0x26   :  { %350 = vrot.lane.b32.xlu0 %v5394_v7, %s5318_s21  ;;  %359 = vrot.lane.b32.xlu1 %v5394_v7, %s5320_s22 }
  0x2a   :  { %368 = vrot.lane.b32.xlu0 %v5394_v7, %s5317_s20  ;;  %383 = vrot.lane.b32.xlu1 %v5399_v8, %s5318_s21 }
  0x2e   :  { %392 = vrot.lane.b32.xlu0 %v5399_v8, %s5320_s22  ;;  %401 = vrot.lane.b32.xlu1 %v5399_v8, %s5317_s20 }
  0x2f   :  { %10 = vsyncpa [#allocation3], 0  ;;  %v26_v11 = vld [vmem:[%s6675_s2 + $0x18] sm:$0xff]  ;;  %v25_v12 = vld [vmem:[%s6675_s2 + $0x10] sm:$0xff]  ;;  %vm1240_vm0 = vcmask 130048   ;;  %vm2239_vm1 = vcmask 261120  }
  0x30   :  { %v28_v13 = vld [vmem:[%s6675_s2 + $0x28] sm:$0xff]  ;;  %v27_v14 = vld [vmem:[%s6675_s2 + $0x20] sm:$0xff]  ;;  %v30_v15 = vld [vmem:[%s6675_s2 + $0x38] sm:$0xff] }
  0x31   :  { %v29_v16 = vld [vmem:[%s6675_s2 + $0x30] sm:$0xff]  ;;  %v32_v17 = vld [vmem:[%s6675_s2 + $0x48] sm:$0xff]  ;;  %v31_v18 = vld [vmem:[%s6675_s2 + $0x40] sm:$0xff] }
  0x32   :  { %412 = vperm.xlu0 %5242, %v23_v9   ;;  %417 = vperm.xlu1 %5243, %v24_v10   ;;  %v34_v19 = vld [vmem:[%s6675_s2 + $0x58] sm:$0xff]  ;;  %v33_v20 = vld [vmem:[%s6675_s2 + $0x50] sm:$0xff]  ;;  %v36_v21 = vld [vmem:[%s6675_s2 + $0x68] sm:$0xff] }
  0x33   :  { %v35_v22 = vld [vmem:[%s6675_s2 + $0x60] sm:$0xff]  ;;  %v38_v23 = vld [vmem:[%s6675_s2 + $0x78] sm:$0xff]  ;;  %v37_v24 = vld [vmem:[%s6675_s2 + $0x70] sm:$0xff]  ;;  %s5172_s29 = spop %5171 }
  0x34   :  { %v5244_v33 = vld [vmem:[%s6676_s3] sm:$0xff]   ;;  %v139_v50 = vstv %s5172_s29  ;;  %v5474_v52 = vld [vmem:[%s6673_s0 + $0x48] sm:$0xff]  ;;  %v5489_v55 = vld [vmem:[%s6673_s0 + $0x10] sm:$0xff] }
  0x35   :  { %4497 = vmatprep.mubr.bf16.mxu0 %v5244_v33  ;;  %v5469_v51 = vld [vmem:[%s6673_s0 + $0x40] sm:$0xff]  ;;  %v5484_v54 = vld [vmem:[%s6673_s0 + $0x8] sm:$0xff]  ;;  %v5494_v56 = vld [vmem:[%s6673_s0 + $0x18] sm:$0xff]  ;;  %v2276_v60 = vmul.f32 %v5474_v52, %v139_v50 }
  0x36   :  { %427 = vperm.xlu0 %5242, %v26_v11   ;;  %422 = vperm.xlu1 %5243, %v25_v12   ;;  %v5479_v53 = vld [vmem:[%s6673_s0] sm:$0xff]  ;;  %v5499_v57 = vld [vmem:[%s6673_s0 + $0x50] sm:$0xff]  ;;  %v5504_v58 = vld [vmem:[%s6673_s0 + $0x58] sm:$0xff]  ;;  %v2275_v59 = vmul.f32 %v5469_v51, %v139_v50  ;;  %v142_v62 = vmul.f32 %v139_v50, %v5484_v54 }
  0x37   :  { %v141_v61 = vmul.f32 %v139_v50, %v5479_v53  ;;  %v5532_v9 = vld [vmem:[%s6673_s0 + $0x68] sm:$0xff]  ;;  %v5537_v10 = vld [vmem:[%s6673_s0 + $0x30] sm:$0xff]  ;;  %v5542_v12 = vld [vmem:[%s6673_s0 + $0x38] sm:$0xff] }
  0x3a   :  { %437 = vperm.xlu0 %5242, %v28_v13   ;;  %432 = vperm.xlu1 %5243, %v27_v14   ;;  %v5547_v13 = vld [vmem:[%s6673_s0 + $0x70] sm:$0xff]  ;;  %v5552_v14 = vld [vmem:[%s6673_s0 + $0x78] sm:$0xff] }
  0x3e   :  { %447 = vperm.xlu0 %5242, %v30_v15   ;;  %442 = vperm.xlu1 %5243, %v29_v16  }
  0x42   :  { %457 = vperm.xlu0 %5242, %v32_v17   ;;  %452 = vperm.xlu1 %5243, %v31_v18  }
  0x46   :  { %467 = vperm.xlu0 %5242, %v34_v19   ;;  %462 = vperm.xlu1 %5243, %v33_v20  }
  0x4a   :  { %477 = vperm.xlu0 %5242, %v36_v21   ;;  %472 = vperm.xlu1 %5243, %v35_v22  }
  0x4e   :  { %487 = vperm.xlu0 %5242, %v38_v23   ;;  %482 = vperm.xlu1 %5243, %v37_v24  }
  0x74   :  { %v147_v25 = vpop.permute.xlu0 %146  ;;  %v171_v26 = vpop.permute.xlu1 %170 }
  0x75   :  { %5173 = vpush %v147_v25 }
  0x78   :  { %v159_v27 = vpop.permute.xlu0 %158  ;;  %v186_v28 = vpop.permute.xlu1 %185 }
  0x79   :  { %5175 = vpush %v159_v27 }
  0x7a   :  { %5177 = vpush %v171_v26 }
  0x7b   :  { %5179 = vpush %v5359_v1 }
  0x7c   :  { %5181 = vpush %v186_v28  ;;  %v195_v29 = vpop.permute.xlu0 %194  ;;  %v204_v30 = vpop.permute.xlu1 %203 }
  0x7d   :  { %5183 = vpush %v195_v29 }
  0x7e   :  { %5185 = vpush %v204_v30 }
  0x7f   :  { %5187 = vpush %v5366_v3 }
  0x80   :  { %v219_v31 = vpop.permute.xlu0 %218  ;;  %v228_v32 = vpop.permute.xlu1 %227 }
  0x81   :  { %5189 = vpush %v219_v31 }
  0x82   :  { %5191 = vpush %v228_v32 }
  0x84   :  { %v237_v34 = vpop.permute.xlu0 %236  ;;  %v252_v35 = vpop.permute.xlu1 %251 }
  0x85   :  { %5193 = vpush %v237_v34 }
  0x86   :  { %5195 = vpush %v5371_v4  ;;  %v5517_v4 = vld [vmem:[%s6673_s0 + $0x20] sm:$0xff] }
  0x87   :  { %5197 = vpush %v252_v35 }
  0x88   :  { %v261_v36 = vpop.permute.xlu0 %260  ;;  %v270_v37 = vpop.permute.xlu1 %269 }
  0x89   :  { %5199 = vpush %v261_v36 }
  0x8a   :  { %5201 = vpush %v270_v37 }
  0x8b   :  { %5203 = vpush %v5380_v5  ;;  %v5522_v5 = vld [vmem:[%s6673_s0 + $0x28] sm:$0xff] }
  0x8c   :  { %v285_v38 = vpop.permute.xlu0 %284  ;;  %v294_v39 = vpop.permute.xlu1 %293 }
  0x8d   :  { %5205 = vpush %v285_v38 }
  0x8e   :  { %5207 = vpush %v294_v39 }
  0x90   :  { %v303_v40 = vpop.permute.xlu0 %302  ;;  %v318_v41 = vpop.permute.xlu1 %317 }
  0x91   :  { %5209 = vpush %v303_v40 }
  0x92   :  { %5211 = vpush %v5385_v6 }
  0x93   :  { %5213 = vpush %v318_v41 }
  0x94   :  { %v327_v42 = vpop.permute.xlu0 %326  ;;  %v336_v43 = vpop.permute.xlu1 %335 }
  0x95   :  { %5215 = vpush %v327_v42 }
  0x96   :  { %5217 = vpush %v336_v43 }
  0x97   :  { %5219 = vpush %v5394_v7 }
  0x98   :  { %v351_v44 = vpop.permute.xlu0 %350  ;;  %v360_v45 = vpop.permute.xlu1 %359 }
  0x99   :  { %5221 = vpush %v351_v44 }
  0x9a   :  { %5223 = vpush %v360_v45 }
  0x9c   :  { %v369_v46 = vpop.permute.xlu0 %368  ;;  %v384_v47 = vpop.permute.xlu1 %383 }
  0x9d   :  { %5225 = vpush %v369_v46 }
  0x9e   :  { %5227 = vpush %v5399_v8  ;;  %v5527_v8 = vld [vmem:[%s6673_s0 + $0x60] sm:$0xff] }
  0x9f   :  { %5229 = vpush %v384_v47 }
  0xa0   :  { %v393_v48 = vpop.permute.xlu0 %392  ;;  %v402_v49 = vpop.permute.xlu1 %401 }
  0xa1   :  { %5231 = vpush %v393_v48 }
  0xa2   :  { %5233 = vpush %v402_v49 }
  0xa6   :  { %s5174_s21 = spop %5173 }
  0xa7   :  { %v149_v63 = vstv %s5174_s21 }
  0xa8   :  { %v151_v0 = vmul.f32 %v5489_v55, %v149_v63  ;;  %v152_v1 = vmul.f32 %v5494_v56, %v149_v63  ;;  %v2280_v2 = vmul.f32 %v5499_v57, %v149_v63  ;;  %v2281_v3 = vmul.f32 %v5504_v58, %v149_v63 }
  0xaa   :  { %v2282_v6 = vadd.f32 %v2280_v2, %v2275_v59  ;;  %v2283_v7 = vadd.f32 %v2281_v3, %v2276_v60  ;;  %s5176_s25 = spop %5175  ;;  %v153_v15 = vadd.f32 %v151_v0, %v141_v61  ;;  %v154_v16 = vadd.f32 %v152_v1, %v142_v62 }
  0xab   :  { %v161_v11 = vstv %s5176_s25  ;;  %s5178_s8 = spop %5177 }
  0xac   :  { %v163_v17 = vmul.f32 %v5517_v4, %v161_v11  ;;  %v164_v18 = vmul.f32 %v5522_v5, %v161_v11  ;;  %s5180_s13 = spop %5179  ;;  %v2287_v19 = vmul.f32 %v5527_v8, %v161_v11  ;;  %v2288_v20 = vmul.f32 %v5532_v9, %v161_v11 }
  0xad   :  { %v173_v21 = vstv %s5178_s8  ;;  %v181_v22 = vstv %s5180_s13  ;;  %s5182_s14 = spop %5181 }
  0xae   :  { %v175_v23 = vmul.f32 %v5537_v10, %v173_v21  ;;  %v176_v24 = vmul.f32 %v5542_v12, %v173_v21  ;;  %v2294_v25 = vmul.f32 %v5547_v13, %v173_v21  ;;  %v2295_v26 = vmul.f32 %v5552_v14, %v173_v21  ;;  %s5184_s0 = spop %5183 }
  0xaf   :  { %v183_v27 = vmul.f32 %v181_v22, %v5479_v53  ;;  %v184_v28 = vmul.f32 %v181_v22, %v5484_v54  ;;  %v2298_v29 = vmul.f32 %v5469_v51, %v181_v22  ;;  %v2299_v30 = vmul.f32 %v5474_v52, %v181_v22  ;;  %s5186_s15 = spop %5185 }
  0xb0   :  { %v188_v31 = vstv %s5182_s14  ;;  %v197_v32 = vstv %s5184_s0  ;;  %v206_v33 = vstv %s5186_s15  ;;  %v165_v34 = vadd.f32 %v163_v17, %v153_v15  ;;  %s5188_s16 = spop %5187 }
  0xb1   :  { %v190_v35 = vmul.f32 %v5489_v55, %v188_v31  ;;  %v191_v36 = vmul.f32 %v5494_v56, %v188_v31  ;;  %v2300_v37 = vmul.f32 %v5499_v57, %v188_v31  ;;  %v2301_v38 = vmul.f32 %v5504_v58, %v188_v31  ;;  %v413_v59 = vpop.permute.xlu0 %412  ;;  %v418_v0 = vpop.permute.xlu1 %417 }
  0xb2   :  { %v199_v39 = vmul.f32 %v5517_v4, %v197_v32  ;;  %v200_v40 = vmul.f32 %v5522_v5, %v197_v32  ;;  %v2304_v41 = vmul.f32 %v5527_v8, %v197_v32  ;;  %v2305_v42 = vmul.f32 %v5532_v9, %v197_v32  ;;  %s5190_s17 = spop %5189 }
  0xb3   :  { %v192_v43 = vadd.f32 %v190_v35, %v183_v27  ;;  %v193_v44 = vadd.f32 %v191_v36, %v184_v28  ;;  %v2302_v45 = vadd.f32 %v2300_v37, %v2298_v29  ;;  %v2303_v46 = vadd.f32 %v2301_v38, %v2299_v30  ;;  %s5192_s18 = spop %5191 }
  0xb4   :  { %v208_v47 = vmul.f32 %v5537_v10, %v206_v33  ;;  %v209_v48 = vmul.f32 %v5542_v12, %v206_v33  ;;  %v2308_v49 = vmul.f32 %v5547_v13, %v206_v33  ;;  %v2309_v50 = vmul.f32 %v5552_v14, %v206_v33 }
  0xb5   :  { %v177_v60 = vadd.f32 %v175_v23, %v165_v34  ;;  %v2289_v61 = vadd.f32 %v2287_v19, %v2282_v6  ;;  %v166_v62 = vadd.f32 %v164_v18, %v154_v16  ;;  %v2290_v63 = vadd.f32 %v2288_v20, %v2283_v7  ;;  %v428_v37 = vpop.permute.xlu0 %427 }
  0xb6   :  { %v214_v1 = vstv %s5188_s16  ;;  %v221_v2 = vstv %s5190_s17  ;;  %v230_v3 = vstv %s5192_s18  ;;  %v202_v11 = vadd.f32 %v200_v40, %v193_v44  ;;  %s5194_s19 = spop %5193 }
  0xb7   :  { %v490_v15 = vadd.f32 %v413_v59, %v177_v60  ;;  %v2296_v17 = vadd.f32 %v2294_v25, %v2289_v61  ;;  %v178_v21 = vadd.f32 %v176_v24, %v166_v62  ;;  %v2297_v22 = vadd.f32 %v2295_v26, %v2290_v63  ;;  %s5196_s20 = spop %5195 }
  0xb8   :  { %v216_v27 = vmul.f32 %v214_v1, %v5479_v53  ;;  %v217_v28 = vmul.f32 %v214_v1, %v5484_v54  ;;  %v2312_v29 = vmul.f32 %v5469_v51, %v214_v1  ;;  %v2313_v23 = vmul.f32 %v5474_v52, %v214_v1  ;;  %s5198_s21 = spop %5197  ;;  %v423_v1 = vpop.permute.xlu1 %422 }
  0xb9   :  { %v506_v6 = vmax.f32 %v490_v15, 0.0  ;;  %v5582_v16 = vadd.f32 %v2296_v17, %v413_v59  ;;  %v491_v7 = vadd.f32 %v418_v0, %v178_v21  ;;  %v5584_v18 = vadd.f32 %v2297_v22, %v418_v0 }
  0xba   :  { %v223_v19 = vmul.f32 %v5489_v55, %v221_v2  ;;  %v224_v20 = vmul.f32 %v5494_v56, %v221_v2  ;;  %v2314_v24 = vmul.f32 %v5499_v57, %v221_v2  ;;  %v2315_v25 = vmul.f32 %v5504_v58, %v221_v2  ;;  %s5200_s22 = spop %5199 }
  0xbb   :  { %v2412_v26 = vmax.f32 %v5582_v16, 0.0  ;;  %v507_v30 = vmax.f32 %v491_v7, 0.0  ;;  %v2413_v31 = vmax.f32 %v5584_v18, 0.0  ;;  %v232_v32 = vmul.f32 %v5517_v4, %v230_v3  ;;  %s5202_s1 = spop %5201 }
  0xbc   :  { %v225_v33 = vadd.f32 %v223_v19, %v216_v27  ;;  %v226_v34 = vadd.f32 %v224_v20, %v217_v28  ;;  %v2316_v35 = vadd.f32 %v2314_v24, %v2312_v29  ;;  %v2317_v36 = vadd.f32 %v2315_v25, %v2313_v23  ;;  %s5204_s23 = spop %5203 }
  0xbd   :  { %v233_v38 = vmul.f32 %v5522_v5, %v230_v3  ;;  %v2318_v40 = vmul.f32 %v5527_v8, %v230_v3  ;;  %v2319_v44 = vmul.f32 %v5532_v9, %v230_v3  ;;  %v211_v59 = vadd.f32 %v209_v48, %v202_v11 }
  0xbe   :  { %v2307_v60 = vadd.f32 %v2305_v42, %v2303_v46  ;;  %v201_v61 = vadd.f32 %v199_v39, %v192_v43  ;;  %v2306_v62 = vadd.f32 %v2304_v41, %v2302_v45  ;;  %v239_v63 = vstv %s5194_s19  ;;  %s5206_s24 = spop %5205 }
  0xbf   :  { %v5596_v0 = vadd.f32 %v428_v37, %v211_v59  ;;  %v241_v2 = vmul.f32 %v5537_v10, %v239_v63  ;;  %v242_v15 = vmul.f32 %v5542_v12, %v239_v63  ;;  %v2322_v17 = vmul.f32 %v5547_v13, %v239_v63  ;;  %s5208_s25 = spop %5207 }
  0xc0   :  { %v2311_v21 = vadd.f32 %v2309_v50, %v2307_v60  ;;  %v210_v22 = vadd.f32 %v208_v47, %v201_v61  ;;  %v2310_v27 = vadd.f32 %v2308_v49, %v2306_v62  ;;  %v2323_v3 = vmul.f32 %v5552_v14, %v239_v63 }
  0xc1   :  { %v509_v42 = vmax.f32 %v5596_v0, 0.0  ;;  %v247_v39 = vstv %s5196_s20  ;;  %v254_v41 = vstv %s5198_s21  ;;  %v522_v43 = vpack.c.bf16 %v507_v30, %v506_v6 }
  0xc2   :  { %v5603_v45 = vadd.f32 %v2311_v21, %v428_v37  ;;  %v492_v46 = vadd.f32 %v423_v1, %v210_v22  ;;  %v5605_v48 = vadd.f32 %v2310_v27, %v423_v1  ;;  %v249_v11 = vmul.f32 %v247_v39, %v5479_v53  ;;  %v438_v1 = vpop.permute.xlu0 %437  ;;  %s5210_s26 = spop %5209 }
  0xc3   :  { %v250_v28 = vmul.f32 %v247_v39, %v5484_v54  ;;  %v2326_v50 = vmul.f32 %v5469_v51, %v247_v39  ;;  %v2327_v47 = vmul.f32 %v5474_v52, %v247_v39  ;;  %v256_v49 = vmul.f32 %v5489_v55, %v254_v41  ;;  %4481 = vmatprep.subr.bf16.mxu0 %v522_v43  ;;  %s5212_s27 = spop %5211 }
  0xc4   :  { %v508_v23 = vmax.f32 %v492_v46, 0.0  ;;  %v2414_v6 = vmax.f32 %v5605_v48, 0.0  ;;  %v257_v7 = vmul.f32 %v5494_v56, %v254_v41  ;;  %4482 = vmatpush3.bf16.msra.mxu0 %v522_v43  ;;  %v2328_v20 = vmul.f32 %v5499_v57, %v254_v41  ;;  %s5214_s2 = spop %5213 }
  0xc5   :  { %v258_v19 = vadd.f32 %v256_v49, %v249_v11  ;;  %v2329_v24 = vmul.f32 %v5504_v58, %v254_v41  ;;  %v235_v25 = vadd.f32 %v233_v38, %v226_v34  ;;  %v2321_v37 = vadd.f32 %v2319_v44, %v2317_v36  ;;  %v433_v41 = vpop.permute.xlu1 %432 }
  0xc6   :  { %v259_v30 = vadd.f32 %v257_v7, %v250_v28  ;;  %v234_v59 = vadd.f32 %v232_v32, %v225_v33  ;;  %v2320_v60 = vadd.f32 %v2318_v40, %v2316_v35  ;;  %v2330_v61 = vadd.f32 %v2328_v20, %v2326_v50  ;;  %s5216_s28 = spop %5215 }
  0xc7   :  { %v2331_v62 = vadd.f32 %v2329_v24, %v2327_v47  ;;  %v244_v63 = vadd.f32 %v242_v15, %v235_v25  ;;  %v263_v0 = vstv %s5200_s22  ;;  %v2325_v21 = vadd.f32 %v2323_v3, %v2321_v37  ;;  %s5218_s29 = spop %5217 }
  0xc8   :  { %v243_v22 = vadd.f32 %v241_v2, %v234_v59  ;;  %v2324_v27 = vadd.f32 %v2322_v17, %v2320_v60  ;;  %v265_v39 = vmul.f32 %v5517_v4, %v263_v0  ;;  %v266_v34 = vmul.f32 %v5522_v5, %v263_v0  ;;  %s5220_s30 = spop %5219 }
  0xc9   :  { %v5618_v43 = vadd.f32 %v438_v1, %v244_v63  ;;  %v2332_v32 = vmul.f32 %v5527_v8, %v263_v0  ;;  %v2333_v33 = vmul.f32 %v5532_v9, %v263_v0  ;;  %v5623_v35 = vadd.f32 %v2325_v21, %v438_v1  ;;  %v448_v1 = vpop.permute.xlu0 %447  ;;  %v443_v21 = vpop.permute.xlu1 %442 }
  0xca   :  { %v494_v36 = vadd.f32 %v433_v41, %v243_v22  ;;  %v5625_v38 = vadd.f32 %v2324_v27, %v433_v41  ;;  %v272_v40 = vstv %s5202_s1  ;;  %v523_v50 = vpack.c.bf16 %v509_v42, %v508_v23  ;;  %s5222_s6 = spop %5221 }
  0xcb   :  { %v511_v44 = vmax.f32 %v5618_v43, 0.0  ;;  %v274_v2 = vmul.f32 %v5537_v10, %v272_v40  ;;  %v275_v15 = vmul.f32 %v5542_v12, %v272_v40  ;;  %v2336_v17 = vmul.f32 %v5547_v13, %v272_v40  ;;  %s5224_s7 = spop %5223 }
  0xcc   :  { %v510_v46 = vmax.f32 %v494_v36, 0.0  ;;  %v2337_v28 = vmul.f32 %v5552_v14, %v272_v40  ;;  %v268_v47 = vadd.f32 %v266_v34, %v259_v30  ;;  %v2335_v49 = vadd.f32 %v2333_v33, %v2331_v62  ;;  %4483 = vmatprep.subr.bf16.mxu0 %v523_v50 }
  0xcd   :  { %v267_v7 = vadd.f32 %v265_v39, %v258_v19  ;;  %v2334_v20 = vadd.f32 %v2332_v32, %v2330_v61  ;;  %v280_v24 = vstv %s5204_s23  ;;  %v287_v25 = vstv %s5206_s24  ;;  %4484 = vmatpush3.bf16.msra.mxu0 %v523_v50 }
  0xce   :  { %v296_v37 = vstv %s5208_s25  ;;  %v277_v59 = vadd.f32 %v275_v15, %v268_v47  ;;  %v2339_v60 = vadd.f32 %v2337_v28, %v2335_v49  ;;  %v282_v0 = vmul.f32 %v280_v24, %v5479_v53  ;;  %s5226_s8 = spop %5225 }
  0xcf   :  { %v276_v63 = vadd.f32 %v274_v2, %v267_v7  ;;  %v2338_v22 = vadd.f32 %v2336_v17, %v2334_v20  ;;  %v283_v27 = vmul.f32 %v280_v24, %v5484_v54  ;;  %v2340_v42 = vmul.f32 %v5469_v51, %v280_v24  ;;  %s5228_s9 = spop %5227 }
  0xd0   :  { %v2341_v23 = vmul.f32 %v5474_v52, %v280_v24  ;;  %v497_v19 = vadd.f32 %v448_v1, %v277_v59  ;;  %v5638_v30 = vadd.f32 %v2339_v60, %v448_v1  ;;  %v289_v62 = vmul.f32 %v5489_v55, %v287_v25  ;;  %s5230_s10 = spop %5229 }
  0xd1   :  { %v496_v61 = vadd.f32 %v443_v21, %v276_v63  ;;  %v5641_v39 = vadd.f32 %v2338_v22, %v443_v21  ;;  %v290_v43 = vmul.f32 %v5494_v56, %v287_v25  ;;  %v2342_v41 = vmul.f32 %v5499_v57, %v287_v25 }
  0xd2   :  { %v2343_v34 = vmul.f32 %v5504_v58, %v287_v25  ;;  %v513_v32 = vmax.f32 %v497_v19, 0.0  ;;  %v291_v40 = vadd.f32 %v289_v62, %v282_v0  ;;  %v298_v50 = vmul.f32 %v5517_v4, %v296_v37  ;;  %s5232_s11 = spop %5231 }
  0xd3   :  { %v512_v36 = vmax.f32 %v496_v61, 0.0  ;;  %v292_v15 = vadd.f32 %v290_v43, %v283_v27  ;;  %v2344_v17 = vadd.f32 %v2342_v41, %v2340_v42  ;;  %v299_v47 = vmul.f32 %v5522_v5, %v296_v37  ;;  %s5234_s12 = spop %5233 }
  0xd4   :  { %v2345_v28 = vadd.f32 %v2343_v34, %v2341_v23  ;;  %v2346_v49 = vmul.f32 %v5527_v8, %v296_v37  ;;  %v2347_v7 = vmul.f32 %v5532_v9, %v296_v37  ;;  %v305_v20 = vstv %s5210_s26 }
  0xd5   :  { %v524_v24 = vpack.c.bf16 %v511_v44, %v510_v46  ;;  %v313_v25 = vstv %s5212_s27  ;;  %v320_v59 = vstv %s5214_s2  ;;  %v300_v60 = vadd.f32 %v298_v50, %v291_v40 }
  0xd6   :  { %v301_v63 = vadd.f32 %v299_v47, %v292_v15  ;;  %v2348_v0 = vadd.f32 %v2346_v49, %v2344_v17  ;;  %v2349_v1 = vadd.f32 %v2347_v7, %v2345_v28  ;;  %v307_v21 = vmul.f32 %v5537_v10, %v305_v20 }
  0xd7   :  { %v308_v22 = vmul.f32 %v5542_v12, %v305_v20  ;;  %v2350_v27 = vmul.f32 %v5547_v13, %v305_v20  ;;  %v2351_v42 = vmul.f32 %v5552_v14, %v305_v20  ;;  %4485 = vmatprep.subr.bf16.mxu0 %v524_v24  ;;  %v315_v44 = vmul.f32 %v313_v25, %v5479_v53 }
  0xd8   :  { %4486 = vmatpush3.bf16.msra.mxu0 %v524_v24  ;;  %v316_v46 = vmul.f32 %v313_v25, %v5484_v54  ;;  %v2354_v37 = vmul.f32 %v5469_v51, %v313_v25  ;;  %v2355_v23 = vmul.f32 %v5474_v52, %v313_v25  ;;  %v309_v19 = vadd.f32 %v307_v21, %v300_v60 }
  0xd9   :  { %v5660_v61 = vadd.f32 %v308_v22, %v301_v63  ;;  %v5662_v62 = vadd.f32 %v2350_v27, %v2348_v0  ;;  %v5664_v43 = vadd.f32 %v2351_v42, %v2349_v1  ;;  %v322_v41 = vmul.f32 %v5489_v55, %v320_v59 }
  0xda   :  { %v323_v34 = vmul.f32 %v5494_v56, %v320_v59  ;;  %v2356_v40 = vmul.f32 %v5499_v57, %v320_v59  ;;  %v2357_v15 = vmul.f32 %v5504_v58, %v320_v59  ;;  %v329_v17 = vstv %s5216_s28 }
  0xdb   :  { %v338_v28 = vstv %s5218_s29  ;;  %v525_v50 = vpack.c.bf16 %v513_v32, %v512_v36  ;;  %v346_v47 = vstv %s5220_s30  ;;  %v324_v49 = vadd.f32 %v322_v41, %v315_v44  ;;  %v5678_v44 = vpop.permute.xlu1 %452 }
  0xdc   :  { %v325_v7 = vadd.f32 %v323_v34, %v316_v46  ;;  %v2358_v20 = vadd.f32 %v2356_v40, %v2354_v37  ;;  %v2359_v24 = vadd.f32 %v2357_v15, %v2355_v23  ;;  %v331_v25 = vmul.f32 %v5517_v4, %v329_v17  ;;  %v5684_v34 = vpop.permute.xlu0 %457 }
  0xdd   :  { %v332_v60 = vmul.f32 %v5522_v5, %v329_v17  ;;  %v2360_v63 = vmul.f32 %v5527_v8, %v329_v17  ;;  %v2361_v0 = vmul.f32 %v5532_v9, %v329_v17  ;;  %4487 = vmatprep.subr.bf16.mxu0 %v525_v50  ;;  %v340_v59 = vmul.f32 %v5537_v10, %v338_v28 }
  0xde   :  { %v341_v1 = vmul.f32 %v5542_v12, %v338_v28  ;;  %v2364_v32 = vmul.f32 %v5547_v13, %v338_v28  ;;  %v2365_v36 = vmul.f32 %v5552_v14, %v338_v28  ;;  %4488 = vmatpush3.bf16.msra.mxu0 %v525_v50  ;;  %v333_v21 = vadd.f32 %v331_v25, %v324_v49 }
  0xdf   :  { %v334_v22 = vadd.f32 %v332_v60, %v325_v7  ;;  %v2362_v27 = vadd.f32 %v2360_v63, %v2358_v20  ;;  %v2363_v42 = vadd.f32 %v2361_v0, %v2359_v24  ;;  %v348_v46 = vmul.f32 %v346_v47, %v5479_v53 }
  0xe0   :  { %v349_v37 = vmul.f32 %v346_v47, %v5484_v54  ;;  %v2368_v23 = vmul.f32 %v5469_v51, %v346_v47  ;;  %v2369_v41 = vmul.f32 %v5474_v52, %v346_v47  ;;  %v5686_v40 = vadd.f32 %v340_v59, %v333_v21  ;;  %v5709_v2 = vpop.permute.xlu0 %467 }
  0xe1   :  { %v5688_v15 = vadd.f32 %v341_v1, %v334_v22  ;;  %v5690_v17 = vadd.f32 %v2364_v32, %v2362_v27  ;;  %v5692_v28 = vadd.f32 %v2365_v36, %v2363_v42  ;;  %v353_v50 = vstv %s5222_s6  ;;  %v5703_v22 = vpop.permute.xlu1 %462 }
  0xe2   :  { %v362_v49 = vstv %s5224_s7  ;;  %v371_v7 = vstv %s5226_s8  ;;  %v498_v20 = vadd.f32 %v5678_v44, %v309_v19  ;;  %v355_v24 = vmul.f32 %v5489_v55, %v353_v50 }
  0xe3   :  { %v356_v25 = vmul.f32 %v5494_v56, %v353_v50  ;;  %v2370_v47 = vmul.f32 %v5499_v57, %v353_v50  ;;  %v2371_v60 = vmul.f32 %v5504_v58, %v353_v50  ;;  %v364_v63 = vmul.f32 %v5517_v4, %v362_v49 }
  0xe4   :  { %v365_v0 = vmul.f32 %v5522_v5, %v362_v49  ;;  %v2374_v59 = vmul.f32 %v5527_v8, %v362_v49  ;;  %v2375_v1 = vmul.f32 %v5532_v9, %v362_v49  ;;  %v357_v32 = vadd.f32 %v355_v24, %v348_v46 }
  0xe5   :  { %v358_v36 = vadd.f32 %v356_v25, %v349_v37  ;;  %v2372_v19 = vadd.f32 %v2370_v47, %v2368_v23  ;;  %v2373_v21 = vadd.f32 %v2371_v60, %v2369_v41  ;;  %v373_v27 = vmul.f32 %v5537_v10, %v371_v7 }
  0xe6   :  { %v374_v42 = vmul.f32 %v5542_v12, %v371_v7  ;;  %v2378_v50 = vmul.f32 %v5547_v13, %v371_v7  ;;  %v2379_v33 = vmul.f32 %v5552_v14, %v371_v7  ;;  %v366_v3 = vadd.f32 %v364_v63, %v357_v32 }
  0xe7   :  { %v367_v11 = vadd.f32 %v365_v0, %v358_v36  ;;  %v2376_v49 = vadd.f32 %v2374_v59, %v2372_v19  ;;  %v2377_v46 = vadd.f32 %v2375_v1, %v2373_v21  ;;  %v499_v37 = vadd.f32 %v5684_v34, %v5660_v61  ;;  %v478_v21 = vpop.permute.xlu0 %477 }
  0xe8   :  { %v514_v23 = vmax.f32 %v498_v20, 0.0  ;;  %v379_v41 = vstv %s5228_s9  ;;  %v386_v24 = vstv %s5230_s10  ;;  %v375_v25 = vadd.f32 %v373_v27, %v366_v3 }
  0xe9   :  { %v376_v47 = vadd.f32 %v374_v42, %v367_v11  ;;  %v5713_v60 = vadd.f32 %v2378_v50, %v2376_v49  ;;  %v5715_v29 = vadd.f32 %v2379_v33, %v2377_v46  ;;  %v515_v7 = vmax.f32 %v499_v37, 0.0  ;;  %v473_v11 = vpop.permute.xlu1 %472 }
  0xea   :  { %v381_v63 = vmul.f32 %v379_v41, %v5479_v53  ;;  %v382_v0 = vmul.f32 %v379_v41, %v5484_v54  ;;  %v2382_v59 = vmul.f32 %v5469_v51, %v379_v41  ;;  %v2383_v61 = vmul.f32 %v5474_v52, %v379_v41 }
  0xeb   :  { %v388_v20 = vmul.f32 %v5489_v55, %v386_v24  ;;  %v389_v1 = vmul.f32 %v5494_v56, %v386_v24  ;;  %v2384_v3 = vmul.f32 %v5499_v57, %v386_v24  ;;  %v526_v32 = vpack.c.bf16 %v515_v7, %v514_v23 }
  0xec   :  { %v2385_v33 = vmul.f32 %v5504_v58, %v386_v24  ;;  %v395_v36 = vstv %s5232_s11  ;;  %v404_v19 = vstv %s5234_s12  ;;  %v6718_v16 = vmax.f32 %v5641_v39, 0.0 }
  0xed   :  { %v390_v53 = vadd.f32 %v388_v20, %v381_v63  ;;  %v391_v27 = vadd.f32 %v389_v1, %v382_v0  ;;  %v2386_v54 = vadd.f32 %v2384_v3, %v2382_v59  ;;  %v397_v51 = vmul.f32 %v5517_v4, %v395_v36  ;;  %4489 = vmatprep.subr.bf16.mxu0 %v526_v32  ;;  %v483_v24 = vpop.permute.xlu1 %482  ;;  %v488_v0 = vpop.permute.xlu0 %487 }
  0xee   :  { %v2387_v52 = vadd.f32 %v2385_v33, %v2383_v61  ;;  %v398_v55 = vmul.f32 %v5522_v5, %v395_v36  ;;  %v2388_v56 = vmul.f32 %v5527_v8, %v395_v36  ;;  %v2389_v57 = vmul.f32 %v5532_v9, %v395_v36  ;;  %4490 = vmatpush3.bf16.msra.mxu0 %v526_v32 }
  0xef   :  { %v399_v42 = vadd.f32 %v397_v51, %v390_v53  ;;  %v406_v58 = vmul.f32 %v5537_v10, %v404_v19  ;;  %v407_v50 = vmul.f32 %v5542_v12, %v404_v19  ;;  %v2392_v49 = vmul.f32 %v5547_v13, %v404_v19 }
  0xf0   :  { %v400_v46 = vadd.f32 %v398_v55, %v391_v27  ;;  %v2390_v37 = vadd.f32 %v2388_v56, %v2386_v54  ;;  %v2391_v23 = vadd.f32 %v2389_v57, %v2387_v52  ;;  %v2393_v4 = vmul.f32 %v5552_v14, %v404_v19  ;;  %v5799_v55 = vld [vmem:[%s6676_s3 + $0x20] sm:$0xff]   ;;  %v5806_v56 = vld [vmem:[%s6676_s3 + $0x28] sm:$0xff]   ;;  %v5811_v57 = vld [vmem:[%s6676_s3 + $0x30] sm:$0xff]  }
  0xf1   :  { %v408_v41 = vadd.f32 %v406_v58, %v399_v42  ;;  %v500_v5 = vadd.f32 %v5703_v22, %v5686_v40  ;;  %v501_v8 = vadd.f32 %v5709_v2, %v5688_v15  ;;  %v502_v9 = vadd.f32 %v473_v11, %v375_v25  ;;  %v5818_v42 = vld [vmem:[%s6676_s3 + $0x38] sm:$0xff]   ;;  %v5823_v58 = vld [vmem:[%s6676_s3 + $0x40] sm:$0xff]  }
  0xf2   :  { %v409_v7 = vadd.f32 %v407_v50, %v400_v46  ;;  %v2394_v10 = vadd.f32 %v2392_v49, %v2390_v37  ;;  %v2395_v63 = vadd.f32 %v2393_v4, %v2391_v23  ;;  %v503_v12 = vadd.f32 %v478_v21, %v376_v47  ;;  %v5830_v50 = vld [vmem:[%s6676_s3 + $0x48] sm:$0xff]   ;;  %v5835_v49 = vld [vmem:[%s6676_s3 + $0x50] sm:$0xff]   ;;  %v5842_v46 = vld [vmem:[%s6676_s3 + $0x58] sm:$0xff]  }
  0xf3   :  { %v516_v13 = vmax.f32 %v500_v5, 0.0  ;;  %v517_v59 = vmax.f32 %v501_v8, 0.0  ;;  %v518_v61 = vmax.f32 %v502_v9, 0.0  ;;  %v504_v20 = vadd.f32 %v483_v24, %v408_v41  ;;  %v5847_v37 = vld [vmem:[%s6676_s3 + $0x60] sm:$0xff]   ;;  %v5854_v23 = vld [vmem:[%s6676_s3 + $0x68] sm:$0xff]   ;;  %v5859_v4 = vld [vmem:[%s6676_s3 + $0x70] sm:$0xff]  }
  0xf4   :  { %v519_v1 = vmax.f32 %v503_v12, 0.0  ;;  %v505_v14 = vadd.f32 %v488_v0, %v409_v7  ;;  %v5741_v40 = vpack.c.bf16 %v2413_v31, %v2412_v26  ;;  %v6715_v15 = vmax.f32 %v5603_v45, 0.0  ;;  %6720 = vst [vmem:[#allocation5_spill] sm:$0xff] %v5847_v37  ;;  %6721 = vst [vmem:[#allocation6_spill] sm:$0xff] %v5854_v23  ;;  %v5866_v41 = vld [vmem:[%s6676_s3 + $0x78] sm:$0xff]   ;;  %v5871_v5 = vld [vmem:[%s6676_s3 + $0x80] sm:$0xff]  }
  0xf5   :  { %v527_v47 = vpack.c.bf16 %v517_v59, %v516_v13  ;;  %v520_v3 = vmax.f32 %v504_v20, 0.0  ;;  %v6716_v32 = vmax.f32 %v5625_v38, 0.0  ;;  %v6717_v33 = vmax.f32 %v5623_v35, 0.0  ;;  %6722 = vst [vmem:[#allocation7_spill] sm:$0xff] %v5859_v4  ;;  %6723 = vst [vmem:[#allocation8_spill] sm:$0xff] %v5866_v41  ;;  %v5878_v8 = vld [vmem:[%s6676_s3 + $0x88] sm:$0xff]  }
  0xf6   :  { %v5747_v25 = vpack.c.bf16 %v6715_v15, %v2414_v6  ;;  %v6719_v18 = vmax.f32 %v5638_v30, 0.0  ;;  %v528_v31 = vpack.c.bf16 %v519_v1, %v518_v61  ;;  %v521_v48 = vmax.f32 %v505_v14, 0.0  ;;  %6724 = vst [vmem:[#allocation9_spill] sm:$0xff] %v5871_v5  ;;  %6725 = vst [vmem:[#allocation10_spill] sm:$0xff] %v5878_v8  ;;  %v5883_v9 = vld [vmem:[%s6676_s3 + $0x90] sm:$0xff]   ;;  %v5895_v7 = vld [vmem:[%s6676_s3 + $0xa0] sm:$0xff]  }
  0xf7   :  { %v5753_v36 = vpack.c.bf16 %v6717_v33, %v6716_v32  ;;  %v2404_v45 = vadd.f32 %v5662_v62, %v5678_v44  ;;  %v2405_v6 = vadd.f32 %v5664_v43, %v5684_v34  ;;  %4491 = vmatprep.subr.bf16.mxu0 %v527_v47  ;;  %v2406_v35 = vadd.f32 %v5690_v17, %v5703_v22  ;;  %v5914_v12 = vld [vmem:[%s6676_s3 + $0xb8] sm:$0xff]   ;;  %v5926_v13 = vld [vmem:[%s6676_s3 + $0xc8] sm:$0xff]   ;;  %v5931_v59 = vld [vmem:[%s6676_s3 + $0xd0] sm:$0xff]  }
  0xf8   :  { %v5759_v26 = vpack.c.bf16 %v6719_v18, %v6718_v16  ;;  %v2407_v38 = vadd.f32 %v5692_v28, %v5709_v2  ;;  %v2408_v39 = vadd.f32 %v5713_v60, %v473_v11  ;;  %v2409_v30 = vadd.f32 %v5715_v29, %v478_v21  ;;  %4492 = vmatpush3.bf16.msra.mxu0 %v527_v47  ;;  %v5782_v60 = vld [vmem:[%s6676_s3 + $0x8] sm:$0xff]   ;;  %v5787_v11 = vld [vmem:[%s6676_s3 + $0x10] sm:$0xff]   ;;  %v5794_v21 = vld [vmem:[%s6676_s3 + $0x18] sm:$0xff]  }
  0xf9   :  { %v529_v19 = vpack.c.bf16 %v521_v48, %v520_v3  ;;  %v2420_v53 = vmax.f32 %v2404_v45, 0.0  ;;  %v2421_v27 = vmax.f32 %v2405_v6, 0.0  ;;  %v2410_v54 = vadd.f32 %v2394_v10, %v483_v24  ;;  %4493 = vmatprep.subr.bf16.mxu0 %v528_v31  ;;  %6726 = vst [vmem:[#allocation11_spill] sm:$0xff] %v5883_v9  ;;  %v5890_v24 = vld [vmem:[%s6676_s3 + $0x98] sm:$0xff]   ;;  %6728 = vst [vmem:[#allocation13_spill] sm:$0xff] %v5895_v7  ;;  %v5902_v10 = vld [vmem:[%s6676_s3 + $0xa8] sm:$0xff]  }
  0xfa   :  { %v2422_v62 = vmax.f32 %v2406_v35, 0.0  ;;  %v2423_v44 = vmax.f32 %v2407_v38, 0.0  ;;  %v2424_v43 = vmax.f32 %v2408_v39, 0.0  ;;  %v2425_v34 = vmax.f32 %v2409_v30, 0.0  ;;  %6727 = vst [vmem:[#allocation12_spill] sm:$0xff] %v5890_v24  ;;  %6729 = vst [vmem:[#allocation14_spill] sm:$0xff] %v5902_v10 }
  0xfb   :  { %v5771_v51 = vpack.c.bf16 %v2421_v27, %v2420_v53  ;;  %v2411_v17 = vadd.f32 %v2395_v63, %v488_v0  ;;  %v2426_v22 = vmax.f32 %v2410_v54, 0.0  ;;  %v5907_v63 = vld [vmem:[%s6676_s3 + $0xb0] sm:$0xff]   ;;  %6731 = vst [vmem:[#allocation16_spill] sm:$0xff] %v5914_v12  ;;  %v5919_v0 = vld [vmem:[%s6676_s3 + $0xc0] sm:$0xff]   ;;  %6733 = vst [vmem:[#allocation18_spill] sm:$0xff] %v5926_v13 }
  0xfc   :  { %v5773_v52 = vpack.c.bf16 %v2423_v44, %v2422_v62  ;;  %v5775_v2 = vpack.c.bf16 %v2425_v34, %v2424_v43  ;;  %4494 = vmatpush3.bf16.msra.mxu0 %v528_v31  ;;  %6730 = vst [vmem:[#allocation15_spill] sm:$0xff] %v5907_v63  ;;  %6732 = vst [vmem:[#allocation17_spill] sm:$0xff] %v5919_v0  ;;  %v5938_v61 = vld [vmem:[%s6676_s3 + $0xd8] sm:$0xff]   ;;  %v5943_v20 = vld [vmem:[%s6676_s3 + $0xe0] sm:$0xff]  }
  0xfd   :  { %v2427_v29 = vmax.f32 %v2411_v17, 0.0  ;;  %4495 = vmatprep.subr.bf16.mxu0 %v529_v19  ;;  %6734 = vst [vmem:[#allocation19_spill] sm:$0xff] %v5931_v59  ;;  %6735 = vst [vmem:[#allocation20_spill] sm:$0xff] %v5938_v61  ;;  %v5950_v1 = vld [vmem:[%s6676_s3 + $0xe8] sm:$0xff]   ;;  %v5955_v14 = vld [vmem:[%s6676_s3 + $0xf0] sm:$0xff]  }
  0xfe   :  { %6736 = vst [vmem:[#allocation21_spill] sm:$0xff] %v5943_v20  ;;  %6737 = vst [vmem:[#allocation22_spill] sm:$0xff] %v5950_v1  ;;  %v5962_v15 = vld [vmem:[%s6676_s3 + $0xf8] sm:$0xff]   ;;  %v5967_v47 = vld [vmem:[%s6676_s3 + $0x100] sm:$0xff]  }
  0xff   :  { %v5777_v28 = vpack.c.bf16 %v2427_v29, %v2426_v22  ;;  %6738 = vst [vmem:[#allocation23_spill] sm:$0xff] %v5955_v14  ;;  %6739 = vst [vmem:[#allocation24_spill] sm:$0xff] %v5962_v15  ;;  %v5974_v3 = vld [vmem:[%s6676_s3 + $0x108] sm:$0xff]   ;;  %v5979_v32 = vld [vmem:[%s6676_s3 + $0x110] sm:$0xff]  }
 0x100   :  { %4496 = vmatpush3.bf16.msra.mxu0 %v529_v19  ;;  %6740 = vst [vmem:[#allocation25_spill] sm:$0xff] %v5967_v47  ;;  %6741 = vst [vmem:[#allocation26_spill] sm:$0xff] %v5974_v3  ;;  %v5986_v33 = vld [vmem:[%s6676_s3 + $0x118] sm:$0xff]   ;;  %v5991_v16 = vld [vmem:[%s6676_s3 + $0x120] sm:$0xff]  }
 0x101   :  { %6742 = vst [vmem:[#allocation27_spill] sm:$0xff] %v5979_v32  ;;  %6743 = vst [vmem:[#allocation28_spill] sm:$0xff] %v5986_v33  ;;  %v5998_v18 = vld [vmem:[%s6676_s3 + $0x128] sm:$0xff]   ;;  %v6003_v31 = vld [vmem:[%s6676_s3 + $0x130] sm:$0xff]  }
 0x102   :  { %6744 = vst [vmem:[#allocation29_spill] sm:$0xff] %v5991_v16  ;;  %6745 = vst [vmem:[#allocation30_spill] sm:$0xff] %v5998_v18  ;;  %v3957_v48 = vld [vmem:[%s6677_s4 + $0x10] sm:$0xff]  ;;  %v3958_v45 = vld [vmem:[%s6677_s4 + $0x18] sm:$0xff] }
 0x103   :  { %4498 = vmatmul.mubr.bf16.vlgmr.msra.gmra.mrb[0].mxu0 %v5782_v60  ;;  %6746 = vst [vmem:[#allocation31_spill] sm:$0xff] %v6003_v31  ;;  %v6011_v6 = vpack.c.bf16 %v3958_v45, %v3957_v48  ;;  %v6022_v35 = vld [vmem:[%s6676_s3 + $0x138] sm:$0xff]   ;;  %v6027_v38 = vld [vmem:[%s6676_s3 + $0x140] sm:$0xff]   ;;  %v1236_v30 = vld [vmem:[%s6677_s4 + $0x8] sm:$0xff] }
 0x104   :  { %4501 = vmatprep.mubr.bf16.mxu0 %v5787_v11  ;;  %6747 = vst [vmem:[#allocation32_spill] sm:$0xff] %v6022_v35  ;;  %6748 = vst [vmem:[#allocation33_spill] sm:$0xff] %v6027_v38  ;;  %v1235_v39 = vld [vmem:[%s6677_s4] sm:$0xff]  ;;  %v6044_v53 = vld [vmem:[%s6676_s3 + $0x148] sm:$0xff]  }
 0x105   :  { %5018 = vmatprep.subr.bf16.mxu1 %v6011_v6  ;;  %5030 = vmatprep.subr.bf16.mxu0 %v6011_v6  ;;  %v6035_v19 = vpack.c.bf16 %v1236_v30, %v1235_v39  ;;  %6749 = vst [vmem:[#allocation34_spill] sm:$0xff] %v6044_v53  ;;  %v6049_v27 = vld [vmem:[%s6676_s3 + $0x150] sm:$0xff]   ;;  %v6056_v54 = vld [vmem:[%s6676_s3 + $0x158] sm:$0xff]   ;;  %v6061_v62 = vld [vmem:[%s6676_s3 + $0x160] sm:$0xff]  }
 0x106   :  { %5020 = vmatpush3.bf16.msra.mxu1 %v6011_v6  ;;  %5032 = vmatpush3.bf16.msra.mxu0 %v6011_v6  ;;  %6750 = vst [vmem:[#allocation35_spill] sm:$0xff] %v6049_v27  ;;  %6751 = vst [vmem:[#allocation36_spill] sm:$0xff] %v6056_v54  ;;  %v6068_v44 = vld [vmem:[%s6676_s3 + $0x168] sm:$0xff]   ;;  %v6073_v43 = vld [vmem:[%s6676_s3 + $0x170] sm:$0xff]  }
 0x107   :  { %5022 = vmatprep.subr.bf16.mxu1 %v6035_v19  ;;  %5034 = vmatprep.subr.bf16.mxu0 %v6035_v19  ;;  %6752 = vst [vmem:[#allocation37_spill] sm:$0xff] %v6061_v62  ;;  %6753 = vst [vmem:[#allocation38_spill] sm:$0xff] %v6068_v44  ;;  %v6080_v34 = vld [vmem:[%s6676_s3 + $0x178] sm:$0xff]  }
 0x108   :  { %6754 = vst [vmem:[#allocation39_spill] sm:$0xff] %v6073_v43  ;;  %6755 = vst [vmem:[#allocation40_spill] sm:$0xff] %v6080_v34 }
 0x10b   :  { %4502 = vmatmul.mubr.bf16.gmra.mrb[4].mxu0 %v5794_v21 }
 0x10c   :  { %4505 = vmatprep.mubr.bf16.mxu0 %v5799_v55 }
 0x113   :  { %4506 = vmatmul.mubr.bf16.gmra.mrb[8].mxu0 %v5806_v56 }
 0x114   :  { %4509 = vmatprep.mubr.bf16.mxu0 %v5811_v57 }
 0x11b   :  { %4510 = vmatmul.mubr.bf16.gmra.mrb[12].mxu0 %v5818_v42 }
 0x11c   :  { %4513 = vmatprep.mubr.bf16.mxu0 %v5823_v58 }
 0x123   :  { %4514 = vmatmul.mubr.bf16.gmra.mrb[16].mxu0 %v5830_v50 }
 0x124   :  { %4517 = vmatprep.mubr.bf16.mxu0 %v5835_v49 }
 0x12b   :  { %4518 = vmatmul.mubr.bf16.gmra.mrb[20].mxu0 %v5842_v46 }
 0x12c   :  { %4521 = vmatprep.mubr.bf16.mxu0 %v5847_v37 }
 0x133   :  { %4522 = vmatmul.mubr.bf16.gmra.mrb[24].mxu0 %v5854_v23 }
 0x134   :  { %4525 = vmatprep.mubr.bf16.mxu0 %v5859_v4 }
 0x13b   :  { %4526 = vmatmul.mubr.bf16.gmra.mrb[28].mxu0 %v5866_v41 }
 0x13c   :  { %4529 = vmatprep.mubr.bf16.mxu0 %v5871_v5 }
 0x143   :  { %4530 = vmatmul.mubr.bf16.gmra.mrb[32].mxu0 %v5878_v8 }
 0x144   :  { %4533 = vmatprep.mubr.bf16.mxu0 %v5883_v9 }
 0x14b   :  { %4534 = vmatmul.mubr.bf16.gmra.mrb[36].mxu0 %v5890_v24 }
 0x14c   :  { %4537 = vmatprep.mubr.bf16.mxu0 %v5895_v7 }
 0x153   :  { %4538 = vmatmul.mubr.bf16.gmra.mrb[40].mxu0 %v5902_v10  ;;  %v4024_v10 = vld [vmem:[%s6677_s4 + $0x28] sm:$0xff] }
 0x154   :  { %4541 = vmatprep.mubr.bf16.mxu0 %v5907_v63  ;;  %v4023_v63 = vld [vmem:[%s6677_s4 + $0x20] sm:$0xff] }
 0x155   :  { %v6154_v8 = vpack.c.bf16 %v4024_v10, %v4023_v63 }
 0x15b   :  { %4542 = vmatmul.mubr.bf16.gmra.mrb[44].mxu0 %v5914_v12 }
 0x15c   :  { %4545 = vmatprep.mubr.bf16.mxu0 %v5919_v0 }
 0x163   :  { %4546 = vmatmul.mubr.bf16.gmra.mrb[48].mxu0 %v5926_v13 }
 0x164   :  { %4549 = vmatprep.mubr.bf16.mxu0 %v5931_v59 }
 0x16b   :  { %4550 = vmatmul.mubr.bf16.gmra.mrb[52].mxu0 %v5938_v61 }
 0x16c   :  { %4553 = vmatprep.mubr.bf16.mxu0 %v5943_v20 }
 0x173   :  { %4554 = vmatmul.mubr.bf16.gmra.mrb[56].mxu0 %v5950_v1 }
 0x174   :  { %4557 = vmatprep.mubr.bf16.mxu0 %v5955_v14 }
 0x17b   :  { %4558 = vmatmul.mubr.bf16.gmra.mrb[60].mxu0 %v5962_v15 }
 0x17c   :  { %4561 = vmatprep.mubr.bf16.mxu0 %v5967_v47 }
 0x183   :  { %4562 = vmatmul.mubr.bf16.gmra.mrb[64].mxu0 %v5974_v3 }
 0x184   :  { %4565 = vmatprep.mubr.bf16.mxu0 %v5979_v32 }
 0x18b   :  { %4566 = vmatmul.mubr.bf16.gmra.mrb[68].mxu0 %v5986_v33 }
 0x18c   :  { %4569 = vmatprep.mubr.bf16.mxu0 %v5991_v16 }
 0x193   :  { %4570 = vmatmul.mubr.bf16.gmra.mrb[72].mxu0 %v5998_v18 }
 0x194   :  { %4573 = vmatprep.mubr.bf16.mxu0 %v6003_v31 }
 0x19b   :  { %4574 = vmatmul.mubr.bf16.gmra.mrb[76].mxu0 %v6022_v35 }
 0x19c   :  { %4577 = vmatprep.mubr.bf16.mxu0 %v6027_v38 }
 0x1a3   :  { %4578 = vmatmul.mubr.bf16.gmra.mrb[80].mxu0 %v6044_v53 }
 0x1a4   :  { %4581 = vmatprep.mubr.bf16.mxu0 %v6049_v27 }
 0x1ab   :  { %4582 = vmatmul.mubr.bf16.gmra.mrb[84].mxu0 %v6056_v54 }
 0x1ac   :  { %4585 = vmatprep.mubr.bf16.mxu0 %v6061_v62 }
 0x1b3   :  { %4586 = vmatmul.mubr.bf16.gmra.mrb[88].mxu0 %v6068_v44 }
 0x1b4   :  { %4589 = vmatprep.mubr.bf16.mxu0 %v6073_v43 }
 0x1bb   :  { %4590 = vmatmul.mubr.bf16.gmra.mrb[92].mxu0 %v6080_v34 }
 0x1d6   :  { %v6083_v17 = vpop.f32.mrb[0].mxu0 }
 0x1d7   :  { %v6085_v22 = vpop.f32.mrb[1].mxu0 }
 0x1d8   :  { %v6087_v29 = vpop.f32.mrb[2].mxu0 }
 0x1d9   :  { %v6089_v48 = vpop.f32.mrb[3].mxu0 }
 0x1de   :  { %v6091_v45 = vpop.f32.mrb[4].mxu0 }
 0x1df   :  { %v6093_v39 = vpop.f32.mrb[5].mxu0 }
 0x1e0   :  { %v6095_v30 = vpop.f32.mrb[6].mxu0 }
 0x1e1   :  { %v6097_v43 = vpop.f32.mrb[7].mxu0 }
 0x1e6   :  { %v6099_v44 = vpop.f32.mrb[8].mxu0 }
 0x1e7   :  { %v6101_v62 = vpop.f32.mrb[9].mxu0 }
 0x1e8   :  { %v6103_v34 = vpop.f32.mrb[10].mxu0 }
 0x1e9   :  { %v6105_v54 = vpop.f32.mrb[11].mxu0 }
 0x1ee   :  { %v6107_v27 = vpop.f32.mrb[12].mxu0 }
 0x1ef   :  { %v6109_v53 = vpop.f32.mrb[13].mxu0 }
 0x1f0   :  { %v6111_v38 = vpop.f32.mrb[14].mxu0 }
 0x1f1   :  { %v6113_v35 = vpop.f32.mrb[15].mxu0 }
 0x1f6   :  { %v6115_v31 = vpop.f32.mrb[16].mxu0 }
 0x1f7   :  { %v6117_v18 = vpop.f32.mrb[17].mxu0 }
 0x1f8   :  { %v6119_v16 = vpop.f32.mrb[18].mxu0 }
 0x1f9   :  { %v6121_v33 = vpop.f32.mrb[19].mxu0 }
 0x1fe   :  { %v6123_v32 = vpop.f32.mrb[20].mxu0 }
 0x1ff   :  { %v6125_v3 = vpop.f32.mrb[21].mxu0 }
 0x200   :  { %v6127_v47 = vpop.f32.mrb[22].mxu0 }
 0x201   :  { %v6129_v15 = vpop.f32.mrb[23].mxu0 }
 0x206   :  { %v6131_v14 = vpop.f32.mrb[24].mxu0 }
 0x207   :  { %v6133_v1 = vpop.f32.mrb[25].mxu0 }
 0x208   :  { %v6135_v20 = vpop.f32.mrb[26].mxu0 }
 0x209   :  { %v6137_v61 = vpop.f32.mrb[27].mxu0 }
 0x20e   :  { %v6139_v59 = vpop.f32.mrb[28].mxu0 }
 0x20f   :  { %v6141_v13 = vpop.f32.mrb[29].mxu0 }
 0x210   :  { %v6143_v0 = vpop.f32.mrb[30].mxu0 }
 0x211   :  { %v6145_v12 = vpop.f32.mrb[31].mxu0 }
 0x216   :  { %v4531_v7 = vpop.f32.mrb[32].mxu0 }
 0x217   :  { %v980_v24 = vpop.f32.mrb[33].mxu0 }
 0x218   :  { %v4532_v9 = vpop.f32.mrb[34].mxu0  ;;  %4597 = vmatprep.mubr.msk.f32.mxu1 %vm1240_vm0, %v980_v24 }
 0x219   :  { %v983_v5 = vpop.f32.mrb[35].mxu0 }
 0x21a   :  { %4598 = vmatmul.mubr.msk.f32.vlgmr.msra.gmra.mrb[0].mxu1 %vm1240_vm0, %v983_v5 }
 0x21b   :  { %5024 = vmatpush3.bf16.msra.mxu1 %v6035_v19  ;;  %4600 = vmatprep.mubr.msk.f32.mxu1 %vm1240_vm0, %v4531_v7 }
 0x21c   :  { %5026 = vmatprep.subr.bf16.mxu1 %v6154_v8 }
 0x21e   :  { %v4535_v41 = vpop.f32.mrb[36].mxu0  ;;  %4601 = vmatmul.mubr.msk.f32.gmra.mrb[2].mxu1 %vm1240_vm0, %v4532_v9 }
 0x21f   :  { %v996_v4 = vpop.f32.mrb[37].mxu0 }
 0x220   :  { %v4536_v23 = vpop.f32.mrb[38].mxu0  ;;  %4603 = vmatprep.mubr.msk.f32.mxu1 %vm1240_vm0, %v996_v4 }
 0x221   :  { %v999_v37 = vpop.f32.mrb[39].mxu0 }
 0x222   :  { %4604 = vmatmul.mubr.msk.f32.gmra.mrb[4].mxu1 %vm1240_vm0, %v999_v37 }
 0x223   :  { %4606 = vmatprep.mubr.msk.f32.mxu1 %vm1240_vm0, %v4535_v41 }
 0x226   :  { %v4539_v24 = vpop.f32.mrb[40].mxu0  ;;  %4607 = vmatmul.mubr.msk.f32.gmra.mrb[6].mxu1 %vm1240_vm0, %v4536_v23 }
 0x227   :  { %v1012_v5 = vpop.f32.mrb[41].mxu0 }
 0x228   :  { %v4540_v10 = vpop.f32.mrb[42].mxu0  ;;  %4609 = vmatprep.mubr.msk.f32.mxu1 %vm1240_vm0, %v1012_v5 }
 0x229   :  { %v1015_v7 = vpop.f32.mrb[43].mxu0 }
 0x22a   :  { %4610 = vmatmul.mubr.msk.f32.gmra.mrb[8].mxu1 %vm1240_vm0, %v1015_v7 }
 0x22b   :  { %4612 = vmatprep.mubr.msk.f32.mxu1 %vm1240_vm0, %v4539_v24 }
 0x22e   :  { %v4543_v9 = vpop.f32.mrb[44].mxu0  ;;  %4613 = vmatmul.mubr.msk.f32.gmra.mrb[10].mxu1 %vm1240_vm0, %v4540_v10 }
 0x22f   :  { %v1028_v4 = vpop.f32.mrb[45].mxu0 }
 0x230   :  { %v4544_v63 = vpop.f32.mrb[46].mxu0  ;;  %4615 = vmatprep.mubr.msk.f32.mxu1 %vm1240_vm0, %v1028_v4 }
 0x231   :  { %v1031_v37 = vpop.f32.mrb[47].mxu0 }
 0x232   :  { %4616 = vmatmul.mubr.msk.f32.gmra.mrb[12].mxu1 %vm1240_vm0, %v1031_v37 }
 0x233   :  { %4618 = vmatprep.mubr.msk.f32.mxu1 %vm1240_vm0, %v4543_v9 }
 0x236   :  { %v4547_v23 = vpop.f32.mrb[48].mxu0  ;;  %4619 = vmatmul.mubr.msk.f32.gmra.mrb[14].mxu1 %vm1240_vm0, %v4544_v63 }
 0x237   :  { %v1044_v41 = vpop.f32.mrb[49].mxu0 }
 0x238   :  { %v4548_v5 = vpop.f32.mrb[50].mxu0  ;;  %4621 = vmatprep.mubr.msk.f32.mxu1 %vm1240_vm0, %v1044_v41 }
 0x239   :  { %v1047_v24 = vpop.f32.mrb[51].mxu0 }
 0x23a   :  { %4622 = vmatmul.mubr.msk.f32.gmra.mrb[16].mxu1 %vm1240_vm0, %v1047_v24 }
 0x23b   :  { %4624 = vmatprep.mubr.msk.f32.mxu1 %vm1240_vm0, %v4547_v23 }
 0x23e   :  { %v4551_v10 = vpop.f32.mrb[52].mxu0  ;;  %4625 = vmatmul.mubr.msk.f32.gmra.mrb[18].mxu1 %vm1240_vm0, %v4548_v5 }
 0x23f   :  { %v1060_v7 = vpop.f32.mrb[53].mxu0 }
 0x240   :  { %v4552_v4 = vpop.f32.mrb[54].mxu0  ;;  %4627 = vmatprep.mubr.msk.f32.mxu1 %vm1240_vm0, %v1060_v7 }
 0x241   :  { %v1063_v9 = vpop.f32.mrb[55].mxu0 }
 0x242   :  { %4628 = vmatmul.mubr.msk.f32.gmra.mrb[20].mxu1 %vm1240_vm0, %v1063_v9 }
 0x243   :  { %4630 = vmatprep.mubr.msk.f32.mxu1 %vm1240_vm0, %v4551_v10 }
 0x246   :  { %v4555_v63 = vpop.f32.mrb[56].mxu0  ;;  %4631 = vmatmul.mubr.msk.f32.gmra.mrb[22].mxu1 %vm1240_vm0, %v4552_v4 }
 0x247   :  { %v1076_v37 = vpop.f32.mrb[57].mxu0 }
 0x248   :  { %v4556_v41 = vpop.f32.mrb[58].mxu0  ;;  %4633 = vmatprep.mubr.msk.f32.mxu1 %vm1240_vm0, %v1076_v37 }
 0x249   :  { %v1079_v23 = vpop.f32.mrb[59].mxu0 }
 0x24a   :  { %4634 = vmatmul.mubr.msk.f32.gmra.mrb[24].mxu1 %vm1240_vm0, %v1079_v23 }
 0x24b   :  { %4636 = vmatprep.mubr.msk.f32.mxu1 %vm1240_vm0, %v4555_v63 }
 0x24e   :  { %v4559_v5 = vpop.f32.mrb[60].mxu0  ;;  %4637 = vmatmul.mubr.msk.f32.gmra.mrb[26].mxu1 %vm1240_vm0, %v4556_v41 }
 0x24f   :  { %v1092_v24 = vpop.f32.mrb[61].mxu0 }
 0x250   :  { %v4560_v7 = vpop.f32.mrb[62].mxu0  ;;  %4639 = vmatprep.mubr.msk.f32.mxu1 %vm1240_vm0, %v1092_v24 }
 0x251   :  { %v1095_v10 = vpop.f32.mrb[63].mxu0 }
 0x252   :  { %4640 = vmatmul.mubr.msk.f32.gmra.mrb[28].mxu1 %vm1240_vm0, %v1095_v10 }
 0x253   :  { %4642 = vmatprep.mubr.msk.f32.mxu1 %vm1240_vm0, %v4559_v5 }
 0x256   :  { %4643 = vmatmul.mubr.msk.f32.gmra.mrb[30].mxu1 %vm1240_vm0, %v4560_v7  ;;  %v6189_v4 = vpop.f32.mrb[64].mxu0 }
 0x257   :  { %4649 = vmatprep.mubr.msk.f32.mxu1 %vm1240_vm0, %v6085_v22  ;;  %v6193_v9 = vpop.f32.mrb[65].mxu0 }
 0x258   :  { %v6195_v63 = vpop.f32.mrb[66].mxu0 }
 0x259   :  { %v6197_v37 = vpop.f32.mrb[67].mxu0 }
 0x25a   :  { %4650 = vmatmul.mubr.msk.f32.vlgmr.msra.gmra.mrb[0].mxu1 %vm1240_vm0, %v6089_v48 }
 0x25b   :  { %5028 = vmatpush3.bf16.msra.mxu1 %v6154_v8  ;;  %4652 = vmatprep.mubr.msk.f32.mxu1 %vm1240_vm0, %v6083_v17 }
 0x25c   :  { %4749 = vmatprep.subr.bf16.mxu1 %v5741_v40 }
 0x25e   :  { %4653 = vmatmul.mubr.msk.f32.gmra.mrb[2].mxu1 %vm1240_vm0, %v6087_v29  ;;  %v6207_v22 = vpop.f32.mrb[68].mxu0 }
 0x25f   :  { %4655 = vmatprep.mubr.msk.f32.mxu1 %vm1240_vm0, %v6093_v39  ;;  %v1124_v41 = vpop.f32.mrb[69].mxu0 }
 0x260   :  { %v6211_v23 = vpop.f32.mrb[70].mxu0 }
 0x261   :  { %v1127_v5 = vpop.f32.mrb[71].mxu0 }
 0x262   :  { %4656 = vmatmul.mubr.msk.f32.gmra.mrb[4].mxu1 %vm1240_vm0, %v6097_v43 }
 0x263   :  { %4658 = vmatprep.mubr.msk.f32.mxu1 %vm1240_vm0, %v6091_v45 }
 0x266   :  { %4659 = vmatmul.mubr.msk.f32.gmra.mrb[6].mxu1 %vm1240_vm0, %v6095_v30  ;;  %v6219_v17 = vpop.f32.mrb[72].mxu0 }
 0x267   :  { %4661 = vmatprep.mubr.msk.f32.mxu1 %vm1240_vm0, %v6101_v62  ;;  %v1140_v29 = vpop.f32.mrb[73].mxu0 }
 0x268   :  { %v6223_v48 = vpop.f32.mrb[74].mxu0 }
 0x269   :  { %v1143_v39 = vpop.f32.mrb[75].mxu0 }
 0x26a   :  { %4662 = vmatmul.mubr.msk.f32.gmra.mrb[8].mxu1 %vm1240_vm0, %v6105_v54 }
 0x26b   :  { %4664 = vmatprep.mubr.msk.f32.mxu1 %vm1240_vm0, %v6099_v44 }
 0x26e   :  { %4665 = vmatmul.mubr.msk.f32.gmra.mrb[10].mxu1 %vm1240_vm0, %v6103_v34  ;;  %v6231_v43 = vpop.f32.mrb[76].mxu0 }
 0x26f   :  { %4667 = vmatprep.mubr.msk.f32.mxu1 %vm1240_vm0, %v6109_v53  ;;  %v1156_v45 = vpop.f32.mrb[77].mxu0 }
 0x270   :  { %v6235_v62 = vpop.f32.mrb[78].mxu0 }
 0x271   :  { %v1159_v30 = vpop.f32.mrb[79].mxu0 }
 0x272   :  { %4668 = vmatmul.mubr.msk.f32.gmra.mrb[12].mxu1 %vm1240_vm0, %v6113_v35 }
 0x273   :  { %4670 = vmatprep.mubr.msk.f32.mxu1 %vm1240_vm0, %v6107_v27 }
 0x276   :  { %4671 = vmatmul.mubr.msk.f32.gmra.mrb[14].mxu1 %vm1240_vm0, %v6111_v38  ;;  %v6243_v54 = vpop.f32.mrb[80].mxu0 }
 0x277   :  { %4673 = vmatprep.mubr.msk.f32.mxu1 %vm1240_vm0, %v6117_v18  ;;  %v1172_v44 = vpop.f32.mrb[81].mxu0 }
 0x278   :  { %v6247_v53 = vpop.f32.mrb[82].mxu0 }
 0x279   :  { %v1175_v34 = vpop.f32.mrb[83].mxu0 }
 0x27a   :  { %4674 = vmatmul.mubr.msk.f32.gmra.mrb[16].mxu1 %vm1240_vm0, %v6121_v33 }
 0x27b   :  { %4676 = vmatprep.mubr.msk.f32.mxu1 %vm1240_vm0, %v6115_v31 }
 0x27e   :  { %4677 = vmatmul.mubr.msk.f32.gmra.mrb[18].mxu1 %vm1240_vm0, %v6119_v16  ;;  %v4583_v35 = vpop.f32.mrb[84].mxu0 }
 0x27f   :  { %4679 = vmatprep.mubr.msk.f32.mxu1 %vm1240_vm0, %v6125_v3  ;;  %v1188_v38 = vpop.f32.mrb[85].mxu0 }
 0x280   :  { %v4584_v27 = vpop.f32.mrb[86].mxu0 }
 0x281   :  { %v1191_v18 = vpop.f32.mrb[87].mxu0 }
 0x282   :  { %4680 = vmatmul.mubr.msk.f32.gmra.mrb[20].mxu1 %vm1240_vm0, %v6129_v15 }
 0x283   :  { %4682 = vmatprep.mubr.msk.f32.mxu1 %vm1240_vm0, %v6123_v32 }
 0x286   :  { %4683 = vmatmul.mubr.msk.f32.gmra.mrb[22].mxu1 %vm1240_vm0, %v6127_v47  ;;  %v4587_v33 = vpop.f32.mrb[88].mxu0 }
 0x287   :  { %4685 = vmatprep.mubr.msk.f32.mxu1 %vm1240_vm0, %v6133_v1  ;;  %v1204_v16 = vpop.f32.mrb[89].mxu0  ;;  %v6780_v1 = vld [vmem:[#allocation29_spill] sm:$0xff] }
 0x288   :  { %v4588_v31 = vpop.f32.mrb[90].mxu0 }
 0x289   :  { %v1207_v24 = vpop.f32.mrb[91].mxu0 }
 0x28a   :  { %4686 = vmatmul.mubr.msk.f32.gmra.mrb[24].mxu1 %vm1240_vm0, %v6137_v61  ;;  %v6778_v61 = vld [vmem:[#allocation27_spill] sm:$0xff] }
 0x28b   :  { %4688 = vmatprep.mubr.msk.f32.mxu1 %vm1240_vm0, %v6131_v14  ;;  %v6781_v14 = vld [vmem:[#allocation30_spill] sm:$0xff] }
 0x28e   :  { %4689 = vmatmul.mubr.msk.f32.gmra.mrb[26].mxu1 %vm1240_vm0, %v6135_v20  ;;  %v4591_v15 = vpop.f32.mrb[92].mxu0  ;;  %v6779_v20 = vld [vmem:[#allocation28_spill] sm:$0xff] }
 0x28f   :  { %4691 = vmatprep.mubr.msk.f32.mxu1 %vm1240_vm0, %v6141_v13  ;;  %v1220_v47 = vpop.f32.mrb[93].mxu0  ;;  %v6776_v13 = vld [vmem:[#allocation25_spill] sm:$0xff] }
 0x290   :  { %v4592_v3 = vpop.f32.mrb[94].mxu0 }
 0x291   :  { %v1223_v32 = vpop.f32.mrb[95].mxu0 }
 0x292   :  { %4692 = vmatmul.mubr.msk.f32.gmra.mrb[28].mxu1 %vm1240_vm0, %v6145_v12  ;;  %v6774_v12 = vld [vmem:[#allocation23_spill] sm:$0xff] }
 0x293   :  { %4694 = vmatprep.mubr.msk.f32.mxu1 %vm1240_vm0, %v6139_v59  ;;  %v6777_v59 = vld [vmem:[#allocation26_spill] sm:$0xff] }
 0x296   :  { %4695 = vmatmul.mubr.msk.f32.gmra.mrb[30].mxu1 %vm1240_vm0, %v6143_v0  ;;  %v6775_v0 = vld [vmem:[#allocation24_spill] sm:$0xff] }
 0x297   :  { %4701 = vmatprep.mubr.msk.f32.mxu1 %vm1240_vm0, %v6193_v9 }
 0x29a   :  { %4702 = vmatmul.mubr.msk.f32.vlgmr.msra.gmra.mrb[0].mxu1 %vm1240_vm0, %v6197_v37  ;;  %v6784_v37 = vld [vmem:[#allocation33_spill] sm:$0xff] }
 0x29b   :  { %4750 = vmatpush3.bf16.msra.mxu1 %v5741_v40  ;;  %4704 = vmatprep.mubr.msk.f32.mxu1 %vm1240_vm0, %v6189_v4  ;;  %v5292_v40 = vld [vmem:[%s6676_s3] sm:$0xff]   ;;  %s5321_s3 = smov [#allocation2]  }
 0x29c   :  { %4751 = vmatprep.subr.bf16.mxu1 %v5747_v25  ;;  %s3892_s8 = sshll.u32 %s5321_s3, 4  ;;  %s3893_s8 = int_to_ptr.vmem [resolvable:$true] %s3892_s8 }
 0x29d   :  { %s5293_s9 = scalar_lea.vmem %s3893_s8, 8192  ;;  %p5298_p1 = scmp.lt.s32.totalorder %s3893_s8, %s3893_s8 }
 0x29e   :  { %4705 = vmatmul.mubr.msk.f32.gmra.mrb[2].mxu1 %vm1240_vm0, %v6195_v63  ;;  %v6783_v63 = vld [vmem:[#allocation32_spill] sm:$0xff]  ;;  %p5294_p0 = scmp.ne.s32.totalorder %s3893_s8, %s5293_s9  ;;  %p5299_p2 = scmp.lt.s32.totalorder %s5293_s9, %s5293_s9 }
 0x29f   :  { %4752 = vmatpush3.bf16.msra.mxu1 %v5747_v25  ;;  %4707 = vmatprep.mubr.msk.f32.mxu1 %vm1240_vm0, %v1124_v41  ;;  %v6756_v25 = vld [vmem:[#allocation5_spill] sm:$0xff] }
 0x2a0   :  { %4753 = vmatprep.subr.bf16.mxu1 %v5753_v36  ;;  %p5300_p3 = por %p5299_p2, %p5298_p1 }
 0x2a2   :  { %4708 = vmatmul.mubr.msk.f32.gmra.mrb[4].mxu1 %vm1240_vm0, %v1127_v5  ;;  %p5301_p4 = pnand %p5300_p3, %p5294_p0 }
 0x2a3   :  { %4754 = vmatpush3.bf16.msra.mxu1 %v5753_v36  ;;  %4710 = vmatprep.mubr.msk.f32.mxu1 %vm1240_vm0, %v6207_v22  ;;  %v6757_v36 = vld [vmem:[#allocation6_spill] sm:$0xff] }
 0x2a4   :  { %4755 = vmatprep.subr.bf16.mxu1 %v5759_v26 }
 0x2a6   :  { %4711 = vmatmul.mubr.msk.f32.gmra.mrb[6].mxu1 %vm1240_vm0, %v6211_v23 }
 0x2a7   :  { %4756 = vmatpush3.bf16.msra.mxu1 %v5759_v26  ;;  %4713 = vmatprep.mubr.msk.f32.mxu1 %vm1240_vm0, %v1140_v29  ;;  %v6758_v26 = vld [vmem:[#allocation7_spill] sm:$0xff] }
 0x2a8   :  { %4757 = vmatprep.subr.bf16.mxu1 %v5771_v51  ;;  %v6786_v29 = vld [vmem:[#allocation35_spill] sm:$0xff] }
 0x2aa   :  { %4714 = vmatmul.mubr.msk.f32.gmra.mrb[8].mxu1 %vm1240_vm0, %v1143_v39 }
 0x2ab   :  { %4758 = vmatpush3.bf16.msra.mxu1 %v5771_v51  ;;  %4716 = vmatprep.mubr.msk.f32.mxu1 %vm1240_vm0, %v6219_v17  ;;  %v6759_v51 = vld [vmem:[#allocation8_spill] sm:$0xff]  ;;  %v6785_v17 = vld [vmem:[#allocation34_spill] sm:$0xff] }
 0x2ac   :  { %4759 = vmatprep.subr.bf16.mxu1 %v5773_v52 }
 0x2ae   :  { %4717 = vmatmul.mubr.msk.f32.gmra.mrb[10].mxu1 %vm1240_vm0, %v6223_v48 }
 0x2af   :  { %4760 = vmatpush3.bf16.msra.mxu1 %v5773_v52  ;;  %4719 = vmatprep.mubr.msk.f32.mxu1 %vm1240_vm0, %v1156_v45  ;;  %v6760_v52 = vld [vmem:[#allocation9_spill] sm:$0xff] }
 0x2b0   :  { %4761 = vmatprep.subr.bf16.mxu1 %v5775_v2 }
 0x2b2   :  { %4720 = vmatmul.mubr.msk.f32.gmra.mrb[12].mxu1 %vm1240_vm0, %v1159_v30  ;;  %v6788_v30 = vld [vmem:[#allocation37_spill] sm:$0xff] }
 0x2b3   :  { %4762 = vmatpush3.bf16.msra.mxu1 %v5775_v2  ;;  %4722 = vmatprep.mubr.msk.f32.mxu1 %vm1240_vm0, %v6231_v43  ;;  %v6761_v2 = vld [vmem:[#allocation10_spill] sm:$0xff] }
 0x2b4   :  { %4763 = vmatprep.subr.bf16.mxu1 %v5777_v28 }
 0x2b6   :  { %4723 = vmatmul.mubr.msk.f32.gmra.mrb[14].mxu1 %vm1240_vm0, %v6235_v62  ;;  %v6787_v62 = vld [vmem:[#allocation36_spill] sm:$0xff] }
 0x2b7   :  { %4764 = vmatpush3.bf16.msra.mxu1 %v5777_v28  ;;  %4725 = vmatprep.mubr.msk.f32.mxu1 %vm1240_vm0, %v1172_v44  ;;  %v6762_v28 = vld [vmem:[#allocation11_spill] sm:$0xff] }
 0x2b8   :  { %5041 = vmatprep.subr.bf16.mxu1 %v6011_v6 }
 0x2ba   :  { %4726 = vmatmul.mubr.msk.f32.gmra.mrb[16].mxu1 %vm1240_vm0, %v1175_v34 }
 0x2bb   :  { %4728 = vmatprep.mubr.msk.f32.mxu1 %vm1240_vm0, %v6243_v54 }
 0x2be   :  { %4729 = vmatmul.mubr.msk.f32.gmra.mrb[18].mxu1 %vm1240_vm0, %v6247_v53 }
 0x2bf   :  { %4731 = vmatprep.mubr.msk.f32.mxu1 %vm1240_vm0, %v1188_v38  ;;  %v6790_v38 = vld [vmem:[#allocation39_spill] sm:$0xff] }
 0x2c2   :  { %4732 = vmatmul.mubr.msk.f32.gmra.mrb[20].mxu1 %vm1240_vm0, %v1191_v18 }
 0x2c3   :  { %4734 = vmatprep.mubr.msk.f32.mxu1 %vm1240_vm0, %v4583_v35  ;;  %v6789_v35 = vld [vmem:[#allocation38_spill] sm:$0xff] }
 0x2c6   :  { %4735 = vmatmul.mubr.msk.f32.gmra.mrb[22].mxu1 %vm1240_vm0, %v4584_v27 }
 0x2c7   :  { %4737 = vmatprep.mubr.msk.f32.mxu1 %vm1240_vm0, %v1204_v16 }
 0x2ca   :  { %4738 = vmatmul.mubr.msk.f32.gmra.mrb[24].mxu1 %vm1240_vm0, %v1207_v24 }
 0x2cb   :  { %4740 = vmatprep.mubr.msk.f32.mxu1 %vm1240_vm0, %v4587_v33 }
 0x2ce   :  { %4741 = vmatmul.mubr.msk.f32.gmra.mrb[26].mxu1 %vm1240_vm0, %v4588_v31  ;;  %v6791_v31 = vld [vmem:[#allocation40_spill] sm:$0xff] }
 0x2cf   :  { %4743 = vmatprep.mubr.msk.f32.mxu1 %vm1240_vm0, %v1220_v47 }
 0x2d2   :  { %4744 = vmatmul.mubr.msk.f32.gmra.mrb[28].mxu1 %vm1240_vm0, %v1223_v32 }
 0x2d3   :  { %4746 = vmatprep.mubr.msk.f32.mxu1 %vm1240_vm0, %v4591_v15 }
 0x2d6   :  { %4747 = vmatmul.mubr.msk.f32.gmra.mrb[30].mxu1 %vm1240_vm0, %v4592_v3 }
 0x2d7   :  { %4765 = vmatprep.mubr.bf16.mxu1 %v5292_v40 }
 0x2da   :  { %4766 = vmatmul.mubr.bf16.vlgmr.msra.gmra.mrb[32].mxu1 %v5782_v60  ;;  %v6763_v60 = vld [vmem:[#allocation12_spill] sm:$0xff] }
 0x2db   :  { %4769 = vmatprep.mubr.bf16.mxu1 %v5787_v11  ;;  %5042 = vmatpush3.bf16.msra.mxu1 %v6011_v6  ;;  %v6764_v11 = vld [vmem:[#allocation13_spill] sm:$0xff]  ;;  %v6782_v6 = vld [vmem:[#allocation31_spill] sm:$0xff] }
 0x2e2   :  { %4770 = vmatmul.mubr.bf16.gmra.mrb[36].mxu1 %v5794_v21  ;;  %v6765_v21 = vld [vmem:[#allocation14_spill] sm:$0xff] }
 0x2e3   :  { %4773 = vmatprep.mubr.bf16.mxu1 %v5799_v55  ;;  %v6766_v55 = vld [vmem:[#allocation15_spill] sm:$0xff] }
 0x2ea   :  { %4774 = vmatmul.mubr.bf16.gmra.mrb[40].mxu1 %v5806_v56  ;;  %v6767_v56 = vld [vmem:[#allocation16_spill] sm:$0xff] }
 0x2eb   :  { %4777 = vmatprep.mubr.bf16.mxu1 %v5811_v57  ;;  %v6768_v57 = vld [vmem:[#allocation17_spill] sm:$0xff] }
 0x2f2   :  { %4778 = vmatmul.mubr.bf16.gmra.mrb[44].mxu1 %v5818_v42  ;;  %v6769_v42 = vld [vmem:[#allocation18_spill] sm:$0xff] }
 0x2f3   :  { %4781 = vmatprep.mubr.bf16.mxu1 %v5823_v58  ;;  %v6770_v58 = vld [vmem:[#allocation19_spill] sm:$0xff] }
 0x2fa   :  { %4782 = vmatmul.mubr.bf16.gmra.mrb[48].mxu1 %v5830_v50  ;;  %v6771_v50 = vld [vmem:[#allocation20_spill] sm:$0xff] }
 0x2fb   :  { %4785 = vmatprep.mubr.bf16.mxu1 %v5835_v49  ;;  %v6772_v49 = vld [vmem:[#allocation21_spill] sm:$0xff] }
 0x302   :  { %4786 = vmatmul.mubr.bf16.gmra.mrb[52].mxu1 %v5842_v46  ;;  %v6773_v46 = vld [vmem:[#allocation22_spill] sm:$0xff] }
 0x303   :  { %4789 = vmatprep.mubr.bf16.mxu1 %v6756_v25 }
 0x30a   :  { %4790 = vmatmul.mubr.bf16.gmra.mrb[56].mxu1 %v6757_v36 }
 0x30b   :  { %4793 = vmatprep.mubr.bf16.mxu1 %v6758_v26 }
 0x312   :  { %4794 = vmatmul.mubr.bf16.gmra.mrb[60].mxu1 %v6759_v51 }
 0x313   :  { %4797 = vmatprep.mubr.bf16.mxu1 %v6760_v52 }
 0x31a   :  { %4798 = vmatmul.mubr.bf16.gmra.mrb[64].mxu1 %v6761_v2 }
 0x31b   :  { %4801 = vmatprep.mubr.bf16.mxu1 %v6762_v28 }
 0x322   :  { %4802 = vmatmul.mubr.bf16.gmra.mrb[68].mxu1 %v6763_v60 }
 0x323   :  { %4805 = vmatprep.mubr.bf16.mxu1 %v6764_v11 }
 0x32a   :  { %4806 = vmatmul.mubr.bf16.gmra.mrb[72].mxu1 %v6765_v21 }
 0x32b   :  { %4809 = vmatprep.mubr.bf16.mxu1 %v6766_v55 }
 0x332   :  { %4810 = vmatmul.mubr.bf16.gmra.mrb[76].mxu1 %v6767_v56 }
 0x333   :  { %4813 = vmatprep.mubr.bf16.mxu1 %v6768_v57 }
 0x33a   :  { %4814 = vmatmul.mubr.bf16.gmra.mrb[80].mxu1 %v6769_v42 }
 0x33b   :  { %4817 = vmatprep.mubr.bf16.mxu1 %v6770_v58 }
 0x342   :  { %4818 = vmatmul.mubr.bf16.gmra.mrb[84].mxu1 %v6771_v50 }
 0x343   :  { %4821 = vmatprep.mubr.bf16.mxu1 %v6772_v49 }
 0x34a   :  { %4822 = vmatmul.mubr.bf16.gmra.mrb[88].mxu1 %v6773_v46 }
 0x34b   :  { %4825 = vmatprep.mubr.bf16.mxu1 %v6774_v12 }
 0x352   :  { %4826 = vmatmul.mubr.bf16.gmra.mrb[92].mxu1 %v6775_v0 }
 0x353   :  { %4829 = vmatprep.mubr.bf16.mxu1 %v6776_v13 }
 0x35a   :  { %4830 = vmatmul.mubr.bf16.gmra.mrb[96].mxu1 %v6777_v59 }
 0x35b   :  { %4833 = vmatprep.mubr.bf16.mxu1 %v6778_v61 }
 0x362   :  { %4834 = vmatmul.mubr.bf16.gmra.mrb[100].mxu1 %v6779_v20 }
 0x363   :  { %4837 = vmatprep.mubr.bf16.mxu1 %v6780_v1 }
 0x36a   :  { %4838 = vmatmul.mubr.bf16.gmra.mrb[104].mxu1 %v6781_v14 }
 0x36b   :  { %4841 = vmatprep.mubr.bf16.mxu1 %v6782_v6 }
 0x36d   :  { %v4703_v7 = vpop.f32.mrb[0].mxu1 }
 0x36e   :  { %2241 = vst.msk [vmem:[#allocation2 + $0x8] sm:$0xff] %vm2239_vm1, %v4703_v7  ;;  %v2048_v10 = vpop.f32.mrb[1].mxu1 }
 0x36f   :  { %2240 = vst.msk [vmem:[#allocation2] sm:$0xff] %vm2239_vm1, %v2048_v10 }
 0x371   :  { %v4706_v4 = vpop.f32.mrb[2].mxu1 }
 0x372   :  { %2243 = vst.msk [vmem:[#allocation2 + $0x18] sm:$0xff] %vm2239_vm1, %v4706_v4  ;;  %v2058_v9 = vpop.f32.mrb[3].mxu1  ;;  %4842 = vmatmul.mubr.bf16.gmra.mrb[108].mxu1 %v6783_v63 }
 0x373   :  { %2242 = vst.msk [vmem:[#allocation2 + $0x10] sm:$0xff] %vm2239_vm1, %v2058_v9  ;;  %4845 = vmatprep.mubr.bf16.mxu1 %v6784_v37 }
 0x375   :  { %v4709_v22 = vpop.f32.mrb[4].mxu1 }
 0x376   :  { %2245 = vst.msk [vmem:[#allocation2 + $0x28] sm:$0xff] %vm2239_vm1, %v4709_v22  ;;  %v2068_v41 = vpop.f32.mrb[5].mxu1 }
 0x377   :  { %2244 = vst.msk [vmem:[#allocation2 + $0x20] sm:$0xff] %vm2239_vm1, %v2068_v41 }
 0x379   :  { %v4712_v23 = vpop.f32.mrb[6].mxu1 }
 0x37a   :  { %2247 = vst.msk [vmem:[#allocation2 + $0x38] sm:$0xff] %vm2239_vm1, %v4712_v23  ;;  %v2078_v5 = vpop.f32.mrb[7].mxu1  ;;  %4846 = vmatmul.mubr.bf16.gmra.mrb[112].mxu1 %v6785_v17 }
 0x37b   :  { %2246 = vst.msk [vmem:[#allocation2 + $0x30] sm:$0xff] %vm2239_vm1, %v2078_v5  ;;  %4849 = vmatprep.mubr.bf16.mxu1 %v6786_v29 }
 0x37d   :  { %v4715_v48 = vpop.f32.mrb[8].mxu1 }
 0x37e   :  { %2249 = vst.msk [vmem:[#allocation2 + $0x48] sm:$0xff] %vm2239_vm1, %v4715_v48  ;;  %v2088_v39 = vpop.f32.mrb[9].mxu1 }
 0x37f   :  { %2248 = vst.msk [vmem:[#allocation2 + $0x40] sm:$0xff] %vm2239_vm1, %v2088_v39 }
 0x381   :  { %v4718_v43 = vpop.f32.mrb[10].mxu1 }
 0x382   :  { %2251 = vst.msk [vmem:[#allocation2 + $0x58] sm:$0xff] %vm2239_vm1, %v4718_v43  ;;  %v2098_v45 = vpop.f32.mrb[11].mxu1  ;;  %4850 = vmatmul.mubr.bf16.gmra.mrb[116].mxu1 %v6787_v62 }
 0x383   :  { %2250 = vst.msk [vmem:[#allocation2 + $0x50] sm:$0xff] %vm2239_vm1, %v2098_v45  ;;  %4853 = vmatprep.mubr.bf16.mxu1 %v6788_v30 }
 0x385   :  { %v4721_v54 = vpop.f32.mrb[12].mxu1 }
 0x386   :  { %2253 = vst.msk [vmem:[#allocation2 + $0x68] sm:$0xff] %vm2239_vm1, %v4721_v54  ;;  %v2108_v44 = vpop.f32.mrb[13].mxu1 }
 0x387   :  { %2252 = vst.msk [vmem:[#allocation2 + $0x60] sm:$0xff] %vm2239_vm1, %v2108_v44 }
 0x389   :  { %v4724_v53 = vpop.f32.mrb[14].mxu1 }
 0x38a   :  { %2255 = vst.msk [vmem:[#allocation2 + $0x78] sm:$0xff] %vm2239_vm1, %v4724_v53  ;;  %v2118_v34 = vpop.f32.mrb[15].mxu1  ;;  %4854 = vmatmul.mubr.bf16.gmra.mrb[120].mxu1 %v6789_v35 }
 0x38b   :  { %2254 = vst.msk [vmem:[#allocation2 + $0x70] sm:$0xff] %vm2239_vm1, %v2118_v34  ;;  %4857 = vmatprep.mubr.bf16.mxu1 %v6790_v38 }
 0x38d   :  { %v4727_v27 = vpop.f32.mrb[16].mxu1 }
 0x38e   :  { %2257 = vst.msk [vmem:[#allocation2 + $0x88] sm:$0xff] %vm2239_vm1, %v4727_v27  ;;  %v2128_v18 = vpop.f32.mrb[17].mxu1 }
 0x38f   :  { %2256 = vst.msk [vmem:[#allocation2 + $0x80] sm:$0xff] %vm2239_vm1, %v2128_v18 }
 0x391   :  { %v4730_v33 = vpop.f32.mrb[18].mxu1 }
 0x392   :  { %2259 = vst.msk [vmem:[#allocation2 + $0x98] sm:$0xff] %vm2239_vm1, %v4730_v33  ;;  %v2138_v16 = vpop.f32.mrb[19].mxu1  ;;  %4858 = vmatmul.mubr.bf16.gmra.mrb[124].mxu1 %v6791_v31 }
 0x393   :  { %2258 = vst.msk [vmem:[#allocation2 + $0x90] sm:$0xff] %vm2239_vm1, %v2138_v16 }
 0x395   :  { %v4733_v24 = vpop.f32.mrb[20].mxu1 }
 0x396   :  { %2261 = vst.msk [vmem:[#allocation2 + $0xa8] sm:$0xff] %vm2239_vm1, %v4733_v24  ;;  %v2148_v15 = vpop.f32.mrb[21].mxu1 }
 0x397   :  { %2260 = vst.msk [vmem:[#allocation2 + $0xa0] sm:$0xff] %vm2239_vm1, %v2148_v15 }
 0x399   :  { %v4736_v47 = vpop.f32.mrb[22].mxu1 }
 0x39a   :  { %2263 = vst.msk [vmem:[#allocation2 + $0xb8] sm:$0xff] %vm2239_vm1, %v4736_v47  ;;  %v2158_v3 = vpop.f32.mrb[23].mxu1 }
 0x39b   :  { %2262 = vst.msk [vmem:[#allocation2 + $0xb0] sm:$0xff] %vm2239_vm1, %v2158_v3 }
 0x39d   :  { %v4739_v32 = vpop.f32.mrb[24].mxu1 }
 0x39e   :  { %2265 = vst.msk [vmem:[#allocation2 + $0xc8] sm:$0xff] %vm2239_vm1, %v4739_v32  ;;  %v2168_v40 = vpop.f32.mrb[25].mxu1 }
 0x39f   :  { %2264 = vst.msk [vmem:[#allocation2 + $0xc0] sm:$0xff] %vm2239_vm1, %v2168_v40 }
 0x3a1   :  { %v4742_v25 = vpop.f32.mrb[26].mxu1 }
 0x3a2   :  { %2267 = vst.msk [vmem:[#allocation2 + $0xd8] sm:$0xff] %vm2239_vm1, %v4742_v25  ;;  %v2178_v36 = vpop.f32.mrb[27].mxu1 }
 0x3a3   :  { %2266 = vst.msk [vmem:[#allocation2 + $0xd0] sm:$0xff] %vm2239_vm1, %v2178_v36 }
 0x3a5   :  { %v4745_v26 = vpop.f32.mrb[28].mxu1 }
 0x3a6   :  { %2269 = vst.msk [vmem:[#allocation2 + $0xe8] sm:$0xff] %vm2239_vm1, %v4745_v26  ;;  %v2188_v51 = vpop.f32.mrb[29].mxu1 }
 0x3a7   :  { %2268 = vst.msk [vmem:[#allocation2 + $0xe0] sm:$0xff] %vm2239_vm1, %v2188_v51 }
 0x3a9   :  { %v4748_v52 = vpop.f32.mrb[30].mxu1 }
 0x3aa   :  { %2271 = vst.msk [vmem:[#allocation2 + $0xf8] sm:$0xff] %vm2239_vm1, %v4748_v52  ;;  %v2198_v2 = vpop.f32.mrb[31].mxu1 }
 0x3ab   :  { %2270 = vst.msk [vmem:[#allocation2 + $0xf0] sm:$0xff] %vm2239_vm1, %v2198_v2 }
 0x3ad   :  { %v6422_v28 = vpop.f32.mrb[32].mxu1 }
 0x3ae   :  { %v6424_v60 = vpop.f32.mrb[33].mxu1 }
 0x3af   :  { %v6426_v11 = vpop.f32.mrb[34].mxu1 }
 0x3b0   :  { %v6428_v21 = vpop.f32.mrb[35].mxu1 }
 0x3b5   :  { %v6430_v55 = vpop.f32.mrb[36].mxu1 }
 0x3b6   :  { %v6432_v56 = vpop.f32.mrb[37].mxu1 }
 0x3b7   :  { %v6434_v57 = vpop.f32.mrb[38].mxu1 }
 0x3b8   :  { %v6436_v42 = vpop.f32.mrb[39].mxu1 }
 0x3bd   :  { %v6438_v58 = vpop.f32.mrb[40].mxu1 }
 0x3be   :  { %v6440_v50 = vpop.f32.mrb[41].mxu1 }
 0x3bf   :  { %v6442_v49 = vpop.f32.mrb[42].mxu1 }
 0x3c0   :  { %v6444_v46 = vpop.f32.mrb[43].mxu1 }
 0x3c5   :  { %v6446_v12 = vpop.f32.mrb[44].mxu1 }
 0x3c6   :  { %v6448_v0 = vpop.f32.mrb[45].mxu1 }
 0x3c7   :  { %v6450_v13 = vpop.f32.mrb[46].mxu1 }
 0x3c8   :  { %v6452_v59 = vpop.f32.mrb[47].mxu1 }
 0x3cd   :  { %v6454_v61 = vpop.f32.mrb[48].mxu1 }
 0x3ce   :  { %v6456_v20 = vpop.f32.mrb[49].mxu1 }
 0x3cf   :  { %v6458_v1 = vpop.f32.mrb[50].mxu1 }
 0x3d0   :  { %v6460_v14 = vpop.f32.mrb[51].mxu1 }
 0x3d5   :  { %v6462_v6 = vpop.f32.mrb[52].mxu1 }
 0x3d6   :  { %v6464_v7 = vpop.f32.mrb[53].mxu1 }
 0x3d7   :  { %v6466_v10 = vpop.f32.mrb[54].mxu1 }
 0x3d8   :  { %v6468_v4 = vpop.f32.mrb[55].mxu1 }
 0x3dd   :  { %v6470_v9 = vpop.f32.mrb[56].mxu1 }
 0x3de   :  { %v6472_v63 = vpop.f32.mrb[57].mxu1 }
 0x3df   :  { %v6474_v37 = vpop.f32.mrb[58].mxu1 }
 0x3e0   :  { %v6476_v22 = vpop.f32.mrb[59].mxu1 }
 0x3e5   :  { %v6478_v41 = vpop.f32.mrb[60].mxu1 }
 0x3e6   :  { %v6480_v23 = vpop.f32.mrb[61].mxu1 }
 0x3e7   :  { %v6482_v5 = vpop.f32.mrb[62].mxu1 }
 0x3e8   :  { %v6484_v17 = vpop.f32.mrb[63].mxu1 }
 0x3ed   :  { %v4799_v29 = vpop.f32.mrb[64].mxu1 }
 0x3ee   :  { %v2598_v48 = vpop.f32.mrb[65].mxu1 }
 0x3ef   :  { %v4800_v39 = vpop.f32.mrb[66].mxu1  ;;  %4865 = vmatprep.mubr.msk.f32.mxu0 %vm1240_vm0, %v2598_v48 }
 0x3f0   :  { %v2601_v43 = vpop.f32.mrb[67].mxu1 }
 0x3f1   :  { %4866 = vmatmul.mubr.msk.f32.vlgmr.msra.gmra.mrb[96].mxu0 %vm1240_vm0, %v2601_v43 }
 0x3f2   :  { %5036 = vmatpush3.bf16.msra.mxu0 %v6035_v19  ;;  %4868 = vmatprep.mubr.msk.f32.mxu0 %vm1240_vm0, %v4799_v29 }
 0x3f3   :  { %5038 = vmatprep.subr.bf16.mxu0 %v6154_v8 }
 0x3f5   :  { %v4803_v45 = vpop.f32.mrb[68].mxu1  ;;  %4869 = vmatmul.mubr.msk.f32.gmra.mrb[98].mxu0 %vm1240_vm0, %v4800_v39 }
 0x3f6   :  { %v2614_v62 = vpop.f32.mrb[69].mxu1 }
 0x3f7   :  { %v4804_v30 = vpop.f32.mrb[70].mxu1  ;;  %4871 = vmatprep.mubr.msk.f32.mxu0 %vm1240_vm0, %v2614_v62 }
 0x3f8   :  { %v2617_v54 = vpop.f32.mrb[71].mxu1 }
 0x3f9   :  { %4872 = vmatmul.mubr.msk.f32.gmra.mrb[100].mxu0 %vm1240_vm0, %v2617_v54 }
 0x3fa   :  { %4874 = vmatprep.mubr.msk.f32.mxu0 %vm1240_vm0, %v4803_v45 }
 0x3fd   :  { %v4807_v44 = vpop.f32.mrb[72].mxu1  ;;  %4875 = vmatmul.mubr.msk.f32.gmra.mrb[102].mxu0 %vm1240_vm0, %v4804_v30 }
 0x3fe   :  { %v2630_v19 = vpop.f32.mrb[73].mxu1 }
 0x3ff   :  { %v4808_v53 = vpop.f32.mrb[74].mxu1  ;;  %4877 = vmatprep.mubr.msk.f32.mxu0 %vm1240_vm0, %v2630_v19 }
 0x400   :  { %v2633_v34 = vpop.f32.mrb[75].mxu1 }
 0x401   :  { %4878 = vmatmul.mubr.msk.f32.gmra.mrb[104].mxu0 %vm1240_vm0, %v2633_v34 }
 0x402   :  { %4880 = vmatprep.mubr.msk.f32.mxu0 %vm1240_vm0, %v4807_v44 }
 0x405   :  { %v4811_v35 = vpop.f32.mrb[76].mxu1  ;;  %4881 = vmatmul.mubr.msk.f32.gmra.mrb[106].mxu0 %vm1240_vm0, %v4808_v53 }
 0x406   :  { %v2646_v38 = vpop.f32.mrb[77].mxu1 }
 0x407   :  { %v4812_v27 = vpop.f32.mrb[78].mxu1  ;;  %4883 = vmatprep.mubr.msk.f32.mxu0 %vm1240_vm0, %v2646_v38 }
 0x408   :  { %v2649_v18 = vpop.f32.mrb[79].mxu1 }
 0x409   :  { %4884 = vmatmul.mubr.msk.f32.gmra.mrb[108].mxu0 %vm1240_vm0, %v2649_v18 }
 0x40a   :  { %4886 = vmatprep.mubr.msk.f32.mxu0 %vm1240_vm0, %v4811_v35 }
 0x40d   :  { %v4815_v33 = vpop.f32.mrb[80].mxu1  ;;  %4887 = vmatmul.mubr.msk.f32.gmra.mrb[110].mxu0 %vm1240_vm0, %v4812_v27 }
 0x40e   :  { %v2662_v16 = vpop.f32.mrb[81].mxu1 }
 0x40f   :  { %v4816_v31 = vpop.f32.mrb[82].mxu1  ;;  %4889 = vmatprep.mubr.msk.f32.mxu0 %vm1240_vm0, %v2662_v16 }
 0x410   :  { %v2665_v24 = vpop.f32.mrb[83].mxu1 }
 0x411   :  { %4890 = vmatmul.mubr.msk.f32.gmra.mrb[112].mxu0 %vm1240_vm0, %v2665_v24 }
 0x412   :  { %4892 = vmatprep.mubr.msk.f32.mxu0 %vm1240_vm0, %v4815_v33 }
 0x415   :  { %v4819_v15 = vpop.f32.mrb[84].mxu1  ;;  %4893 = vmatmul.mubr.msk.f32.gmra.mrb[114].mxu0 %vm1240_vm0, %v4816_v31 }
 0x416   :  { %v2678_v47 = vpop.f32.mrb[85].mxu1 }
 0x417   :  { %v4820_v3 = vpop.f32.mrb[86].mxu1  ;;  %4895 = vmatprep.mubr.msk.f32.mxu0 %vm1240_vm0, %v2678_v47 }
 0x418   :  { %v2681_v32 = vpop.f32.mrb[87].mxu1 }
 0x419   :  { %4896 = vmatmul.mubr.msk.f32.gmra.mrb[116].mxu0 %vm1240_vm0, %v2681_v32 }
 0x41a   :  { %4898 = vmatprep.mubr.msk.f32.mxu0 %vm1240_vm0, %v4819_v15 }
 0x41d   :  { %v4823_v40 = vpop.f32.mrb[88].mxu1  ;;  %4899 = vmatmul.mubr.msk.f32.gmra.mrb[118].mxu0 %vm1240_vm0, %v4820_v3 }
 0x41e   :  { %v2694_v25 = vpop.f32.mrb[89].mxu1  ;;  %4904 = vmatprep.mubr.msk.f32.mxu1 %vm1240_vm0, %v4823_v40 }
 0x41f   :  { %v4824_v36 = vpop.f32.mrb[90].mxu1  ;;  %4901 = vmatprep.mubr.msk.f32.mxu0 %vm1240_vm0, %v2694_v25 }
 0x420   :  { %v2697_v26 = vpop.f32.mrb[91].mxu1  ;;  %4905 = vmatmul.mubr.msk.f32.vlgmr.msra.gmra.mrb[128].mxu1 %vm1240_vm0, %v4824_v36 }
 0x421   :  { %4902 = vmatmul.mubr.msk.f32.gmra.mrb[120].mxu0 %vm1240_vm0, %v2697_v26 }
 0x422   :  { %4917 = vmatprep.mubr.msk.f32.mxu0 %vm1240_vm0, %v6424_v60 }
 0x425   :  { %4918 = vmatmul.mubr.msk.f32.vlgmr.msra.gmra.mrb[96].mxu0 %vm1240_vm0, %v6428_v21  ;;  %v4827_v51 = vpop.f32.mrb[92].mxu1 }
 0x426   :  { %5040 = vmatpush3.bf16.msra.mxu0 %v6154_v8  ;;  %4920 = vmatprep.mubr.msk.f32.mxu0 %vm1240_vm0, %v6422_v28  ;;  %v2710_v52 = vpop.f32.mrb[93].mxu1 }
 0x427   :  { %v4828_v2 = vpop.f32.mrb[94].mxu1  ;;  %4907 = vmatprep.mubr.msk.f32.mxu1 %vm1240_vm0, %v2710_v52 }
 0x428   :  { %v2713_v29 = vpop.f32.mrb[95].mxu1 }
 0x429   :  { %4921 = vmatmul.mubr.msk.f32.gmra.mrb[98].mxu0 %vm1240_vm0, %v6426_v11  ;;  %4908 = vmatmul.mubr.msk.f32.gmra.mrb[130].mxu1 %vm1240_vm0, %v2713_v29 }
 0x42a   :  { %4923 = vmatprep.mubr.msk.f32.mxu0 %vm1240_vm0, %v6432_v56  ;;  %4910 = vmatprep.mubr.msk.f32.mxu1 %vm1240_vm0, %v4827_v51 }
 0x42d   :  { %4924 = vmatmul.mubr.msk.f32.gmra.mrb[100].mxu0 %vm1240_vm0, %v6436_v42  ;;  %4911 = vmatmul.mubr.msk.f32.gmra.mrb[132].mxu1 %vm1240_vm0, %v4828_v2  ;;  %v4831_v8 = vpop.f32.mrb[96].mxu1 }
 0x42e   :  { %4926 = vmatprep.mubr.msk.f32.mxu0 %vm1240_vm0, %v6430_v55  ;;  %v2726_v28 = vpop.f32.mrb[97].mxu1 }
 0x42f   :  { %v4832_v60 = vpop.f32.mrb[98].mxu1 }
 0x430   :  { %v2729_v21 = vpop.f32.mrb[99].mxu1 }
 0x431   :  { %4927 = vmatmul.mubr.msk.f32.gmra.mrb[102].mxu0 %vm1240_vm0, %v6434_v57 }
 0x432   :  { %4929 = vmatprep.mubr.msk.f32.mxu0 %vm1240_vm0, %v6440_v50 }
 0x435   :  { %4930 = vmatmul.mubr.msk.f32.gmra.mrb[104].mxu0 %vm1240_vm0, %v6444_v46  ;;  %v4835_v11 = vpop.f32.mrb[100].mxu1 }
 0x436   :  { %4932 = vmatprep.mubr.msk.f32.mxu0 %vm1240_vm0, %v6438_v58  ;;  %v2742_v56 = vpop.f32.mrb[101].mxu1 }
 0x437   :  { %v4836_v42 = vpop.f32.mrb[102].mxu1 }
 0x438   :  { %v2745_v48 = vpop.f32.mrb[103].mxu1 }
 0x439   :  { %4933 = vmatmul.mubr.msk.f32.gmra.mrb[106].mxu0 %vm1240_vm0, %v6442_v49 }
 0x43a   :  { %4935 = vmatprep.mubr.msk.f32.mxu0 %vm1240_vm0, %v6448_v0 }
 0x43d   :  { %4936 = vmatmul.mubr.msk.f32.gmra.mrb[108].mxu0 %vm1240_vm0, %v6452_v59  ;;  %v4839_v55 = vpop.f32.mrb[104].mxu1 }
 0x43e   :  { %4938 = vmatprep.mubr.msk.f32.mxu0 %vm1240_vm0, %v6446_v12  ;;  %v2758_v57 = vpop.f32.mrb[105].mxu1 }
 0x43f   :  { %v4840_v50 = vpop.f32.mrb[106].mxu1 }
 0x440   :  { %v2761_v46 = vpop.f32.mrb[107].mxu1 }
 0x441   :  { %4939 = vmatmul.mubr.msk.f32.gmra.mrb[110].mxu0 %vm1240_vm0, %v6450_v13 }
 0x442   :  { %4941 = vmatprep.mubr.msk.f32.mxu0 %vm1240_vm0, %v6456_v20 }
 0x445   :  { %4942 = vmatmul.mubr.msk.f32.gmra.mrb[112].mxu0 %vm1240_vm0, %v6460_v14  ;;  %v4843_v58 = vpop.f32.mrb[108].mxu1 }
 0x446   :  { %4944 = vmatprep.mubr.msk.f32.mxu0 %vm1240_vm0, %v6454_v61  ;;  %v2774_v49 = vpop.f32.mrb[109].mxu1 }
 0x447   :  { %v4844_v0 = vpop.f32.mrb[110].mxu1 }
 0x448   :  { %v2777_v59 = vpop.f32.mrb[111].mxu1 }
 0x449   :  { %4945 = vmatmul.mubr.msk.f32.gmra.mrb[114].mxu0 %vm1240_vm0, %v6458_v1 }
 0x44a   :  { %4947 = vmatprep.mubr.msk.f32.mxu0 %vm1240_vm0, %v6464_v7 }
 0x44d   :  { %4948 = vmatmul.mubr.msk.f32.gmra.mrb[116].mxu0 %vm1240_vm0, %v6468_v4  ;;  %v4847_v12 = vpop.f32.mrb[112].mxu1 }
 0x44e   :  { %4950 = vmatprep.mubr.msk.f32.mxu0 %vm1240_vm0, %v6462_v6  ;;  %v2790_v13 = vpop.f32.mrb[113].mxu1 }
 0x44f   :  { %v4848_v20 = vpop.f32.mrb[114].mxu1 }
 0x450   :  { %v2793_v14 = vpop.f32.mrb[115].mxu1 }
 0x451   :  { %4951 = vmatmul.mubr.msk.f32.gmra.mrb[118].mxu0 %vm1240_vm0, %v6466_v10 }
 0x452   :  { %4953 = vmatprep.mubr.msk.f32.mxu0 %vm1240_vm0, %v6472_v63 }
 0x455   :  { %4954 = vmatmul.mubr.msk.f32.gmra.mrb[120].mxu0 %vm1240_vm0, %v6476_v22  ;;  %v4851_v61 = vpop.f32.mrb[116].mxu1 }
 0x456   :  { %4956 = vmatprep.mubr.msk.f32.mxu0 %vm1240_vm0, %v6470_v9  ;;  %v2806_v1 = vpop.f32.mrb[117].mxu1 }
 0x457   :  { %v4852_v7 = vpop.f32.mrb[118].mxu1 }
 0x458   :  { %v2809_v4 = vpop.f32.mrb[119].mxu1 }
 0x459   :  { %4957 = vmatmul.mubr.msk.f32.gmra.mrb[122].mxu0 %vm1240_vm0, %v6474_v37 }
 0x45a   :  { %4959 = vmatprep.mubr.msk.f32.mxu0 %vm1240_vm0, %v6480_v23 }
 0x45d   :  { %4960 = vmatmul.mubr.msk.f32.gmra.mrb[124].mxu0 %vm1240_vm0, %v6484_v17  ;;  %v4855_v6 = vpop.f32.mrb[120].mxu1 }
 0x45e   :  { %4962 = vmatprep.mubr.msk.f32.mxu0 %vm1240_vm0, %v6478_v41  ;;  %v2822_v10 = vpop.f32.mrb[121].mxu1 }
 0x45f   :  { %v4856_v63 = vpop.f32.mrb[122].mxu1 }
 0x460   :  { %v2825_v22 = vpop.f32.mrb[123].mxu1 }
 0x461   :  { %4963 = vmatmul.mubr.msk.f32.gmra.mrb[126].mxu0 %vm1240_vm0, %v6482_v5 }
 0x462   :  { %4969 = vmatprep.mubr.msk.f32.mxu0 %vm1240_vm0, %v2726_v28 }
 0x465   :  { %4970 = vmatmul.mubr.msk.f32.vlgmr.msra.gmra.mrb[96].mxu0 %vm1240_vm0, %v2729_v21  ;;  %v4859_v9 = vpop.f32.mrb[124].mxu1 }
 0x466   :  { %4972 = vmatprep.mubr.msk.f32.mxu0 %vm1240_vm0, %v4831_v8  ;;  %v2838_v37 = vpop.f32.mrb[125].mxu1 }
 0x467   :  { %v4860_v23 = vpop.f32.mrb[126].mxu1 }
 0x468   :  { %v2841_v17 = vpop.f32.mrb[127].mxu1 }
 0x469   :  { %4973 = vmatmul.mubr.msk.f32.gmra.mrb[98].mxu0 %vm1240_vm0, %v4832_v60 }
 0x46a   :  { %4975 = vmatprep.mubr.msk.f32.mxu0 %vm1240_vm0, %v2742_v56 }
 0x46d   :  { %4976 = vmatmul.mubr.msk.f32.gmra.mrb[100].mxu0 %vm1240_vm0, %v2745_v48 }
 0x46e   :  { %4978 = vmatprep.mubr.msk.f32.mxu0 %vm1240_vm0, %v4835_v11 }
 0x471   :  { %4979 = vmatmul.mubr.msk.f32.gmra.mrb[102].mxu0 %vm1240_vm0, %v4836_v42 }
 0x472   :  { %4981 = vmatprep.mubr.msk.f32.mxu0 %vm1240_vm0, %v2758_v57 }
 0x475   :  { %4982 = vmatmul.mubr.msk.f32.gmra.mrb[104].mxu0 %vm1240_vm0, %v2761_v46 }
 0x476   :  { %4984 = vmatprep.mubr.msk.f32.mxu0 %vm1240_vm0, %v4839_v55 }
 0x479   :  { %4985 = vmatmul.mubr.msk.f32.gmra.mrb[106].mxu0 %vm1240_vm0, %v4840_v50 }
 0x47a   :  { %4987 = vmatprep.mubr.msk.f32.mxu0 %vm1240_vm0, %v2774_v49 }
 0x47d   :  { %4988 = vmatmul.mubr.msk.f32.gmra.mrb[108].mxu0 %vm1240_vm0, %v2777_v59 }
 0x47e   :  { %4990 = vmatprep.mubr.msk.f32.mxu0 %vm1240_vm0, %v4843_v58 }
 0x481   :  { %4991 = vmatmul.mubr.msk.f32.gmra.mrb[110].mxu0 %vm1240_vm0, %v4844_v0 }
 0x482   :  { %4993 = vmatprep.mubr.msk.f32.mxu0 %vm1240_vm0, %v2790_v13 }
 0x485   :  { %4994 = vmatmul.mubr.msk.f32.gmra.mrb[112].mxu0 %vm1240_vm0, %v2793_v14 }
 0x486   :  { %4996 = vmatprep.mubr.msk.f32.mxu0 %vm1240_vm0, %v4847_v12 }
 0x489   :  { %4997 = vmatmul.mubr.msk.f32.gmra.mrb[114].mxu0 %vm1240_vm0, %v4848_v20 }
 0x48a   :  { %4999 = vmatprep.mubr.msk.f32.mxu0 %vm1240_vm0, %v2806_v1 }
 0x48d   :  { %5000 = vmatmul.mubr.msk.f32.gmra.mrb[116].mxu0 %vm1240_vm0, %v2809_v4 }
 0x48e   :  { %5002 = vmatprep.mubr.msk.f32.mxu0 %vm1240_vm0, %v4851_v61 }
 0x491   :  { %5003 = vmatmul.mubr.msk.f32.gmra.mrb[118].mxu0 %vm1240_vm0, %v4852_v7 }
 0x492   :  { %5005 = vmatprep.mubr.msk.f32.mxu0 %vm1240_vm0, %v2822_v10 }
 0x495   :  { %5006 = vmatmul.mubr.msk.f32.gmra.mrb[120].mxu0 %vm1240_vm0, %v2825_v22 }
 0x496   :  { %5008 = vmatprep.mubr.msk.f32.mxu0 %vm1240_vm0, %v4855_v6 }
 0x499   :  { %5009 = vmatmul.mubr.msk.f32.gmra.mrb[122].mxu0 %vm1240_vm0, %v4856_v63 }
 0x49a   :  { %5011 = vmatprep.mubr.msk.f32.mxu0 %vm1240_vm0, %v2838_v37 }
 0x49d   :  { %5012 = vmatmul.mubr.msk.f32.gmra.mrb[124].mxu0 %vm1240_vm0, %v2841_v17 }
 0x49e   :  { %5014 = vmatprep.mubr.msk.f32.mxu0 %vm1240_vm0, %v4859_v9 }
 0x4a1   :  { %5015 = vmatmul.mubr.msk.f32.gmra.mrb[126].mxu0 %vm1240_vm0, %v4860_v23 }
 0x4f3   :  { %v4906_v41 = vpop.f32.mrb[128].mxu1 }
 0x4f4   :  { %v3149_v5 = vpop.f32.mrb[129].mxu1 }
 0x4fc   :  { %v6617_v39 = vpop.f32.mrb[130].mxu1 }
 0x4fd   :  { %v6619_v43 = vpop.f32.mrb[131].mxu1 }
 0x500   :  { %v6621_v45 = vpop.f32.mrb[132].mxu1 }
 0x501   :  { %v6623_v62 = vpop.f32.mrb[133].mxu1 }
 0x538   :  { %v4971_v30 = vpop.f32.mrb[96].mxu0 }
 0x539   :  { %3856 = vst.msk [vmem:[#allocation2 + $0x108] sm:$0xff] %vm2239_vm1, %v4971_v30  ;;  %v3663_v54 = vpop.f32.mrb[97].mxu0 }
 0x53a   :  { %3855 = vst.msk [vmem:[#allocation2 + $0x100] sm:$0xff] %vm2239_vm1, %v3663_v54 }
 0x53c   :  { %v4974_v44 = vpop.f32.mrb[98].mxu0 }
 0x53d   :  { %3858 = vst.msk [vmem:[#allocation2 + $0x118] sm:$0xff] %vm2239_vm1, %v4974_v44  ;;  %v3673_v19 = vpop.f32.mrb[99].mxu0 }
 0x53e   :  { %3857 = vst.msk [vmem:[#allocation2 + $0x110] sm:$0xff] %vm2239_vm1, %v3673_v19 }
 0x540   :  { %v4977_v53 = vpop.f32.mrb[100].mxu0 }
 0x541   :  { %3860 = vst.msk [vmem:[#allocation2 + $0x128] sm:$0xff] %vm2239_vm1, %v4977_v53  ;;  %v3683_v34 = vpop.f32.mrb[101].mxu0 }
 0x542   :  { %3859 = vst.msk [vmem:[#allocation2 + $0x120] sm:$0xff] %vm2239_vm1, %v3683_v34 }
 0x544   :  { %v4980_v35 = vpop.f32.mrb[102].mxu0 }
 0x545   :  { %3862 = vst.msk [vmem:[#allocation2 + $0x138] sm:$0xff] %vm2239_vm1, %v4980_v35  ;;  %v3693_v38 = vpop.f32.mrb[103].mxu0 }
 0x546   :  { %3861 = vst.msk [vmem:[#allocation2 + $0x130] sm:$0xff] %vm2239_vm1, %v3693_v38 }
 0x548   :  { %v4983_v27 = vpop.f32.mrb[104].mxu0 }
 0x549   :  { %3864 = vst.msk [vmem:[#allocation2 + $0x148] sm:$0xff] %vm2239_vm1, %v4983_v27  ;;  %v3703_v18 = vpop.f32.mrb[105].mxu0 }
 0x54a   :  { %3863 = vst.msk [vmem:[#allocation2 + $0x140] sm:$0xff] %vm2239_vm1, %v3703_v18 }
 0x54c   :  { %v4986_v33 = vpop.f32.mrb[106].mxu0 }
 0x54d   :  { %3866 = vst.msk [vmem:[#allocation2 + $0x158] sm:$0xff] %vm2239_vm1, %v4986_v33  ;;  %v3713_v16 = vpop.f32.mrb[107].mxu0 }
 0x54e   :  { %3865 = vst.msk [vmem:[#allocation2 + $0x150] sm:$0xff] %vm2239_vm1, %v3713_v16 }
 0x550   :  { %v4989_v31 = vpop.f32.mrb[108].mxu0 }
 0x551   :  { %3868 = vst.msk [vmem:[#allocation2 + $0x168] sm:$0xff] %vm2239_vm1, %v4989_v31  ;;  %v3723_v24 = vpop.f32.mrb[109].mxu0 }
 0x552   :  { %3867 = vst.msk [vmem:[#allocation2 + $0x160] sm:$0xff] %vm2239_vm1, %v3723_v24 }
 0x554   :  { %v4992_v15 = vpop.f32.mrb[110].mxu0 }
 0x555   :  { %3870 = vst.msk [vmem:[#allocation2 + $0x178] sm:$0xff] %vm2239_vm1, %v4992_v15  ;;  %v3733_v47 = vpop.f32.mrb[111].mxu0 }
 0x556   :  { %3869 = vst.msk [vmem:[#allocation2 + $0x170] sm:$0xff] %vm2239_vm1, %v3733_v47 }
 0x558   :  { %v4995_v3 = vpop.f32.mrb[112].mxu0 }
 0x559   :  { %3872 = vst.msk [vmem:[#allocation2 + $0x188] sm:$0xff] %vm2239_vm1, %v4995_v3  ;;  %v3743_v32 = vpop.f32.mrb[113].mxu0 }
 0x55a   :  { %3871 = vst.msk [vmem:[#allocation2 + $0x180] sm:$0xff] %vm2239_vm1, %v3743_v32 }
 0x55c   :  { %v4998_v40 = vpop.f32.mrb[114].mxu0 }
 0x55d   :  { %3874 = vst.msk [vmem:[#allocation2 + $0x198] sm:$0xff] %vm2239_vm1, %v4998_v40  ;;  %v3753_v25 = vpop.f32.mrb[115].mxu0 }
 0x55e   :  { %3873 = vst.msk [vmem:[#allocation2 + $0x190] sm:$0xff] %vm2239_vm1, %v3753_v25 }
 0x560   :  { %v5001_v36 = vpop.f32.mrb[116].mxu0 }
 0x561   :  { %3876 = vst.msk [vmem:[#allocation2 + $0x1a8] sm:$0xff] %vm2239_vm1, %v5001_v36  ;;  %v3763_v26 = vpop.f32.mrb[117].mxu0 }
 0x562   :  { %3875 = vst.msk [vmem:[#allocation2 + $0x1a0] sm:$0xff] %vm2239_vm1, %v3763_v26 }
 0x564   :  { %v5004_v51 = vpop.f32.mrb[118].mxu0 }
 0x565   :  { %3878 = vst.msk [vmem:[#allocation2 + $0x1b8] sm:$0xff] %vm2239_vm1, %v5004_v51  ;;  %v3773_v52 = vpop.f32.mrb[119].mxu0 }
 0x566   :  { %3877 = vst.msk [vmem:[#allocation2 + $0x1b0] sm:$0xff] %vm2239_vm1, %v3773_v52 }
 0x568   :  { %v5007_v2 = vpop.f32.mrb[120].mxu0 }
 0x569   :  { %3880 = vst.msk [vmem:[#allocation2 + $0x1c8] sm:$0xff] %vm2239_vm1, %v5007_v2  ;;  %v3783_v29 = vpop.f32.mrb[121].mxu0 }
 0x56a   :  { %3879 = vst.msk [vmem:[#allocation2 + $0x1c0] sm:$0xff] %vm2239_vm1, %v3783_v29 }
 0x56c   :  { %v5010_v8 = vpop.f32.mrb[122].mxu0 }
 0x56d   :  { %v5043_v28 = vadd.f32 %v5010_v8, %v4906_v41  ;;  %v3793_v60 = vpop.f32.mrb[123].mxu0 }
 0x56e   :  { %v5044_v21 = vadd.f32 %v3793_v60, %v3149_v5 }
 0x56f   :  { %3882 = vst.msk [vmem:[#allocation2 + $0x1d8] sm:$0xff] %vm2239_vm1, %v5043_v28 }
 0x570   :  { %3881 = vst.msk [vmem:[#allocation2 + $0x1d0] sm:$0xff] %vm2239_vm1, %v5044_v21  ;;  %v5013_v11 = vpop.f32.mrb[124].mxu0 }
 0x571   :  { %v5045_v56 = vadd.f32 %v5013_v11, %v6617_v39  ;;  %v3803_v42 = vpop.f32.mrb[125].mxu0 }
 0x572   :  { %v5046_v48 = vadd.f32 %v3803_v42, %v6619_v43 }
 0x573   :  { %3884 = vst.msk [vmem:[#allocation2 + $0x1e8] sm:$0xff] %vm2239_vm1, %v5045_v56 }
 0x574   :  { %3883 = vst.msk [vmem:[#allocation2 + $0x1e0] sm:$0xff] %vm2239_vm1, %v5046_v48  ;;  %v5016_v55 = vpop.f32.mrb[126].mxu0 }
 0x575   :  { %v5047_v57 = vadd.f32 %v5016_v55, %v6621_v45  ;;  %v3813_v50 = vpop.f32.mrb[127].mxu0 }
 0x576   :  { %v5048_v46 = vadd.f32 %v3813_v50, %v6623_v62 }
 0x577   :  { %3886 = vst.msk [vmem:[#allocation2 + $0x1f8] sm:$0xff] %vm2239_vm1, %v5047_v57 }
 0x578   :  { %3885 = vst.msk [vmem:[#allocation2 + $0x1f0] sm:$0xff] %vm2239_vm1, %v5048_v46 }
 0x579   :  { %5304 = shalt.err (!%p5301_p4)
}
 0x57a   :  { %s5305_s12 = scalar_lea.hbm %s6678_s5, 8192 }
 0x57b   :  { %p5306_p5 = scmp.ne.s32.totalorder %s6678_s5, %s5305_s12  ;;  %p5309_p6 = scmp.lt.u32.totalorder %s5305_s12, %s6678_s5 }
 0x57d   :  { %p5311_p7 = pnand %p5309_p6, %p5306_p5 }
 0x57f   :  { %5314 = shalt.err (!%p5311_p7)
}
 0x580   :  { %s5322_s16 = smov 128   ;;  %s5323_s17 = smov 8  }
 0x581   :  { %3898 = dma.vmem_to_hbm [thread:$0]  %s3893_s8, 8192, %s6678_s5, [#allocation3], %s5322_s16, %s5322_s16, %s5323_s17  }
 0x582   :  { %5315 = dma.done.wait [#allocation3], 8192  }
 0x583   :  { %5316 = vsyncadd [#allocation3], 4294959104 }
 0x584   :  { %3902 = vsyncpa [#allocation3], 1 }

// kernel: adjustment_block_forward.1
= control target key start
LH: loop header
LB: loop body
LE: loop exit
PB: predicated region body
PF: predicated region fallthrough
CT: control target
= control target key end

     0   :  { %s5317_s20 = smov 125   ;;  %s5318_s21 = smov 127   ;;  %v5319_v2 = vmov 0   ;;  %s6673_s0 = inlined_call_operand.vmem [shape: f32[2,4,16,16], index: 0, kind: input, shape index: {}]   ;;  %s6674_s1 = inlined_call_operand.vmem [shape: f32[8,4], index: 1, kind: input, shape index: {}]   ;;  %s6675_s2 = inlined_call_operand.vmem [shape: f32[128,1], index: 2, kind: input, shape index: {}]   ;;  %s6676_s3 = inlined_call_operand.vmem [shape: bf16[768,128], index: 3, kind: input, shape index: {}]   ;;  %s6677_s4 = inlined_call_operand.vmem [shape: f32[3,16,32], index: 4, kind: input, shape index: {}]   ;;  %s6678_s5 = inlined_call_operand.hbm [shape: f32[2,256,32], index: 5, kind: output, shape index: {}]  }
   0x1   :  { %v22_v0 = vld [vmem:[%s6674_s1] sm:$0xff]  ;;  %5243 = vset.pattern.permute.xlu1 %v5319_v2  ;;  %5242 = vset.pattern.permute.xlu0 %v5319_v2  ;;  %s5320_s22 = smov 126   ;;  %v24_v10 = vld [vmem:[%s6675_s2 + $0x8] sm:$0xff] }
   0x2   :  { %170 = vrot.lane.b32.xlu1 %v22_v0, %s5317_s20  ;;  %146 = vrot.lane.b32.xlu0 %v22_v0, %s5318_s21  ;;  %v5359_v1 = vrot.slane %v22_v0, 1  ;;  %5171 = vpush %v22_v0  ;;  %v5366_v3 = vrot.slane %v22_v0, 2  ;;  %v5371_v4 = vrot.slane %v22_v0, 3  ;;  %v5380_v5 = vrot.slane %v22_v0, 4  ;;  %v23_v9 = vld [vmem:[%s6675_s2] sm:$0xff] }
   0x3   :  { %v5385_v6 = vrot.slane %v22_v0, 5  ;;  %v5394_v7 = vrot.slane %v22_v0, 6  ;;  %v5399_v8 = vrot.slane %v22_v0, 7 }
   0x6   :  { %158 = vrot.lane.b32.xlu0 %v22_v0, %s5320_s22  ;;  %185 = vrot.lane.b32.xlu1 %v5359_v1, %s5318_s21 }
   0xa   :  { %194 = vrot.lane.b32.xlu0 %v5359_v1, %s5320_s22  ;;  %203 = vrot.lane.b32.xlu1 %v5359_v1, %s5317_s20 }
   0xe   :  { %218 = vrot.lane.b32.xlu0 %v5366_v3, %s5318_s21  ;;  %227 = vrot.lane.b32.xlu1 %v5366_v3, %s5320_s22 }
  0x12   :  { %236 = vrot.lane.b32.xlu0 %v5366_v3, %s5317_s20  ;;  %251 = vrot.lane.b32.xlu1 %v5371_v4, %s5318_s21 }
  0x16   :  { %260 = vrot.lane.b32.xlu0 %v5371_v4, %s5320_s22  ;;  %269 = vrot.lane.b32.xlu1 %v5371_v4, %s5317_s20 }
  0x1a   :  { %284 = vrot.lane.b32.xlu0 %v5380_v5, %s5318_s21  ;;  %293 = vrot.lane.b32.xlu1 %v5380_v5, %s5320_s22 }
  0x1e   :  { %302 = vrot.lane.b32.xlu0 %v5380_v5, %s5317_s20  ;;  %317 = vrot.lane.b32.xlu1 %v5385_v6, %s5318_s21 }
  0x22   :  { %326 = vrot.lane.b32.xlu0 %v5385_v6, %s5320_s22  ;;  %335 = vrot.lane.b32.xlu1 %v5385_v6, %s5317_s20 }
  0x26   :  { %350 = vrot.lane.b32.xlu0 %v5394_v7, %s5318_s21  ;;  %359 = vrot.lane.b32.xlu1 %v5394_v7, %s5320_s22 }
  0x2a   :  { %368 = vrot.lane.b32.xlu0 %v5394_v7, %s5317_s20  ;;  %383 = vrot.lane.b32.xlu1 %v5399_v8, %s5318_s21 }
  0x2e   :  { %392 = vrot.lane.b32.xlu0 %v5399_v8, %s5320_s22  ;;  %401 = vrot.lane.b32.xlu1 %v5399_v8, %s5317_s20 }
  0x2f   :  { %10 = vsyncpa [#allocation3], 0  ;;  %v26_v11 = vld [vmem:[%s6675_s2 + $0x18] sm:$0xff]  ;;  %v25_v12 = vld [vmem:[%s6675_s2 + $0x10] sm:$0xff]  ;;  %vm1240_vm0 = vcmask 130048   ;;  %vm2239_vm1 = vcmask 261120  }
  0x30   :  { %v28_v13 = vld [vmem:[%s6675_s2 + $0x28] sm:$0xff]  ;;  %v27_v14 = vld [vmem:[%s6675_s2 + $0x20] sm:$0xff]  ;;  %v30_v15 = vld [vmem:[%s6675_s2 + $0x38] sm:$0xff] }
  0x31   :  { %v29_v16 = vld [vmem:[%s6675_s2 + $0x30] sm:$0xff]  ;;  %v32_v17 = vld [vmem:[%s6675_s2 + $0x48] sm:$0xff]  ;;  %v31_v18 = vld [vmem:[%s6675_s2 + $0x40] sm:$0xff] }
  0x32   :  { %412 = vperm.xlu0 %5242, %v23_v9   ;;  %417 = vperm.xlu1 %5243, %v24_v10   ;;  %v34_v19 = vld [vmem:[%s6675_s2 + $0x58] sm:$0xff]  ;;  %v33_v20 = vld [vmem:[%s6675_s2 + $0x50] sm:$0xff]  ;;  %v36_v21 = vld [vmem:[%s6675_s2 + $0x68] sm:$0xff] }
  0x33   :  { %v35_v22 = vld [vmem:[%s6675_s2 + $0x60] sm:$0xff]  ;;  %v38_v23 = vld [vmem:[%s6675_s2 + $0x78] sm:$0xff]  ;;  %v37_v24 = vld [vmem:[%s6675_s2 + $0x70] sm:$0xff]  ;;  %s5172_s29 = spop %5171 }
  0x34   :  { %v5244_v33 = vld [vmem:[%s6676_s3] sm:$0xff]   ;;  %v139_v50 = vstv %s5172_s29  ;;  %v5474_v52 = vld [vmem:[%s6673_s0 + $0x48] sm:$0xff]  ;;  %v5489_v55 = vld [vmem:[%s6673_s0 + $0x10] sm:$0xff] }
  0x35   :  { %4497 = vmatprep.mubr.bf16.mxu0 %v5244_v33  ;;  %v5469_v51 = vld [vmem:[%s6673_s0 + $0x40] sm:$0xff]  ;;  %v5484_v54 = vld [vmem:[%s6673_s0 + $0x8] sm:$0xff]  ;;  %v5494_v56 = vld [vmem:[%s6673_s0 + $0x18] sm:$0xff]  ;;  %v2276_v60 = vmul.f32 %v5474_v52, %v139_v50 }
  0x36   :  { %427 = vperm.xlu0 %5242, %v26_v11   ;;  %422 = vperm.xlu1 %5243, %v25_v12   ;;  %v5479_v53 = vld [vmem:[%s6673_s0] sm:$0xff]  ;;  %v5499_v57 = vld [vmem:[%s6673_s0 + $0x50] sm:$0xff]  ;;  %v5504_v58 = vld [vmem:[%s6673_s0 + $0x58] sm:$0xff]  ;;  %v2275_v59 = vmul.f32 %v5469_v51, %v139_v50  ;;  %v142_v62 = vmul.f32 %v139_v50, %v5484_v54 }
  0x37   :  { %v141_v61 = vmul.f32 %v139_v50, %v5479_v53  ;;  %v5532_v9 = vld [vmem:[%s6673_s0 + $0x68] sm:$0xff]  ;;  %v5537_v10 = vld [vmem:[%s6673_s0 + $0x30] sm:$0xff]  ;;  %v5542_v12 = vld [vmem:[%s6673_s0 + $0x38] sm:$0xff] }
  0x3a   :  { %437 = vperm.xlu0 %5242, %v28_v13   ;;  %432 = vperm.xlu1 %5243, %v27_v14   ;;  %v5547_v13 = vld [vmem:[%s6673_s0 + $0x70] sm:$0xff]  ;;  %v5552_v14 = vld [vmem:[%s6673_s0 + $0x78] sm:$0xff] }
  0x3e   :  { %447 = vperm.xlu0 %5242, %v30_v15   ;;  %442 = vperm.xlu1 %5243, %v29_v16  }
  0x42   :  { %457 = vperm.xlu0 %5242, %v32_v17   ;;  %452 = vperm.xlu1 %5243, %v31_v18  }
  0x46   :  { %467 = vperm.xlu0 %5242, %v34_v19   ;;  %462 = vperm.xlu1 %5243, %v33_v20  }
  0x4a   :  { %477 = vperm.xlu0 %5242, %v36_v21   ;;  %472 = vperm.xlu1 %5243, %v35_v22  }
  0x4e   :  { %487 = vperm.xlu0 %5242, %v38_v23   ;;  %482 = vperm.xlu1 %5243, %v37_v24  }
  0x74   :  { %v147_v25 = vpop.permute.xlu0 %146  ;;  %v171_v26 = vpop.permute.xlu1 %170 }
  0x75   :  { %5173 = vpush %v147_v25 }
  0x78   :  { %v159_v27 = vpop.permute.xlu0 %158  ;;  %v186_v28 = vpop.permute.xlu1 %185 }
  0x79   :  { %5175 = vpush %v159_v27 }
  0x7a   :  { %5177 = vpush %v171_v26 }
  0x7b   :  { %5179 = vpush %v5359_v1 }
  0x7c   :  { %5181 = vpush %v186_v28  ;;  %v195_v29 = vpop.permute.xlu0 %194  ;;  %v204_v30 = vpop.permute.xlu1 %203 }
  0x7d   :  { %5183 = vpush %v195_v29 }
  0x7e   :  { %5185 = vpush %v204_v30 }
  0x7f   :  { %5187 = vpush %v5366_v3 }
  0x80   :  { %v219_v31 = vpop.permute.xlu0 %218  ;;  %v228_v32 = vpop.permute.xlu1 %227 }
  0x81   :  { %5189 = vpush %v219_v31 }
  0x82   :  { %5191 = vpush %v228_v32 }
  0x84   :  { %v237_v34 = vpop.permute.xlu0 %236  ;;  %v252_v35 = vpop.permute.xlu1 %251 }
  0x85   :  { %5193 = vpush %v237_v34 }
  0x86   :  { %5195 = vpush %v5371_v4  ;;  %v5517_v4 = vld [vmem:[%s6673_s0 + $0x20] sm:$0xff] }
  0x87   :  { %5197 = vpush %v252_v35 }
  0x88   :  { %v261_v36 = vpop.permute.xlu0 %260  ;;  %v270_v37 = vpop.permute.xlu1 %269 }
  0x89   :  { %5199 = vpush %v261_v36 }
  0x8a   :  { %5201 = vpush %v270_v37 }
  0x8b   :  { %5203 = vpush %v5380_v5  ;;  %v5522_v5 = vld [vmem:[%s6673_s0 + $0x28] sm:$0xff] }
  0x8c   :  { %v285_v38 = vpop.permute.xlu0 %284  ;;  %v294_v39 = vpop.permute.xlu1 %293 }
  0x8d   :  { %5205 = vpush %v285_v38 }
  0x8e   :  { %5207 = vpush %v294_v39 }
  0x90   :  { %v303_v40 = vpop.permute.xlu0 %302  ;;  %v318_v41 = vpop.permute.xlu1 %317 }
  0x91   :  { %5209 = vpush %v303_v40 }
  0x92   :  { %5211 = vpush %v5385_v6 }
  0x93   :  { %5213 = vpush %v318_v41 }
  0x94   :  { %v327_v42 = vpop.permute.xlu0 %326  ;;  %v336_v43 = vpop.permute.xlu1 %335 }
  0x95   :  { %5215 = vpush %v327_v42 }
  0x96   :  { %5217 = vpush %v336_v43 }
  0x97   :  { %5219 = vpush %v5394_v7 }
  0x98   :  { %v351_v44 = vpop.permute.xlu0 %350  ;;  %v360_v45 = vpop.permute.xlu1 %359 }
  0x99   :  { %5221 = vpush %v351_v44 }
  0x9a   :  { %5223 = vpush %v360_v45 }
  0x9c   :  { %v369_v46 = vpop.permute.xlu0 %368  ;;  %v384_v47 = vpop.permute.xlu1 %383 }
  0x9d   :  { %5225 = vpush %v369_v46 }
  0x9e   :  { %5227 = vpush %v5399_v8  ;;  %v5527_v8 = vld [vmem:[%s6673_s0 + $0x60] sm:$0xff] }
  0x9f   :  { %5229 = vpush %v384_v47 }
  0xa0   :  { %v393_v48 = vpop.permute.xlu0 %392  ;;  %v402_v49 = vpop.permute.xlu1 %401 }
  0xa1   :  { %5231 = vpush %v393_v48 }
  0xa2   :  { %5233 = vpush %v402_v49 }
  0xa6   :  { %s5174_s21 = spop %5173 }
  0xa7   :  { %v149_v63 = vstv %s5174_s21 }
  0xa8   :  { %v151_v0 = vmul.f32 %v5489_v55, %v149_v63  ;;  %v152_v1 = vmul.f32 %v5494_v56, %v149_v63  ;;  %v2280_v2 = vmul.f32 %v5499_v57, %v149_v63  ;;  %v2281_v3 = vmul.f32 %v5504_v58, %v149_v63 }
  0xaa   :  { %v2282_v6 = vadd.f32 %v2280_v2, %v2275_v59  ;;  %v2283_v7 = vadd.f32 %v2281_v3, %v2276_v60  ;;  %s5176_s25 = spop %5175  ;;  %v153_v15 = vadd.f32 %v151_v0, %v141_v61  ;;  %v154_v16 = vadd.f32 %v152_v1, %v142_v62 }
  0xab   :  { %v161_v11 = vstv %s5176_s25  ;;  %s5178_s8 = spop %5177 }
  0xac   :  { %v163_v17 = vmul.f32 %v5517_v4, %v161_v11  ;;  %v164_v18 = vmul.f32 %v5522_v5, %v161_v11  ;;  %s5180_s13 = spop %5179  ;;  %v2287_v19 = vmul.f32 %v5527_v8, %v161_v11  ;;  %v2288_v20 = vmul.f32 %v5532_v9, %v161_v11 }
  0xad   :  { %v173_v21 = vstv %s5178_s8  ;;  %v181_v22 = vstv %s5180_s13  ;;  %s5182_s14 = spop %5181 }
  0xae   :  { %v175_v23 = vmul.f32 %v5537_v10, %v173_v21  ;;  %v176_v24 = vmul.f32 %v5542_v12, %v173_v21  ;;  %v2294_v25 = vmul.f32 %v5547_v13, %v173_v21  ;;  %v2295_v26 = vmul.f32 %v5552_v14, %v173_v21  ;;  %s5184_s0 = spop %5183 }
  0xaf   :  { %v183_v27 = vmul.f32 %v181_v22, %v5479_v53  ;;  %v184_v28 = vmul.f32 %v181_v22, %v5484_v54  ;;  %v2298_v29 = vmul.f32 %v5469_v51, %v181_v22  ;;  %v2299_v30 = vmul.f32 %v5474_v52, %v181_v22  ;;  %s5186_s15 = spop %5185 }
  0xb0   :  { %v188_v31 = vstv %s5182_s14  ;;  %v197_v32 = vstv %s5184_s0  ;;  %v206_v33 = vstv %s5186_s15  ;;  %v165_v34 = vadd.f32 %v163_v17, %v153_v15  ;;  %s5188_s16 = spop %5187 }
  0xb1   :  { %v190_v35 = vmul.f32 %v5489_v55, %v188_v31  ;;  %v191_v36 = vmul.f32 %v5494_v56, %v188_v31  ;;  %v2300_v37 = vmul.f32 %v5499_v57, %v188_v31  ;;  %v2301_v38 = vmul.f32 %v5504_v58, %v188_v31  ;;  %v413_v59 = vpop.permute.xlu0 %412  ;;  %v418_v0 = vpop.permute.xlu1 %417 }
  0xb2   :  { %v199_v39 = vmul.f32 %v5517_v4, %v197_v32  ;;  %v200_v40 = vmul.f32 %v5522_v5, %v197_v32  ;;  %v2304_v41 = vmul.f32 %v5527_v8, %v197_v32  ;;  %v2305_v42 = vmul.f32 %v5532_v9, %v197_v32  ;;  %s5190_s17 = spop %5189 }
  0xb3   :  { %v192_v43 = vadd.f32 %v190_v35, %v183_v27  ;;  %v193_v44 = vadd.f32 %v191_v36, %v184_v28  ;;  %v2302_v45 = vadd.f32 %v2300_v37, %v2298_v29  ;;  %v2303_v46 = vadd.f32 %v2301_v38, %v2299_v30  ;;  %s5192_s18 = spop %5191 }
  0xb4   :  { %v208_v47 = vmul.f32 %v5537_v10, %v206_v33  ;;  %v209_v48 = vmul.f32 %v5542_v12, %v206_v33  ;;  %v2308_v49 = vmul.f32 %v5547_v13, %v206_v33  ;;  %v2309_v50 = vmul.f32 %v5552_v14, %v206_v33 }
  0xb5   :  { %v177_v60 = vadd.f32 %v175_v23, %v165_v34  ;;  %v2289_v61 = vadd.f32 %v2287_v19, %v2282_v6  ;;  %v166_v62 = vadd.f32 %v164_v18, %v154_v16  ;;  %v2290_v63 = vadd.f32 %v2288_v20, %v2283_v7  ;;  %v428_v37 = vpop.permute.xlu0 %427 }
  0xb6   :  { %v214_v1 = vstv %s5188_s16  ;;  %v221_v2 = vstv %s5190_s17  ;;  %v230_v3 = vstv %s5192_s18  ;;  %v202_v11 = vadd.f32 %v200_v40, %v193_v44  ;;  %s5194_s19 = spop %5193 }
  0xb7   :  { %v490_v15 = vadd.f32 %v413_v59, %v177_v60  ;;  %v2296_v17 = vadd.f32 %v2294_v25, %v2289_v61  ;;  %v178_v21 = vadd.f32 %v176_v24, %v166_v62  ;;  %v2297_v22 = vadd.f32 %v2295_v26, %v2290_v63  ;;  %s5196_s20 = spop %5195 }
  0xb8   :  { %v216_v27 = vmul.f32 %v214_v1, %v5479_v53  ;;  %v217_v28 = vmul.f32 %v214_v1, %v5484_v54  ;;  %v2312_v29 = vmul.f32 %v5469_v51, %v214_v1  ;;  %v2313_v23 = vmul.f32 %v5474_v52, %v214_v1  ;;  %s5198_s21 = spop %5197  ;;  %v423_v1 = vpop.permute.xlu1 %422 }
  0xb9   :  { %v506_v6 = vmax.f32 %v490_v15, 0.0  ;;  %v5582_v16 = vadd.f32 %v2296_v17, %v413_v59  ;;  %v491_v7 = vadd.f32 %v418_v0, %v178_v21  ;;  %v5584_v18 = vadd.f32 %v2297_v22, %v418_v0 }
  0xba   :  { %v223_v19 = vmul.f32 %v5489_v55, %v221_v2  ;;  %v224_v20 = vmul.f32 %v5494_v56, %v221_v2  ;;  %v2314_v24 = vmul.f32 %v5499_v57, %v221_v2  ;;  %v2315_v25 = vmul.f32 %v5504_v58, %v221_v2  ;;  %s5200_s22 = spop %5199 }
  0xbb   :  { %v2412_v26 = vmax.f32 %v5582_v16, 0.0  ;;  %v507_v30 = vmax.f32 %v491_v7, 0.0  ;;  %v2413_v31 = vmax.f32 %v5584_v18, 0.0  ;;  %v232_v32 = vmul.f32 %v5517_v4, %v230_v3  ;;  %s5202_s1 = spop %5201 }
  0xbc   :  { %v225_v33 = vadd.f32 %v223_v19, %v216_v27  ;;  %v226_v34 = vadd.f32 %v224_v20, %v217_v28  ;;  %v2316_v35 = vadd.f32 %v2314_v24, %v2312_v29  ;;  %v2317_v36 = vadd.f32 %v2315_v25, %v2313_v23  ;;  %s5204_s23 = spop %5203 }
  0xbd   :  { %v233_v38 = vmul.f32 %v5522_v5, %v230_v3  ;;  %v2318_v40 = vmul.f32 %v5527_v8, %v230_v3  ;;  %v2319_v44 = vmul.f32 %v5532_v9, %v230_v3  ;;  %v211_v59 = vadd.f32 %v209_v48, %v202_v11 }
  0xbe   :  { %v2307_v60 = vadd.f32 %v2305_v42, %v2303_v46  ;;  %v201_v61 = vadd.f32 %v199_v39, %v192_v43  ;;  %v2306_v62 = vadd.f32 %v2304_v41, %v2302_v45  ;;  %v239_v63 = vstv %s5194_s19  ;;  %s5206_s24 = spop %5205 }
  0xbf   :  { %v5596_v0 = vadd.f32 %v428_v37, %v211_v59  ;;  %v241_v2 = vmul.f32 %v5537_v10, %v239_v63  ;;  %v242_v15 = vmul.f32 %v5542_v12, %v239_v63  ;;  %v2322_v17 = vmul.f32 %v5547_v13, %v239_v63  ;;  %s5208_s25 = spop %5207 }
  0xc0   :  { %v2311_v21 = vadd.f32 %v2309_v50, %v2307_v60  ;;  %v210_v22 = vadd.f32 %v208_v47, %v201_v61  ;;  %v2310_v27 = vadd.f32 %v2308_v49, %v2306_v62  ;;  %v2323_v3 = vmul.f32 %v5552_v14, %v239_v63 }
  0xc1   :  { %v509_v42 = vmax.f32 %v5596_v0, 0.0  ;;  %v247_v39 = vstv %s5196_s20  ;;  %v254_v41 = vstv %s5198_s21  ;;  %v522_v43 = vpack.c.bf16 %v507_v30, %v506_v6 }
  0xc2   :  { %v5603_v45 = vadd.f32 %v2311_v21, %v428_v37  ;;  %v492_v46 = vadd.f32 %v423_v1, %v210_v22  ;;  %v5605_v48 = vadd.f32 %v2310_v27, %v423_v1  ;;  %v249_v11 = vmul.f32 %v247_v39, %v5479_v53  ;;  %v438_v1 = vpop.permute.xlu0 %437  ;;  %s5210_s26 = spop %5209 }
  0xc3   :  { %v250_v28 = vmul.f32 %v247_v39, %v5484_v54  ;;  %v2326_v50 = vmul.f32 %v5469_v51, %v247_v39  ;;  %v2327_v47 = vmul.f32 %v5474_v52, %v247_v39  ;;  %v256_v49 = vmul.f32 %v5489_v55, %v254_v41  ;;  %4481 = vmatprep.subr.bf16.mxu0 %v522_v43  ;;  %s5212_s27 = spop %5211 }
  0xc4   :  { %v508_v23 = vmax.f32 %v492_v46, 0.0  ;;  %v2414_v6 = vmax.f32 %v5605_v48, 0.0  ;;  %v257_v7 = vmul.f32 %v5494_v56, %v254_v41  ;;  %4482 = vmatpush3.bf16.msra.mxu0 %v522_v43  ;;  %v2328_v20 = vmul.f32 %v5499_v57, %v254_v41  ;;  %s5214_s2 = spop %5213 }
  0xc5   :  { %v258_v19 = vadd.f32 %v256_v49, %v249_v11  ;;  %v2329_v24 = vmul.f32 %v5504_v58, %v254_v41  ;;  %v235_v25 = vadd.f32 %v233_v38, %v226_v34  ;;  %v2321_v37 = vadd.f32 %v2319_v44, %v2317_v36  ;;  %v433_v41 = vpop.permute.xlu1 %432 }
  0xc6   :  { %v259_v30 = vadd.f32 %v257_v7, %v250_v28  ;;  %v234_v59 = vadd.f32 %v232_v32, %v225_v33  ;;  %v2320_v60 = vadd.f32 %v2318_v40, %v2316_v35  ;;  %v2330_v61 = vadd.f32 %v2328_v20, %v2326_v50  ;;  %s5216_s28 = spop %5215 }
  0xc7   :  { %v2331_v62 = vadd.f32 %v2329_v24, %v2327_v47  ;;  %v244_v63 = vadd.f32 %v242_v15, %v235_v25  ;;  %v263_v0 = vstv %s5200_s22  ;;  %v2325_v21 = vadd.f32 %v2323_v3, %v2321_v37  ;;  %s5218_s29 = spop %5217 }
  0xc8   :  { %v243_v22 = vadd.f32 %v241_v2, %v234_v59  ;;  %v2324_v27 = vadd.f32 %v2322_v17, %v2320_v60  ;;  %v265_v39 = vmul.f32 %v5517_v4, %v263_v0  ;;  %v266_v34 = vmul.f32 %v5522_v5, %v263_v0  ;;  %s5220_s30 = spop %5219 }
  0xc9   :  { %v5618_v43 = vadd.f32 %v438_v1, %v244_v63  ;;  %v2332_v32 = vmul.f32 %v5527_v8, %v263_v0  ;;  %v2333_v33 = vmul.f32 %v5532_v9, %v263_v0  ;;  %v5623_v35 = vadd.f32 %v2325_v21, %v438_v1  ;;  %v448_v1 = vpop.permute.xlu0 %447  ;;  %v443_v21 = vpop.permute.xlu1 %442 }
  0xca   :  { %v494_v36 = vadd.f32 %v433_v41, %v243_v22  ;;  %v5625_v38 = vadd.f32 %v2324_v27, %v433_v41  ;;  %v272_v40 = vstv %s5202_s1  ;;  %v523_v50 = vpack.c.bf16 %v509_v42, %v508_v23  ;;  %s5222_s6 = spop %5221 }
  0xcb   :  { %v511_v44 = vmax.f32 %v5618_v43, 0.0  ;;  %v274_v2 = vmul.f32 %v5537_v10, %v272_v40  ;;  %v275_v15 = vmul.f32 %v5542_v12, %v272_v40  ;;  %v2336_v17 = vmul.f32 %v5547_v13, %v272_v40  ;;  %s5224_s7 = spop %5223 }
  0xcc   :  { %v510_v46 = vmax.f32 %v494_v36, 0.0  ;;  %v2337_v28 = vmul.f32 %v5552_v14, %v272_v40  ;;  %v268_v47 = vadd.f32 %v266_v34, %v259_v30  ;;  %v2335_v49 = vadd.f32 %v2333_v33, %v2331_v62  ;;  %4483 = vmatprep.subr.bf16.mxu0 %v523_v50 }
  0xcd   :  { %v267_v7 = vadd.f32 %v265_v39, %v258_v19  ;;  %v2334_v20 = vadd.f32 %v2332_v32, %v2330_v61  ;;  %v280_v24 = vstv %s5204_s23  ;;  %v287_v25 = vstv %s5206_s24  ;;  %4484 = vmatpush3.bf16.msra.mxu0 %v523_v50 }
  0xce   :  { %v296_v37 = vstv %s5208_s25  ;;  %v277_v59 = vadd.f32 %v275_v15, %v268_v47  ;;  %v2339_v60 = vadd.f32 %v2337_v28, %v2335_v49  ;;  %v282_v0 = vmul.f32 %v280_v24, %v5479_v53  ;;  %s5226_s8 = spop %5225 }
  0xcf   :  { %v276_v63 = vadd.f32 %v274_v2, %v267_v7  ;;  %v2338_v22 = vadd.f32 %v2336_v17, %v2334_v20  ;;  %v283_v27 = vmul.f32 %v280_v24, %v5484_v54  ;;  %v2340_v42 = vmul.f32 %v5469_v51, %v280_v24  ;;  %s5228_s9 = spop %5227 }
  0xd0   :  { %v2341_v23 = vmul.f32 %v5474_v52, %v280_v24  ;;  %v497_v19 = vadd.f32 %v448_v1, %v277_v59  ;;  %v5638_v30 = vadd.f32 %v2339_v60, %v448_v1  ;;  %v289_v62 = vmul.f32 %v5489_v55, %v287_v25  ;;  %s5230_s10 = spop %5229 }
  0xd1   :  { %v496_v61 = vadd.f32 %v443_v21, %v276_v63  ;;  %v5641_v39 = vadd.f32 %v2338_v22, %v443_v21  ;;  %v290_v43 = vmul.f32 %v5494_v56, %v287_v25  ;;  %v2342_v41 = vmul.f32 %v5499_v57, %v287_v25 }
  0xd2   :  { %v2343_v34 = vmul.f32 %v5504_v58, %v287_v25  ;;  %v513_v32 = vmax.f32 %v497_v19, 0.0  ;;  %v291_v40 = vadd.f32 %v289_v62, %v282_v0  ;;  %v298_v50 = vmul.f32 %v5517_v4, %v296_v37  ;;  %s5232_s11 = spop %5231 }
  0xd3   :  { %v512_v36 = vmax.f32 %v496_v61, 0.0  ;;  %v292_v15 = vadd.f32 %v290_v43, %v283_v27  ;;  %v2344_v17 = vadd.f32 %v2342_v41, %v2340_v42  ;;  %v299_v47 = vmul.f32 %v5522_v5, %v296_v37  ;;  %s5234_s12 = spop %5233 }
  0xd4   :  { %v2345_v28 = vadd.f32 %v2343_v34, %v2341_v23  ;;  %v2346_v49 = vmul.f32 %v5527_v8, %v296_v37  ;;  %v2347_v7 = vmul.f32 %v5532_v9, %v296_v37  ;;  %v305_v20 = vstv %s5210_s26 }
  0xd5   :  { %v524_v24 = vpack.c.bf16 %v511_v44, %v510_v46  ;;  %v313_v25 = vstv %s5212_s27  ;;  %v320_v59 = vstv %s5214_s2  ;;  %v300_v60 = vadd.f32 %v298_v50, %v291_v40 }
  0xd6   :  { %v301_v63 = vadd.f32 %v299_v47, %v292_v15  ;;  %v2348_v0 = vadd.f32 %v2346_v49, %v2344_v17  ;;  %v2349_v1 = vadd.f32 %v2347_v7, %v2345_v28  ;;  %v307_v21 = vmul.f32 %v5537_v10, %v305_v20 }
  0xd7   :  { %v308_v22 = vmul.f32 %v5542_v12, %v305_v20  ;;  %v2350_v27 = vmul.f32 %v5547_v13, %v305_v20  ;;  %v2351_v42 = vmul.f32 %v5552_v14, %v305_v20  ;;  %4485 = vmatprep.subr.bf16.mxu0 %v524_v24  ;;  %v315_v44 = vmul.f32 %v313_v25, %v5479_v53 }
  0xd8   :  { %4486 = vmatpush3.bf16.msra.mxu0 %v524_v24  ;;  %v316_v46 = vmul.f32 %v313_v25, %v5484_v54  ;;  %v2354_v37 = vmul.f32 %v5469_v51, %v313_v25  ;;  %v2355_v23 = vmul.f32 %v5474_v52, %v313_v25  ;;  %v309_v19 = vadd.f32 %v307_v21, %v300_v60 }
  0xd9   :  { %v5660_v61 = vadd.f32 %v308_v22, %v301_v63  ;;  %v5662_v62 = vadd.f32 %v2350_v27, %v2348_v0  ;;  %v5664_v43 = vadd.f32 %v2351_v42, %v2349_v1  ;;  %v322_v41 = vmul.f32 %v5489_v55, %v320_v59 }
  0xda   :  { %v323_v34 = vmul.f32 %v5494_v56, %v320_v59  ;;  %v2356_v40 = vmul.f32 %v5499_v57, %v320_v59  ;;  %v2357_v15 = vmul.f32 %v5504_v58, %v320_v59  ;;  %v329_v17 = vstv %s5216_s28 }
  0xdb   :  { %v338_v28 = vstv %s5218_s29  ;;  %v525_v50 = vpack.c.bf16 %v513_v32, %v512_v36  ;;  %v346_v47 = vstv %s5220_s30  ;;  %v324_v49 = vadd.f32 %v322_v41, %v315_v44  ;;  %v5678_v44 = vpop.permute.xlu1 %452 }
  0xdc   :  { %v325_v7 = vadd.f32 %v323_v34, %v316_v46  ;;  %v2358_v20 = vadd.f32 %v2356_v40, %v2354_v37  ;;  %v2359_v24 = vadd.f32 %v2357_v15, %v2355_v23  ;;  %v331_v25 = vmul.f32 %v5517_v4, %v329_v17  ;;  %v5684_v34 = vpop.permute.xlu0 %457 }
  0xdd   :  { %v332_v60 = vmul.f32 %v5522_v5, %v329_v17  ;;  %v2360_v63 = vmul.f32 %v5527_v8, %v329_v17  ;;  %v2361_v0 = vmul.f32 %v5532_v9, %v329_v17  ;;  %4487 = vmatprep.subr.bf16.mxu0 %v525_v50  ;;  %v340_v59 = vmul.f32 %v5537_v10, %v338_v28 }
  0xde   :  { %v341_v1 = vmul.f32 %v5542_v12, %v338_v28  ;;  %v2364_v32 = vmul.f32 %v5547_v13, %v338_v28  ;;  %v2365_v36 = vmul.f32 %v5552_v14, %v338_v28  ;;  %4488 = vmatpush3.bf16.msra.mxu0 %v525_v50  ;;  %v333_v21 = vadd.f32 %v331_v25, %v324_v49 }
  0xdf   :  { %v334_v22 = vadd.f32 %v332_v60, %v325_v7  ;;  %v2362_v27 = vadd.f32 %v2360_v63, %v2358_v20  ;;  %v2363_v42 = vadd.f32 %v2361_v0, %v2359_v24  ;;  %v348_v46 = vmul.f32 %v346_v47, %v5479_v53 }
  0xe0   :  { %v349_v37 = vmul.f32 %v346_v47, %v5484_v54  ;;  %v2368_v23 = vmul.f32 %v5469_v51, %v346_v47  ;;  %v2369_v41 = vmul.f32 %v5474_v52, %v346_v47  ;;  %v5686_v40 = vadd.f32 %v340_v59, %v333_v21  ;;  %v5709_v2 = vpop.permute.xlu0 %467 }
  0xe1   :  { %v5688_v15 = vadd.f32 %v341_v1, %v334_v22  ;;  %v5690_v17 = vadd.f32 %v2364_v32, %v2362_v27  ;;  %v5692_v28 = vadd.f32 %v2365_v36, %v2363_v42  ;;  %v353_v50 = vstv %s5222_s6  ;;  %v5703_v22 = vpop.permute.xlu1 %462 }
  0xe2   :  { %v362_v49 = vstv %s5224_s7  ;;  %v371_v7 = vstv %s5226_s8  ;;  %v498_v20 = vadd.f32 %v5678_v44, %v309_v19  ;;  %v355_v24 = vmul.f32 %v5489_v55, %v353_v50 }
  0xe3   :  { %v356_v25 = vmul.f32 %v5494_v56, %v353_v50  ;;  %v2370_v47 = vmul.f32 %v5499_v57, %v353_v50  ;;  %v2371_v60 = vmul.f32 %v5504_v58, %v353_v50  ;;  %v364_v63 = vmul.f32 %v5517_v4, %v362_v49 }
  0xe4   :  { %v365_v0 = vmul.f32 %v5522_v5, %v362_v49  ;;  %v2374_v59 = vmul.f32 %v5527_v8, %v362_v49  ;;  %v2375_v1 = vmul.f32 %v5532_v9, %v362_v49  ;;  %v357_v32 = vadd.f32 %v355_v24, %v348_v46 }
  0xe5   :  { %v358_v36 = vadd.f32 %v356_v25, %v349_v37  ;;  %v2372_v19 = vadd.f32 %v2370_v47, %v2368_v23  ;;  %v2373_v21 = vadd.f32 %v2371_v60, %v2369_v41  ;;  %v373_v27 = vmul.f32 %v5537_v10, %v371_v7 }
  0xe6   :  { %v374_v42 = vmul.f32 %v5542_v12, %v371_v7  ;;  %v2378_v50 = vmul.f32 %v5547_v13, %v371_v7  ;;  %v2379_v33 = vmul.f32 %v5552_v14, %v371_v7  ;;  %v366_v3 = vadd.f32 %v364_v63, %v357_v32 }
  0xe7   :  { %v367_v11 = vadd.f32 %v365_v0, %v358_v36  ;;  %v2376_v49 = vadd.f32 %v2374_v59, %v2372_v19  ;;  %v2377_v46 = vadd.f32 %v2375_v1, %v2373_v21  ;;  %v499_v37 = vadd.f32 %v5684_v34, %v5660_v61  ;;  %v478_v21 = vpop.permute.xlu0 %477 }
  0xe8   :  { %v514_v23 = vmax.f32 %v498_v20, 0.0  ;;  %v379_v41 = vstv %s5228_s9  ;;  %v386_v24 = vstv %s5230_s10  ;;  %v375_v25 = vadd.f32 %v373_v27, %v366_v3 }
  0xe9   :  { %v376_v47 = vadd.f32 %v374_v42, %v367_v11  ;;  %v5713_v60 = vadd.f32 %v2378_v50, %v2376_v49  ;;  %v5715_v29 = vadd.f32 %v2379_v33, %v2377_v46  ;;  %v515_v7 = vmax.f32 %v499_v37, 0.0  ;;  %v473_v11 = vpop.permute.xlu1 %472 }
  0xea   :  { %v381_v63 = vmul.f32 %v379_v41, %v5479_v53  ;;  %v382_v0 = vmul.f32 %v379_v41, %v5484_v54  ;;  %v2382_v59 = vmul.f32 %v5469_v51, %v379_v41  ;;  %v2383_v61 = vmul.f32 %v5474_v52, %v379_v41 }
  0xeb   :  { %v388_v20 = vmul.f32 %v5489_v55, %v386_v24  ;;  %v389_v1 = vmul.f32 %v5494_v56, %v386_v24  ;;  %v2384_v3 = vmul.f32 %v5499_v57, %v386_v24  ;;  %v526_v32 = vpack.c.bf16 %v515_v7, %v514_v23 }
  0xec   :  { %v2385_v33 = vmul.f32 %v5504_v58, %v386_v24  ;;  %v395_v36 = vstv %s5232_s11  ;;  %v404_v19 = vstv %s5234_s12  ;;  %v6718_v16 = vmax.f32 %v5641_v39, 0.0 }
  0xed   :  { %v390_v53 = vadd.f32 %v388_v20, %v381_v63  ;;  %v391_v27 = vadd.f32 %v389_v1, %v382_v0  ;;  %v2386_v54 = vadd.f32 %v2384_v3, %v2382_v59  ;;  %v397_v51 = vmul.f32 %v5517_v4, %v395_v36  ;;  %4489 = vmatprep.subr.bf16.mxu0 %v526_v32  ;;  %v483_v24 = vpop.permute.xlu1 %482  ;;  %v488_v0 = vpop.permute.xlu0 %487 }
  0xee   :  { %v2387_v52 = vadd.f32 %v2385_v33, %v2383_v61  ;;  %v398_v55 = vmul.f32 %v5522_v5, %v395_v36  ;;  %v2388_v56 = vmul.f32 %v5527_v8, %v395_v36  ;;  %v2389_v57 = vmul.f32 %v5532_v9, %v395_v36  ;;  %4490 = vmatpush3.bf16.msra.mxu0 %v526_v32 }
  0xef   :  { %v399_v42 = vadd.f32 %v397_v51, %v390_v53  ;;  %v406_v58 = vmul.f32 %v5537_v10, %v404_v19  ;;  %v407_v50 = vmul.f32 %v5542_v12, %v404_v19  ;;  %v2392_v49 = vmul.f32 %v5547_v13, %v404_v19 }
  0xf0   :  { %v400_v46 = vadd.f32 %v398_v55, %v391_v27  ;;  %v2390_v37 = vadd.f32 %v2388_v56, %v2386_v54  ;;  %v2391_v23 = vadd.f32 %v2389_v57, %v2387_v52  ;;  %v2393_v4 = vmul.f32 %v5552_v14, %v404_v19  ;;  %v5799_v55 = vld [vmem:[%s6676_s3 + $0x20] sm:$0xff]   ;;  %v5806_v56 = vld [vmem:[%s6676_s3 + $0x28] sm:$0xff]   ;;  %v5811_v57 = vld [vmem:[%s6676_s3 + $0x30] sm:$0xff]  }
  0xf1   :  { %v408_v41 = vadd.f32 %v406_v58, %v399_v42  ;;  %v500_v5 = vadd.f32 %v5703_v22, %v5686_v40  ;;  %v501_v8 = vadd.f32 %v5709_v2, %v5688_v15  ;;  %v502_v9 = vadd.f32 %v473_v11, %v375_v25  ;;  %v5818_v42 = vld [vmem:[%s6676_s3 + $0x38] sm:$0xff]   ;;  %v5823_v58 = vld [vmem:[%s6676_s3 + $0x40] sm:$0xff]  }
  0xf2   :  { %v409_v7 = vadd.f32 %v407_v50, %v400_v46  ;;  %v2394_v10 = vadd.f32 %v2392_v49, %v2390_v37  ;;  %v2395_v63 = vadd.f32 %v2393_v4, %v2391_v23  ;;  %v503_v12 = vadd.f32 %v478_v21, %v376_v47  ;;  %v5830_v50 = vld [vmem:[%s6676_s3 + $0x48] sm:$0xff]   ;;  %v5835_v49 = vld [vmem:[%s6676_s3 + $0x50] sm:$0xff]   ;;  %v5842_v46 = vld [vmem:[%s6676_s3 + $0x58] sm:$0xff]  }
  0xf3   :  { %v516_v13 = vmax.f32 %v500_v5, 0.0  ;;  %v517_v59 = vmax.f32 %v501_v8, 0.0  ;;  %v518_v61 = vmax.f32 %v502_v9, 0.0  ;;  %v504_v20 = vadd.f32 %v483_v24, %v408_v41  ;;  %v5847_v37 = vld [vmem:[%s6676_s3 + $0x60] sm:$0xff]   ;;  %v5854_v23 = vld [vmem:[%s6676_s3 + $0x68] sm:$0xff]   ;;  %v5859_v4 = vld [vmem:[%s6676_s3 + $0x70] sm:$0xff]  }
  0xf4   :  { %v519_v1 = vmax.f32 %v503_v12, 0.0  ;;  %v505_v14 = vadd.f32 %v488_v0, %v409_v7  ;;  %v5741_v40 = vpack.c.bf16 %v2413_v31, %v2412_v26  ;;  %v6715_v15 = vmax.f32 %v5603_v45, 0.0  ;;  %6720 = vst [vmem:[#allocation5_spill] sm:$0xff] %v5847_v37  ;;  %6721 = vst [vmem:[#allocation6_spill] sm:$0xff] %v5854_v23  ;;  %v5866_v41 = vld [vmem:[%s6676_s3 + $0x78] sm:$0xff]   ;;  %v5871_v5 = vld [vmem:[%s6676_s3 + $0x80] sm:$0xff]  }
  0xf5   :  { %v527_v47 = vpack.c.bf16 %v517_v59, %v516_v13  ;;  %v520_v3 = vmax.f32 %v504_v20, 0.0  ;;  %v6716_v32 = vmax.f32 %v5625_v38, 0.0  ;;  %v6717_v33 = vmax.f32 %v5623_v35, 0.0  ;;  %6722 = vst [vmem:[#allocation7_spill] sm:$0xff] %v5859_v4  ;;  %6723 = vst [vmem:[#allocation8_spill] sm:$0xff] %v5866_v41  ;;  %v5878_v8 = vld [vmem:[%s6676_s3 + $0x88] sm:$0xff]  }
  0xf6   :  { %v5747_v25 = vpack.c.bf16 %v6715_v15, %v2414_v6  ;;  %v6719_v18 = vmax.f32 %v5638_v30, 0.0  ;;  %v528_v31 = vpack.c.bf16 %v519_v1, %v518_v61  ;;  %v521_v48 = vmax.f32 %v505_v14, 0.0  ;;  %6724 = vst [vmem:[#allocation9_spill] sm:$0xff] %v5871_v5  ;;  %6725 = vst [vmem:[#allocation10_spill] sm:$0xff] %v5878_v8  ;;  %v5883_v9 = vld [vmem:[%s6676_s3 + $0x90] sm:$0xff]   ;;  %v5895_v7 = vld [vmem:[%s6676_s3 + $0xa0] sm:$0xff]  }
  0xf7   :  { %v5753_v36 = vpack.c.bf16 %v6717_v33, %v6716_v32  ;;  %v2404_v45 = vadd.f32 %v5662_v62, %v5678_v44  ;;  %v2405_v6 = vadd.f32 %v5664_v43, %v5684_v34  ;;  %4491 = vmatprep.subr.bf16.mxu0 %v527_v47  ;;  %v2406_v35 = vadd.f32 %v5690_v17, %v5703_v22  ;;  %v5914_v12 = vld [vmem:[%s6676_s3 + $0xb8] sm:$0xff]   ;;  %v5926_v13 = vld [vmem:[%s6676_s3 + $0xc8] sm:$0xff]   ;;  %v5931_v59 = vld [vmem:[%s6676_s3 + $0xd0] sm:$0xff]  }
  0xf8   :  { %v5759_v26 = vpack.c.bf16 %v6719_v18, %v6718_v16  ;;  %v2407_v38 = vadd.f32 %v5692_v28, %v5709_v2  ;;  %v2408_v39 = vadd.f32 %v5713_v60, %v473_v11  ;;  %v2409_v30 = vadd.f32 %v5715_v29, %v478_v21  ;;  %4492 = vmatpush3.bf16.msra.mxu0 %v527_v47  ;;  %v5782_v60 = vld [vmem:[%s6676_s3 + $0x8] sm:$0xff]   ;;  %v5787_v11 = vld [vmem:[%s6676_s3 + $0x10] sm:$0xff]   ;;  %v5794_v21 = vld [vmem:[%s6676_s3 + $0x18] sm:$0xff]  }
  0xf9   :  { %v529_v19 = vpack.c.bf16 %v521_v48, %v520_v3  ;;  %v2420_v53 = vmax.f32 %v2404_v45, 0.0  ;;  %v2421_v27 = vmax.f32 %v2405_v6, 0.0  ;;  %v2410_v54 = vadd.f32 %v2394_v10, %v483_v24  ;;  %4493 = vmatprep.subr.bf16.mxu0 %v528_v31  ;;  %6726 = vst [vmem:[#allocation11_spill] sm:$0xff] %v5883_v9  ;;  %v5890_v24 = vld [vmem:[%s6676_s3 + $0x98] sm:$0xff]   ;;  %6728 = vst [vmem:[#allocation13_spill] sm:$0xff] %v5895_v7  ;;  %v5902_v10 = vld [vmem:[%s6676_s3 + $0xa8] sm:$0xff]  }
  0xfa   :  { %v2422_v62 = vmax.f32 %v2406_v35, 0.0  ;;  %v2423_v44 = vmax.f32 %v2407_v38, 0.0  ;;  %v2424_v43 = vmax.f32 %v2408_v39, 0.0  ;;  %v2425_v34 = vmax.f32 %v2409_v30, 0.0  ;;  %6727 = vst [vmem:[#allocation12_spill] sm:$0xff] %v5890_v24  ;;  %6729 = vst [vmem:[#allocation14_spill] sm:$0xff] %v5902_v10 }
  0xfb   :  { %v5771_v51 = vpack.c.bf16 %v2421_v27, %v2420_v53  ;;  %v2411_v17 = vadd.f32 %v2395_v63, %v488_v0  ;;  %v2426_v22 = vmax.f32 %v2410_v54, 0.0  ;;  %v5907_v63 = vld [vmem:[%s6676_s3 + $0xb0] sm:$0xff]   ;;  %6731 = vst [vmem:[#allocation16_spill] sm:$0xff] %v5914_v12  ;;  %v5919_v0 = vld [vmem:[%s6676_s3 + $0xc0] sm:$0xff]   ;;  %6733 = vst [vmem:[#allocation18_spill] sm:$0xff] %v5926_v13 }
  0xfc   :  { %v5773_v52 = vpack.c.bf16 %v2423_v44, %v2422_v62  ;;  %v5775_v2 = vpack.c.bf16 %v2425_v34, %v2424_v43  ;;  %4494 = vmatpush3.bf16.msra.mxu0 %v528_v31  ;;  %6730 = vst [vmem:[#allocation15_spill] sm:$0xff] %v5907_v63  ;;  %6732 = vst [vmem:[#allocation17_spill] sm:$0xff] %v5919_v0  ;;  %v5938_v61 = vld [vmem:[%s6676_s3 + $0xd8] sm:$0xff]   ;;  %v5943_v20 = vld [vmem:[%s6676_s3 + $0xe0] sm:$0xff]  }
  0xfd   :  { %v2427_v29 = vmax.f32 %v2411_v17, 0.0  ;;  %4495 = vmatprep.subr.bf16.mxu0 %v529_v19  ;;  %6734 = vst [vmem:[#allocation19_spill] sm:$0xff] %v5931_v59  ;;  %6735 = vst [vmem:[#allocation20_spill] sm:$0xff] %v5938_v61  ;;  %v5950_v1 = vld [vmem:[%s6676_s3 + $0xe8] sm:$0xff]   ;;  %v5955_v14 = vld [vmem:[%s6676_s3 + $0xf0] sm:$0xff]  }
  0xfe   :  { %6736 = vst [vmem:[#allocation21_spill] sm:$0xff] %v5943_v20  ;;  %6737 = vst [vmem:[#allocation22_spill] sm:$0xff] %v5950_v1  ;;  %v5962_v15 = vld [vmem:[%s6676_s3 + $0xf8] sm:$0xff]   ;;  %v5967_v47 = vld [vmem:[%s6676_s3 + $0x100] sm:$0xff]  }
  0xff   :  { %v5777_v28 = vpack.c.bf16 %v2427_v29, %v2426_v22  ;;  %6738 = vst [vmem:[#allocation23_spill] sm:$0xff] %v5955_v14  ;;  %6739 = vst [vmem:[#allocation24_spill] sm:$0xff] %v5962_v15  ;;  %v5974_v3 = vld [vmem:[%s6676_s3 + $0x108] sm:$0xff]   ;;  %v5979_v32 = vld [vmem:[%s6676_s3 + $0x110] sm:$0xff]  }
 0x100   :  { %4496 = vmatpush3.bf16.msra.mxu0 %v529_v19  ;;  %6740 = vst [vmem:[#allocation25_spill] sm:$0xff] %v5967_v47  ;;  %6741 = vst [vmem:[#allocation26_spill] sm:$0xff] %v5974_v3  ;;  %v5986_v33 = vld [vmem:[%s6676_s3 + $0x118] sm:$0xff]   ;;  %v5991_v16 = vld [vmem:[%s6676_s3 + $0x120] sm:$0xff]  }
 0x101   :  { %6742 = vst [vmem:[#allocation27_spill] sm:$0xff] %v5979_v32  ;;  %6743 = vst [vmem:[#allocation28_spill] sm:$0xff] %v5986_v33  ;;  %v5998_v18 = vld [vmem:[%s6676_s3 + $0x128] sm:$0xff]   ;;  %v6003_v31 = vld [vmem:[%s6676_s3 + $0x130] sm:$0xff]  }
 0x102   :  { %6744 = vst [vmem:[#allocation29_spill] sm:$0xff] %v5991_v16  ;;  %6745 = vst [vmem:[#allocation30_spill] sm:$0xff] %v5998_v18  ;;  %v3957_v48 = vld [vmem:[%s6677_s4 + $0x10] sm:$0xff]  ;;  %v3958_v45 = vld [vmem:[%s6677_s4 + $0x18] sm:$0xff] }
 0x103   :  { %4498 = vmatmul.mubr.bf16.vlgmr.msra.gmra.mrb[0].mxu0 %v5782_v60  ;;  %6746 = vst [vmem:[#allocation31_spill] sm:$0xff] %v6003_v31  ;;  %v6011_v6 = vpack.c.bf16 %v3958_v45, %v3957_v48  ;;  %v6022_v35 = vld [vmem:[%s6676_s3 + $0x138] sm:$0xff]   ;;  %v6027_v38 = vld [vmem:[%s6676_s3 + $0x140] sm:$0xff]   ;;  %v1236_v30 = vld [vmem:[%s6677_s4 + $0x8] sm:$0xff] }
 0x104   :  { %4501 = vmatprep.mubr.bf16.mxu0 %v5787_v11  ;;  %6747 = vst [vmem:[#allocation32_spill] sm:$0xff] %v6022_v35  ;;  %6748 = vst [vmem:[#allocation33_spill] sm:$0xff] %v6027_v38  ;;  %v1235_v39 = vld [vmem:[%s6677_s4] sm:$0xff]  ;;  %v6044_v53 = vld [vmem:[%s6676_s3 + $0x148] sm:$0xff]  }
 0x105   :  { %5018 = vmatprep.subr.bf16.mxu1 %v6011_v6  ;;  %5030 = vmatprep.subr.bf16.mxu0 %v6011_v6  ;;  %v6035_v19 = vpack.c.bf16 %v1236_v30, %v1235_v39  ;;  %6749 = vst [vmem:[#allocation34_spill] sm:$0xff] %v6044_v53  ;;  %v6049_v27 = vld [vmem:[%s6676_s3 + $0x150] sm:$0xff]   ;;  %v6056_v54 = vld [vmem:[%s6676_s3 + $0x158] sm:$0xff]   ;;  %v6061_v62 = vld [vmem:[%s6676_s3 + $0x160] sm:$0xff]  }
 0x106   :  { %5020 = vmatpush3.bf16.msra.mxu1 %v6011_v6  ;;  %5032 = vmatpush3.bf16.msra.mxu0 %v6011_v6  ;;  %6750 = vst [vmem:[#allocation35_spill] sm:$0xff] %v6049_v27  ;;  %6751 = vst [vmem:[#allocation36_spill] sm:$0xff] %v6056_v54  ;;  %v6068_v44 = vld [vmem:[%s6676_s3 + $0x168] sm:$0xff]   ;;  %v6073_v43 = vld [vmem:[%s6676_s3 + $0x170] sm:$0xff]  }
 0x107   :  { %5022 = vmatprep.subr.bf16.mxu1 %v6035_v19  ;;  %5034 = vmatprep.subr.bf16.mxu0 %v6035_v19  ;;  %6752 = vst [vmem:[#allocation37_spill] sm:$0xff] %v6061_v62  ;;  %6753 = vst [vmem:[#allocation38_spill] sm:$0xff] %v6068_v44  ;;  %v6080_v34 = vld [vmem:[%s6676_s3 + $0x178] sm:$0xff]  }
 0x108   :  { %6754 = vst [vmem:[#allocation39_spill] sm:$0xff] %v6073_v43  ;;  %6755 = vst [vmem:[#allocation40_spill] sm:$0xff] %v6080_v34 }
 0x10b   :  { %4502 = vmatmul.mubr.bf16.gmra.mrb[4].mxu0 %v5794_v21 }
 0x10c   :  { %4505 = vmatprep.mubr.bf16.mxu0 %v5799_v55 }
 0x113   :  { %4506 = vmatmul.mubr.bf16.gmra.mrb[8].mxu0 %v5806_v56 }
 0x114   :  { %4509 = vmatprep.mubr.bf16.mxu0 %v5811_v57 }
 0x11b   :  { %4510 = vmatmul.mubr.bf16.gmra.mrb[12].mxu0 %v5818_v42 }
 0x11c   :  { %4513 = vmatprep.mubr.bf16.mxu0 %v5823_v58 }
 0x123   :  { %4514 = vmatmul.mubr.bf16.gmra.mrb[16].mxu0 %v5830_v50 }
 0x124   :  { %4517 = vmatprep.mubr.bf16.mxu0 %v5835_v49 }
 0x12b   :  { %4518 = vmatmul.mubr.bf16.gmra.mrb[20].mxu0 %v5842_v46 }
 0x12c   :  { %4521 = vmatprep.mubr.bf16.mxu0 %v5847_v37 }
 0x133   :  { %4522 = vmatmul.mubr.bf16.gmra.mrb[24].mxu0 %v5854_v23 }
 0x134   :  { %4525 = vmatprep.mubr.bf16.mxu0 %v5859_v4 }
 0x13b   :  { %4526 = vmatmul.mubr.bf16.gmra.mrb[28].mxu0 %v5866_v41 }
 0x13c   :  { %4529 = vmatprep.mubr.bf16.mxu0 %v5871_v5 }
 0x143   :  { %4530 = vmatmul.mubr.bf16.gmra.mrb[32].mxu0 %v5878_v8 }
 0x144   :  { %4533 = vmatprep.mubr.bf16.mxu0 %v5883_v9 }
 0x14b   :  { %4534 = vmatmul.mubr.bf16.gmra.mrb[36].mxu0 %v5890_v24 }
 0x14c   :  { %4537 = vmatprep.mubr.bf16.mxu0 %v5895_v7 }
 0x153   :  { %4538 = vmatmul.mubr.bf16.gmra.mrb[40].mxu0 %v5902_v10  ;;  %v4024_v10 = vld [vmem:[%s6677_s4 + $0x28] sm:$0xff] }
 0x154   :  { %4541 = vmatprep.mubr.bf16.mxu0 %v5907_v63  ;;  %v4023_v63 = vld [vmem:[%s6677_s4 + $0x20] sm:$0xff] }
 0x155   :  { %v6154_v8 = vpack.c.bf16 %v4024_v10, %v4023_v63 }
 0x15b   :  { %4542 = vmatmul.mubr.bf16.gmra.mrb[44].mxu0 %v5914_v12 }
 0x15c   :  { %4545 = vmatprep.mubr.bf16.mxu0 %v5919_v0 }
 0x163   :  { %4546 = vmatmul.mubr.bf16.gmra.mrb[48].mxu0 %v5926_v13 }
 0x164   :  { %4549 = vmatprep.mubr.bf16.mxu0 %v5931_v59 }
 0x16b   :  { %4550 = vmatmul.mubr.bf16.gmra.mrb[52].mxu0 %v5938_v61 }
 0x16c   :  { %4553 = vmatprep.mubr.bf16.mxu0 %v5943_v20 }
 0x173   :  { %4554 = vmatmul.mubr.bf16.gmra.mrb[56].mxu0 %v5950_v1 }
 0x174   :  { %4557 = vmatprep.mubr.bf16.mxu0 %v5955_v14 }
 0x17b   :  { %4558 = vmatmul.mubr.bf16.gmra.mrb[60].mxu0 %v5962_v15 }
 0x17c   :  { %4561 = vmatprep.mubr.bf16.mxu0 %v5967_v47 }
 0x183   :  { %4562 = vmatmul.mubr.bf16.gmra.mrb[64].mxu0 %v5974_v3 }
 0x184   :  { %4565 = vmatprep.mubr.bf16.mxu0 %v5979_v32 }
 0x18b   :  { %4566 = vmatmul.mubr.bf16.gmra.mrb[68].mxu0 %v5986_v33 }
 0x18c   :  { %4569 = vmatprep.mubr.bf16.mxu0 %v5991_v16 }
 0x193   :  { %4570 = vmatmul.mubr.bf16.gmra.mrb[72].mxu0 %v5998_v18 }
 0x194   :  { %4573 = vmatprep.mubr.bf16.mxu0 %v6003_v31 }
 0x19b   :  { %4574 = vmatmul.mubr.bf16.gmra.mrb[76].mxu0 %v6022_v35 }
 0x19c   :  { %4577 = vmatprep.mubr.bf16.mxu0 %v6027_v38 }
 0x1a3   :  { %4578 = vmatmul.mubr.bf16.gmra.mrb[80].mxu0 %v6044_v53 }
 0x1a4   :  { %4581 = vmatprep.mubr.bf16.mxu0 %v6049_v27 }
 0x1ab   :  { %4582 = vmatmul.mubr.bf16.gmra.mrb[84].mxu0 %v6056_v54 }
 0x1ac   :  { %4585 = vmatprep.mubr.bf16.mxu0 %v6061_v62 }
 0x1b3   :  { %4586 = vmatmul.mubr.bf16.gmra.mrb[88].mxu0 %v6068_v44 }
 0x1b4   :  { %4589 = vmatprep.mubr.bf16.mxu0 %v6073_v43 }
 0x1bb   :  { %4590 = vmatmul.mubr.bf16.gmra.mrb[92].mxu0 %v6080_v34 }
 0x1d6   :  { %v6083_v17 = vpop.f32.mrb[0].mxu0 }
 0x1d7   :  { %v6085_v22 = vpop.f32.mrb[1].mxu0 }
 0x1d8   :  { %v6087_v29 = vpop.f32.mrb[2].mxu0 }
 0x1d9   :  { %v6089_v48 = vpop.f32.mrb[3].mxu0 }
 0x1de   :  { %v6091_v45 = vpop.f32.mrb[4].mxu0 }
 0x1df   :  { %v6093_v39 = vpop.f32.mrb[5].mxu0 }
 0x1e0   :  { %v6095_v30 = vpop.f32.mrb[6].mxu0 }
 0x1e1   :  { %v6097_v43 = vpop.f32.mrb[7].mxu0 }
 0x1e6   :  { %v6099_v44 = vpop.f32.mrb[8].mxu0 }
 0x1e7   :  { %v6101_v62 = vpop.f32.mrb[9].mxu0 }
 0x1e8   :  { %v6103_v34 = vpop.f32.mrb[10].mxu0 }
 0x1e9   :  { %v6105_v54 = vpop.f32.mrb[11].mxu0 }
 0x1ee   :  { %v6107_v27 = vpop.f32.mrb[12].mxu0 }
 0x1ef   :  { %v6109_v53 = vpop.f32.mrb[13].mxu0 }
 0x1f0   :  { %v6111_v38 = vpop.f32.mrb[14].mxu0 }
 0x1f1   :  { %v6113_v35 = vpop.f32.mrb[15].mxu0 }
 0x1f6   :  { %v6115_v31 = vpop.f32.mrb[16].mxu0 }
 0x1f7   :  { %v6117_v18 = vpop.f32.mrb[17].mxu0 }
 0x1f8   :  { %v6119_v16 = vpop.f32.mrb[18].mxu0 }
 0x1f9   :  { %v6121_v33 = vpop.f32.mrb[19].mxu0 }
 0x1fe   :  { %v6123_v32 = vpop.f32.mrb[20].mxu0 }
 0x1ff   :  { %v6125_v3 = vpop.f32.mrb[21].mxu0 }
 0x200   :  { %v6127_v47 = vpop.f32.mrb[22].mxu0 }
 0x201   :  { %v6129_v15 = vpop.f32.mrb[23].mxu0 }
 0x206   :  { %v6131_v14 = vpop.f32.mrb[24].mxu0 }
 0x207   :  { %v6133_v1 = vpop.f32.mrb[25].mxu0 }
 0x208   :  { %v6135_v20 = vpop.f32.mrb[26].mxu0 }
 0x209   :  { %v6137_v61 = vpop.f32.mrb[27].mxu0 }
 0x20e   :  { %v6139_v59 = vpop.f32.mrb[28].mxu0 }
 0x20f   :  { %v6141_v13 = vpop.f32.mrb[29].mxu0 }
 0x210   :  { %v6143_v0 = vpop.f32.mrb[30].mxu0 }
 0x211   :  { %v6145_v12 = vpop.f32.mrb[31].mxu0 }
 0x216   :  { %v4531_v7 = vpop.f32.mrb[32].mxu0 }
 0x217   :  { %v980_v24 = vpop.f32.mrb[33].mxu0 }
 0x218   :  { %v4532_v9 = vpop.f32.mrb[34].mxu0  ;;  %4597 = vmatprep.mubr.msk.f32.mxu1 %vm1240_vm0, %v980_v24 }
 0x219   :  { %v983_v5 = vpop.f32.mrb[35].mxu0 }
 0x21a   :  { %4598 = vmatmul.mubr.msk.f32.vlgmr.msra.gmra.mrb[0].mxu1 %vm1240_vm0, %v983_v5 }
 0x21b   :  { %5024 = vmatpush3.bf16.msra.mxu1 %v6035_v19  ;;  %4600 = vmatprep.mubr.msk.f32.mxu1 %vm1240_vm0, %v4531_v7 }
 0x21c   :  { %5026 = vmatprep.subr.bf16.mxu1 %v6154_v8 }
 0x21e   :  { %v4535_v41 = vpop.f32.mrb[36].mxu0  ;;  %4601 = vmatmul.mubr.msk.f32.gmra.mrb[2].mxu1 %vm1240_vm0, %v4532_v9 }
 0x21f   :  { %v996_v4 = vpop.f32.mrb[37].mxu0 }
 0x220   :  { %v4536_v23 = vpop.f32.mrb[38].mxu0  ;;  %4603 = vmatprep.mubr.msk.f32.mxu1 %vm1240_vm0, %v996_v4 }
 0x221   :  { %v999_v37 = vpop.f32.mrb[39].mxu0 }
 0x222   :  { %4604 = vmatmul.mubr.msk.f32.gmra.mrb[4].mxu1 %vm1240_vm0, %v999_v37 }
 0x223   :  { %4606 = vmatprep.mubr.msk.f32.mxu1 %vm1240_vm0, %v4535_v41 }
 0x226   :  { %v4539_v24 = vpop.f32.mrb[40].mxu0  ;;  %4607 = vmatmul.mubr.msk.f32.gmra.mrb[6].mxu1 %vm1240_vm0, %v4536_v23 }
 0x227   :  { %v1012_v5 = vpop.f32.mrb[41].mxu0 }
 0x228   :  { %v4540_v10 = vpop.f32.mrb[42].mxu0  ;;  %4609 = vmatprep.mubr.msk.f32.mxu1 %vm1240_vm0, %v1012_v5 }
 0x229   :  { %v1015_v7 = vpop.f32.mrb[43].mxu0 }
 0x22a   :  { %4610 = vmatmul.mubr.msk.f32.gmra.mrb[8].mxu1 %vm1240_vm0, %v1015_v7 }
 0x22b   :  { %4612 = vmatprep.mubr.msk.f32.mxu1 %vm1240_vm0, %v4539_v24 }
 0x22e   :  { %v4543_v9 = vpop.f32.mrb[44].mxu0  ;;  %4613 = vmatmul.mubr.msk.f32.gmra.mrb[10].mxu1 %vm1240_vm0, %v4540_v10 }
 0x22f   :  { %v1028_v4 = vpop.f32.mrb[45].mxu0 }
 0x230   :  { %v4544_v63 = vpop.f32.mrb[46].mxu0  ;;  %4615 = vmatprep.mubr.msk.f32.mxu1 %vm1240_vm0, %v1028_v4 }
 0x231   :  { %v1031_v37 = vpop.f32.mrb[47].mxu0 }
 0x232   :  { %4616 = vmatmul.mubr.msk.f32.gmra.mrb[12].mxu1 %vm1240_vm0, %v1031_v37 }
 0x233   :  { %4618 = vmatprep.mubr.msk.f32.mxu1 %vm1240_vm0, %v4543_v9 }
 0x236   :  { %v4547_v23 = vpop.f32.mrb[48].mxu0  ;;  %4619 = vmatmul.mubr.msk.f32.gmra.mrb[14].mxu1 %vm1240_vm0, %v4544_v63 }
 0x237   :  { %v1044_v41 = vpop.f32.mrb[49].mxu0 }
 0x238   :  { %v4548_v5 = vpop.f32.mrb[50].mxu0  ;;  %4621 = vmatprep.mubr.msk.f32.mxu1 %vm1240_vm0, %v1044_v41 }
 0x239   :  { %v1047_v24 = vpop.f32.mrb[51].mxu0 }
 0x23a   :  { %4622 = vmatmul.mubr.msk.f32.gmra.mrb[16].mxu1 %vm1240_vm0, %v1047_v24 }
 0x23b   :  { %4624 = vmatprep.mubr.msk.f32.mxu1 %vm1240_vm0, %v4547_v23 }
 0x23e   :  { %v4551_v10 = vpop.f32.mrb[52].mxu0  ;;  %4625 = vmatmul.mubr.msk.f32.gmra.mrb[18].mxu1 %vm1240_vm0, %v4548_v5 }
 0x23f   :  { %v1060_v7 = vpop.f32.mrb[53].mxu0 }
 0x240   :  { %v4552_v4 = vpop.f32.mrb[54].mxu0  ;;  %4627 = vmatprep.mubr.msk.f32.mxu1 %vm1240_vm0, %v1060_v7 }
 0x241   :  { %v1063_v9 = vpop.f32.mrb[55].mxu0 }
 0x242   :  { %4628 = vmatmul.mubr.msk.f32.gmra.mrb[20].mxu1 %vm1240_vm0, %v1063_v9 }
 0x243   :  { %4630 = vmatprep.mubr.msk.f32.mxu1 %vm1240_vm0, %v4551_v10 }
 0x246   :  { %v4555_v63 = vpop.f32.mrb[56].mxu0  ;;  %4631 = vmatmul.mubr.msk.f32.gmra.mrb[22].mxu1 %vm1240_vm0, %v4552_v4 }
 0x247   :  { %v1076_v37 = vpop.f32.mrb[57].mxu0 }
 0x248   :  { %v4556_v41 = vpop.f32.mrb[58].mxu0  ;;  %4633 = vmatprep.mubr.msk.f32.mxu1 %vm1240_vm0, %v1076_v37 }
 0x249   :  { %v1079_v23 = vpop.f32.mrb[59].mxu0 }
 0x24a   :  { %4634 = vmatmul.mubr.msk.f32.gmra.mrb[24].mxu1 %vm1240_vm0, %v1079_v23 }
 0x24b   :  { %4636 = vmatprep.mubr.msk.f32.mxu1 %vm1240_vm0, %v4555_v63 }
 0x24e   :  { %v4559_v5 = vpop.f32.mrb[60].mxu0  ;;  %4637 = vmatmul.mubr.msk.f32.gmra.mrb[26].mxu1 %vm1240_vm0, %v4556_v41 }
 0x24f   :  { %v1092_v24 = vpop.f32.mrb[61].mxu0 }
 0x250   :  { %v4560_v7 = vpop.f32.mrb[62].mxu0  ;;  %4639 = vmatprep.mubr.msk.f32.mxu1 %vm1240_vm0, %v1092_v24 }
 0x251   :  { %v1095_v10 = vpop.f32.mrb[63].mxu0 }
 0x252   :  { %4640 = vmatmul.mubr.msk.f32.gmra.mrb[28].mxu1 %vm1240_vm0, %v1095_v10 }
 0x253   :  { %4642 = vmatprep.mubr.msk.f32.mxu1 %vm1240_vm0, %v4559_v5 }
 0x256   :  { %4643 = vmatmul.mubr.msk.f32.gmra.mrb[30].mxu1 %vm1240_vm0, %v4560_v7  ;;  %v6189_v4 = vpop.f32.mrb[64].mxu0 }
 0x257   :  { %4649 = vmatprep.mubr.msk.f32.mxu1 %vm1240_vm0, %v6085_v22  ;;  %v6193_v9 = vpop.f32.mrb[65].mxu0 }
 0x258   :  { %v6195_v63 = vpop.f32.mrb[66].mxu0 }
 0x259   :  { %v6197_v37 = vpop.f32.mrb[67].mxu0 }
 0x25a   :  { %4650 = vmatmul.mubr.msk.f32.vlgmr.msra.gmra.mrb[0].mxu1 %vm1240_vm0, %v6089_v48 }
 0x25b   :  { %5028 = vmatpush3.bf16.msra.mxu1 %v6154_v8  ;;  %4652 = vmatprep.mubr.msk.f32.mxu1 %vm1240_vm0, %v6083_v17 }
 0x25c   :  { %4749 = vmatprep.subr.bf16.mxu1 %v5741_v40 }
 0x25e   :  { %4653 = vmatmul.mubr.msk.f32.gmra.mrb[2].mxu1 %vm1240_vm0, %v6087_v29  ;;  %v6207_v22 = vpop.f32.mrb[68].mxu0 }
 0x25f   :  { %4655 = vmatprep.mubr.msk.f32.mxu1 %vm1240_vm0, %v6093_v39  ;;  %v1124_v41 = vpop.f32.mrb[69].mxu0 }
 0x260   :  { %v6211_v23 = vpop.f32.mrb[70].mxu0 }
 0x261   :  { %v1127_v5 = vpop.f32.mrb[71].mxu0 }
 0x262   :  { %4656 = vmatmul.mubr.msk.f32.gmra.mrb[4].mxu1 %vm1240_vm0, %v6097_v43 }
 0x263   :  { %4658 = vmatprep.mubr.msk.f32.mxu1 %vm1240_vm0, %v6091_v45 }
 0x266   :  { %4659 = vmatmul.mubr.msk.f32.gmra.mrb[6].mxu1 %vm1240_vm0, %v6095_v30  ;;  %v6219_v17 = vpop.f32.mrb[72].mxu0 }
 0x267   :  { %4661 = vmatprep.mubr.msk.f32.mxu1 %vm1240_vm0, %v6101_v62  ;;  %v1140_v29 = vpop.f32.mrb[73].mxu0 }
 0x268   :  { %v6223_v48 = vpop.f32.mrb[74].mxu0 }
 0x269   :  { %v1143_v39 = vpop.f32.mrb[75].mxu0 }
 0x26a   :  { %4662 = vmatmul.mubr.msk.f32.gmra.mrb[8].mxu1 %vm1240_vm0, %v6105_v54 }
 0x26b   :  { %4664 = vmatprep.mubr.msk.f32.mxu1 %vm1240_vm0, %v6099_v44 }
 0x26e   :  { %4665 = vmatmul.mubr.msk.f32.gmra.mrb[10].mxu1 %vm1240_vm0, %v6103_v34  ;;  %v6231_v43 = vpop.f32.mrb[76].mxu0 }
 0x26f   :  { %4667 = vmatprep.mubr.msk.f32.mxu1 %vm1240_vm0, %v6109_v53  ;;  %v1156_v45 = vpop.f32.mrb[77].mxu0 }
 0x270   :  { %v6235_v62 = vpop.f32.mrb[78].mxu0 }
 0x271   :  { %v1159_v30 = vpop.f32.mrb[79].mxu0 }
 0x272   :  { %4668 = vmatmul.mubr.msk.f32.gmra.mrb[12].mxu1 %vm1240_vm0, %v6113_v35 }
 0x273   :  { %4670 = vmatprep.mubr.msk.f32.mxu1 %vm1240_vm0, %v6107_v27 }
 0x276   :  { %4671 = vmatmul.mubr.msk.f32.gmra.mrb[14].mxu1 %vm1240_vm0, %v6111_v38  ;;  %v6243_v54 = vpop.f32.mrb[80].mxu0 }
 0x277   :  { %4673 = vmatprep.mubr.msk.f32.mxu1 %vm1240_vm0, %v6117_v18  ;;  %v1172_v44 = vpop.f32.mrb[81].mxu0 }
 0x278   :  { %v6247_v53 = vpop.f32.mrb[82].mxu0 }
 0x279   :  { %v1175_v34 = vpop.f32.mrb[83].mxu0 }
 0x27a   :  { %4674 = vmatmul.mubr.msk.f32.gmra.mrb[16].mxu1 %vm1240_vm0, %v6121_v33 }
 0x27b   :  { %4676 = vmatprep.mubr.msk.f32.mxu1 %vm1240_vm0, %v6115_v31 }
 0x27e   :  { %4677 = vmatmul.mubr.msk.f32.gmra.mrb[18].mxu1 %vm1240_vm0, %v6119_v16  ;;  %v4583_v35 = vpop.f32.mrb[84].mxu0 }
 0x27f   :  { %4679 = vmatprep.mubr.msk.f32.mxu1 %vm1240_vm0, %v6125_v3  ;;  %v1188_v38 = vpop.f32.mrb[85].mxu0 }
 0x280   :  { %v4584_v27 = vpop.f32.mrb[86].mxu0 }
 0x281   :  { %v1191_v18 = vpop.f32.mrb[87].mxu0 }
 0x282   :  { %4680 = vmatmul.mubr.msk.f32.gmra.mrb[20].mxu1 %vm1240_vm0, %v6129_v15 }
 0x283   :  { %4682 = vmatprep.mubr.msk.f32.mxu1 %vm1240_vm0, %v6123_v32 }
 0x286   :  { %4683 = vmatmul.mubr.msk.f32.gmra.mrb[22].mxu1 %vm1240_vm0, %v6127_v47  ;;  %v4587_v33 = vpop.f32.mrb[88].mxu0 }
 0x287   :  { %4685 = vmatprep.mubr.msk.f32.mxu1 %vm1240_vm0, %v6133_v1  ;;  %v1204_v16 = vpop.f32.mrb[89].mxu0  ;;  %v6780_v1 = vld [vmem:[#allocation29_spill] sm:$0xff] }
 0x288   :  { %v4588_v31 = vpop.f32.mrb[90].mxu0 }
 0x289   :  { %v1207_v24 = vpop.f32.mrb[91].mxu0 }
 0x28a   :  { %4686 = vmatmul.mubr.msk.f32.gmra.mrb[24].mxu1 %vm1240_vm0, %v6137_v61  ;;  %v6778_v61 = vld [vmem:[#allocation27_spill] sm:$0xff] }
 0x28b   :  { %4688 = vmatprep.mubr.msk.f32.mxu1 %vm1240_vm0, %v6131_v14  ;;  %v6781_v14 = vld [vmem:[#allocation30_spill] sm:$0xff] }
 0x28e   :  { %4689 = vmatmul.mubr.msk.f32.gmra.mrb[26].mxu1 %vm1240_vm0, %v6135_v20  ;;  %v4591_v15 = vpop.f32.mrb[92].mxu0  ;;  %v6779_v20 = vld [vmem:[#allocation28_spill] sm:$0xff] }
 0x28f   :  { %4691 = vmatprep.mubr.msk.f32.mxu1 %vm1240_vm0, %v6141_v13  ;;  %v1220_v47 = vpop.f32.mrb[93].mxu0  ;;  %v6776_v13 = vld [vmem:[#allocation25_spill] sm:$0xff] }
 0x290   :  { %v4592_v3 = vpop.f32.mrb[94].mxu0 }
 0x291   :  { %v1223_v32 = vpop.f32.mrb[95].mxu0 }
 0x292   :  { %4692 = vmatmul.mubr.msk.f32.gmra.mrb[28].mxu1 %vm1240_vm0, %v6145_v12  ;;  %v6774_v12 = vld [vmem:[#allocation23_spill] sm:$0xff] }
 0x293   :  { %4694 = vmatprep.mubr.msk.f32.mxu1 %vm1240_vm0, %v6139_v59  ;;  %v6777_v59 = vld [vmem:[#allocation26_spill] sm:$0xff] }
 0x296   :  { %4695 = vmatmul.mubr.msk.f32.gmra.mrb[30].mxu1 %vm1240_vm0, %v6143_v0  ;;  %v6775_v0 = vld [vmem:[#allocation24_spill] sm:$0xff] }
 0x297   :  { %4701 = vmatprep.mubr.msk.f32.mxu1 %vm1240_vm0, %v6193_v9 }
 0x29a   :  { %4702 = vmatmul.mubr.msk.f32.vlgmr.msra.gmra.mrb[0].mxu1 %vm1240_vm0, %v6197_v37  ;;  %v6784_v37 = vld [vmem:[#allocation33_spill] sm:$0xff] }
 0x29b   :  { %4750 = vmatpush3.bf16.msra.mxu1 %v5741_v40  ;;  %4704 = vmatprep.mubr.msk.f32.mxu1 %vm1240_vm0, %v6189_v4  ;;  %v5292_v40 = vld [vmem:[%s6676_s3] sm:$0xff]   ;;  %s5321_s3 = smov [#allocation2]  }
 0x29c   :  { %4751 = vmatprep.subr.bf16.mxu1 %v5747_v25  ;;  %s3892_s8 = sshll.u32 %s5321_s3, 4  ;;  %s3893_s8 = int_to_ptr.vmem [resolvable:$true] %s3892_s8 }
 0x29d   :  { %s5293_s9 = scalar_lea.vmem %s3893_s8, 8192  ;;  %p5298_p1 = scmp.lt.s32.totalorder %s3893_s8, %s3893_s8 }
 0x29e   :  { %4705 = vmatmul.mubr.msk.f32.gmra.mrb[2].mxu1 %vm1240_vm0, %v6195_v63  ;;  %v6783_v63 = vld [vmem:[#allocation32_spill] sm:$0xff]  ;;  %p5294_p0 = scmp.ne.s32.totalorder %s3893_s8, %s5293_s9  ;;  %p5299_p2 = scmp.lt.s32.totalorder %s5293_s9, %s5293_s9 }
 0x29f   :  { %4752 = vmatpush3.bf16.msra.mxu1 %v5747_v25  ;;  %4707 = vmatprep.mubr.msk.f32.mxu1 %vm1240_vm0, %v1124_v41  ;;  %v6756_v25 = vld [vmem:[#allocation5_spill] sm:$0xff] }
 0x2a0   :  { %4753 = vmatprep.subr.bf16.mxu1 %v5753_v36  ;;  %p5300_p3 = por %p5299_p2, %p5298_p1 }
 0x2a2   :  { %4708 = vmatmul.mubr.msk.f32.gmra.mrb[4].mxu1 %vm1240_vm0, %v1127_v5  ;;  %p5301_p4 = pnand %p5300_p3, %p5294_p0 }
 0x2a3   :  { %4754 = vmatpush3.bf16.msra.mxu1 %v5753_v36  ;;  %4710 = vmatprep.mubr.msk.f32.mxu1 %vm1240_vm0, %v6207_v22  ;;  %v6757_v36 = vld [vmem:[#allocation6_spill] sm:$0xff] }
 0x2a4   :  { %4755 = vmatprep.subr.bf16.mxu1 %v5759_v26 }
 0x2a6   :  { %4711 = vmatmul.mubr.msk.f32.gmra.mrb[6].mxu1 %vm1240_vm0, %v6211_v23 }
 0x2a7   :  { %4756 = vmatpush3.bf16.msra.mxu1 %v5759_v26  ;;  %4713 = vmatprep.mubr.msk.f32.mxu1 %vm1240_vm0, %v1140_v29  ;;  %v6758_v26 = vld [vmem:[#allocation7_spill] sm:$0xff] }
 0x2a8   :  { %4757 = vmatprep.subr.bf16.mxu1 %v5771_v51  ;;  %v6786_v29 = vld [vmem:[#allocation35_spill] sm:$0xff] }
 0x2aa   :  { %4714 = vmatmul.mubr.msk.f32.gmra.mrb[8].mxu1 %vm1240_vm0, %v1143_v39 }
 0x2ab   :  { %4758 = vmatpush3.bf16.msra.mxu1 %v5771_v51  ;;  %4716 = vmatprep.mubr.msk.f32.mxu1 %vm1240_vm0, %v6219_v17  ;;  %v6759_v51 = vld [vmem:[#allocation8_spill] sm:$0xff]  ;;  %v6785_v17 = vld [vmem:[#allocation34_spill] sm:$0xff] }
 0x2ac   :  { %4759 = vmatprep.subr.bf16.mxu1 %v5773_v52 }
 0x2ae   :  { %4717 = vmatmul.mubr.msk.f32.gmra.mrb[10].mxu1 %vm1240_vm0, %v6223_v48 }
 0x2af   :  { %4760 = vmatpush3.bf16.msra.mxu1 %v5773_v52  ;;  %4719 = vmatprep.mubr.msk.f32.mxu1 %vm1240_vm0, %v1156_v45  ;;  %v6760_v52 = vld [vmem:[#allocation9_spill] sm:$0xff] }
 0x2b0   :  { %4761 = vmatprep.subr.bf16.mxu1 %v5775_v2 }
 0x2b2   :  { %4720 = vmatmul.mubr.msk.f32.gmra.mrb[12].mxu1 %vm1240_vm0, %v1159_v30  ;;  %v6788_v30 = vld [vmem:[#allocation37_spill] sm:$0xff] }
 0x2b3   :  { %4762 = vmatpush3.bf16.msra.mxu1 %v5775_v2  ;;  %4722 = vmatprep.mubr.msk.f32.mxu1 %vm1240_vm0, %v6231_v43  ;;  %v6761_v2 = vld [vmem:[#allocation10_spill] sm:$0xff] }
 0x2b4   :  { %4763 = vmatprep.subr.bf16.mxu1 %v5777_v28 }
 0x2b6   :  { %4723 = vmatmul.mubr.msk.f32.gmra.mrb[14].mxu1 %vm1240_vm0, %v6235_v62  ;;  %v6787_v62 = vld [vmem:[#allocation36_spill] sm:$0xff] }
 0x2b7   :  { %4764 = vmatpush3.bf16.msra.mxu1 %v5777_v28  ;;  %4725 = vmatprep.mubr.msk.f32.mxu1 %vm1240_vm0, %v1172_v44  ;;  %v6762_v28 = vld [vmem:[#allocation11_spill] sm:$0xff] }
 0x2b8   :  { %5041 = vmatprep.subr.bf16.mxu1 %v6011_v6 }
 0x2ba   :  { %4726 = vmatmul.mubr.msk.f32.gmra.mrb[16].mxu1 %vm1240_vm0, %v1175_v34 }
 0x2bb   :  { %4728 = vmatprep.mubr.msk.f32.mxu1 %vm1240_vm0, %v6243_v54 }
 0x2be   :  { %4729 = vmatmul.mubr.msk.f32.gmra.mrb[18].mxu1 %vm1240_vm0, %v6247_v53 }
 0x2bf   :  { %4731 = vmatprep.mubr.msk.f32.mxu1 %vm1240_vm0, %v1188_v38  ;;  %v6790_v38 = vld [vmem:[#allocation39_spill] sm:$0xff] }
 0x2c2   :  { %4732 = vmatmul.mubr.msk.f32.gmra.mrb[20].mxu1 %vm1240_vm0, %v1191_v18 }
 0x2c3   :  { %4734 = vmatprep.mubr.msk.f32.mxu1 %vm1240_vm0, %v4583_v35  ;;  %v6789_v35 = vld [vmem:[#allocation38_spill] sm:$0xff] }
 0x2c6   :  { %4735 = vmatmul.mubr.msk.f32.gmra.mrb[22].mxu1 %vm1240_vm0, %v4584_v27 }
 0x2c7   :  { %4737 = vmatprep.mubr.msk.f32.mxu1 %vm1240_vm0, %v1204_v16 }
 0x2ca   :  { %4738 = vmatmul.mubr.msk.f32.gmra.mrb[24].mxu1 %vm1240_vm0, %v1207_v24 }
 0x2cb   :  { %4740 = vmatprep.mubr.msk.f32.mxu1 %vm1240_vm0, %v4587_v33 }
 0x2ce   :  { %4741 = vmatmul.mubr.msk.f32.gmra.mrb[26].mxu1 %vm1240_vm0, %v4588_v31  ;;  %v6791_v31 = vld [vmem:[#allocation40_spill] sm:$0xff] }
 0x2cf   :  { %4743 = vmatprep.mubr.msk.f32.mxu1 %vm1240_vm0, %v1220_v47 }
 0x2d2   :  { %4744 = vmatmul.mubr.msk.f32.gmra.mrb[28].mxu1 %vm1240_vm0, %v1223_v32 }
 0x2d3   :  { %4746 = vmatprep.mubr.msk.f32.mxu1 %vm1240_vm0, %v4591_v15 }
 0x2d6   :  { %4747 = vmatmul.mubr.msk.f32.gmra.mrb[30].mxu1 %vm1240_vm0, %v4592_v3 }
 0x2d7   :  { %4765 = vmatprep.mubr.bf16.mxu1 %v5292_v40 }
 0x2da   :  { %4766 = vmatmul.mubr.bf16.vlgmr.msra.gmra.mrb[32].mxu1 %v5782_v60  ;;  %v6763_v60 = vld [vmem:[#allocation12_spill] sm:$0xff] }
 0x2db   :  { %4769 = vmatprep.mubr.bf16.mxu1 %v5787_v11  ;;  %5042 = vmatpush3.bf16.msra.mxu1 %v6011_v6  ;;  %v6764_v11 = vld [vmem:[#allocation13_spill] sm:$0xff]  ;;  %v6782_v6 = vld [vmem:[#allocation31_spill] sm:$0xff] }
 0x2e2   :  { %4770 = vmatmul.mubr.bf16.gmra.mrb[36].mxu1 %v5794_v21  ;;  %v6765_v21 = vld [vmem:[#allocation14_spill] sm:$0xff] }
 0x2e3   :  { %4773 = vmatprep.mubr.bf16.mxu1 %v5799_v55  ;;  %v6766_v55 = vld [vmem:[#allocation15_spill] sm:$0xff] }
 0x2ea   :  { %4774 = vmatmul.mubr.bf16.gmra.mrb[40].mxu1 %v5806_v56  ;;  %v6767_v56 = vld [vmem:[#allocation16_spill] sm:$0xff] }
 0x2eb   :  { %4777 = vmatprep.mubr.bf16.mxu1 %v5811_v57  ;;  %v6768_v57 = vld [vmem:[#allocation17_spill] sm:$0xff] }
 0x2f2   :  { %4778 = vmatmul.mubr.bf16.gmra.mrb[44].mxu1 %v5818_v42  ;;  %v6769_v42 = vld [vmem:[#allocation18_spill] sm:$0xff] }
 0x2f3   :  { %4781 = vmatprep.mubr.bf16.mxu1 %v5823_v58  ;;  %v6770_v58 = vld [vmem:[#allocation19_spill] sm:$0xff] }
 0x2fa   :  { %4782 = vmatmul.mubr.bf16.gmra.mrb[48].mxu1 %v5830_v50  ;;  %v6771_v50 = vld [vmem:[#allocation20_spill] sm:$0xff] }
 0x2fb   :  { %4785 = vmatprep.mubr.bf16.mxu1 %v5835_v49  ;;  %v6772_v49 = vld [vmem:[#allocation21_spill] sm:$0xff] }
 0x302   :  { %4786 = vmatmul.mubr.bf16.gmra.mrb[52].mxu1 %v5842_v46  ;;  %v6773_v46 = vld [vmem:[#allocation22_spill] sm:$0xff] }
 0x303   :  { %4789 = vmatprep.mubr.bf16.mxu1 %v6756_v25 }
 0x30a   :  { %4790 = vmatmul.mubr.bf16.gmra.mrb[56].mxu1 %v6757_v36 }
 0x30b   :  { %4793 = vmatprep.mubr.bf16.mxu1 %v6758_v26 }
 0x312   :  { %4794 = vmatmul.mubr.bf16.gmra.mrb[60].mxu1 %v6759_v51 }
 0x313   :  { %4797 = vmatprep.mubr.bf16.mxu1 %v6760_v52 }
 0x31a   :  { %4798 = vmatmul.mubr.bf16.gmra.mrb[64].mxu1 %v6761_v2 }
 0x31b   :  { %4801 = vmatprep.mubr.bf16.mxu1 %v6762_v28 }
 0x322   :  { %4802 = vmatmul.mubr.bf16.gmra.mrb[68].mxu1 %v6763_v60 }
 0x323   :  { %4805 = vmatprep.mubr.bf16.mxu1 %v6764_v11 }
 0x32a   :  { %4806 = vmatmul.mubr.bf16.gmra.mrb[72].mxu1 %v6765_v21 }
 0x32b   :  { %4809 = vmatprep.mubr.bf16.mxu1 %v6766_v55 }
 0x332   :  { %4810 = vmatmul.mubr.bf16.gmra.mrb[76].mxu1 %v6767_v56 }
 0x333   :  { %4813 = vmatprep.mubr.bf16.mxu1 %v6768_v57 }
 0x33a   :  { %4814 = vmatmul.mubr.bf16.gmra.mrb[80].mxu1 %v6769_v42 }
 0x33b   :  { %4817 = vmatprep.mubr.bf16.mxu1 %v6770_v58 }
 0x342   :  { %4818 = vmatmul.mubr.bf16.gmra.mrb[84].mxu1 %v6771_v50 }
 0x343   :  { %4821 = vmatprep.mubr.bf16.mxu1 %v6772_v49 }
 0x34a   :  { %4822 = vmatmul.mubr.bf16.gmra.mrb[88].mxu1 %v6773_v46 }
 0x34b   :  { %4825 = vmatprep.mubr.bf16.mxu1 %v6774_v12 }
 0x352   :  { %4826 = vmatmul.mubr.bf16.gmra.mrb[92].mxu1 %v6775_v0 }
 0x353   :  { %4829 = vmatprep.mubr.bf16.mxu1 %v6776_v13 }
 0x35a   :  { %4830 = vmatmul.mubr.bf16.gmra.mrb[96].mxu1 %v6777_v59 }
 0x35b   :  { %4833 = vmatprep.mubr.bf16.mxu1 %v6778_v61 }
 0x362   :  { %4834 = vmatmul.mubr.bf16.gmra.mrb[100].mxu1 %v6779_v20 }
 0x363   :  { %4837 = vmatprep.mubr.bf16.mxu1 %v6780_v1 }
 0x36a   :  { %4838 = vmatmul.mubr.bf16.gmra.mrb[104].mxu1 %v6781_v14 }
 0x36b   :  { %4841 = vmatprep.mubr.bf16.mxu1 %v6782_v6 }
 0x36d   :  { %v4703_v7 = vpop.f32.mrb[0].mxu1 }
 0x36e   :  { %2241 = vst.msk [vmem:[#allocation2 + $0x8] sm:$0xff] %vm2239_vm1, %v4703_v7  ;;  %v2048_v10 = vpop.f32.mrb[1].mxu1 }
 0x36f   :  { %2240 = vst.msk [vmem:[#allocation2] sm:$0xff] %vm2239_vm1, %v2048_v10 }
 0x371   :  { %v4706_v4 = vpop.f32.mrb[2].mxu1 }
 0x372   :  { %2243 = vst.msk [vmem:[#allocation2 + $0x18] sm:$0xff] %vm2239_vm1, %v4706_v4  ;;  %v2058_v9 = vpop.f32.mrb[3].mxu1  ;;  %4842 = vmatmul.mubr.bf16.gmra.mrb[108].mxu1 %v6783_v63 }
 0x373   :  { %2242 = vst.msk [vmem:[#allocation2 + $0x10] sm:$0xff] %vm2239_vm1, %v2058_v9  ;;  %4845 = vmatprep.mubr.bf16.mxu1 %v6784_v37 }
 0x375   :  { %v4709_v22 = vpop.f32.mrb[4].mxu1 }
 0x376   :  { %2245 = vst.msk [vmem:[#allocation2 + $0x28] sm:$0xff] %vm2239_vm1, %v4709_v22  ;;  %v2068_v41 = vpop.f32.mrb[5].mxu1 }
 0x377   :  { %2244 = vst.msk [vmem:[#allocation2 + $0x20] sm:$0xff] %vm2239_vm1, %v2068_v41 }
 0x379   :  { %v4712_v23 = vpop.f32.mrb[6].mxu1 }
 0x37a   :  { %2247 = vst.msk [vmem:[#allocation2 + $0x38] sm:$0xff] %vm2239_vm1, %v4712_v23  ;;  %v2078_v5 = vpop.f32.mrb[7].mxu1  ;;  %4846 = vmatmul.mubr.bf16.gmra.mrb[112].mxu1 %v6785_v17 }
 0x37b   :  { %2246 = vst.msk [vmem:[#allocation2 + $0x30] sm:$0xff] %vm2239_vm1, %v2078_v5  ;;  %4849 = vmatprep.mubr.bf16.mxu1 %v6786_v29 }
 0x37d   :  { %v4715_v48 = vpop.f32.mrb[8].mxu1 }
 0x37e   :  { %2249 = vst.msk [vmem:[#allocation2 + $0x48] sm:$0xff] %vm2239_vm1, %v4715_v48  ;;  %v2088_v39 = vpop.f32.mrb[9].mxu1 }
 0x37f   :  { %2248 = vst.msk [vmem:[#allocation2 + $0x40] sm:$0xff] %vm2239_vm1, %v2088_v39 }
 0x381   :  { %v4718_v43 = vpop.f32.mrb[10].mxu1 }
 0x382   :  { %2251 = vst.msk [vmem:[#allocation2 + $0x58] sm:$0xff] %vm2239_vm1, %v4718_v43  ;;  %v2098_v45 = vpop.f32.mrb[11].mxu1  ;;  %4850 = vmatmul.mubr.bf16.gmra.mrb[116].mxu1 %v6787_v62 }
 0x383   :  { %2250 = vst.msk [vmem:[#allocation2 + $0x50] sm:$0xff] %vm2239_vm1, %v2098_v45  ;;  %4853 = vmatprep.mubr.bf16.mxu1 %v6788_v30 }
 0x385   :  { %v4721_v54 = vpop.f32.mrb[12].mxu1 }
 0x386   :  { %2253 = vst.msk [vmem:[#allocation2 + $0x68] sm:$0xff] %vm2239_vm1, %v4721_v54  ;;  %v2108_v44 = vpop.f32.mrb[13].mxu1 }
 0x387   :  { %2252 = vst.msk [vmem:[#allocation2 + $0x60] sm:$0xff] %vm2239_vm1, %v2108_v44 }
 0x389   :  { %v4724_v53 = vpop.f32.mrb[14].mxu1 }
 0x38a   :  { %2255 = vst.msk [vmem:[#allocation2 + $0x78] sm:$0xff] %vm2239_vm1, %v4724_v53  ;;  %v2118_v34 = vpop.f32.mrb[15].mxu1  ;;  %4854 = vmatmul.mubr.bf16.gmra.mrb[120].mxu1 %v6789_v35 }
 0x38b   :  { %2254 = vst.msk [vmem:[#allocation2 + $0x70] sm:$0xff] %vm2239_vm1, %v2118_v34  ;;  %4857 = vmatprep.mubr.bf16.mxu1 %v6790_v38 }
 0x38d   :  { %v4727_v27 = vpop.f32.mrb[16].mxu1 }
 0x38e   :  { %2257 = vst.msk [vmem:[#allocation2 + $0x88] sm:$0xff] %vm2239_vm1, %v4727_v27  ;;  %v2128_v18 = vpop.f32.mrb[17].mxu1 }
 0x38f   :  { %2256 = vst.msk [vmem:[#allocation2 + $0x80] sm:$0xff] %vm2239_vm1, %v2128_v18 }
 0x391   :  { %v4730_v33 = vpop.f32.mrb[18].mxu1 }
 0x392   :  { %2259 = vst.msk [vmem:[#allocation2 + $0x98] sm:$0xff] %vm2239_vm1, %v4730_v33  ;;  %v2138_v16 = vpop.f32.mrb[19].mxu1  ;;  %4858 = vmatmul.mubr.bf16.gmra.mrb[124].mxu1 %v6791_v31 }
 0x393   :  { %2258 = vst.msk [vmem:[#allocation2 + $0x90] sm:$0xff] %vm2239_vm1, %v2138_v16 }
 0x395   :  { %v4733_v24 = vpop.f32.mrb[20].mxu1 }
 0x396   :  { %2261 = vst.msk [vmem:[#allocation2 + $0xa8] sm:$0xff] %vm2239_vm1, %v4733_v24  ;;  %v2148_v15 = vpop.f32.mrb[21].mxu1 }
 0x397   :  { %2260 = vst.msk [vmem:[#allocation2 + $0xa0] sm:$0xff] %vm2239_vm1, %v2148_v15 }
 0x399   :  { %v4736_v47 = vpop.f32.mrb[22].mxu1 }
 0x39a   :  { %2263 = vst.msk [vmem:[#allocation2 + $0xb8] sm:$0xff] %vm2239_vm1, %v4736_v47  ;;  %v2158_v3 = vpop.f32.mrb[23].mxu1 }
 0x39b   :  { %2262 = vst.msk [vmem:[#allocation2 + $0xb0] sm:$0xff] %vm2239_vm1, %v2158_v3 }
 0x39d   :  { %v4739_v32 = vpop.f32.mrb[24].mxu1 }
 0x39e   :  { %2265 = vst.msk [vmem:[#allocation2 + $0xc8] sm:$0xff] %vm2239_vm1, %v4739_v32  ;;  %v2168_v40 = vpop.f32.mrb[25].mxu1 }
 0x39f   :  { %2264 = vst.msk [vmem:[#allocation2 + $0xc0] sm:$0xff] %vm2239_vm1, %v2168_v40 }
 0x3a1   :  { %v4742_v25 = vpop.f32.mrb[26].mxu1 }
 0x3a2   :  { %2267 = vst.msk [vmem:[#allocation2 + $0xd8] sm:$0xff] %vm2239_vm1, %v4742_v25  ;;  %v2178_v36 = vpop.f32.mrb[27].mxu1 }
 0x3a3   :  { %2266 = vst.msk [vmem:[#allocation2 + $0xd0] sm:$0xff] %vm2239_vm1, %v2178_v36 }
 0x3a5   :  { %v4745_v26 = vpop.f32.mrb[28].mxu1 }
 0x3a6   :  { %2269 = vst.msk [vmem:[#allocation2 + $0xe8] sm:$0xff] %vm2239_vm1, %v4745_v26  ;;  %v2188_v51 = vpop.f32.mrb[29].mxu1 }
 0x3a7   :  { %2268 = vst.msk [vmem:[#allocation2 + $0xe0] sm:$0xff] %vm2239_vm1, %v2188_v51 }
 0x3a9   :  { %v4748_v52 = vpop.f32.mrb[30].mxu1 }
 0x3aa   :  { %2271 = vst.msk [vmem:[#allocation2 + $0xf8] sm:$0xff] %vm2239_vm1, %v4748_v52  ;;  %v2198_v2 = vpop.f32.mrb[31].mxu1 }
 0x3ab   :  { %2270 = vst.msk [vmem:[#allocation2 + $0xf0] sm:$0xff] %vm2239_vm1, %v2198_v2 }
 0x3ad   :  { %v6422_v28 = vpop.f32.mrb[32].mxu1 }
 0x3ae   :  { %v6424_v60 = vpop.f32.mrb[33].mxu1 }
 0x3af   :  { %v6426_v11 = vpop.f32.mrb[34].mxu1 }
 0x3b0   :  { %v6428_v21 = vpop.f32.mrb[35].mxu1 }
 0x3b5   :  { %v6430_v55 = vpop.f32.mrb[36].mxu1 }
 0x3b6   :  { %v6432_v56 = vpop.f32.mrb[37].mxu1 }
 0x3b7   :  { %v6434_v57 = vpop.f32.mrb[38].mxu1 }
 0x3b8   :  { %v6436_v42 = vpop.f32.mrb[39].mxu1 }
 0x3bd   :  { %v6438_v58 = vpop.f32.mrb[40].mxu1 }
 0x3be   :  { %v6440_v50 = vpop.f32.mrb[41].mxu1 }
 0x3bf   :  { %v6442_v49 = vpop.f32.mrb[42].mxu1 }
 0x3c0   :  { %v6444_v46 = vpop.f32.mrb[43].mxu1 }
 0x3c5   :  { %v6446_v12 = vpop.f32.mrb[44].mxu1 }
 0x3c6   :  { %v6448_v0 = vpop.f32.mrb[45].mxu1 }
 0x3c7   :  { %v6450_v13 = vpop.f32.mrb[46].mxu1 }
 0x3c8   :  { %v6452_v59 = vpop.f32.mrb[47].mxu1 }
 0x3cd   :  { %v6454_v61 = vpop.f32.mrb[48].mxu1 }
 0x3ce   :  { %v6456_v20 = vpop.f32.mrb[49].mxu1 }
 0x3cf   :  { %v6458_v1 = vpop.f32.mrb[50].mxu1 }
 0x3d0   :  { %v6460_v14 = vpop.f32.mrb[51].mxu1 }
 0x3d5   :  { %v6462_v6 = vpop.f32.mrb[52].mxu1 }
 0x3d6   :  { %v6464_v7 = vpop.f32.mrb[53].mxu1 }
 0x3d7   :  { %v6466_v10 = vpop.f32.mrb[54].mxu1 }
 0x3d8   :  { %v6468_v4 = vpop.f32.mrb[55].mxu1 }
 0x3dd   :  { %v6470_v9 = vpop.f32.mrb[56].mxu1 }
 0x3de   :  { %v6472_v63 = vpop.f32.mrb[57].mxu1 }
 0x3df   :  { %v6474_v37 = vpop.f32.mrb[58].mxu1 }
 0x3e0   :  { %v6476_v22 = vpop.f32.mrb[59].mxu1 }
 0x3e5   :  { %v6478_v41 = vpop.f32.mrb[60].mxu1 }
 0x3e6   :  { %v6480_v23 = vpop.f32.mrb[61].mxu1 }
 0x3e7   :  { %v6482_v5 = vpop.f32.mrb[62].mxu1 }
 0x3e8   :  { %v6484_v17 = vpop.f32.mrb[63].mxu1 }
 0x3ed   :  { %v4799_v29 = vpop.f32.mrb[64].mxu1 }
 0x3ee   :  { %v2598_v48 = vpop.f32.mrb[65].mxu1 }
 0x3ef   :  { %v4800_v39 = vpop.f32.mrb[66].mxu1  ;;  %4865 = vmatprep.mubr.msk.f32.mxu0 %vm1240_vm0, %v2598_v48 }
 0x3f0   :  { %v2601_v43 = vpop.f32.mrb[67].mxu1 }
 0x3f1   :  { %4866 = vmatmul.mubr.msk.f32.vlgmr.msra.gmra.mrb[96].mxu0 %vm1240_vm0, %v2601_v43 }
 0x3f2   :  { %5036 = vmatpush3.bf16.msra.mxu0 %v6035_v19  ;;  %4868 = vmatprep.mubr.msk.f32.mxu0 %vm1240_vm0, %v4799_v29 }
 0x3f3   :  { %5038 = vmatprep.subr.bf16.mxu0 %v6154_v8 }
 0x3f5   :  { %v4803_v45 = vpop.f32.mrb[68].mxu1  ;;  %4869 = vmatmul.mubr.msk.f32.gmra.mrb[98].mxu0 %vm1240_vm0, %v4800_v39 }
 0x3f6   :  { %v2614_v62 = vpop.f32.mrb[69].mxu1 }
 0x3f7   :  { %v4804_v30 = vpop.f32.mrb[70].mxu1  ;;  %4871 = vmatprep.mubr.msk.f32.mxu0 %vm1240_vm0, %v2614_v62 }
 0x3f8   :  { %v2617_v54 = vpop.f32.mrb[71].mxu1 }
 0x3f9   :  { %4872 = vmatmul.mubr.msk.f32.gmra.mrb[100].mxu0 %vm1240_vm0, %v2617_v54 }
 0x3fa   :  { %4874 = vmatprep.mubr.msk.f32.mxu0 %vm1240_vm0, %v4803_v45 }
 0x3fd   :  { %v4807_v44 = vpop.f32.mrb[72].mxu1  ;;  %4875 = vmatmul.mubr.msk.f32.gmra.mrb[102].mxu0 %vm1240_vm0, %v4804_v30 }
 0x3fe   :  { %v2630_v19 = vpop.f32.mrb[73].mxu1 }
 0x3ff   :  { %v4808_v53 = vpop.f32.mrb[74].mxu1  ;;  %4877 = vmatprep.mubr.msk.f32.mxu0 %vm1240_vm0, %v2630_v19 }
 0x400   :  { %v2633_v34 = vpop.f32.mrb[75].mxu1 }
 0x401   :  { %4878 = vmatmul.mubr.msk.f32.gmra.mrb[104].mxu0 %vm1240_vm0, %v2633_v34 }
 0x402   :  { %4880 = vmatprep.mubr.msk.f32.mxu0 %vm1240_vm0, %v4807_v44 }
 0x405   :  { %v4811_v35 = vpop.f32.mrb[76].mxu1  ;;  %4881 = vmatmul.mubr.msk.f32.gmra.mrb[106].mxu0 %vm1240_vm0, %v4808_v53 }
 0x406   :  { %v2646_v38 = vpop.f32.mrb[77].mxu1 }
 0x407   :  { %v4812_v27 = vpop.f32.mrb[78].mxu1  ;;  %4883 = vmatprep.mubr.msk.f32.mxu0 %vm1240_vm0, %v2646_v38 }
 0x408   :  { %v2649_v18 = vpop.f32.mrb[79].mxu1 }
 0x409   :  { %4884 = vmatmul.mubr.msk.f32.gmra.mrb[108].mxu0 %vm1240_vm0, %v2649_v18 }
 0x40a   :  { %4886 = vmatprep.mubr.msk.f32.mxu0 %vm1240_vm0, %v4811_v35 }
 0x40d   :  { %v4815_v33 = vpop.f32.mrb[80].mxu1  ;;  %4887 = vmatmul.mubr.msk.f32.gmra.mrb[110].mxu0 %vm1240_vm0, %v4812_v27 }
 0x40e   :  { %v2662_v16 = vpop.f32.mrb[81].mxu1 }
 0x40f   :  { %v4816_v31 = vpop.f32.mrb[82].mxu1  ;;  %4889 = vmatprep.mubr.msk.f32.mxu0 %vm1240_vm0, %v2662_v16 }
 0x410   :  { %v2665_v24 = vpop.f32.mrb[83].mxu1 }
 0x411   :  { %4890 = vmatmul.mubr.msk.f32.gmra.mrb[112].mxu0 %vm1240_vm0, %v2665_v24 }
 0x412   :  { %4892 = vmatprep.mubr.msk.f32.mxu0 %vm1240_vm0, %v4815_v33 }
 0x415   :  { %v4819_v15 = vpop.f32.mrb[84].mxu1  ;;  %4893 = vmatmul.mubr.msk.f32.gmra.mrb[114].mxu0 %vm1240_vm0, %v4816_v31 }
 0x416   :  { %v2678_v47 = vpop.f32.mrb[85].mxu1 }
 0x417   :  { %v4820_v3 = vpop.f32.mrb[86].mxu1  ;;  %4895 = vmatprep.mubr.msk.f32.mxu0 %vm1240_vm0, %v2678_v47 }
 0x418   :  { %v2681_v32 = vpop.f32.mrb[87].mxu1 }
 0x419   :  { %4896 = vmatmul.mubr.msk.f32.gmra.mrb[116].mxu0 %vm1240_vm0, %v2681_v32 }
 0x41a   :  { %4898 = vmatprep.mubr.msk.f32.mxu0 %vm1240_vm0, %v4819_v15 }
 0x41d   :  { %v4823_v40 = vpop.f32.mrb[88].mxu1  ;;  %4899 = vmatmul.mubr.msk.f32.gmra.mrb[118].mxu0 %vm1240_vm0, %v4820_v3 }
 0x41e   :  { %v2694_v25 = vpop.f32.mrb[89].mxu1  ;;  %4904 = vmatprep.mubr.msk.f32.mxu1 %vm1240_vm0, %v4823_v40 }
 0x41f   :  { %v4824_v36 = vpop.f32.mrb[90].mxu1  ;;  %4901 = vmatprep.mubr.msk.f32.mxu0 %vm1240_vm0, %v2694_v25 }
 0x420   :  { %v2697_v26 = vpop.f32.mrb[91].mxu1  ;;  %4905 = vmatmul.mubr.msk.f32.vlgmr.msra.gmra.mrb[128].mxu1 %vm1240_vm0, %v4824_v36 }
 0x421   :  { %4902 = vmatmul.mubr.msk.f32.gmra.mrb[120].mxu0 %vm1240_vm0, %v2697_v26 }
 0x422   :  { %4917 = vmatprep.mubr.msk.f32.mxu0 %vm1240_vm0, %v6424_v60 }
 0x425   :  { %4918 = vmatmul.mubr.msk.f32.vlgmr.msra.gmra.mrb[96].mxu0 %vm1240_vm0, %v6428_v21  ;;  %v4827_v51 = vpop.f32.mrb[92].mxu1 }
 0x426   :  { %5040 = vmatpush3.bf16.msra.mxu0 %v6154_v8  ;;  %4920 = vmatprep.mubr.msk.f32.mxu0 %vm1240_vm0, %v6422_v28  ;;  %v2710_v52 = vpop.f32.mrb[93].mxu1 }
 0x427   :  { %v4828_v2 = vpop.f32.mrb[94].mxu1  ;;  %4907 = vmatprep.mubr.msk.f32.mxu1 %vm1240_vm0, %v2710_v52 }
 0x428   :  { %v2713_v29 = vpop.f32.mrb[95].mxu1 }
 0x429   :  { %4921 = vmatmul.mubr.msk.f32.gmra.mrb[98].mxu0 %vm1240_vm0, %v6426_v11  ;;  %4908 = vmatmul.mubr.msk.f32.gmra.mrb[130].mxu1 %vm1240_vm0, %v2713_v29 }
 0x42a   :  { %4923 = vmatprep.mubr.msk.f32.mxu0 %vm1240_vm0, %v6432_v56  ;;  %4910 = vmatprep.mubr.msk.f32.mxu1 %vm1240_vm0, %v4827_v51 }
 0x42d   :  { %4924 = vmatmul.mubr.msk.f32.gmra.mrb[100].mxu0 %vm1240_vm0, %v6436_v42  ;;  %4911 = vmatmul.mubr.msk.f32.gmra.mrb[132].mxu1 %vm1240_vm0, %v4828_v2  ;;  %v4831_v8 = vpop.f32.mrb[96].mxu1 }
 0x42e   :  { %4926 = vmatprep.mubr.msk.f32.mxu0 %vm1240_vm0, %v6430_v55  ;;  %v2726_v28 = vpop.f32.mrb[97].mxu1 }
 0x42f   :  { %v4832_v60 = vpop.f32.mrb[98].mxu1 }
 0x430   :  { %v2729_v21 = vpop.f32.mrb[99].mxu1 }
 0x431   :  { %4927 = vmatmul.mubr.msk.f32.gmra.mrb[102].mxu0 %vm1240_vm0, %v6434_v57 }
 0x432   :  { %4929 = vmatprep.mubr.msk.f32.mxu0 %vm1240_vm0, %v6440_v50 }
 0x435   :  { %4930 = vmatmul.mubr.msk.f32.gmra.mrb[104].mxu0 %vm1240_vm0, %v6444_v46  ;;  %v4835_v11 = vpop.f32.mrb[100].mxu1 }
 0x436   :  { %4932 = vmatprep.mubr.msk.f32.mxu0 %vm1240_vm0, %v6438_v58  ;;  %v2742_v56 = vpop.f32.mrb[101].mxu1 }
 0x437   :  { %v4836_v42 = vpop.f32.mrb[102].mxu1 }
 0x438   :  { %v2745_v48 = vpop.f32.mrb[103].mxu1 }
 0x439   :  { %4933 = vmatmul.mubr.msk.f32.gmra.mrb[106].mxu0 %vm1240_vm0, %v6442_v49 }
 0x43a   :  { %4935 = vmatprep.mubr.msk.f32.mxu0 %vm1240_vm0, %v6448_v0 }
 0x43d   :  { %4936 = vmatmul.mubr.msk.f32.gmra.mrb[108].mxu0 %vm1240_vm0, %v6452_v59  ;;  %v4839_v55 = vpop.f32.mrb[104].mxu1 }
 0x43e   :  { %4938 = vmatprep.mubr.msk.f32.mxu0 %vm1240_vm0, %v6446_v12  ;;  %v2758_v57 = vpop.f32.mrb[105].mxu1 }
 0x43f   :  { %v4840_v50 = vpop.f32.mrb[106].mxu1 }
 0x440   :  { %v2761_v46 = vpop.f32.mrb[107].mxu1 }
 0x441   :  { %4939 = vmatmul.mubr.msk.f32.gmra.mrb[110].mxu0 %vm1240_vm0, %v6450_v13 }
 0x442   :  { %4941 = vmatprep.mubr.msk.f32.mxu0 %vm1240_vm0, %v6456_v20 }
 0x445   :  { %4942 = vmatmul.mubr.msk.f32.gmra.mrb[112].mxu0 %vm1240_vm0, %v6460_v14  ;;  %v4843_v58 = vpop.f32.mrb[108].mxu1 }
 0x446   :  { %4944 = vmatprep.mubr.msk.f32.mxu0 %vm1240_vm0, %v6454_v61  ;;  %v2774_v49 = vpop.f32.mrb[109].mxu1 }
 0x447   :  { %v4844_v0 = vpop.f32.mrb[110].mxu1 }
 0x448   :  { %v2777_v59 = vpop.f32.mrb[111].mxu1 }
 0x449   :  { %4945 = vmatmul.mubr.msk.f32.gmra.mrb[114].mxu0 %vm1240_vm0, %v6458_v1 }
 0x44a   :  { %4947 = vmatprep.mubr.msk.f32.mxu0 %vm1240_vm0, %v6464_v7 }
 0x44d   :  { %4948 = vmatmul.mubr.msk.f32.gmra.mrb[116].mxu0 %vm1240_vm0, %v6468_v4  ;;  %v4847_v12 = vpop.f32.mrb[112].mxu1 }
 0x44e   :  { %4950 = vmatprep.mubr.msk.f32.mxu0 %vm1240_vm0, %v6462_v6  ;;  %v2790_v13 = vpop.f32.mrb[113].mxu1 }
 0x44f   :  { %v4848_v20 = vpop.f32.mrb[114].mxu1 }
 0x450   :  { %v2793_v14 = vpop.f32.mrb[115].mxu1 }
 0x451   :  { %4951 = vmatmul.mubr.msk.f32.gmra.mrb[118].mxu0 %vm1240_vm0, %v6466_v10 }
 0x452   :  { %4953 = vmatprep.mubr.msk.f32.mxu0 %vm1240_vm0, %v6472_v63 }
 0x455   :  { %4954 = vmatmul.mubr.msk.f32.gmra.mrb[120].mxu0 %vm1240_vm0, %v6476_v22  ;;  %v4851_v61 = vpop.f32.mrb[116].mxu1 }
 0x456   :  { %4956 = vmatprep.mubr.msk.f32.mxu0 %vm1240_vm0, %v6470_v9  ;;  %v2806_v1 = vpop.f32.mrb[117].mxu1 }
 0x457   :  { %v4852_v7 = vpop.f32.mrb[118].mxu1 }
 0x458   :  { %v2809_v4 = vpop.f32.mrb[119].mxu1 }
 0x459   :  { %4957 = vmatmul.mubr.msk.f32.gmra.mrb[122].mxu0 %vm1240_vm0, %v6474_v37 }
 0x45a   :  { %4959 = vmatprep.mubr.msk.f32.mxu0 %vm1240_vm0, %v6480_v23 }
 0x45d   :  { %4960 = vmatmul.mubr.msk.f32.gmra.mrb[124].mxu0 %vm1240_vm0, %v6484_v17  ;;  %v4855_v6 = vpop.f32.mrb[120].mxu1 }
 0x45e   :  { %4962 = vmatprep.mubr.msk.f32.mxu0 %vm1240_vm0, %v6478_v41  ;;  %v2822_v10 = vpop.f32.mrb[121].mxu1 }
 0x45f   :  { %v4856_v63 = vpop.f32.mrb[122].mxu1 }
 0x460   :  { %v2825_v22 = vpop.f32.mrb[123].mxu1 }
 0x461   :  { %4963 = vmatmul.mubr.msk.f32.gmra.mrb[126].mxu0 %vm1240_vm0, %v6482_v5 }
 0x462   :  { %4969 = vmatprep.mubr.msk.f32.mxu0 %vm1240_vm0, %v2726_v28 }
 0x465   :  { %4970 = vmatmul.mubr.msk.f32.vlgmr.msra.gmra.mrb[96].mxu0 %vm1240_vm0, %v2729_v21  ;;  %v4859_v9 = vpop.f32.mrb[124].mxu1 }
 0x466   :  { %4972 = vmatprep.mubr.msk.f32.mxu0 %vm1240_vm0, %v4831_v8  ;;  %v2838_v37 = vpop.f32.mrb[125].mxu1 }
 0x467   :  { %v4860_v23 = vpop.f32.mrb[126].mxu1 }
 0x468   :  { %v2841_v17 = vpop.f32.mrb[127].mxu1 }
 0x469   :  { %4973 = vmatmul.mubr.msk.f32.gmra.mrb[98].mxu0 %vm1240_vm0, %v4832_v60 }
 0x46a   :  { %4975 = vmatprep.mubr.msk.f32.mxu0 %vm1240_vm0, %v2742_v56 }
 0x46d   :  { %4976 = vmatmul.mubr.msk.f32.gmra.mrb[100].mxu0 %vm1240_vm0, %v2745_v48 }
 0x46e   :  { %4978 = vmatprep.mubr.msk.f32.mxu0 %vm1240_vm0, %v4835_v11 }
 0x471   :  { %4979 = vmatmul.mubr.msk.f32.gmra.mrb[102].mxu0 %vm1240_vm0, %v4836_v42 }
 0x472   :  { %4981 = vmatprep.mubr.msk.f32.mxu0 %vm1240_vm0, %v2758_v57 }
 0x475   :  { %4982 = vmatmul.mubr.msk.f32.gmra.mrb[104].mxu0 %vm1240_vm0, %v2761_v46 }
 0x476   :  { %4984 = vmatprep.mubr.msk.f32.mxu0 %vm1240_vm0, %v4839_v55 }
 0x479   :  { %4985 = vmatmul.mubr.msk.f32.gmra.mrb[106].mxu0 %vm1240_vm0, %v4840_v50 }
 0x47a   :  { %4987 = vmatprep.mubr.msk.f32.mxu0 %vm1240_vm0, %v2774_v49 }
 0x47d   :  { %4988 = vmatmul.mubr.msk.f32.gmra.mrb[108].mxu0 %vm1240_vm0, %v2777_v59 }
 0x47e   :  { %4990 = vmatprep.mubr.msk.f32.mxu0 %vm1240_vm0, %v4843_v58 }
 0x481   :  { %4991 = vmatmul.mubr.msk.f32.gmra.mrb[110].mxu0 %vm1240_vm0, %v4844_v0 }
 0x482   :  { %4993 = vmatprep.mubr.msk.f32.mxu0 %vm1240_vm0, %v2790_v13 }
 0x485   :  { %4994 = vmatmul.mubr.msk.f32.gmra.mrb[112].mxu0 %vm1240_vm0, %v2793_v14 }
 0x486   :  { %4996 = vmatprep.mubr.msk.f32.mxu0 %vm1240_vm0, %v4847_v12 }
 0x489   :  { %4997 = vmatmul.mubr.msk.f32.gmra.mrb[114].mxu0 %vm1240_vm0, %v4848_v20 }
 0x48a   :  { %4999 = vmatprep.mubr.msk.f32.mxu0 %vm1240_vm0, %v2806_v1 }
 0x48d   :  { %5000 = vmatmul.mubr.msk.f32.gmra.mrb[116].mxu0 %vm1240_vm0, %v2809_v4 }
 0x48e   :  { %5002 = vmatprep.mubr.msk.f32.mxu0 %vm1240_vm0, %v4851_v61 }
 0x491   :  { %5003 = vmatmul.mubr.msk.f32.gmra.mrb[118].mxu0 %vm1240_vm0, %v4852_v7 }
 0x492   :  { %5005 = vmatprep.mubr.msk.f32.mxu0 %vm1240_vm0, %v2822_v10 }
 0x495   :  { %5006 = vmatmul.mubr.msk.f32.gmra.mrb[120].mxu0 %vm1240_vm0, %v2825_v22 }
 0x496   :  { %5008 = vmatprep.mubr.msk.f32.mxu0 %vm1240_vm0, %v4855_v6 }
 0x499   :  { %5009 = vmatmul.mubr.msk.f32.gmra.mrb[122].mxu0 %vm1240_vm0, %v4856_v63 }
 0x49a   :  { %5011 = vmatprep.mubr.msk.f32.mxu0 %vm1240_vm0, %v2838_v37 }
 0x49d   :  { %5012 = vmatmul.mubr.msk.f32.gmra.mrb[124].mxu0 %vm1240_vm0, %v2841_v17 }
 0x49e   :  { %5014 = vmatprep.mubr.msk.f32.mxu0 %vm1240_vm0, %v4859_v9 }
 0x4a1   :  { %5015 = vmatmul.mubr.msk.f32.gmra.mrb[126].mxu0 %vm1240_vm0, %v4860_v23 }
 0x4f3   :  { %v4906_v41 = vpop.f32.mrb[128].mxu1 }
 0x4f4   :  { %v3149_v5 = vpop.f32.mrb[129].mxu1 }
 0x4fc   :  { %v6617_v39 = vpop.f32.mrb[130].mxu1 }
 0x4fd   :  { %v6619_v43 = vpop.f32.mrb[131].mxu1 }
 0x500   :  { %v6621_v45 = vpop.f32.mrb[132].mxu1 }
 0x501   :  { %v6623_v62 = vpop.f32.mrb[133].mxu1 }
 0x538   :  { %v4971_v30 = vpop.f32.mrb[96].mxu0 }
 0x539   :  { %3856 = vst.msk [vmem:[#allocation2 + $0x108] sm:$0xff] %vm2239_vm1, %v4971_v30  ;;  %v3663_v54 = vpop.f32.mrb[97].mxu0 }
 0x53a   :  { %3855 = vst.msk [vmem:[#allocation2 + $0x100] sm:$0xff] %vm2239_vm1, %v3663_v54 }
 0x53c   :  { %v4974_v44 = vpop.f32.mrb[98].mxu0 }
 0x53d   :  { %3858 = vst.msk [vmem:[#allocation2 + $0x118] sm:$0xff] %vm2239_vm1, %v4974_v44  ;;  %v3673_v19 = vpop.f32.mrb[99].mxu0 }
 0x53e   :  { %3857 = vst.msk [vmem:[#allocation2 + $0x110] sm:$0xff] %vm2239_vm1, %v3673_v19 }
 0x540   :  { %v4977_v53 = vpop.f32.mrb[100].mxu0 }
 0x541   :  { %3860 = vst.msk [vmem:[#allocation2 + $0x128] sm:$0xff] %vm2239_vm1, %v4977_v53  ;;  %v3683_v34 = vpop.f32.mrb[101].mxu0 }
 0x542   :  { %3859 = vst.msk [vmem:[#allocation2 + $0x120] sm:$0xff] %vm2239_vm1, %v3683_v34 }
 0x544   :  { %v4980_v35 = vpop.f32.mrb[102].mxu0 }
 0x545   :  { %3862 = vst.msk [vmem:[#allocation2 + $0x138] sm:$0xff] %vm2239_vm1, %v4980_v35  ;;  %v3693_v38 = vpop.f32.mrb[103].mxu0 }
 0x546   :  { %3861 = vst.msk [vmem:[#allocation2 + $0x130] sm:$0xff] %vm2239_vm1, %v3693_v38 }
 0x548   :  { %v4983_v27 = vpop.f32.mrb[104].mxu0 }
 0x549   :  { %3864 = vst.msk [vmem:[#allocation2 + $0x148] sm:$0xff] %vm2239_vm1, %v4983_v27  ;;  %v3703_v18 = vpop.f32.mrb[105].mxu0 }
 0x54a   :  { %3863 = vst.msk [vmem:[#allocation2 + $0x140] sm:$0xff] %vm2239_vm1, %v3703_v18 }
 0x54c   :  { %v4986_v33 = vpop.f32.mrb[106].mxu0 }
 0x54d   :  { %3866 = vst.msk [vmem:[#allocation2 + $0x158] sm:$0xff] %vm2239_vm1, %v4986_v33  ;;  %v3713_v16 = vpop.f32.mrb[107].mxu0 }
 0x54e   :  { %3865 = vst.msk [vmem:[#allocation2 + $0x150] sm:$0xff] %vm2239_vm1, %v3713_v16 }
 0x550   :  { %v4989_v31 = vpop.f32.mrb[108].mxu0 }
 0x551   :  { %3868 = vst.msk [vmem:[#allocation2 + $0x168] sm:$0xff] %vm2239_vm1, %v4989_v31  ;;  %v3723_v24 = vpop.f32.mrb[109].mxu0 }
 0x552   :  { %3867 = vst.msk [vmem:[#allocation2 + $0x160] sm:$0xff] %vm2239_vm1, %v3723_v24 }
 0x554   :  { %v4992_v15 = vpop.f32.mrb[110].mxu0 }
 0x555   :  { %3870 = vst.msk [vmem:[#allocation2 + $0x178] sm:$0xff] %vm2239_vm1, %v4992_v15  ;;  %v3733_v47 = vpop.f32.mrb[111].mxu0 }
 0x556   :  { %3869 = vst.msk [vmem:[#allocation2 + $0x170] sm:$0xff] %vm2239_vm1, %v3733_v47 }
 0x558   :  { %v4995_v3 = vpop.f32.mrb[112].mxu0 }
 0x559   :  { %3872 = vst.msk [vmem:[#allocation2 + $0x188] sm:$0xff] %vm2239_vm1, %v4995_v3  ;;  %v3743_v32 = vpop.f32.mrb[113].mxu0 }
 0x55a   :  { %3871 = vst.msk [vmem:[#allocation2 + $0x180] sm:$0xff] %vm2239_vm1, %v3743_v32 }
 0x55c   :  { %v4998_v40 = vpop.f32.mrb[114].mxu0 }
 0x55d   :  { %3874 = vst.msk [vmem:[#allocation2 + $0x198] sm:$0xff] %vm2239_vm1, %v4998_v40  ;;  %v3753_v25 = vpop.f32.mrb[115].mxu0 }
 0x55e   :  { %3873 = vst.msk [vmem:[#allocation2 + $0x190] sm:$0xff] %vm2239_vm1, %v3753_v25 }
 0x560   :  { %v5001_v36 = vpop.f32.mrb[116].mxu0 }
 0x561   :  { %3876 = vst.msk [vmem:[#allocation2 + $0x1a8] sm:$0xff] %vm2239_vm1, %v5001_v36  ;;  %v3763_v26 = vpop.f32.mrb[117].mxu0 }
 0x562   :  { %3875 = vst.msk [vmem:[#allocation2 + $0x1a0] sm:$0xff] %vm2239_vm1, %v3763_v26 }
 0x564   :  { %v5004_v51 = vpop.f32.mrb[118].mxu0 }
 0x565   :  { %3878 = vst.msk [vmem:[#allocation2 + $0x1b8] sm:$0xff] %vm2239_vm1, %v5004_v51  ;;  %v3773_v52 = vpop.f32.mrb[119].mxu0 }
 0x566   :  { %3877 = vst.msk [vmem:[#allocation2 + $0x1b0] sm:$0xff] %vm2239_vm1, %v3773_v52 }
 0x568   :  { %v5007_v2 = vpop.f32.mrb[120].mxu0 }
 0x569   :  { %3880 = vst.msk [vmem:[#allocation2 + $0x1c8] sm:$0xff] %vm2239_vm1, %v5007_v2  ;;  %v3783_v29 = vpop.f32.mrb[121].mxu0 }
 0x56a   :  { %3879 = vst.msk [vmem:[#allocation2 + $0x1c0] sm:$0xff] %vm2239_vm1, %v3783_v29 }
 0x56c   :  { %v5010_v8 = vpop.f32.mrb[122].mxu0 }
 0x56d   :  { %v5043_v28 = vadd.f32 %v5010_v8, %v4906_v41  ;;  %v3793_v60 = vpop.f32.mrb[123].mxu0 }
 0x56e   :  { %v5044_v21 = vadd.f32 %v3793_v60, %v3149_v5 }
 0x56f   :  { %3882 = vst.msk [vmem:[#allocation2 + $0x1d8] sm:$0xff] %vm2239_vm1, %v5043_v28 }
 0x570   :  { %3881 = vst.msk [vmem:[#allocation2 + $0x1d0] sm:$0xff] %vm2239_vm1, %v5044_v21  ;;  %v5013_v11 = vpop.f32.mrb[124].mxu0 }
 0x571   :  { %v5045_v56 = vadd.f32 %v5013_v11, %v6617_v39  ;;  %v3803_v42 = vpop.f32.mrb[125].mxu0 }
 0x572   :  { %v5046_v48 = vadd.f32 %v3803_v42, %v6619_v43 }
 0x573   :  { %3884 = vst.msk [vmem:[#allocation2 + $0x1e8] sm:$0xff] %vm2239_vm1, %v5045_v56 }
 0x574   :  { %3883 = vst.msk [vmem:[#allocation2 + $0x1e0] sm:$0xff] %vm2239_vm1, %v5046_v48  ;;  %v5016_v55 = vpop.f32.mrb[126].mxu0 }
 0x575   :  { %v5047_v57 = vadd.f32 %v5016_v55, %v6621_v45  ;;  %v3813_v50 = vpop.f32.mrb[127].mxu0 }
 0x576   :  { %v5048_v46 = vadd.f32 %v3813_v50, %v6623_v62 }
 0x577   :  { %3886 = vst.msk [vmem:[#allocation2 + $0x1f8] sm:$0xff] %vm2239_vm1, %v5047_v57 }
 0x578   :  { %3885 = vst.msk [vmem:[#allocation2 + $0x1f0] sm:$0xff] %vm2239_vm1, %v5048_v46 }
 0x579   :  { %5304 = shalt.err (!%p5301_p4)
}
 0x57a   :  { %s5305_s12 = scalar_lea.hbm %s6678_s5, 8192 }
 0x57b   :  { %p5306_p5 = scmp.ne.s32.totalorder %s6678_s5, %s5305_s12  ;;  %p5309_p6 = scmp.lt.u32.totalorder %s5305_s12, %s6678_s5 }
 0x57d   :  { %p5311_p7 = pnand %p5309_p6, %p5306_p5 }
 0x57f   :  { %5314 = shalt.err (!%p5311_p7)
}
 0x580   :  { %s5322_s16 = smov 128   ;;  %s5323_s17 = smov 8  }
 0x581   :  { %3898 = dma.vmem_to_hbm [thread:$0]  %s3893_s8, 8192, %s6678_s5, [#allocation3], %s5322_s16, %s5322_s16, %s5323_s17  }
 0x582   :  { %5315 = dma.done.wait [#allocation3], 8192  }
 0x583   :  { %5316 = vsyncadd [#allocation3], 4294959104 }
 0x584   :  { %3902 = vsyncpa [#allocation3], 1 }

</bundles_post_ra>
